<compile_context>
chip_gen: v7x
topology: tpu7x:2x2x1
jax: 0.10.0
libtpu: 0.0.40
codegen_flags: <defaults>
</compile_context>

<pallas_src>
import jax
import jax.numpy as jnp
from jax.experimental import pallas as pl
from jax.experimental.pallas import tpu as pltpu


# ----------------------------------------------------------------------------
# Kernel 1: fused conv stack
# ----------------------------------------------------------------------------

def _im2col_same_8x8(pbuf_ref, bt, C):
    """9-tap im2col of an 8x8 'same'-padded image held in the pad buffer.

    pbuf layout: (bt, 10, 24, C).  The image lives at pbuf[:, 1:9, 8:16, :]
    (row offset 1, lane-tile-aligned column offset 8); everything else is
    zero, so rows 0/9 and columns 7/16 provide the padding=1 zeros.
    Returns a (bt*64, 9*C) patch matrix with tap-major (dy, dx) column order.
    """
    taps = []
    for dy in range(3):
        for dx in range(3):
            taps.append(
                pbuf_ref[:, dy:dy + 8, 7 + dx:15 + dx, :].reshape(bt * 64, C))
    return jnp.concatenate(taps, axis=-1)


def conv_stack_kernel(x0_ref, w1_ref, s1_ref, b1_ref,
                      w2_ref, s2_ref, b2_ref,
                      w3_ref, s3_ref, b3_ref,
                      w4_ref, s4_ref, b4_ref,
                      out_ref, pbuf_ref, a3_ref):
    bt, _, _, C = pbuf_ref.shape
    bf16 = jnp.bfloat16

    def bn_relu(acc, s_ref, b_ref):
        # folded (conv bias + BatchNorm) scale/bias and ReLU, kept in f32.
        return jnp.maximum(acc * s_ref[...] + b_ref[...], 0.0)

    # Zero the padded scratch -- its border supplies the 'same' padding zeros.
    pbuf_ref[...] = jnp.zeros_like(pbuf_ref)

    # conv1 + bn1 + relu.  x0 is the glue-built 9-tap im2col of the 1-channel
    # board, so this is a single (bt*64, 9) @ (9, C) matmul (no K=1 matmuls).
    y = jnp.dot(x0_ref[...], w1_ref[...], preferred_element_type=jnp.float32)
    y = bn_relu(y, s1_ref, b1_ref)
    pbuf_ref[:, 1:9, 8:16, :] = y.reshape(bt, 8, 8, C)

    # conv2 + bn2 + relu ('same'): one im2col matmul with K = 9*C.
    p = _im2col_same_8x8(pbuf_ref, bt, C).astype(bf16)
    y = jnp.dot(p, w2_ref[...], preferred_element_type=jnp.float32)
    y = bn_relu(y, s2_ref, b2_ref)
    pbuf_ref[:, 1:9, 8:16, :] = y.reshape(bt, 8, 8, C)   # reuse the pad buffer

    # conv3 + bn3 + relu.  The layer is 'valid' (6x6 output) but we evaluate
    # it on the full 8x8 'same' grid so the scratch stays sublane-tile
    # aligned; only the interior 6x6 (== the true 'valid' output) is ever
    # read by conv4, so the border ring is dead but harmless.
    p = _im2col_same_8x8(pbuf_ref, bt, C).astype(bf16)
    y = jnp.dot(p, w3_ref[...], preferred_element_type=jnp.float32)
    y = bn_relu(y, s3_ref, b3_ref)
    a3_ref[...] = y.reshape(bt, 8, 8, C)

    # conv4 + bn4 + relu ('valid', 4x4 output): all windows land inside the
    # valid interior of a3.
    taps = []
    for dy in range(3):
        for dx in range(3):
            taps.append(
                a3_ref[:, 1 + dy:5 + dy, 1 + dx:5 + dx, :].reshape(bt * 16, C))
    p = jnp.concatenate(taps, axis=-1).astype(bf16)
    y = jnp.dot(p, w4_ref[...], preferred_element_type=jnp.float32)
    y = bn_relu(y, s4_ref, b4_ref)
    out_ref[...] = y.astype(out_ref.dtype)   # (bt*16, C), NHWC flatten order


# ----------------------------------------------------------------------------
# Kernel 2: fused FC stack + heads (fc1 weight streamed in K tiles)
# ----------------------------------------------------------------------------

def fc_head_kernel(x_ref, w1_ref, s1_ref, b1_ref,
                   w2_ref, s2_ref, b2_ref,
                   w3_ref, b3_ref, w4_ref, b4_ref,
                   pi_ref, v_ref, acc_ref):
    k = pl.program_id(0)

    @pl.when(k == 0)
    def _():
        acc_ref[...] = jnp.zeros_like(acc_ref)

    # fc1 partial product for this K tile (accumulated in f32).
    acc_ref[...] += jnp.dot(x_ref[...], w1_ref[...],
                            preferred_element_type=jnp.float32)

    @pl.when(k == pl.num_programs(0) - 1)
    def _():
        # fc1 epilogue: folded bias + BatchNorm1d, ReLU (f32).
        h1 = jnp.maximum(acc_ref[...] * s1_ref[...] + b1_ref[...], 0.0)
        # TODO(synk): dropout (p=0.3) is identity in eval mode; training-mode
        # stochastic dropout is not implemented here.
        h2 = jnp.dot(h1.astype(w2_ref.dtype), w2_ref[...],
                     preferred_element_type=jnp.float32)
        h2 = jnp.maximum(h2 * s2_ref[...] + b2_ref[...], 0.0)

        # Policy head: fc3 + log_softmax (f32).
        logits = jnp.dot(h2.astype(w3_ref.dtype), w3_ref[...],
                         preferred_element_type=jnp.float32) + b3_ref[...]
        m = jnp.max(logits, axis=-1, keepdims=True)
        z = logits - m
        lse = jnp.log(jnp.sum(jnp.exp(z), axis=-1, keepdims=True))
        pi_ref[...] = z - lse

        # Value head: fc4 (512 -> 1) as a VPU multiply + lane reduction
        # instead of an almost-empty MXU matmul.
        v = jnp.sum(h2 * w4_ref[...], axis=-1, keepdims=True) + b4_ref[...]
        v_ref[...] = jnp.tanh(v)


# ----------------------------------------------------------------------------
# pallas_call wrappers
# ----------------------------------------------------------------------------

def _nbytes(*arrays):
    return sum(int(a.size) * a.dtype.itemsize for a in arrays)


def conv_stack(x0, params, *, batch, channels, batch_tile=None):
    """x0: (B*64, 9) bf16 im2col of the 1-channel board.  Returns (B*16, C) bf16."""
    B, C = batch, channels
    # Lane-aligned channel count keeps the in-kernel im2col concatenation and
    # window slices on 128-lane boundaries (the real model uses C=512).
    assert C % 128 == 0, "num_channels must be a multiple of 128"
    bt = B if batch_tile is None else batch_tile
    assert B % bt == 0

    w1, s1, b1 = params["conv1"]
    w2, s2, b2 = params["conv2"]
    w3, s3, b3 = params["conv3"]
    w4, s4, b4 = params["conv4"]
    ins = (x0, w1, s1, b1, w2, s2, b2, w3, s3, b3, w4, s4, b4)

    def full(a):
        return pl.BlockSpec(a.shape, lambda b: (0,) * a.ndim)

    flops = 2 * B * 64 * 9 * C + 2 * B * (64 + 64 + 16) * 9 * C * C
    cost = pl.CostEstimate(flops=int(flops), transcendentals=0,
                           bytes_accessed=int(_nbytes(*ins) + B * 16 * C * 2))

    return pl.pallas_call(
        conv_stack_kernel,
        out_shape=jax.ShapeDtypeStruct((B * 16, C), jnp.bfloat16),
        grid=(B // bt,),
        in_specs=[pl.BlockSpec((bt * 64, 9), lambda b: (b, 0))]
                 + [full(a) for a in ins[1:]],
        out_specs=pl.BlockSpec((bt * 16, C), lambda b: (b, 0)),
        scratch_shapes=[
            pltpu.VMEM((bt, 10, 24, C), jnp.float32),   # padded activation
            pltpu.VMEM((bt, 8, 8, C), jnp.float32),     # conv3 output
        ],
        compiler_params=pltpu.CompilerParams(
            dimension_semantics=("parallel",),          # batch tiles -> both TCs on v7x
            vmem_limit_bytes=48 * 1024 * 1024),         # headroom for C=512 weights
        cost_estimate=cost,
    )(*ins)


def fc_policy_value(x, params, *, action_size, k_tile=2048):
    """x: (B, flat) bf16 features.  Returns (log_pi (B, A) f32, v (B, 1) f32)."""
    B, flat = x.shape
    w1, s1, b1 = params["fc1"]
    w2, s2, b2 = params["fc2"]
    w3, b3 = params["fc3_w"], params["fc3_b"]
    w4, b4 = params["fc4_w"], params["fc4_b"]
    d1, d2 = w1.shape[1], w2.shape[1]
    A = action_size

    tk = min(k_tile, flat)
    assert flat % tk == 0 and tk % 128 == 0

    flops = 2 * B * (flat * d1 + d1 * d2 + d2 * A + d2)
    cost = pl.CostEstimate(
        flops=int(flops), transcendentals=int(B * (A + 2)),
        bytes_accessed=int(_nbytes(x, w1, s1, b1, w2, s2, b2, w3, b3, w4, b4)
                           + B * A * 4 + B * 4))

    return pl.pallas_call(
        fc_head_kernel,
        out_shape=(jax.ShapeDtypeStruct((B, A), jnp.float32),
                   jax.ShapeDtypeStruct((B, 1), jnp.float32)),
        grid=(flat // tk,),
        in_specs=[
            pl.BlockSpec((B, tk), lambda k: (0, k)),     # activation K slice
            pl.BlockSpec((tk, d1), lambda k: (k, 0)),    # fc1 weight K tile
            pl.BlockSpec((1, d1), lambda k: (0, 0)),
            pl.BlockSpec((1, d1), lambda k: (0, 0)),
            pl.BlockSpec((d1, d2), lambda k: (0, 0)),    # fc2 weight (resident)
            pl.BlockSpec((1, d2), lambda k: (0, 0)),
            pl.BlockSpec((1, d2), lambda k: (0, 0)),
            pl.BlockSpec((d2, A), lambda k: (0, 0)),     # fc3 weight
            pl.BlockSpec((1, A), lambda k: (0, 0)),
            pl.BlockSpec((1, d2), lambda k: (0, 0)),     # fc4 as a row vector
            pl.BlockSpec((1, 1), lambda k: (0, 0)),
        ],
        out_specs=(pl.BlockSpec((B, A), lambda k: (0, 0)),
                   pl.BlockSpec((B, 1), lambda k: (0, 0))),
        scratch_shapes=[pltpu.VMEM((B, d1), jnp.float32)],
        compiler_params=pltpu.CompilerParams(
            dimension_semantics=("arbitrary",)),         # K is a reduction axis
        cost_estimate=cost,
    )(x, w1, s1, b1, w2, s2, b2, w3, b3, w4, b4)


# ----------------------------------------------------------------------------
# Parameter construction (deterministic, synthetic, BN folded for eval)
# ----------------------------------------------------------------------------

def _bn_fold(linear_bias, gamma, beta, mean, var, eps=1e-5):
    scale = gamma / jnp.sqrt(var + eps)
    bias = (linear_bias - mean) * scale + beta
    return scale[None, :].astype(jnp.float32), bias[None, :].astype(jnp.float32)


def _bn_stats(key, n):
    k1, k2, k3, k4 = jax.random.split(key, 4)
    gamma = 1.0 + 0.1 * jax.random.normal(k1, (n,), jnp.float32)
    beta = 0.1 * jax.random.normal(k2, (n,), jnp.float32)
    mean = 0.1 * jax.random.normal(k3, (n,), jnp.float32)
    var = 1.0 + 0.05 * jnp.abs(jax.random.normal(k4, (n,), jnp.float32))
    return gamma, beta, mean, var


def init_params(key, *, board_x, board_y, num_channels, action_size,
                fc1_out=1024, fc2_out=512):
    C = num_channels
    keys = jax.random.split(key, 24)
    p = {}

    def conv_w_im2col(k, cin, cout):
        # PyTorch layout (Cout, Cin, 3, 3) -> im2col layout (9*Cin, Cout),
        # row index = (dy*3 + dx)*Cin + cin (tap-major, matches the kernel).
        w = jax.random.normal(k, (cout, cin, 3, 3), jnp.float32) / jnp.sqrt(9.0 * cin)
        return jnp.transpose(w, (2, 3, 1, 0)).reshape(9 * cin, cout)

    def fc_w(k, din, dout):
        # PyTorch layout (Dout, Din).
        return jax.random.normal(k, (dout, din), jnp.float32) / jnp.sqrt(din)

    cins = [1, C, C, C]
    for i in range(4):
        w = conv_w_im2col(keys[i], cins[i], C)
        cb = 0.01 * jax.random.normal(keys[4 + i], (C,), jnp.float32)
        g, bt_, m, v = _bn_stats(keys[8 + i], C)
        scale, bias = _bn_fold(cb, g, bt_, m, v)
        p[f"conv{i + 1}"] = (w.astype(jnp.bfloat16), scale, bias)

    hp, wp = board_x - 4, board_y - 4
    flat = C * hp * wp

    # fc1 + fc_bn1.  Fold the PyTorch NCHW flatten order (c, h, w) into the
    # weight rows so the conv kernel can emit a channels-last (h, w, c)
    # flatten with no runtime transpose.
    w1_torch = fc_w(keys[12], flat, fc1_out)                  # (1024, flat) cols in (c,h,w)
    perm = jnp.transpose(jnp.arange(flat).reshape(C, hp, wp), (1, 2, 0)).reshape(flat)
    w1 = jnp.transpose(w1_torch, (1, 0))[perm, :]             # rows now in (h,w,c)
    b1 = 0.01 * jax.random.normal(keys[13], (fc1_out,), jnp.float32)
    g, bt_, m, v = _bn_stats(keys[14], fc1_out)
    s1, bb1 = _bn_fold(b1, g, bt_, m, v)
    p["fc1"] = (w1.astype(jnp.bfloat16), s1, bb1)

    # fc2 + fc_bn2.
    w2 = jnp.transpose(fc_w(keys[15], fc1_out, fc2_out), (1, 0))
    b2 = 0.01 * jax.random.normal(keys[16], (fc2_out,), jnp.float32)
    g, bt_, m, v = _bn_stats(keys[17], fc2_out)
    s2, bb2 = _bn_fold(b2, g, bt_, m, v)
    p["fc2"] = (w2.astype(jnp.bfloat16), s2, bb2)

    # fc3 (policy) and fc4 (value).
    p["fc3_w"] = jnp.transpose(fc_w(keys[18], fc2_out, action_size),
                               (1, 0)).astype(jnp.bfloat16)
    p["fc3_b"] = (0.01 * jax.random.normal(keys[19], (action_size,),
                                           jnp.float32))[None, :]
    p["fc4_w"] = fc_w(keys[20], fc2_out, 1).astype(jnp.float32)   # (1, 512) row
    p["fc4_b"] = (0.01 * jax.random.normal(keys[21], (1,),
                                           jnp.float32))[None, :]
    return p


# ----------------------------------------------------------------------------
# Forward pass (thin glue + two Pallas kernels)
# ----------------------------------------------------------------------------

def othello_nnet_forward(params, s, *, board_x, board_y, num_channels,
                         batch_tile=None, fc_k_tile=2048):
    # TODO(synk): the conv kernel is specialized to the standard 8x8 Othello
    # board (sublane-tile-aligned scratch); other board sizes need re-tiling.
    assert board_x == 8 and board_y == 8
    B, C = s.shape[0], num_channels

    # conv1 has a single input channel: build its 9-tap im2col (tiny) in glue
    # so the kernel's first matmul has K=9 instead of nine K=1 matmuls.
    x = s.reshape(B, board_x, board_y).astype(jnp.float32)
    xp = jnp.pad(x, ((0, 0), (1, 1), (1, 1)))
    taps = [xp[:, dy:dy + board_x, dx:dx + board_y]
            for dy in range(3) for dx in range(3)]
    x0 = jnp.stack(taps, axis=-1).reshape(B * board_x * board_y, 9)
    x0 = x0.astype(jnp.bfloat16)

    feat = conv_stack(x0, params, batch=B, channels=C,
                      batch_tile=batch_tile)          # (B*16, C) bf16, NHWC
    feat = feat.reshape(B, 16 * C)                    # free reshape; matches
                                                      # the permuted fc1 rows

    # TODO(synk): dropout after fc1/fc2 is identity in eval mode.
    action_size = params["fc3_b"].shape[1]
    return fc_policy_value(feat, params, action_size=action_size,
                           k_tile=fc_k_tile)


# ----------------------------------------------------------------------------
# Main
# ----------------------------------------------------------------------------

if __name__ == "__main__":
    BOARD_X = BOARD_Y = 8          # standard Othello board
    NUM_CHANNELS = 128             # small, lane-aligned stand-in for 512
    ACTION_SIZE = BOARD_X * BOARD_Y + 1
    BATCH = 2

    key = jax.random.PRNGKey(0)
    k_param, k_data = jax.random.split(key)
    params = init_params(k_param, board_x=BOARD_X, board_y=BOARD_Y,
                         num_channels=NUM_CHANNELS, action_size=ACTION_SIZE)

    # Synthetic board: values in {-1, 0, 1}
    s = jax.random.randint(k_data, (BATCH, BOARD_X, BOARD_Y), -1, 2
                           ).astype(jnp.float32)

    fwd = jax.jit(lambda p, x: othello_nnet_forward(
        p, x, board_x=BOARD_X, board_y=BOARD_Y, num_channels=NUM_CHANNELS,
        fc_k_tile=512))            # 512 -> 4 K-steps: exercises the fc1 pipeline
    log_pi, v = fwd(params, s)
    jax.block_until_ready((log_pi, v))

    assert log_pi.shape == (BATCH, ACTION_SIZE)
    assert v.shape == (BATCH, 1)
    # log_softmax rows must exp-sum to ~1, tanh in [-1, 1]
    assert bool(jnp.all(jnp.abs(jnp.sum(jnp.exp(log_pi), axis=1) - 1.0) < 1e-3))
    assert bool(jnp.all(jnp.abs(v) <= 1.0))

    print("KERNEL_OK")
</pallas_src>

<mosaic_0001>
module attributes {stable_mosaic.version = 11 : i64} {
  func.func @conv_stack_kernel(%arg0: i32, %arg1: memref<128x9xbf16, #tpu.memory_space<vmem>>, %arg2: memref<9x128xbf16, #tpu.memory_space<vmem>>, %arg3: memref<1x128xf32, #tpu.memory_space<vmem>>, %arg4: memref<1x128xf32, #tpu.memory_space<vmem>>, %arg5: memref<1152x128xbf16, #tpu.memory_space<vmem>>, %arg6: memref<1x128xf32, #tpu.memory_space<vmem>>, %arg7: memref<1x128xf32, #tpu.memory_space<vmem>>, %arg8: memref<1152x128xbf16, #tpu.memory_space<vmem>>, %arg9: memref<1x128xf32, #tpu.memory_space<vmem>>, %arg10: memref<1x128xf32, #tpu.memory_space<vmem>>, %arg11: memref<1152x128xbf16, #tpu.memory_space<vmem>>, %arg12: memref<1x128xf32, #tpu.memory_space<vmem>>, %arg13: memref<1x128xf32, #tpu.memory_space<vmem>>, %arg14: memref<32x128xbf16, #tpu.memory_space<vmem>>, %arg15: memref<2x10x24x128xf32, #tpu.memory_space<vmem>>, %arg16: memref<2x8x8x128xf32, #tpu.memory_space<vmem>>) attributes {dimension_semantics = [#tpu.dimension_semantics<parallel>], iteration_bounds = array<i64: 1>, scalar_prefetch = 0 : i64, scratch_operands = 2 : i64, tpu.core_type = #tpu.core_type<tc>, window_params = [{transform_indices = @transform_0, window_bounds = array<i64: 128, 9>}, {pipeline_mode = #tpu.pipeline_mode<synchronous>, transform_indices = @transform_1, window_bounds = array<i64: 9, 128>}, {pipeline_mode = #tpu.pipeline_mode<synchronous>, transform_indices = @transform_2, window_bounds = array<i64: 1, 128>}, {pipeline_mode = #tpu.pipeline_mode<synchronous>, transform_indices = @transform_3, window_bounds = array<i64: 1, 128>}, {pipeline_mode = #tpu.pipeline_mode<synchronous>, transform_indices = @transform_4, window_bounds = array<i64: 1152, 128>}, {pipeline_mode = #tpu.pipeline_mode<synchronous>, transform_indices = @transform_5, window_bounds = array<i64: 1, 128>}, {pipeline_mode = #tpu.pipeline_mode<synchronous>, transform_indices = @transform_6, window_bounds = array<i64: 1, 128>}, {pipeline_mode = #tpu.pipeline_mode<synchronous>, transform_indices = @transform_7, window_bounds = array<i64: 1152, 128>}, {pipeline_mode = #tpu.pipeline_mode<synchronous>, transform_indices = @transform_8, window_bounds = array<i64: 1, 128>}, {pipeline_mode = #tpu.pipeline_mode<synchronous>, transform_indices = @transform_9, window_bounds = array<i64: 1, 128>}, {pipeline_mode = #tpu.pipeline_mode<synchronous>, transform_indices = @transform_10, window_bounds = array<i64: 1152, 128>}, {pipeline_mode = #tpu.pipeline_mode<synchronous>, transform_indices = @transform_11, window_bounds = array<i64: 1, 128>}, {pipeline_mode = #tpu.pipeline_mode<synchronous>, transform_indices = @transform_12, window_bounds = array<i64: 1, 128>}, {transform_indices = @transform_13, window_bounds = array<i64: 32, 128>}]} {
    %cst = arith.constant 0.000000e+00 : f32
    %0 = vector.broadcast %cst : f32 to vector<2x10x24x128xf32>
    %c0 = arith.constant 0 : index
    %c0_0 = arith.constant 0 : index
    %c0_1 = arith.constant 0 : index
    %c0_2 = arith.constant 0 : index
    %1 = vector.load %arg15[%c0, %c0_0, %c0_1, %c0_2] : memref<2x10x24x128xf32, #tpu.memory_space<vmem>>, vector<2x10x24x128xf32>
    tpu.vector_store %arg15[%c0, %c0_0, %c0_1, %c0_2], %0 {strides = array<i32>} : memref<2x10x24x128xf32, #tpu.memory_space<vmem>>, vector<2x10x24x128xf32>,
    %c0_3 = arith.constant 0 : index
    %c0_4 = arith.constant 0 : index
    %2 = vector.load %arg1[%c0_3, %c0_4] : memref<128x9xbf16, #tpu.memory_space<vmem>>, vector<128x9xbf16>
    %c0_5 = arith.constant 0 : index
    %c0_6 = arith.constant 0 : index
    %3 = vector.load %arg2[%c0_5, %c0_6] : memref<9x128xbf16, #tpu.memory_space<vmem>>, vector<9x128xbf16>
    %cst_7 = arith.constant dense<0.000000e+00> : vector<128x128xf32>
    %4 = tpu.matmul %2, %3, %cst_7 {dimension_numbers = #tpu.dot_dimension_numbers<[1], [0], [0], [1], [0, 0, 1, 1], [], []>} : vector<128x9xbf16>, vector<9x128xbf16>, vector<128x128xf32> -> vector<128x128xf32>
    %c0_8 = arith.constant 0 : index
    %c0_9 = arith.constant 0 : index
    %5 = vector.load %arg3[%c0_8, %c0_9] : memref<1x128xf32, #tpu.memory_space<vmem>>, vector<1x128xf32>
    %6 = vector.broadcast %5 : vector<1x128xf32> to vector<128x128xf32>
    %7 = arith.mulf %4, %6 : vector<128x128xf32>
    %c0_10 = arith.constant 0 : index
    %c0_11 = arith.constant 0 : index
    %8 = vector.load %arg4[%c0_10, %c0_11] : memref<1x128xf32, #tpu.memory_space<vmem>>, vector<1x128xf32>
    %9 = vector.broadcast %8 : vector<1x128xf32> to vector<128x128xf32>
    %10 = arith.addf %7, %9 : vector<128x128xf32>
    %cst_12 = arith.constant 0.000000e+00 : f32
    %11 = vector.broadcast %cst_12 : f32 to vector<128x128xf32>
    %12 = arith.maximumf %10, %11 : vector<128x128xf32>
    %13 = vector.shape_cast %12 : vector<128x128xf32> to vector<2x8x8x128xf32>
    %c0_13 = arith.constant 0 : index
    %c1 = arith.constant 1 : index
    %c8 = arith.constant 8 : index
    %c0_14 = arith.constant 0 : index
    %14 = vector.load %arg15[%c0_13, %c1, %c8, %c0_14] : memref<2x10x24x128xf32, #tpu.memory_space<vmem>>, vector<2x8x8x128xf32>
    tpu.vector_store %arg15[%c0_13, %c1, %c8, %c0_14], %13 {strides = array<i32>} : memref<2x10x24x128xf32, #tpu.memory_space<vmem>>, vector<2x8x8x128xf32>,
    %c0_15 = arith.constant 0 : index
    %c0_16 = arith.constant 0 : index
    %c7 = arith.constant 7 : index
    %c0_17 = arith.constant 0 : index
    %15 = vector.load %arg15[%c0_15, %c0_16, %c7, %c0_17] : memref<2x10x24x128xf32, #tpu.memory_space<vmem>>, vector<2x8x8x128xf32>
    %16 = vector.shape_cast %15 : vector<2x8x8x128xf32> to vector<128x128xf32>
    %c0_18 = arith.constant 0 : index
    %c0_19 = arith.constant 0 : index
    %c8_20 = arith.constant 8 : index
    %c0_21 = arith.constant 0 : index
    %17 = vector.load %arg15[%c0_18, %c0_19, %c8_20, %c0_21] : memref<2x10x24x128xf32, #tpu.memory_space<vmem>>, vector<2x8x8x128xf32>
    %18 = vector.shape_cast %17 : vector<2x8x8x128xf32> to vector<128x128xf32>
    %c0_22 = arith.constant 0 : index
    %c0_23 = arith.constant 0 : index
    %c9 = arith.constant 9 : index
    %c0_24 = arith.constant 0 : index
    %19 = vector.load %arg15[%c0_22, %c0_23, %c9, %c0_24] : memref<2x10x24x128xf32, #tpu.memory_space<vmem>>, vector<2x8x8x128xf32>
    %20 = vector.shape_cast %19 : vector<2x8x8x128xf32> to vector<128x128xf32>
    %c0_25 = arith.constant 0 : index
    %c1_26 = arith.constant 1 : index
    %c7_27 = arith.constant 7 : index
    %c0_28 = arith.constant 0 : index
    %21 = vector.load %arg15[%c0_25, %c1_26, %c7_27, %c0_28] : memref<2x10x24x128xf32, #tpu.memory_space<vmem>>, vector<2x8x8x128xf32>
    %22 = vector.shape_cast %21 : vector<2x8x8x128xf32> to vector<128x128xf32>
    %c0_29 = arith.constant 0 : index
    %c1_30 = arith.constant 1 : index
    %c8_31 = arith.constant 8 : index
    %c0_32 = arith.constant 0 : index
    %23 = vector.load %arg15[%c0_29, %c1_30, %c8_31, %c0_32] : memref<2x10x24x128xf32, #tpu.memory_space<vmem>>, vector<2x8x8x128xf32>
    %24 = vector.shape_cast %23 : vector<2x8x8x128xf32> to vector<128x128xf32>
    %c0_33 = arith.constant 0 : index
    %c1_34 = arith.constant 1 : index
    %c9_35 = arith.constant 9 : index
    %c0_36 = arith.constant 0 : index
    %25 = vector.load %arg15[%c0_33, %c1_34, %c9_35, %c0_36] : memref<2x10x24x128xf32, #tpu.memory_space<vmem>>, vector<2x8x8x128xf32>
    %26 = vector.shape_cast %25 : vector<2x8x8x128xf32> to vector<128x128xf32>
    %c0_37 = arith.constant 0 : index
    %c2 = arith.constant 2 : index
    %c7_38 = arith.constant 7 : index
    %c0_39 = arith.constant 0 : index
    %27 = vector.load %arg15[%c0_37, %c2, %c7_38, %c0_39] : memref<2x10x24x128xf32, #tpu.memory_space<vmem>>, vector<2x8x8x128xf32>
    %28 = vector.shape_cast %27 : vector<2x8x8x128xf32> to vector<128x128xf32>
    %c0_40 = arith.constant 0 : index
    %c2_41 = arith.constant 2 : index
    %c8_42 = arith.constant 8 : index
    %c0_43 = arith.constant 0 : index
    %29 = vector.load %arg15[%c0_40, %c2_41, %c8_42, %c0_43] : memref<2x10x24x128xf32, #tpu.memory_space<vmem>>, vector<2x8x8x128xf32>
    %30 = vector.shape_cast %29 : vector<2x8x8x128xf32> to vector<128x128xf32>
    %c0_44 = arith.constant 0 : index
    %c2_45 = arith.constant 2 : index
    %c9_46 = arith.constant 9 : index
    %c0_47 = arith.constant 0 : index
    %31 = vector.load %arg15[%c0_44, %c2_45, %c9_46, %c0_47] : memref<2x10x24x128xf32, #tpu.memory_space<vmem>>, vector<2x8x8x128xf32>
    %32 = vector.shape_cast %31 : vector<2x8x8x128xf32> to vector<128x128xf32>
    %33 = tpu.concatenate %16, %18, %20, %22, %24, %26, %28, %30, %32 in 1 : vector<128x128xf32>, vector<128x128xf32>, vector<128x128xf32>, vector<128x128xf32>, vector<128x128xf32>, vector<128x128xf32>, vector<128x128xf32>, vector<128x128xf32>, vector<128x128xf32> -> vector<128x1152xf32>
    %34 = arith.truncf %33 : vector<128x1152xf32> to vector<128x1152xbf16>
    %c0_48 = arith.constant 0 : index
    %c0_49 = arith.constant 0 : index
    %35 = vector.load %arg5[%c0_48, %c0_49] : memref<1152x128xbf16, #tpu.memory_space<vmem>>, vector<1152x128xbf16>
    %cst_50 = arith.constant dense<0.000000e+00> : vector<128x128xf32>
    %36 = tpu.matmul %34, %35, %cst_50 {dimension_numbers = #tpu.dot_dimension_numbers<[1], [0], [0], [1], [0, 0, 1, 1], [], []>} : vector<128x1152xbf16>, vector<1152x128xbf16>, vector<128x128xf32> -> vector<128x128xf32>
    %c0_51 = arith.constant 0 : index
    %c0_52 = arith.constant 0 : index
    %37 = vector.load %arg6[%c0_51, %c0_52] : memref<1x128xf32, #tpu.memory_space<vmem>>, vector<1x128xf32>
    %38 = vector.broadcast %37 : vector<1x128xf32> to vector<128x128xf32>
    %39 = arith.mulf %36, %38 : vector<128x128xf32>
    %c0_53 = arith.constant 0 : index
    %c0_54 = arith.constant 0 : index
    %40 = vector.load %arg7[%c0_53, %c0_54] : memref<1x128xf32, #tpu.memory_space<vmem>>, vector<1x128xf32>
    %41 = vector.broadcast %40 : vector<1x128xf32> to vector<128x128xf32>
    %42 = arith.addf %39, %41 : vector<128x128xf32>
    %cst_55 = arith.constant 0.000000e+00 : f32
    %43 = vector.broadcast %cst_55 : f32 to vector<128x128xf32>
    %44 = arith.maximumf %42, %43 : vector<128x128xf32>
    %45 = vector.shape_cast %44 : vector<128x128xf32> to vector<2x8x8x128xf32>
    %c0_56 = arith.constant 0 : index
    %c1_57 = arith.constant 1 : index
    %c8_58 = arith.constant 8 : index
    %c0_59 = arith.constant 0 : index
    %46 = vector.load %arg15[%c0_56, %c1_57, %c8_58, %c0_59] : memref<2x10x24x128xf32, #tpu.memory_space<vmem>>, vector<2x8x8x128xf32>
    tpu.vector_store %arg15[%c0_56, %c1_57, %c8_58, %c0_59], %45 {strides = array<i32>} : memref<2x10x24x128xf32, #tpu.memory_space<vmem>>, vector<2x8x8x128xf32>,
    %c0_60 = arith.constant 0 : index
    %c0_61 = arith.constant 0 : index
    %c7_62 = arith.constant 7 : index
    %c0_63 = arith.constant 0 : index
    %47 = vector.load %arg15[%c0_60, %c0_61, %c7_62, %c0_63] : memref<2x10x24x128xf32, #tpu.memory_space<vmem>>, vector<2x8x8x128xf32>
    %48 = vector.shape_cast %47 : vector<2x8x8x128xf32> to vector<128x128xf32>
    %c0_64 = arith.constant 0 : index
    %c0_65 = arith.constant 0 : index
    %c8_66 = arith.constant 8 : index
    %c0_67 = arith.constant 0 : index
    %49 = vector.load %arg15[%c0_64, %c0_65, %c8_66, %c0_67] : memref<2x10x24x128xf32, #tpu.memory_space<vmem>>, vector<2x8x8x128xf32>
    %50 = vector.shape_cast %49 : vector<2x8x8x128xf32> to vector<128x128xf32>
    %c0_68 = arith.constant 0 : index
    %c0_69 = arith.constant 0 : index
    %c9_70 = arith.constant 9 : index
    %c0_71 = arith.constant 0 : index
    %51 = vector.load %arg15[%c0_68, %c0_69, %c9_70, %c0_71] : memref<2x10x24x128xf32, #tpu.memory_space<vmem>>, vector<2x8x8x128xf32>
    %52 = vector.shape_cast %51 : vector<2x8x8x128xf32> to vector<128x128xf32>
    %c0_72 = arith.constant 0 : index
    %c1_73 = arith.constant 1 : index
    %c7_74 = arith.constant 7 : index
    %c0_75 = arith.constant 0 : index
    %53 = vector.load %arg15[%c0_72, %c1_73, %c7_74, %c0_75] : memref<2x10x24x128xf32, #tpu.memory_space<vmem>>, vector<2x8x8x128xf32>
    %54 = vector.shape_cast %53 : vector<2x8x8x128xf32> to vector<128x128xf32>
    %c0_76 = arith.constant 0 : index
    %c1_77 = arith.constant 1 : index
    %c8_78 = arith.constant 8 : index
    %c0_79 = arith.constant 0 : index
    %55 = vector.load %arg15[%c0_76, %c1_77, %c8_78, %c0_79] : memref<2x10x24x128xf32, #tpu.memory_space<vmem>>, vector<2x8x8x128xf32>
    %56 = vector.shape_cast %55 : vector<2x8x8x128xf32> to vector<128x128xf32>
    %c0_80 = arith.constant 0 : index
    %c1_81 = arith.constant 1 : index
    %c9_82 = arith.constant 9 : index
    %c0_83 = arith.constant 0 : index
    %57 = vector.load %arg15[%c0_80, %c1_81, %c9_82, %c0_83] : memref<2x10x24x128xf32, #tpu.memory_space<vmem>>, vector<2x8x8x128xf32>
    %58 = vector.shape_cast %57 : vector<2x8x8x128xf32> to vector<128x128xf32>
    %c0_84 = arith.constant 0 : index
    %c2_85 = arith.constant 2 : index
    %c7_86 = arith.constant 7 : index
    %c0_87 = arith.constant 0 : index
    %59 = vector.load %arg15[%c0_84, %c2_85, %c7_86, %c0_87] : memref<2x10x24x128xf32, #tpu.memory_space<vmem>>, vector<2x8x8x128xf32>
    %60 = vector.shape_cast %59 : vector<2x8x8x128xf32> to vector<128x128xf32>
    %c0_88 = arith.constant 0 : index
    %c2_89 = arith.constant 2 : index
    %c8_90 = arith.constant 8 : index
    %c0_91 = arith.constant 0 : index
    %61 = vector.load %arg15[%c0_88, %c2_89, %c8_90, %c0_91] : memref<2x10x24x128xf32, #tpu.memory_space<vmem>>, vector<2x8x8x128xf32>
    %62 = vector.shape_cast %61 : vector<2x8x8x128xf32> to vector<128x128xf32>
    %c0_92 = arith.constant 0 : index
    %c2_93 = arith.constant 2 : index
    %c9_94 = arith.constant 9 : index
    %c0_95 = arith.constant 0 : index
    %63 = vector.load %arg15[%c0_92, %c2_93, %c9_94, %c0_95] : memref<2x10x24x128xf32, #tpu.memory_space<vmem>>, vector<2x8x8x128xf32>
    %64 = vector.shape_cast %63 : vector<2x8x8x128xf32> to vector<128x128xf32>
    %65 = tpu.concatenate %48, %50, %52, %54, %56, %58, %60, %62, %64 in 1 : vector<128x128xf32>, vector<128x128xf32>, vector<128x128xf32>, vector<128x128xf32>, vector<128x128xf32>, vector<128x128xf32>, vector<128x128xf32>, vector<128x128xf32>, vector<128x128xf32> -> vector<128x1152xf32>
    %66 = arith.truncf %65 : vector<128x1152xf32> to vector<128x1152xbf16>
    %c0_96 = arith.constant 0 : index
    %c0_97 = arith.constant 0 : index
    %67 = vector.load %arg8[%c0_96, %c0_97] : memref<1152x128xbf16, #tpu.memory_space<vmem>>, vector<1152x128xbf16>
    %cst_98 = arith.constant dense<0.000000e+00> : vector<128x128xf32>
    %68 = tpu.matmul %66, %67, %cst_98 {dimension_numbers = #tpu.dot_dimension_numbers<[1], [0], [0], [1], [0, 0, 1, 1], [], []>} : vector<128x1152xbf16>, vector<1152x128xbf16>, vector<128x128xf32> -> vector<128x128xf32>
    %c0_99 = arith.constant 0 : index
    %c0_100 = arith.constant 0 : index
    %69 = vector.load %arg9[%c0_99, %c0_100] : memref<1x128xf32, #tpu.memory_space<vmem>>, vector<1x128xf32>
    %70 = vector.broadcast %69 : vector<1x128xf32> to vector<128x128xf32>
    %71 = arith.mulf %68, %70 : vector<128x128xf32>
    %c0_101 = arith.constant 0 : index
    %c0_102 = arith.constant 0 : index
    %72 = vector.load %arg10[%c0_101, %c0_102] : memref<1x128xf32, #tpu.memory_space<vmem>>, vector<1x128xf32>
    %73 = vector.broadcast %72 : vector<1x128xf32> to vector<128x128xf32>
    %74 = arith.addf %71, %73 : vector<128x128xf32>
    %cst_103 = arith.constant 0.000000e+00 : f32
    %75 = vector.broadcast %cst_103 : f32 to vector<128x128xf32>
    %76 = arith.maximumf %74, %75 : vector<128x128xf32>
    %77 = vector.shape_cast %76 : vector<128x128xf32> to vector<2x8x8x128xf32>
    %c0_104 = arith.constant 0 : index
    %c0_105 = arith.constant 0 : index
    %c0_106 = arith.constant 0 : index
    %c0_107 = arith.constant 0 : index
    %78 = vector.load %arg16[%c0_104, %c0_105, %c0_106, %c0_107] : memref<2x8x8x128xf32, #tpu.memory_space<vmem>>, vector<2x8x8x128xf32>
    tpu.vector_store %arg16[%c0_104, %c0_105, %c0_106, %c0_107], %77 {strides = array<i32>} : memref<2x8x8x128xf32, #tpu.memory_space<vmem>>, vector<2x8x8x128xf32>,
    %c0_108 = arith.constant 0 : index
    %c1_109 = arith.constant 1 : index
    %c1_110 = arith.constant 1 : index
    %c0_111 = arith.constant 0 : index
    %79 = vector.load %arg16[%c0_108, %c1_109, %c1_110, %c0_111] : memref<2x8x8x128xf32, #tpu.memory_space<vmem>>, vector<2x4x4x128xf32>
    %80 = vector.shape_cast %79 : vector<2x4x4x128xf32> to vector<32x128xf32>
    %c0_112 = arith.constant 0 : index
    %c1_113 = arith.constant 1 : index
    %c2_114 = arith.constant 2 : index
    %c0_115 = arith.constant 0 : index
    %81 = vector.load %arg16[%c0_112, %c1_113, %c2_114, %c0_115] : memref<2x8x8x128xf32, #tpu.memory_space<vmem>>, vector<2x4x4x128xf32>
    %82 = vector.shape_cast %81 : vector<2x4x4x128xf32> to vector<32x128xf32>
    %c0_116 = arith.constant 0 : index
    %c1_117 = arith.constant 1 : index
    %c3 = arith.constant 3 : index
    %c0_118 = arith.constant 0 : index
    %83 = vector.load %arg16[%c0_116, %c1_117, %c3, %c0_118] : memref<2x8x8x128xf32, #tpu.memory_space<vmem>>, vector<2x4x4x128xf32>
    %84 = vector.shape_cast %83 : vector<2x4x4x128xf32> to vector<32x128xf32>
    %c0_119 = arith.constant 0 : index
    %c2_120 = arith.constant 2 : index
    %c1_121 = arith.constant 1 : index
    %c0_122 = arith.constant 0 : index
    %85 = vector.load %arg16[%c0_119, %c2_120, %c1_121, %c0_122] : memref<2x8x8x128xf32, #tpu.memory_space<vmem>>, vector<2x4x4x128xf32>
    %86 = vector.shape_cast %85 : vector<2x4x4x128xf32> to vector<32x128xf32>
    %c0_123 = arith.constant 0 : index
    %c2_124 = arith.constant 2 : index
    %c2_125 = arith.constant 2 : index
    %c0_126 = arith.constant 0 : index
    %87 = vector.load %arg16[%c0_123, %c2_124, %c2_125, %c0_126] : memref<2x8x8x128xf32, #tpu.memory_space<vmem>>, vector<2x4x4x128xf32>
    %88 = vector.shape_cast %87 : vector<2x4x4x128xf32> to vector<32x128xf32>
    %c0_127 = arith.constant 0 : index
    %c2_128 = arith.constant 2 : index
    %c3_129 = arith.constant 3 : index
    %c0_130 = arith.constant 0 : index
    %89 = vector.load %arg16[%c0_127, %c2_128, %c3_129, %c0_130] : memref<2x8x8x128xf32, #tpu.memory_space<vmem>>, vector<2x4x4x128xf32>
    %90 = vector.shape_cast %89 : vector<2x4x4x128xf32> to vector<32x128xf32>
    %c0_131 = arith.constant 0 : index
    %c3_132 = arith.constant 3 : index
    %c1_133 = arith.constant 1 : index
    %c0_134 = arith.constant 0 : index
    %91 = vector.load %arg16[%c0_131, %c3_132, %c1_133, %c0_134] : memref<2x8x8x128xf32, #tpu.memory_space<vmem>>, vector<2x4x4x128xf32>
    %92 = vector.shape_cast %91 : vector<2x4x4x128xf32> to vector<32x128xf32>
    %c0_135 = arith.constant 0 : index
    %c3_136 = arith.constant 3 : index
    %c2_137 = arith.constant 2 : index
    %c0_138 = arith.constant 0 : index
    %93 = vector.load %arg16[%c0_135, %c3_136, %c2_137, %c0_138] : memref<2x8x8x128xf32, #tpu.memory_space<vmem>>, vector<2x4x4x128xf32>
    %94 = vector.shape_cast %93 : vector<2x4x4x128xf32> to vector<32x128xf32>
    %c0_139 = arith.constant 0 : index
    %c3_140 = arith.constant 3 : index
    %c3_141 = arith.constant 3 : index
    %c0_142 = arith.constant 0 : index
    %95 = vector.load %arg16[%c0_139, %c3_140, %c3_141, %c0_142] : memref<2x8x8x128xf32, #tpu.memory_space<vmem>>, vector<2x4x4x128xf32>
    %96 = vector.shape_cast %95 : vector<2x4x4x128xf32> to vector<32x128xf32>
    %97 = tpu.concatenate %80, %82, %84, %86, %88, %90, %92, %94, %96 in 1 : vector<32x128xf32>, vector<32x128xf32>, vector<32x128xf32>, vector<32x128xf32>, vector<32x128xf32>, vector<32x128xf32>, vector<32x128xf32>, vector<32x128xf32>, vector<32x128xf32> -> vector<32x1152xf32>
    %98 = arith.truncf %97 : vector<32x1152xf32> to vector<32x1152xbf16>
    %c0_143 = arith.constant 0 : index
    %c0_144 = arith.constant 0 : index
    %99 = vector.load %arg11[%c0_143, %c0_144] : memref<1152x128xbf16, #tpu.memory_space<vmem>>, vector<1152x128xbf16>
    %cst_145 = arith.constant dense<0.000000e+00> : vector<32x128xf32>
    %100 = tpu.matmul %98, %99, %cst_145 {dimension_numbers = #tpu.dot_dimension_numbers<[1], [0], [0], [1], [0, 0, 1, 1], [], []>} : vector<32x1152xbf16>, vector<1152x128xbf16>, vector<32x128xf32> -> vector<32x128xf32>
    %c0_146 = arith.constant 0 : index
    %c0_147 = arith.constant 0 : index
    %101 = vector.load %arg12[%c0_146, %c0_147] : memref<1x128xf32, #tpu.memory_space<vmem>>, vector<1x128xf32>
    %102 = vector.broadcast %101 : vector<1x128xf32> to vector<32x128xf32>
    %103 = arith.mulf %100, %102 : vector<32x128xf32>
    %c0_148 = arith.constant 0 : index
    %c0_149 = arith.constant 0 : index
    %104 = vector.load %arg13[%c0_148, %c0_149] : memref<1x128xf32, #tpu.memory_space<vmem>>, vector<1x128xf32>
    %105 = vector.broadcast %104 : vector<1x128xf32> to vector<32x128xf32>
    %106 = arith.addf %103, %105 : vector<32x128xf32>
    %cst_150 = arith.constant 0.000000e+00 : f32
    %107 = vector.broadcast %cst_150 : f32 to vector<32x128xf32>
    %108 = arith.maximumf %106, %107 : vector<32x128xf32>
    %109 = arith.truncf %108 : vector<32x128xf32> to vector<32x128xbf16>
    %c0_151 = arith.constant 0 : index
    %c0_152 = arith.constant 0 : index
    %110 = vector.load %arg14[%c0_151, %c0_152] : memref<32x128xbf16, #tpu.memory_space<vmem>>, vector<32x128xbf16>
    tpu.vector_store %arg14[%c0_151, %c0_152], %109 {strides = array<i32>} : memref<32x128xbf16, #tpu.memory_space<vmem>>, vector<32x128xbf16>,
    return
  }
  func.func @transform_0(%arg0: i32) -> (i32, i32) {
    %c0_i32 = arith.constant 0 : i32
    %c0_i32_0 = arith.constant 0 : i32
    return %arg0, %c0_i32 : i32, i32
  }
  func.func @transform_1(%arg0: i32) -> (i32, i32) {
    %c0_i32 = arith.constant 0 : i32
    %c0_i32_0 = arith.constant 0 : i32
    %c0_i32_1 = arith.constant 0 : i32
    return %c0_i32, %c0_i32_0 : i32, i32
  }
  func.func @transform_2(%arg0: i32) -> (i32, i32) {
    %c0_i32 = arith.constant 0 : i32
    %c0_i32_0 = arith.constant 0 : i32
    %c0_i32_1 = arith.constant 0 : i32
    return %c0_i32, %c0_i32_0 : i32, i32
  }
  func.func @transform_3(%arg0: i32) -> (i32, i32) {
    %c0_i32 = arith.constant 0 : i32
    %c0_i32_0 = arith.constant 0 : i32
    %c0_i32_1 = arith.constant 0 : i32
    return %c0_i32, %c0_i32_0 : i32, i32
  }
  func.func @transform_4(%arg0: i32) -> (i32, i32) {
    %c0_i32 = arith.constant 0 : i32
    %c0_i32_0 = arith.constant 0 : i32
    %c0_i32_1 = arith.constant 0 : i32
    return %c0_i32, %c0_i32_0 : i32, i32
  }
  func.func @transform_5(%arg0: i32) -> (i32, i32) {
    %c0_i32 = arith.constant 0 : i32
    %c0_i32_0 = arith.constant 0 : i32
    %c0_i32_1 = arith.constant 0 : i32
    return %c0_i32, %c0_i32_0 : i32, i32
  }
  func.func @transform_6(%arg0: i32) -> (i32, i32) {
    %c0_i32 = arith.constant 0 : i32
    %c0_i32_0 = arith.constant 0 : i32
    %c0_i32_1 = arith.constant 0 : i32
    return %c0_i32, %c0_i32_0 : i32, i32
  }
  func.func @transform_7(%arg0: i32) -> (i32, i32) {
    %c0_i32 = arith.constant 0 : i32
    %c0_i32_0 = arith.constant 0 : i32
    %c0_i32_1 = arith.constant 0 : i32
    return %c0_i32, %c0_i32_0 : i32, i32
  }
  func.func @transform_8(%arg0: i32) -> (i32, i32) {
    %c0_i32 = arith.constant 0 : i32
    %c0_i32_0 = arith.constant 0 : i32
    %c0_i32_1 = arith.constant 0 : i32
    return %c0_i32, %c0_i32_0 : i32, i32
  }
  func.func @transform_9(%arg0: i32) -> (i32, i32) {
    %c0_i32 = arith.constant 0 : i32
    %c0_i32_0 = arith.constant 0 : i32
    %c0_i32_1 = arith.constant 0 : i32
    return %c0_i32, %c0_i32_0 : i32, i32
  }
  func.func @transform_10(%arg0: i32) -> (i32, i32) {
    %c0_i32 = arith.constant 0 : i32
    %c0_i32_0 = arith.constant 0 : i32
    %c0_i32_1 = arith.constant 0 : i32
    return %c0_i32, %c0_i32_0 : i32, i32
  }
  func.func @transform_11(%arg0: i32) -> (i32, i32) {
    %c0_i32 = arith.constant 0 : i32
    %c0_i32_0 = arith.constant 0 : i32
    %c0_i32_1 = arith.constant 0 : i32
    return %c0_i32, %c0_i32_0 : i32, i32
  }
  func.func @transform_12(%arg0: i32) -> (i32, i32) {
    %c0_i32 = arith.constant 0 : i32
    %c0_i32_0 = arith.constant 0 : i32
    %c0_i32_1 = arith.constant 0 : i32
    return %c0_i32, %c0_i32_0 : i32, i32
  }
  func.func @transform_13(%arg0: i32) -> (i32, i32) {
    %c0_i32 = arith.constant 0 : i32
    %c0_i32_0 = arith.constant 0 : i32
    return %arg0, %c0_i32 : i32, i32
  }
}

module attributes {stable_mosaic.version = 11 : i64} {
  func.func @fc_head_kernel(%arg0: i32, %arg1: memref<2x512xbf16, #tpu.memory_space<vmem>>, %arg2: memref<512x1024xbf16, #tpu.memory_space<vmem>>, %arg3: memref<1x1024xf32, #tpu.memory_space<vmem>>, %arg4: memref<1x1024xf32, #tpu.memory_space<vmem>>, %arg5: memref<1024x512xbf16, #tpu.memory_space<vmem>>, %arg6: memref<1x512xf32, #tpu.memory_space<vmem>>, %arg7: memref<1x512xf32, #tpu.memory_space<vmem>>, %arg8: memref<512x65xbf16, #tpu.memory_space<vmem>>, %arg9: memref<1x65xf32, #tpu.memory_space<vmem>>, %arg10: memref<1x512xf32, #tpu.memory_space<vmem>>, %arg11: memref<1x1xf32, #tpu.memory_space<vmem>>, %arg12: memref<2x65xf32, #tpu.memory_space<vmem>>, %arg13: memref<2x1xf32, #tpu.memory_space<vmem>>, %arg14: memref<2x1024xf32, #tpu.memory_space<vmem>>) attributes {dimension_semantics = [#tpu.dimension_semantics<arbitrary>], iteration_bounds = array<i64: 4>, scalar_prefetch = 0 : i64, scratch_operands = 1 : i64, tpu.core_type = #tpu.core_type<tc>, window_params = [{transform_indices = @transform_0, window_bounds = array<i64: 2, 512>}, {transform_indices = @transform_1, window_bounds = array<i64: 512, 1024>}, {pipeline_mode = #tpu.pipeline_mode<synchronous>, transform_indices = @transform_2, window_bounds = array<i64: 1, 1024>}, {pipeline_mode = #tpu.pipeline_mode<synchronous>, transform_indices = @transform_3, window_bounds = array<i64: 1, 1024>}, {pipeline_mode = #tpu.pipeline_mode<synchronous>, transform_indices = @transform_4, window_bounds = array<i64: 1024, 512>}, {pipeline_mode = #tpu.pipeline_mode<synchronous>, transform_indices = @transform_5, window_bounds = array<i64: 1, 512>}, {pipeline_mode = #tpu.pipeline_mode<synchronous>, transform_indices = @transform_6, window_bounds = array<i64: 1, 512>}, {pipeline_mode = #tpu.pipeline_mode<synchronous>, transform_indices = @transform_7, window_bounds = array<i64: 512, 65>}, {pipeline_mode = #tpu.pipeline_mode<synchronous>, transform_indices = @transform_8, window_bounds = array<i64: 1, 65>}, {pipeline_mode = #tpu.pipeline_mode<synchronous>, transform_indices = @transform_9, window_bounds = array<i64: 1, 512>}, {pipeline_mode = #tpu.pipeline_mode<synchronous>, transform_indices = @transform_10, window_bounds = array<i64: 1, 1>}, {pipeline_mode = #tpu.pipeline_mode<synchronous>, transform_indices = @transform_11, window_bounds = array<i64: 2, 65>}, {pipeline_mode = #tpu.pipeline_mode<synchronous>, transform_indices = @transform_12, window_bounds = array<i64: 2, 1>}]} {
    %c0_i32 = arith.constant 0 : i32
    %0 = arith.cmpi eq, %arg0, %c0_i32 : i32
    %1 = arith.extui %0 : i1 to i32
    %c0_i32_0 = arith.constant 0 : i32
    %2 = arith.cmpi ne, %1, %c0_i32_0 : i32
    scf.if %2 {
      %cst_9 = arith.constant 0.000000e+00 : f32
      %12 = vector.broadcast %cst_9 : f32 to vector<2x1024xf32>
      %c0_10 = arith.constant 0 : index
      %c0_11 = arith.constant 0 : index
      %13 = vector.load %arg14[%c0_10, %c0_11] : memref<2x1024xf32, #tpu.memory_space<vmem>>, vector<2x1024xf32>
      tpu.vector_store %arg14[%c0_10, %c0_11], %12 {strides = array<i32>} : memref<2x1024xf32, #tpu.memory_space<vmem>>, vector<2x1024xf32>,
    } else {
    }
    %c0 = arith.constant 0 : index
    %c0_1 = arith.constant 0 : index
    %3 = vector.load %arg14[%c0, %c0_1] : memref<2x1024xf32, #tpu.memory_space<vmem>>, vector<2x1024xf32>
    %c0_2 = arith.constant 0 : index
    %c0_3 = arith.constant 0 : index
    %4 = vector.load %arg1[%c0_2, %c0_3] : memref<2x512xbf16, #tpu.memory_space<vmem>>, vector<2x512xbf16>
    %c0_4 = arith.constant 0 : index
    %c0_5 = arith.constant 0 : index
    %5 = vector.load %arg2[%c0_4, %c0_5] : memref<512x1024xbf16, #tpu.memory_space<vmem>>, vector<512x1024xbf16>
    %cst = arith.constant dense<0.000000e+00> : vector<2x1024xf32>
    %6 = tpu.matmul %4, %5, %cst {dimension_numbers = #tpu.dot_dimension_numbers<[1], [0], [0], [1], [0, 0, 1, 1], [], []>} : vector<2x512xbf16>, vector<512x1024xbf16>, vector<2x1024xf32> -> vector<2x1024xf32>
    %7 = arith.addf %3, %6 : vector<2x1024xf32>
    %c0_6 = arith.constant 0 : index
    %c0_7 = arith.constant 0 : index
    %8 = vector.load %arg14[%c0_6, %c0_7] : memref<2x1024xf32, #tpu.memory_space<vmem>>, vector<2x1024xf32>
    tpu.vector_store %arg14[%c0_6, %c0_7], %7 {strides = array<i32>} : memref<2x1024xf32, #tpu.memory_space<vmem>>, vector<2x1024xf32>,
    %c3_i32 = arith.constant 3 : i32
    %9 = arith.cmpi eq, %arg0, %c3_i32 : i32
    %10 = arith.extui %9 : i1 to i32
    %c0_i32_8 = arith.constant 0 : i32
    %11 = arith.cmpi ne, %10, %c0_i32_8 : i32
    scf.if %11 {
      %c0_9 = arith.constant 0 : index
      %c0_10 = arith.constant 0 : index
      %12 = vector.load %arg14[%c0_9, %c0_10] : memref<2x1024xf32, #tpu.memory_space<vmem>>, vector<2x1024xf32>
      %c0_11 = arith.constant 0 : index
      %c0_12 = arith.constant 0 : index
      %13 = vector.load %arg3[%c0_11, %c0_12] : memref<1x1024xf32, #tpu.memory_space<vmem>>, vector<1x1024xf32>
      %14 = vector.broadcast %13 : vector<1x1024xf32> to vector<2x1024xf32>
      %15 = arith.mulf %12, %14 : vector<2x1024xf32>
      %c0_13 = arith.constant 0 : index
      %c0_14 = arith.constant 0 : index
      %16 = vector.load %arg4[%c0_13, %c0_14] : memref<1x1024xf32, #tpu.memory_space<vmem>>, vector<1x1024xf32>
      %17 = vector.broadcast %16 : vector<1x1024xf32> to vector<2x1024xf32>
      %18 = arith.addf %15, %17 : vector<2x1024xf32>
      %cst_15 = arith.constant 0.000000e+00 : f32
      %19 = vector.broadcast %cst_15 : f32 to vector<2x1024xf32>
      %20 = arith.maximumf %18, %19 : vector<2x1024xf32>
      %21 = arith.truncf %20 : vector<2x1024xf32> to vector<2x1024xbf16>
      %c0_16 = arith.constant 0 : index
      %c0_17 = arith.constant 0 : index
      %22 = vector.load %arg5[%c0_16, %c0_17] : memref<1024x512xbf16, #tpu.memory_space<vmem>>, vector<1024x512xbf16>
      %cst_18 = arith.constant dense<0.000000e+00> : vector<2x512xf32>
      %23 = tpu.matmul %21, %22, %cst_18 {dimension_numbers = #tpu.dot_dimension_numbers<[1], [0], [0], [1], [0, 0, 1, 1], [], []>} : vector<2x1024xbf16>, vector<1024x512xbf16>, vector<2x512xf32> -> vector<2x512xf32>
      %c0_19 = arith.constant 0 : index
      %c0_20 = arith.constant 0 : index
      %24 = vector.load %arg6[%c0_19, %c0_20] : memref<1x512xf32, #tpu.memory_space<vmem>>, vector<1x512xf32>
      %25 = vector.broadcast %24 : vector<1x512xf32> to vector<2x512xf32>
      %26 = arith.mulf %23, %25 : vector<2x512xf32>
      %c0_21 = arith.constant 0 : index
      %c0_22 = arith.constant 0 : index
      %27 = vector.load %arg7[%c0_21, %c0_22] : memref<1x512xf32, #tpu.memory_space<vmem>>, vector<1x512xf32>
      %28 = vector.broadcast %27 : vector<1x512xf32> to vector<2x512xf32>
      %29 = arith.addf %26, %28 : vector<2x512xf32>
      %cst_23 = arith.constant 0.000000e+00 : f32
      %30 = vector.broadcast %cst_23 : f32 to vector<2x512xf32>
      %31 = arith.maximumf %29, %30 : vector<2x512xf32>
      %32 = arith.truncf %31 : vector<2x512xf32> to vector<2x512xbf16>
      %c0_24 = arith.constant 0 : index
      %c0_25 = arith.constant 0 : index
      %33 = vector.load %arg8[%c0_24, %c0_25] : memref<512x65xbf16, #tpu.memory_space<vmem>>, vector<512x65xbf16>
      %cst_26 = arith.constant dense<0.000000e+00> : vector<2x65xf32>
      %34 = tpu.matmul %32, %33, %cst_26 {dimension_numbers = #tpu.dot_dimension_numbers<[1], [0], [0], [1], [0, 0, 1, 1], [], []>} : vector<2x512xbf16>, vector<512x65xbf16>, vector<2x65xf32> -> vector<2x65xf32>
      %c0_27 = arith.constant 0 : index
      %c0_28 = arith.constant 0 : index
      %35 = vector.load %arg9[%c0_27, %c0_28] : memref<1x65xf32, #tpu.memory_space<vmem>>, vector<1x65xf32>
      %36 = vector.broadcast %35 : vector<1x65xf32> to vector<2x65xf32>
      %37 = arith.addf %34, %36 : vector<2x65xf32>
      %cst_29 = arith.constant dense<0xFF800000> : vector<2xf32>
      %38 = vector.multi_reduction <maximumf>, %37, %cst_29 [1] : vector<2x65xf32> to vector<2xf32>
      %39 = vector.shape_cast %38 : vector<2xf32> to vector<2x1xf32>
      %40 = vector.broadcast %39 : vector<2x1xf32> to vector<2x65xf32>
      %41 = arith.subf %37, %40 : vector<2x65xf32>
      %42 = math.exp %41 : vector<2x65xf32>
      %cst_30 = arith.constant dense<0.000000e+00> : vector<2xf32>
      %43 = vector.multi_reduction <add>, %42, %cst_30 [1] : vector<2x65xf32> to vector<2xf32>
      %44 = vector.shape_cast %43 : vector<2xf32> to vector<2x1xf32>
      %45 = math.log %44 : vector<2x1xf32>
      %46 = vector.broadcast %45 : vector<2x1xf32> to vector<2x65xf32>
      %47 = arith.subf %41, %46 : vector<2x65xf32>
      %c0_31 = arith.constant 0 : index
      %c0_32 = arith.constant 0 : index
      %48 = vector.load %arg12[%c0_31, %c0_32] : memref<2x65xf32, #tpu.memory_space<vmem>>, vector<2x65xf32>
      tpu.vector_store %arg12[%c0_31, %c0_32], %47 {strides = array<i32>} : memref<2x65xf32, #tpu.memory_space<vmem>>, vector<2x65xf32>,
      %c0_33 = arith.constant 0 : index
      %c0_34 = arith.constant 0 : index
      %49 = vector.load %arg10[%c0_33, %c0_34] : memref<1x512xf32, #tpu.memory_space<vmem>>, vector<1x512xf32>
      %50 = vector.broadcast %49 : vector<1x512xf32> to vector<2x512xf32>
      %51 = arith.mulf %31, %50 : vector<2x512xf32>
      %cst_35 = arith.constant dense<0.000000e+00> : vector<2xf32>
      %52 = vector.multi_reduction <add>, %51, %cst_35 [1] : vector<2x512xf32> to vector<2xf32>
      %53 = vector.shape_cast %52 : vector<2xf32> to vector<2x1xf32>
      %c0_36 = arith.constant 0 : index
      %c0_37 = arith.constant 0 : index
      %54 = vector.load %arg11[%c0_36, %c0_37] : memref<1x1xf32, #tpu.memory_space<vmem>>, vector<1x1xf32>
      %55 = vector.broadcast %54 : vector<1x1xf32> to vector<2x1xf32>
      %56 = arith.addf %53, %55 : vector<2x1xf32>
      %57 = math.tanh %56 : vector<2x1xf32>
      %c0_38 = arith.constant 0 : index
      %c0_39 = arith.constant 0 : index
      %58 = vector.load %arg13[%c0_38, %c0_39] : memref<2x1xf32, #tpu.memory_space<vmem>>, vector<2x1xf32>
      tpu.vector_store %arg13[%c0_38, %c0_39], %57 {strides = array<i32>} : memref<2x1xf32, #tpu.memory_space<vmem>>, vector<2x1xf32>,
    } else {
    }
    return
  }
  func.func @transform_0(%arg0: i32) -> (i32, i32) {
    %c0_i32 = arith.constant 0 : i32
    %c0_i32_0 = arith.constant 0 : i32
    return %c0_i32, %arg0 : i32, i32
  }
  func.func @transform_1(%arg0: i32) -> (i32, i32) {
    %c0_i32 = arith.constant 0 : i32
    %c0_i32_0 = arith.constant 0 : i32
    return %arg0, %c0_i32 : i32, i32
  }
  func.func @transform_2(%arg0: i32) -> (i32, i32) {
    %c0_i32 = arith.constant 0 : i32
    %c0_i32_0 = arith.constant 0 : i32
    %c0_i32_1 = arith.constant 0 : i32
    return %c0_i32, %c0_i32_0 : i32, i32
  }
  func.func @transform_3(%arg0: i32) -> (i32, i32) {
    %c0_i32 = arith.constant 0 : i32
    %c0_i32_0 = arith.constant 0 : i32
    %c0_i32_1 = arith.constant 0 : i32
    return %c0_i32, %c0_i32_0 : i32, i32
  }
  func.func @transform_4(%arg0: i32) -> (i32, i32) {
    %c0_i32 = arith.constant 0 : i32
    %c0_i32_0 = arith.constant 0 : i32
    %c0_i32_1 = arith.constant 0 : i32
    return %c0_i32, %c0_i32_0 : i32, i32
  }
  func.func @transform_5(%arg0: i32) -> (i32, i32) {
    %c0_i32 = arith.constant 0 : i32
    %c0_i32_0 = arith.constant 0 : i32
    %c0_i32_1 = arith.constant 0 : i32
    return %c0_i32, %c0_i32_0 : i32, i32
  }
  func.func @transform_6(%arg0: i32) -> (i32, i32) {
    %c0_i32 = arith.constant 0 : i32
    %c0_i32_0 = arith.constant 0 : i32
    %c0_i32_1 = arith.constant 0 : i32
    return %c0_i32, %c0_i32_0 : i32, i32
  }
  func.func @transform_7(%arg0: i32) -> (i32, i32) {
    %c0_i32 = arith.constant 0 : i32
    %c0_i32_0 = arith.constant 0 : i32
    %c0_i32_1 = arith.constant 0 : i32
    return %c0_i32, %c0_i32_0 : i32, i32
  }
  func.func @transform_8(%arg0: i32) -> (i32, i32) {
    %c0_i32 = arith.constant 0 : i32
    %c0_i32_0 = arith.constant 0 : i32
    %c0_i32_1 = arith.constant 0 : i32
    return %c0_i32, %c0_i32_0 : i32, i32
  }
  func.func @transform_9(%arg0: i32) -> (i32, i32) {
    %c0_i32 = arith.constant 0 : i32
    %c0_i32_0 = arith.constant 0 : i32
    %c0_i32_1 = arith.constant 0 : i32
    return %c0_i32, %c0_i32_0 : i32, i32
  }
  func.func @transform_10(%arg0: i32) -> (i32, i32) {
    %c0_i32 = arith.constant 0 : i32
    %c0_i32_0 = arith.constant 0 : i32
    %c0_i32_1 = arith.constant 0 : i32
    return %c0_i32, %c0_i32_0 : i32, i32
  }
  func.func @transform_11(%arg0: i32) -> (i32, i32) {
    %c0_i32 = arith.constant 0 : i32
    %c0_i32_0 = arith.constant 0 : i32
    %c0_i32_1 = arith.constant 0 : i32
    return %c0_i32, %c0_i32_0 : i32, i32
  }
  func.func @transform_12(%arg0: i32) -> (i32, i32) {
    %c0_i32 = arith.constant 0 : i32
    %c0_i32_0 = arith.constant 0 : i32
    %c0_i32_1 = arith.constant 0 : i32
    return %c0_i32, %c0_i32_0 : i32, i32
  }
}

</mosaic_0001>

<bundles_post_ra>
// kernel: _lambda_.3
= control target key start
LH: loop header
LB: loop body
LE: loop exit
PB: predicated region body
PF: predicated region fallthrough
CT: control target
= control target key end

     0   :  { %s7577_s0 = inlined_call_operand.vmem [shape: bf16[2,2048], index: 0, kind: input, shape index: {}]   ;;  %s7578_s1 = inlined_call_operand.hbm [shape: bf16[2048,1024], index: 1, kind: input, shape index: {}]   ;;  %s7579_s2 = inlined_call_operand.hbm [shape: f32[1,1024], index: 2, kind: input, shape index: {}]   ;;  %s7580_s3 = inlined_call_operand.hbm [shape: f32[1,1024], index: 3, kind: input, shape index: {}]   ;;  %s7581_s4 = inlined_call_operand.hbm [shape: bf16[1024,512], index: 4, kind: input, shape index: {}]   ;;  %s7582_s5 = inlined_call_operand.hbm [shape: f32[1,512], index: 5, kind: input, shape index: {}]   ;;  %s7583_s6 = inlined_call_operand.hbm [shape: f32[1,512], index: 6, kind: input, shape index: {}]   ;;  %s7584_s7 = inlined_call_operand.vmem [shape: bf16[512,65], index: 7, kind: input, shape index: {}]   ;;  %s7585_s8 = inlined_call_operand.hbm [shape: f32[1,65], index: 8, kind: input, shape index: {}]   ;;  %s7586_s9 = inlined_call_operand.hbm [shape: f32[1,512], index: 9, kind: input, shape index: {}]   ;;  %s7587_s10 = inlined_call_operand.<no memory space> [shape: f32[1,1], index: 10, kind: input, shape index: {}]   ;;  %s7588_s11 = inlined_call_operand.hbm [shape: f32[2,65], index: 11, kind: output, shape index: {0}]   ;;  %s7589_s12 = inlined_call_operand.vmem [shape: f32[2,1], index: 12, kind: output, shape index: {1}]  }
   0x1   :  { %7593 = sst [smem:[#allocation25_spill]] %s7579_s2  ;;  %v18_v0 = vstv %s7587_s10 }
   0x2   :  { %7594 = sst [smem:[#allocation26_spill]] %s7588_s11  ;;  %19 = vst [vmem:[#allocation3] sm:$0x1] %v18_v0 }
   0x3   :  { %20 = vsyncpa [#allocation5], 0 }
   0x4   :  { %22 = vsyncpa [#allocation5 + $0x1], 0 }
   0x5   :  { %23 = vsyncpa [#allocation8], 0 }
   0x6   :  { %24 = vsyncpa [#allocation11], 0 }
   0x7   :  { %25 = vsyncpa [#allocation14], 0 }
   0x8   :  { %26 = vsyncpa [#allocation17], 0 }
   0x9   :  { %27 = vsyncpa [#allocation6], 0  ;;  %s6754_s23 = smov 0   ;;  %s6756_s24 = smov 0  }
   0xa   :  { %s6758_s25 = smov 0   ;;  %s6760_s26 = smov 0  }
   0xb LB: > { %s6670_s10 = smov [#allocation7]   ;;  %s6775_s28 = sadd.s32 4294967295, %s6668_s26   ;;  %s6668_s26 = sphi %s6760_s26, %s7616_s26   ;;  %s6664_s25 = sphi %s6758_s25, %s7615_s25   ;;  %s6660_s24 = sphi %s6756_s24, %s7614_s24   ;;  %s6656_s23 = sphi %s6754_s23, %s7613_s23  }
   0xc   : > { %s334_s27 = sshll.u32 %s6670_s10, 4  ;;  %p5154_p0 = scmp.ge.s32.totalorder %s6668_s26, 1  ;;  %s335_s27 = int_to_ptr.vmem [resolvable:$true] %s334_s27 }
   0xd   : > { %p7590_p1 = scmp.eq.s32.totalorder %s6775_s28, 0  ;;  %p321_p2 = scmp.lt.s32.totalorder %s6668_s26, 5 }
   0xe   : > { %s6671_s30 = smov [#allocation10]   ;;  %s6672_s15 = smov [#allocation13]  }
   0xf   : > { %p6781_p4 = pnand %p5154_p0, %p321_p2  ;;  %s355_s13 = sshll.u32 %s6671_s30, 4  ;;  %s6787_s13 = int_to_ptr.vmem [resolvable:$true] %s355_s13 }
  0x10   : > { %s380_s16 = sshll.u32 %s6672_s15, 4  ;;  %s7597_s2 = sld [smem:[#allocation25_spill]]  ;;  %s6795_s16 = int_to_ptr.vmem [resolvable:$true] %s380_s16 }
  0x11   : > { %s7595_s29 = scalar_select %p6781_p4, 1, 0 }
  0x12   : > { %p5850_p5 = pneg %p6781_p4 }
  0x14   : > { %p6791_p6 = pnand %p5850_p5, %p7590_p1 }
  0x16   : > { %s6362_s19 = scalar_lea.hbm %s7597_s2, 128  ;;  %p6805_p8 = pneg %p6791_p6 }
  0x17   : > { %p6363_p7 = scmp.ne.s32.totalorder %s7597_s2, %s6362_s19  ;;  %p6369_p11 = scmp.lt.u32.totalorder %s6362_s19, %s7597_s2 }
  0x19   : > { %p6365_p9 = pnand %p6805_p8, %p6363_p7 }
  0x1b   : > { %p6366_p10 = pneg %p6365_p9 }
  0x1d   : > { %p6371_p12 = pnand %p6369_p11, %p6366_p10 }
  0x1f   : > { %6374 = shalt.err (!%p6371_p12)
}
  0x20   : > { %s6375_s15 = scalar_lea.vmem %s335_s27, 128  ;;  %p6383_p5 = scmp.lt.s32.totalorder %s335_s27, %s335_s27 }
  0x21   : > { %p6376_p13 = scmp.ne.s32.totalorder %s335_s27, %s6375_s15  ;;  %p6384_p3 = scmp.lt.s32.totalorder %s6375_s15, %s6375_s15 }
  0x23   : > { %p6378_p0 = pnand %p6376_p13, %p6805_p8  ;;  %p6385_p1 = por %p6384_p3, %p6383_p5 }
  0x25   : > { %p6379_p2 = pneg %p6378_p0 }
  0x27   : > { %p6386_p4 = pnand %p6385_p1, %p6379_p2 }
  0x29   : > { %6389 = shalt.err (!%p6386_p4)
}
  0x2a   : > { %5853 = dma.hbm_to_vmem [thread:$0]  (!%p6791_p6), %s7597_s2, 128, %s335_s27, [#allocation8]  }
  0x2b   : > { %s6390_s21 = scalar_lea.hbm %s7581_s4, 32768 }
  0x2c   : > { %p6391_p7 = scmp.ne.s32.totalorder %s7581_s4, %s6390_s21  ;;  %p6397_p1 = scmp.lt.u32.totalorder %s6390_s21, %s7581_s4 }
  0x2e   : > { %p6393_p9 = pnand %p6391_p7, %p6805_p8 }
  0x30   : > { %p6394_p3 = pneg %p6393_p9 }
  0x32   : > { %p6399_p4 = pnand %p6397_p1, %p6394_p3 }
  0x34   : > { %6402 = shalt.err (!%p6399_p4)
}
  0x35   : > { %s6403_s27 = scalar_lea.vmem %s6787_s13, 32768  ;;  %p6411_p13 = scmp.lt.s32.totalorder %s6787_s13, %s6787_s13 }
  0x36   : > { %p6404_p10 = scmp.ne.s32.totalorder %s6787_s13, %s6403_s27  ;;  %p6412_p0 = scmp.lt.s32.totalorder %s6403_s27, %s6403_s27 }
  0x38   : > { %p6406_p11 = pnand %p6404_p10, %p6805_p8  ;;  %p6413_p2 = por %p6412_p0, %p6411_p13 }
  0x3a   : > { %p6407_p12 = pneg %p6406_p11 }
  0x3c   : > { %p6414_p5 = pnand %p6413_p2, %p6407_p12 }
  0x3e   : > { %6417 = shalt.err (!%p6414_p5)
}
  0x3f   : > { %s6673_s17 = smov 256   ;;  %s6674_s11 = smov 16  }
  0x40   : > { %5859 = dma.hbm_to_vmem [thread:$0]  (!%p6791_p6), %s7581_s4, 32768, %s6787_s13, [#allocation11], %s6673_s17, %s6673_s17, %s6674_s11  }
  0x41   : > { %s6418_s10 = scalar_lea.hbm %s7583_s6, 64 }
  0x42   : > { %p6419_p7 = scmp.ne.s32.totalorder %s7583_s6, %s6418_s10  ;;  %p6425_p1 = scmp.lt.u32.totalorder %s6418_s10, %s7583_s6 }
  0x44   : > { %p6421_p9 = pnand %p6419_p7, %p6805_p8 }
  0x46   : > { %p6422_p3 = pneg %p6421_p9 }
  0x48   : > { %p6427_p4 = pnand %p6425_p1, %p6422_p3 }
  0x4a   : > { %6430 = shalt.err (!%p6427_p4)
}
  0x4b   : > { %s6431_s13 = scalar_lea.vmem %s6795_s16, 64  ;;  %p6439_p13 = scmp.lt.s32.totalorder %s6795_s16, %s6795_s16 }
  0x4c   : > { %p6432_p10 = scmp.ne.s32.totalorder %s6795_s16, %s6431_s13  ;;  %p6440_p0 = scmp.lt.s32.totalorder %s6431_s13, %s6431_s13 }
  0x4e   : > { %p6434_p11 = pnand %p6432_p10, %p6805_p8  ;;  %p6441_p2 = por %p6440_p0, %p6439_p13 }
  0x50   : > { %p6435_p12 = pneg %p6434_p11 }
  0x52   : > { %p6442_p5 = pnand %p6441_p2, %p6435_p12 }
  0x54   : > { %6445 = shalt.err (!%p6442_p5)
}
  0x55   : > { %5865 = dma.hbm_to_vmem [thread:$0]  (!%p6791_p6), %s7583_s6, 64, %s6795_s16, [#allocation14]  }
  0x56   : > { %s6675_s11 = smov [#allocation9]   ;;  %s6676_s19 = smov [#allocation12]  }
  0x57   : > { %s345_s18 = sshll.u32 %s6675_s11, 4  ;;  %s369_s20 = sshll.u32 %s6676_s19, 4  ;;  %s346_s18 = int_to_ptr.vmem [resolvable:$true] %s345_s18  ;;  %s370_s20 = int_to_ptr.vmem [resolvable:$true] %s369_s20 }
  0x58   : > { %s6446_s30 = scalar_lea.hbm %s7580_s3, 128 }
  0x59   : > { %p6447_p7 = scmp.ne.s32.totalorder %s7580_s3, %s6446_s30  ;;  %p6453_p1 = scmp.lt.u32.totalorder %s6446_s30, %s7580_s3 }
  0x5b   : > { %p6449_p9 = pnand %p6447_p7, %p6805_p8 }
  0x5d   : > { %p6450_p3 = pneg %p6449_p9 }
  0x5f   : > { %p6455_p4 = pnand %p6453_p1, %p6450_p3 }
  0x61   : > { %6458 = shalt.err (!%p6455_p4)
}
  0x62   : > { %s6459_s16 = scalar_lea.vmem %s346_s18, 128  ;;  %p6467_p13 = scmp.lt.s32.totalorder %s346_s18, %s346_s18 }
  0x63   : > { %p6460_p10 = scmp.ne.s32.totalorder %s346_s18, %s6459_s16  ;;  %p6468_p0 = scmp.lt.s32.totalorder %s6459_s16, %s6459_s16 }
  0x65   : > { %p6462_p11 = pnand %p6460_p10, %p6805_p8  ;;  %p6469_p2 = por %p6468_p0, %p6467_p13 }
  0x67   : > { %p6463_p12 = pneg %p6462_p11 }
  0x69   : > { %p6470_p5 = pnand %p6469_p2, %p6463_p12 }
  0x6b   : > { %6473 = shalt.err (!%p6470_p5)
}
  0x6c   : > { %5856 = dma.hbm_to_vmem [thread:$0]  (!%p6791_p6), %s7580_s3, 128, %s346_s18, [#allocation8]  }
  0x6d   : > { %s6474_s10 = scalar_lea.hbm %s7582_s5, 64 }
  0x6e   : > { %p6475_p7 = scmp.ne.s32.totalorder %s7582_s5, %s6474_s10  ;;  %p6481_p1 = scmp.lt.u32.totalorder %s6474_s10, %s7582_s5 }
  0x70   : > { %p6477_p9 = pnand %p6475_p7, %p6805_p8 }
  0x72   : > { %p6478_p3 = pneg %p6477_p9 }
  0x74   : > { %p6483_p4 = pnand %p6481_p1, %p6478_p3 }
  0x76   : > { %6486 = shalt.err (!%p6483_p4)
}
  0x77   : > { %s6487_s2 = scalar_lea.vmem %s370_s20, 64  ;;  %p6495_p13 = scmp.lt.s32.totalorder %s370_s20, %s370_s20 }
  0x78   : > { %p6488_p10 = scmp.ne.s32.totalorder %s370_s20, %s6487_s2  ;;  %p6496_p0 = scmp.lt.s32.totalorder %s6487_s2, %s6487_s2 }
  0x7a   : > { %p6490_p11 = pnand %p6488_p10, %p6805_p8  ;;  %p6497_p2 = por %p6496_p0, %p6495_p13 }
  0x7c   : > { %p6491_p12 = pneg %p6490_p11 }
  0x7e   : > { %p6498_p5 = pnand %p6497_p2, %p6491_p12 }
  0x80   : > { %6501 = shalt.err (!%p6498_p5)
}
  0x81   : > { %5862 = dma.hbm_to_vmem [thread:$0]  (!%p6791_p6), %s7582_s5, 64, %s370_s20, [#allocation11]  }
  0x82   : > { %s6677_s17 = smov [#allocation15]   ;;  %s6678_s19 = smov [#allocation16]  }
  0x83   : > { %s394_s11 = sshll.u32 %s6677_s17, 4  ;;  %s405_s21 = sshll.u32 %s6678_s19, 4  ;;  %s395_s11 = int_to_ptr.vmem [resolvable:$true] %s394_s11  ;;  %s406_s21 = int_to_ptr.vmem [resolvable:$true] %s405_s21 }
  0x84   : > { %s6502_s15 = scalar_lea.hbm %s7585_s8, 16 }
  0x85   : > { %p6503_p7 = scmp.ne.s32.totalorder %s7585_s8, %s6502_s15  ;;  %p6509_p1 = scmp.lt.u32.totalorder %s6502_s15, %s7585_s8 }
  0x87   : > { %p6505_p9 = pnand %p6503_p7, %p6805_p8 }
  0x89   : > { %p6506_p3 = pneg %p6505_p9 }
  0x8b   : > { %p6511_p4 = pnand %p6509_p1, %p6506_p3 }
  0x8d   : > { %6514 = shalt.err (!%p6511_p4)
}
  0x8e   : > { %s6515_s20 = scalar_lea.vmem %s395_s11, 16  ;;  %s6522_s16 = scalar_lea.vmem %s395_s11, 32 }
  0x8f   : > { %p6516_p10 = scmp.ne.s32.totalorder %s395_s11, %s6515_s20  ;;  %p6523_p13 = scmp.lt.s32.totalorder %s395_s11, %s395_s11 }
  0x90   : > { %p6524_p0 = scmp.lt.s32.totalorder %s6522_s16, %s6515_s20 }
  0x91   : > { %p6518_p11 = pnand %p6516_p10, %p6805_p8 }
  0x92   : > { %p6525_p2 = por %p6524_p0, %p6523_p13 }
  0x93   : > { %p6519_p12 = pneg %p6518_p11 }
  0x95   : > { %p6526_p5 = pnand %p6525_p2, %p6519_p12 }
  0x97   : > { %6529 = shalt.err (!%p6526_p5)
}
  0x98   : > { %5868 = dma.hbm_to_vmem [thread:$0]  (!%p6791_p6), %s7585_s8, 16, %s395_s11, [#allocation14]  }
  0x99   : > { %s6530_s15 = scalar_lea.hbm %s7586_s9, 64 }
  0x9a   : > { %p6531_p7 = scmp.ne.s32.totalorder %s7586_s9, %s6530_s15  ;;  %p6537_p1 = scmp.lt.u32.totalorder %s6530_s15, %s7586_s9 }
  0x9c   : > { %p6533_p9 = pnand %p6531_p7, %p6805_p8 }
  0x9e   : > { %p6534_p3 = pneg %p6533_p9 }
  0xa0   : > { %p6539_p4 = pnand %p6537_p1, %p6534_p3 }
  0xa2   : > { %6542 = shalt.err (!%p6539_p4)
}
  0xa3   : > { %s6543_s20 = scalar_lea.vmem %s406_s21, 64  ;;  %p6551_p13 = scmp.lt.s32.totalorder %s406_s21, %s406_s21 }
  0xa4   : > { %p6544_p10 = scmp.ne.s32.totalorder %s406_s21, %s6543_s20  ;;  %p6552_p0 = scmp.lt.s32.totalorder %s6543_s20, %s6543_s20 }
  0xa6   : > { %p6546_p11 = pnand %p6544_p10, %p6805_p8  ;;  %p6553_p2 = por %p6552_p0, %p6551_p13 }
  0xa8   : > { %p6547_p12 = pneg %p6546_p11 }
  0xaa   : > { %p6554_p5 = pnand %p6553_p2, %p6547_p12 }
  0xac   : > { %6557 = shalt.err (!%p6554_p5)
}
  0xad   : > { %5871 = dma.hbm_to_vmem [thread:$0]  (!%p6791_p6), %s7586_s9, 64, %s406_s21, [#allocation17]  }
  0xae   : > { %s6940_s22 = sadd.s32 1, %s6668_s26   ;;  %s66_s17 = sadd.s32 1, %s6664_s25 }
  0xaf   : > { %s63_s14 = ssub.s32 %s6668_s26, %s6940_s22  ;;  %p73_p7 = scmp.ne.s32.totalorder %s6664_s25, %s6660_s24 }
  0xb0   : > { %p64_p8 = scmp.eq.s32.totalorder %s63_s14, 0  ;;  %p74_p9 = scmp.eq.s32.totalorder %s6668_s26, 0 }
  0xb1   : > { %p79_p3 = scmp.ne.s32.totalorder %s6660_s24, %s6656_s23  ;;  %p7599_p4 = scmp.eq.s32.totalorder %s6775_s28, 0 }
  0xb2   : > { %s6951_s19 = scalar_select %p64_p8, %s6664_s25, %s66_s17  }
  0xb3   : > { %p75_p1 = por %p74_p9, %p73_p7  ;;  %p6955_p10 = por %p7599_p4, %p79_p3 }
  0xb4   : > { %p5883_p11 = scmp.lt.s32.totalorder %s6668_s26, 4  ;;  %s427_s30 = sand.u32 1, %s6664_s25  }
  0xb5   : > { %s5163_s21 = sshll.u32 %s427_s30, 11  ;;  %s5731_s15 = sshll.u32 %s6668_s26, 15 }
  0xb6   : > { %s6965_s2 = scalar_lea.hbm %s7578_s1, %s5731_s15  ;;  %s431_s23 = scalar_lea.vmem [#allocation4], %s5163_s21 }
  0xb7   : > { %s439_s18 = sshll.u32 %s431_s23, 4  ;;  %p6969_p6 = pnand %p5883_p11, %p75_p1  ;;  %s6967_s18 = int_to_ptr.vmem [resolvable:$true] %s439_s18 }
  0xb8   : > { %s6973_s26 = scalar_lea.sflag [#allocation5], %s427_s30  ;;  %s6558_s11 = scalar_lea.hbm %s6965_s2, 32768 }
  0xb9   : > { %p6559_p12 = scmp.ne.s32.totalorder %s6965_s2, %s6558_s11  ;;  %p6560_p13 = pneg %p6969_p6 }
  0xba   : > { %s6563_s17 = scalar_lea.hbm %s7578_s1, 131072  ;;  %p6564_p5 = scmp.lt.u32.totalorder %s6965_s2, %s7578_s1 }
  0xbb   : > { %p6561_p0 = pnand %p6560_p13, %p6559_p12  ;;  %p6565_p8 = scmp.lt.u32.totalorder %s6563_s17, %s6558_s11 }
  0xbc   : > { %p6567_p9 = scmp.lt.u32.totalorder %s6558_s11, %s6965_s2 }
  0xbd   : > { %p6562_p2 = pneg %p6561_p0  ;;  %p6566_p7 = por %p6565_p8, %p6564_p5 }
  0xbf   : > { %p6568_p3 = por %p6567_p9, %p6566_p7 }
  0xc1   : > { %p6569_p1 = pnand %p6568_p3, %p6562_p2 }
  0xc3   : > { %6572 = shalt.err (!%p6569_p1)
}
  0xc4   : > { %s6573_s30 = scalar_lea.vmem %s6967_s18, 32768  ;;  %s6679_s27 = smov [#allocation4]  }
  0xc5   : > { %p6574_p4 = scmp.ne.s32.totalorder %s6967_s18, %s6573_s30  ;;  %s6578_s13 = sshll.u32 %s6679_s27, 4  ;;  %s6579_s13 = int_to_ptr.vmem [resolvable:$false] %s6578_s13 }
  0xc6   : > { %s6580_s23 = scalar_lea.vmem %s6579_s13, 65536  ;;  %p6581_p0 = scmp.lt.s32.totalorder %s6967_s18, %s6579_s13 }
  0xc7   : > { %p6576_p11 = pnand %p6574_p4, %p6560_p13  ;;  %p6582_p5 = scmp.lt.s32.totalorder %s6580_s23, %s6573_s30 }
  0xc9   : > { %p6577_p12 = pneg %p6576_p11  ;;  %p6583_p8 = por %p6582_p5, %p6581_p0 }
  0xcb   : > { %p6584_p7 = pnand %p6583_p8, %p6577_p12 }
  0xcd   : > { %6587 = shalt.err (!%p6584_p7)
}
  0xce   : > { %s6680_s11 = smov 512   ;;  %s6681_s16 = smov 32  }
  0xcf   : > { %5875 = dma.hbm_to_vmem [thread:$0]  (!%p6969_p6), %s6965_s2, 32768, %s6967_s18, %s6973_s26, %s6680_s11, %s6680_s11, %s6681_s16  }
  0xd0   : > { %p7602_p13 = scmp.ne.s32.totalorder %s7595_s29, 0 }
  0xd1   : > { %s453_s14 = sand.u32 (!%p7602_p13), 1, %s6660_s24  }
  0xd2   : > { %451 = sbr.rel (%p7602_p13) target bundleno = 1720 (0x6b8), region = 64  ;;  %s5168_s17 = sshll.u32 (!%p7602_p13), %s453_s14, 11 }
  0xd3   : > { %s454_s21 = scalar_lea.sflag (!%p7602_p13), [#allocation5], %s453_s14  ;;  %s7004_s15 = scalar_lea.vmem (!%p7602_p13), [#allocation4], %s5168_s17 }
  0xd9   : > { %6631 = dma.done.wait (%p6955_p10), %s454_s21, 32768  }
  0xda   : > { %6633 = vsyncadd (%p6955_p10), %s454_s21, 4294934528  ;;  %p7603_p2 = scmp.eq.s32.totalorder %s6775_s28, 0 }
  0xdc   : > { %6635 = dma.done.wait (%p7603_p2), [#allocation8], 256   ;;  %p7604_p6 = pmov %p7603_p2 }
  0xdd   : > { %p7605_p9 = pmov %p7603_p2 }
  0xde   : > { %6637 = vsyncadd (%p7604_p6), [#allocation8], 4294967040 }
  0xdf   : > { %6639 = dma.done.wait (%p7605_p9), [#allocation11], 32832   ;;  %p7606_p3 = pmov %p7603_p2 }
  0xe0   : > { %p7607_p1 = pmov %p7603_p2 }
  0xe1   : > { %6641 = vsyncadd (%p7606_p3), [#allocation11], 4294934464 }
  0xe2   : > { %6643 = dma.done.wait (%p7607_p1), [#allocation14], 80   ;;  %p7608_p4 = pmov %p7607_p1 }
  0xe3   : > { %p7609_p10 = pmov %p7607_p1 }
  0xe4   : > { %6645 = vsyncadd (%p7608_p4), [#allocation14], 4294967216 }
  0xe5   : > { %6647 = dma.done.wait (%p7609_p10), [#allocation17], 64   ;;  %p7610_p11 = pmov %p7607_p1 }
  0xe6   : > { %s5176_s29 = sshll.u32 %s6775_s28, 2  ;;  %p7611_p0 = scmp.ne.s32.totalorder %s6775_s28, 0 }
  0xe7   : > { %6649 = vsyncadd (%p7610_p11), [#allocation17], 4294967232  ;;  %p526_p12 = scmp.lt.s32.totalorder %s5176_s29, 15  ;;  %v6682_v1 = vmov (!%p7611_p0), 0.0  }
  0xe8   : > { %535 = sbr.rel (%p7611_p0) target bundleno = 239 (0xef), region = 100  ;;  %536 = vst [vmem:[#allocation2] sm:$0xff] (!%p7611_p0), %v6682_v1  ;;  %537 = vst [vmem:[#allocation2 + $0x8] sm:$0xff] (!%p7611_p0), %v6682_v1 }
  0xe9   : > { %s7618_s29 = smov (!%p526_p12, %s5176_s29), 15 }
  0xea   : > { %s528_s18 = scalar_lea.vmem %s7577_s0, %s7618_s29 }
  0xef PF: > { %v541_v2 = vld [vmem:[%s7004_s15] sm:$0xff]  ;;  %v542_v4 = vld [vmem:[%s7004_s15 + $0x8] sm:$0xff]  ;;  %v6683_v37 = vmov 1966171168   ;;  %v809_v39 = vlaneseq  ;;  %p5435_p5 = scmp.ne.s32.totalorder %s6775_s28, 3 }
  0xf0   : > { %v545_v3 = vld [vmem:[%s7004_s15 + $0x20] sm:$0xff]  ;;  %v546_v6 = vld [vmem:[%s7004_s15 + $0x28] sm:$0xff]  ;;  %v807_v38 = vunpack.c.l.s4 %v6683_v37  ;;  %vm4993_vm0 = vcmask (!%p5435_p5), 1041408   ;;  %vm5012_vm1 = vcmask (!%p5435_p5), 1024   ;;  %vm4953_vm2 = vcmask (!%p5435_p5), 525312  }
  0xf1   : > { %v5180_v5 = vcombine.high %v541_v2, %v545_v3  ;;  %v5179_v7 = vcombine.low %v541_v2, %v545_v3  ;;  %v549_v8 = vld [vmem:[%s7004_s15 + $0x40] sm:$0xff]  ;;  %v5182_v10 = vcombine.high %v542_v4, %v546_v6  ;;  %v5181_v11 = vcombine.low %v542_v4, %v546_v6  ;;  %v550_v13 = vld [vmem:[%s7004_s15 + $0x48] sm:$0xff] }
  0xf2   : > { %v553_v9 = vld [vmem:[%s7004_s15 + $0x60] sm:$0xff]  ;;  %v554_v14 = vld [vmem:[%s7004_s15 + $0x68] sm:$0xff]  ;;  %v808_v48 = vunpack.c.0.s8 %v807_v38  ;;  %v7059_v49 = vshrl.u32 %v809_v39, 7 }
  0xf3   : > { %v5188_v12 = vcombine.high %v549_v8, %v553_v9  ;;  %v557_v15 = vld [vmem:[%s7004_s15 + $0x80] sm:$0xff]  ;;  %2106 = vmatprep.subr.bf16.mxu0 %v5180_v5  ;;  %v5190_v16 = vcombine.high %v550_v13, %v554_v14  ;;  %v558_v18 = vld [vmem:[%s7004_s15 + $0x88] sm:$0xff]  ;;  %2188 = vmatprep.subr.bf16.mxu1 %v5182_v10  ;;  %v5187_v20 = vcombine.low %v549_v8, %v553_v9 }
  0xf4   : > { %v561_v17 = vld [vmem:[%s7004_s15 + $0xa0] sm:$0xff]  ;;  %v562_v19 = vld [vmem:[%s7004_s15 + $0xa8] sm:$0xff]  ;;  %2107 = vmatpush1.bf16.msra.mxu0 %v5179_v7  ;;  %2189 = vmatpush1.bf16.msra.mxu1 %v5181_v11  ;;  %v5189_v21 = vcombine.low %v550_v13, %v554_v14  ;;  %v7066_v58 = vsub.s32 %v808_v48, %v7059_v49 }
  0xf5   : > { %2108 = vmatprep.subr.bf16.mxu0 %v5188_v12  ;;  %v5196_v22 = vcombine.high %v557_v15, %v561_v17  ;;  %2190 = vmatprep.subr.bf16.mxu1 %v5190_v16  ;;  %v5198_v23 = vcombine.high %v558_v18, %v562_v19  ;;  %v565_v24 = vld [vmem:[%s7004_s15 + $0xc0] sm:$0xff]  ;;  %v566_v26 = vld [vmem:[%s7004_s15 + $0xc8] sm:$0xff]  ;;  %v5195_v28 = vcombine.low %v557_v15, %v561_v17 }
  0xf6   : > { %v569_v25 = vld [vmem:[%s7004_s15 + $0xe0] sm:$0xff]  ;;  %v570_v27 = vld [vmem:[%s7004_s15 + $0xe8] sm:$0xff]  ;;  %v5197_v29 = vcombine.low %v558_v18, %v562_v19 }
  0xf7   : > { %v5204_v30 = vcombine.high %v565_v24, %v569_v25  ;;  %v5206_v31 = vcombine.high %v566_v26, %v570_v27  ;;  %v573_v32 = vld [vmem:[%s7004_s15 + $0x100] sm:$0xff]  ;;  %v574_v34 = vld [vmem:[%s7004_s15 + $0x108] sm:$0xff]  ;;  %v5203_v36 = vcombine.low %v565_v24, %v569_v25  ;;  %v5205_v40 = vcombine.low %v566_v26, %v570_v27 }
  0xf8   : > { %2109 = vmatpush1.bf16.msra.mxu0 %v5187_v20  ;;  %2191 = vmatpush1.bf16.msra.mxu1 %v5189_v21  ;;  %v577_v33 = vld [vmem:[%s7004_s15 + $0x120] sm:$0xff]  ;;  %v578_v35 = vld [vmem:[%s7004_s15 + $0x128] sm:$0xff] }
  0xf9   : > { %2110 = vmatprep.subr.bf16.mxu0 %v5196_v22  ;;  %2192 = vmatprep.subr.bf16.mxu1 %v5198_v23  ;;  %v5212_v41 = vcombine.high %v573_v32, %v577_v33  ;;  %v5214_v42 = vcombine.high %v574_v34, %v578_v35  ;;  %v581_v43 = vld [vmem:[%s7004_s15 + $0x140] sm:$0xff]  ;;  %v582_v45 = vld [vmem:[%s7004_s15 + $0x148] sm:$0xff]  ;;  %v5211_v47 = vcombine.low %v573_v32, %v577_v33 }
  0xfa   : > { %v585_v44 = vld [vmem:[%s7004_s15 + $0x160] sm:$0xff]  ;;  %v586_v46 = vld [vmem:[%s7004_s15 + $0x168] sm:$0xff]  ;;  %v5213_v50 = vcombine.low %v574_v34, %v578_v35 }
  0xfb   : > { %v5220_v51 = vcombine.high %v581_v43, %v585_v44  ;;  %v5222_v52 = vcombine.high %v582_v45, %v586_v46  ;;  %v589_v53 = vld [vmem:[%s7004_s15 + $0x180] sm:$0xff]  ;;  %v590_v55 = vld [vmem:[%s7004_s15 + $0x188] sm:$0xff]  ;;  %v5219_v57 = vcombine.low %v581_v43, %v585_v44  ;;  %v5221_v59 = vcombine.low %v582_v45, %v586_v46 }
  0xfc   : > { %2111 = vmatpush1.bf16.msra.mxu0 %v5195_v28  ;;  %2193 = vmatpush1.bf16.msra.mxu1 %v5197_v29  ;;  %v593_v54 = vld [vmem:[%s7004_s15 + $0x1a0] sm:$0xff]  ;;  %v594_v56 = vld [vmem:[%s7004_s15 + $0x1a8] sm:$0xff] }
  0xfd   : > { %2112 = vmatprep.subr.bf16.mxu0 %v5204_v30  ;;  %2194 = vmatprep.subr.bf16.mxu1 %v5206_v31  ;;  %v5228_v60 = vcombine.high %v589_v53, %v593_v54  ;;  %v7073_v61 = vld.sshfl [vmem:[%s528_s18] sm:$0x33 pattern:$0x75316420]  ;;  %v5230_v62 = vcombine.high %v590_v55, %v594_v56  ;;  %v597_v63 = vld [vmem:[%s7004_s15 + $0x1c0] sm:$0xff]  ;;  %v5227_v4 = vcombine.low %v589_v53, %v593_v54 }
  0xfe   : > { %v601_v0 = vld [vmem:[%s7004_s15 + $0x1e0] sm:$0xff]  ;;  %v805_v1 = vcombine.high %v7073_v61, %v7073_v61  ;;  %v598_v2 = vld [vmem:[%s7004_s15 + $0x1c8] sm:$0xff]  ;;  %v5229_v6 = vcombine.low %v590_v55, %v594_v56 }
  0xff   : > { %v602_v3 = vld [vmem:[%s7004_s15 + $0x1e8] sm:$0xff]  ;;  %v5236_v7 = vcombine.high %v597_v63, %v601_v0  ;;  %v605_v9 = vld [vmem:[%s7004_s15 + $0x200] sm:$0xff]  ;;  %v5235_v13 = vcombine.low %v597_v63, %v601_v0 }
 0x100   : > { %2113 = vmatpush1.bf16.msra.mxu0 %v5203_v36  ;;  %2195 = vmatpush1.bf16.msra.mxu1 %v5205_v40  ;;  %v7082_v5 = vrot.slane %v805_v1, %v7066_v58  ;;  %v5238_v8 = vcombine.high %v598_v2, %v602_v3  ;;  %v609_v10 = vld [vmem:[%s7004_s15 + $0x220] sm:$0xff]  ;;  %v606_v11 = vld [vmem:[%s7004_s15 + $0x208] sm:$0xff]  ;;  %v5237_v14 = vcombine.low %v598_v2, %v602_v3 }
 0x101   : > { %2114 = vmatprep.subr.bf16.mxu0 %v5212_v41  ;;  %2196 = vmatprep.subr.bf16.mxu1 %v5214_v42  ;;  %v610_v12 = vld [vmem:[%s7004_s15 + $0x228] sm:$0xff]  ;;  %v5244_v15 = vcombine.high %v605_v9, %v609_v10  ;;  %v613_v17 = vld [vmem:[%s7004_s15 + $0x240] sm:$0xff]  ;;  %v5243_v21 = vcombine.low %v605_v9, %v609_v10 }
 0x102   : > { %2138 = vmatprep.mubr.bf16.mxu0 %v7082_v5  ;;  %2220 = vmatprep.mubr.bf16.mxu1 %v7082_v5  ;;  %v5246_v16 = vcombine.high %v606_v11, %v610_v12  ;;  %v617_v18 = vld [vmem:[%s7004_s15 + $0x260] sm:$0xff]  ;;  %v614_v19 = vld [vmem:[%s7004_s15 + $0x248] sm:$0xff]  ;;  %v5245_v22 = vcombine.low %v606_v11, %v610_v12 }
 0x103   : > { %v618_v20 = vld [vmem:[%s7004_s15 + $0x268] sm:$0xff]  ;;  %v5252_v23 = vcombine.high %v613_v17, %v617_v18  ;;  %v621_v25 = vld [vmem:[%s7004_s15 + $0x280] sm:$0xff]  ;;  %v5251_v29 = vcombine.low %v613_v17, %v617_v18 }
 0x104   : > { %2115 = vmatpush1.bf16.msra.mxu0 %v5211_v47  ;;  %2197 = vmatpush1.bf16.msra.mxu1 %v5213_v50  ;;  %v5254_v24 = vcombine.high %v614_v19, %v618_v20  ;;  %v625_v26 = vld [vmem:[%s7004_s15 + $0x2a0] sm:$0xff]  ;;  %v622_v27 = vld [vmem:[%s7004_s15 + $0x288] sm:$0xff]  ;;  %v5253_v30 = vcombine.low %v614_v19, %v618_v20 }
 0x105   : > { %2116 = vmatprep.subr.bf16.mxu0 %v5220_v51  ;;  %2198 = vmatprep.subr.bf16.mxu1 %v5222_v52  ;;  %v626_v28 = vld [vmem:[%s7004_s15 + $0x2a8] sm:$0xff]  ;;  %v5260_v31 = vcombine.high %v621_v25, %v625_v26  ;;  %v629_v33 = vld [vmem:[%s7004_s15 + $0x2c0] sm:$0xff]  ;;  %v5259_v37 = vcombine.low %v621_v25, %v625_v26 }
 0x106   : > { %v5262_v32 = vcombine.high %v622_v27, %v626_v28  ;;  %v633_v34 = vld [vmem:[%s7004_s15 + $0x2e0] sm:$0xff]  ;;  %v630_v35 = vld [vmem:[%s7004_s15 + $0x2c8] sm:$0xff]  ;;  %v5261_v38 = vcombine.low %v622_v27, %v626_v28 }
 0x107   : > { %v634_v36 = vld [vmem:[%s7004_s15 + $0x2e8] sm:$0xff]  ;;  %v5268_v39 = vcombine.high %v629_v33, %v633_v34  ;;  %v637_v41 = vld [vmem:[%s7004_s15 + $0x300] sm:$0xff]  ;;  %v5267_v45 = vcombine.low %v629_v33, %v633_v34 }
 0x108   : > { %2117 = vmatpush1.bf16.msra.mxu0 %v5219_v57  ;;  %2199 = vmatpush1.bf16.msra.mxu1 %v5221_v59  ;;  %v5270_v40 = vcombine.high %v630_v35, %v634_v36  ;;  %v641_v42 = vld [vmem:[%s7004_s15 + $0x320] sm:$0xff]  ;;  %v638_v43 = vld [vmem:[%s7004_s15 + $0x308] sm:$0xff]  ;;  %v5269_v46 = vcombine.low %v630_v35, %v634_v36 }
 0x109   : > { %2118 = vmatprep.subr.bf16.mxu0 %v5228_v60  ;;  %2200 = vmatprep.subr.bf16.mxu1 %v5230_v62  ;;  %v642_v44 = vld [vmem:[%s7004_s15 + $0x328] sm:$0xff]  ;;  %v5276_v47 = vcombine.high %v637_v41, %v641_v42  ;;  %v645_v50 = vld [vmem:[%s7004_s15 + $0x340] sm:$0xff]  ;;  %v5275_v54 = vcombine.low %v637_v41, %v641_v42 }
 0x10a   : > { %v5278_v48 = vcombine.high %v638_v43, %v642_v44  ;;  %v649_v51 = vld [vmem:[%s7004_s15 + $0x360] sm:$0xff]  ;;  %v646_v52 = vld [vmem:[%s7004_s15 + $0x348] sm:$0xff]  ;;  %v5277_v55 = vcombine.low %v638_v43, %v642_v44 }
 0x10b   : > { %v650_v53 = vld [vmem:[%s7004_s15 + $0x368] sm:$0xff]  ;;  %v5284_v56 = vcombine.high %v645_v50, %v649_v51  ;;  %v653_v59 = vld [vmem:[%s7004_s15 + $0x380] sm:$0xff]  ;;  %v5283_v0 = vcombine.low %v645_v50, %v649_v51 }
 0x10c   : > { %2119 = vmatpush1.bf16.msra.mxu0 %v5227_v4  ;;  %2201 = vmatpush1.bf16.msra.mxu1 %v5229_v6  ;;  %v5286_v57 = vcombine.high %v646_v52, %v650_v53  ;;  %v657_v60 = vld [vmem:[%s7004_s15 + $0x3a0] sm:$0xff]  ;;  %v654_v62 = vld [vmem:[%s7004_s15 + $0x388] sm:$0xff]  ;;  %v5285_v1 = vcombine.low %v646_v52, %v650_v53 }
 0x10d   : > { %2120 = vmatprep.subr.bf16.mxu0 %v5236_v7  ;;  %2202 = vmatprep.subr.bf16.mxu1 %v5238_v8  ;;  %v658_v63 = vld [vmem:[%s7004_s15 + $0x3a8] sm:$0xff]  ;;  %v5292_v2 = vcombine.high %v653_v59, %v657_v60  ;;  %v661_v4 = vld [vmem:[%s7004_s15 + $0x3c0] sm:$0xff]  ;;  %v5291_v9 = vcombine.low %v653_v59, %v657_v60 }
 0x10e   : > { %v5294_v3 = vcombine.high %v654_v62, %v658_v63  ;;  %v665_v6 = vld [vmem:[%s7004_s15 + $0x3e0] sm:$0xff]  ;;  %v662_v7 = vld [vmem:[%s7004_s15 + $0x3c8] sm:$0xff]  ;;  %v5293_v10 = vcombine.low %v654_v62, %v658_v63 }
 0x10f   : > { %v666_v8 = vld [vmem:[%s7004_s15 + $0x3e8] sm:$0xff]  ;;  %v5300_v11 = vcombine.high %v661_v4, %v665_v6  ;;  %v5299_v17 = vcombine.low %v661_v4, %v665_v6 }
 0x110   : > { %2121 = vmatpush1.bf16.msra.mxu0 %v5235_v13  ;;  %2203 = vmatpush1.bf16.msra.mxu1 %v5237_v14  ;;  %v5302_v12 = vcombine.high %v662_v7, %v666_v8  ;;  %v669_v13 = vld [vmem:[%s7004_s15 + $0x400] sm:$0xff]  ;;  %v5301_v18 = vcombine.low %v662_v7, %v666_v8  ;;  %v682_v25 = vld [vmem:[%s7004_s15 + $0x468] sm:$0xff] }
 0x111   : > { %2122 = vmatprep.subr.bf16.mxu0 %v5244_v15  ;;  %2204 = vmatprep.subr.bf16.mxu1 %v5246_v16  ;;  %v673_v14 = vld [vmem:[%s7004_s15 + $0x420] sm:$0xff]  ;;  %v670_v15 = vld [vmem:[%s7004_s15 + $0x408] sm:$0xff] }
 0x112   : > { %v674_v16 = vld [vmem:[%s7004_s15 + $0x428] sm:$0xff]  ;;  %v5308_v19 = vcombine.high %v669_v13, %v673_v14  ;;  %v5307_v26 = vcombine.low %v669_v13, %v673_v14 }
 0x113   : > { %v5310_v20 = vcombine.high %v670_v15, %v674_v16  ;;  %v5309_v27 = vcombine.low %v670_v15, %v674_v16 }
 0x114   : > { %2123 = vmatpush1.bf16.msra.mxu0 %v5243_v21  ;;  %2205 = vmatpush1.bf16.msra.mxu1 %v5245_v22  ;;  %v677_v21 = vld [vmem:[%s7004_s15 + $0x440] sm:$0xff] }
 0x115   : > { %2124 = vmatprep.subr.bf16.mxu0 %v5252_v23  ;;  %2206 = vmatprep.subr.bf16.mxu1 %v5254_v24  ;;  %v681_v22 = vld [vmem:[%s7004_s15 + $0x460] sm:$0xff]  ;;  %v7126_v23 = vrot.slane %v7073_v61, %v7066_v58  ;;  %v678_v24 = vld [vmem:[%s7004_s15 + $0x448] sm:$0xff] }
 0x116   : > { %v5316_v28 = vcombine.high %v677_v21, %v681_v22  ;;  %v686_v58 = vld [vmem:[%s7004_s15 + $0x488] sm:$0xff]  ;;  %v5315_v33 = vcombine.low %v677_v21, %v681_v22  ;;  %v5317_v34 = vcombine.low %v678_v24, %v682_v25 }
 0x117   : > { %v690_v61 = vld [vmem:[%s7004_s15 + $0x4a8] sm:$0xff] }
 0x118   : > { %2125 = vmatpush1.bf16.msra.mxu0 %v5251_v29  ;;  %2207 = vmatpush1.bf16.msra.mxu1 %v5253_v30  ;;  %v5318_v29 = vcombine.high %v678_v24, %v682_v25  ;;  %v685_v30 = vld [vmem:[%s7004_s15 + $0x480] sm:$0xff]  ;;  %v5326_v36 = vcombine.high %v686_v58, %v690_v61  ;;  %v5325_v42 = vcombine.low %v686_v58, %v690_v61 }
 0x119   : > { %2126 = vmatprep.subr.bf16.mxu0 %v5260_v31  ;;  %2208 = vmatprep.subr.bf16.mxu1 %v5262_v32  ;;  %v689_v31 = vld [vmem:[%s7004_s15 + $0x4a0] sm:$0xff]  ;;  %v7134_v32 = vcombine.high %v7082_v5, %v7082_v5 }
 0x11a   : > { %v5324_v35 = vcombine.high %v685_v30, %v689_v31  ;;  %v5323_v41 = vcombine.low %v685_v30, %v689_v31 }
 0x11c   : > { %2127 = vmatpush1.bf16.msra.mxu0 %v5259_v37  ;;  %2209 = vmatpush1.bf16.msra.mxu1 %v5261_v38  ;;  %v693_v37 = vld [vmem:[%s7004_s15 + $0x4c0] sm:$0xff] }
 0x11d   : > { %2128 = vmatprep.subr.bf16.mxu0 %v5268_v39  ;;  %2210 = vmatprep.subr.bf16.mxu1 %v5270_v40  ;;  %v697_v38 = vld [vmem:[%s7004_s15 + $0x4e0] sm:$0xff]  ;;  %v694_v39 = vld [vmem:[%s7004_s15 + $0x4c8] sm:$0xff] }
 0x11e   : > { %v698_v40 = vld [vmem:[%s7004_s15 + $0x4e8] sm:$0xff]  ;;  %v5332_v43 = vcombine.high %v693_v37, %v697_v38  ;;  %v5331_v50 = vcombine.low %v693_v37, %v697_v38 }
 0x11f   : > { %v5334_v44 = vcombine.high %v694_v39, %v698_v40  ;;  %v5333_v51 = vcombine.low %v694_v39, %v698_v40 }
 0x120   : > { %2129 = vmatpush1.bf16.msra.mxu0 %v5267_v45  ;;  %2211 = vmatpush1.bf16.msra.mxu1 %v5269_v46  ;;  %v701_v45 = vld [vmem:[%s7004_s15 + $0x500] sm:$0xff] }
 0x121   : > { %2130 = vmatprep.subr.bf16.mxu0 %v5276_v47  ;;  %2212 = vmatprep.subr.bf16.mxu1 %v5278_v48  ;;  %v705_v46 = vld [vmem:[%s7004_s15 + $0x520] sm:$0xff]  ;;  %v702_v47 = vld [vmem:[%s7004_s15 + $0x508] sm:$0xff] }
 0x122   : > { %v706_v48 = vld [vmem:[%s7004_s15 + $0x528] sm:$0xff]  ;;  %v5340_v52 = vcombine.high %v701_v45, %v705_v46  ;;  %v5339_v59 = vcombine.low %v701_v45, %v705_v46 }
 0x123   : > { %v5342_v53 = vcombine.high %v702_v47, %v706_v48  ;;  %v5341_v60 = vcombine.low %v702_v47, %v706_v48 }
 0x124   : > { %2131 = vmatpush1.bf16.msra.mxu0 %v5275_v54  ;;  %2213 = vmatpush1.bf16.msra.mxu1 %v5277_v55  ;;  %v709_v54 = vld [vmem:[%s7004_s15 + $0x540] sm:$0xff] }
 0x125   : > { %2132 = vmatprep.subr.bf16.mxu0 %v5284_v56  ;;  %2214 = vmatprep.subr.bf16.mxu1 %v5286_v57  ;;  %v713_v55 = vld [vmem:[%s7004_s15 + $0x560] sm:$0xff]  ;;  %v710_v56 = vld [vmem:[%s7004_s15 + $0x548] sm:$0xff] }
 0x126   : > { %v714_v57 = vld [vmem:[%s7004_s15 + $0x568] sm:$0xff]  ;;  %v5348_v62 = vcombine.high %v709_v54, %v713_v55  ;;  %v5347_v4 = vcombine.low %v709_v54, %v713_v55 }
 0x127   : > { %v5350_v63 = vcombine.high %v710_v56, %v714_v57  ;;  %v5349_v6 = vcombine.low %v710_v56, %v714_v57 }
 0x128   : > { %2133 = vmatpush1.bf16.msra.mxu0 %v5283_v0  ;;  %2215 = vmatpush1.bf16.msra.mxu1 %v5285_v1  ;;  %v717_v0 = vld [vmem:[%s7004_s15 + $0x580] sm:$0xff] }
 0x129   : > { %2134 = vmatprep.subr.bf16.mxu0 %v5292_v2  ;;  %2216 = vmatprep.subr.bf16.mxu1 %v5294_v3  ;;  %v721_v1 = vld [vmem:[%s7004_s15 + $0x5a0] sm:$0xff]  ;;  %v718_v2 = vld [vmem:[%s7004_s15 + $0x588] sm:$0xff] }
 0x12a   : > { %v722_v3 = vld [vmem:[%s7004_s15 + $0x5a8] sm:$0xff]  ;;  %v5356_v7 = vcombine.high %v717_v0, %v721_v1  ;;  %v5355_v13 = vcombine.low %v717_v0, %v721_v1 }
 0x12b   : > { %v5358_v8 = vcombine.high %v718_v2, %v722_v3  ;;  %v5357_v14 = vcombine.low %v718_v2, %v722_v3 }
 0x12c   : > { %2135 = vmatpush1.bf16.msra.mxu0 %v5291_v9  ;;  %2217 = vmatpush1.bf16.msra.mxu1 %v5293_v10  ;;  %v725_v9 = vld [vmem:[%s7004_s15 + $0x5c0] sm:$0xff] }
 0x12d   : > { %2136 = vmatprep.subr.bf16.mxu0 %v5300_v11  ;;  %2218 = vmatprep.subr.bf16.mxu1 %v5302_v12  ;;  %v729_v10 = vld [vmem:[%s7004_s15 + $0x5e0] sm:$0xff]  ;;  %v726_v11 = vld [vmem:[%s7004_s15 + $0x5c8] sm:$0xff] }
 0x12e   : > { %v730_v12 = vld [vmem:[%s7004_s15 + $0x5e8] sm:$0xff]  ;;  %v5364_v15 = vcombine.high %v725_v9, %v729_v10  ;;  %v5363_v21 = vcombine.low %v725_v9, %v729_v10 }
 0x12f   : > { %v5366_v16 = vcombine.high %v726_v11, %v730_v12  ;;  %v5365_v22 = vcombine.low %v726_v11, %v730_v12 }
 0x130   : > { %2137 = vmatpush1.bf16.msra.mxu0 %v5299_v17  ;;  %2219 = vmatpush1.bf16.msra.mxu1 %v5301_v18  ;;  %v733_v17 = vld [vmem:[%s7004_s15 + $0x600] sm:$0xff] }
 0x131   : > { %2147 = vmatprep.subr.bf16.mxu0 %v5308_v19  ;;  %2229 = vmatprep.subr.bf16.mxu1 %v5310_v20  ;;  %v737_v18 = vld [vmem:[%s7004_s15 + $0x620] sm:$0xff]  ;;  %v734_v19 = vld [vmem:[%s7004_s15 + $0x608] sm:$0xff] }
 0x132   : > { %v738_v20 = vld [vmem:[%s7004_s15 + $0x628] sm:$0xff]  ;;  %v5372_v24 = vcombine.high %v733_v17, %v737_v18  ;;  %v5371_v30 = vcombine.low %v733_v17, %v737_v18 }
 0x133   : > { %2139 = vmatmul.mubr.bf16.vlgmr.msra.gmra.mrb[0].mxu0 %v7126_v23  ;;  %2221 = vmatmul.mubr.bf16.vlgmr.msra.gmra.mrb[0].mxu1 %v7126_v23  ;;  %v5374_v25 = vcombine.high %v734_v19, %v738_v20  ;;  %v5373_v31 = vcombine.low %v734_v19, %v738_v20 }
 0x134   : > { %2148 = vmatpush1.bf16.msra.mxu0 %v5307_v26  ;;  %2230 = vmatpush1.bf16.msra.mxu1 %v5309_v27  ;;  %v741_v26 = vld [vmem:[%s7004_s15 + $0x640] sm:$0xff] }
 0x135   : > { %2149 = vmatprep.subr.bf16.mxu0 %v5316_v28  ;;  %2231 = vmatprep.subr.bf16.mxu1 %v5318_v29  ;;  %v745_v27 = vld [vmem:[%s7004_s15 + $0x660] sm:$0xff]  ;;  %v742_v28 = vld [vmem:[%s7004_s15 + $0x648] sm:$0xff] }
 0x136   : > { %2179 = vmatprep.mubr.bf16.mxu0 %v7134_v32  ;;  %2261 = vmatprep.mubr.bf16.mxu1 %v7134_v32  ;;  %v746_v29 = vld [vmem:[%s7004_s15 + $0x668] sm:$0xff]  ;;  %v5380_v58 = vcombine.high %v741_v26, %v745_v27  ;;  %v5379_v37 = vcombine.low %v741_v26, %v745_v27 }
 0x137   : > { %v5382_v61 = vcombine.high %v742_v28, %v746_v29  ;;  %v5381_v38 = vcombine.low %v742_v28, %v746_v29 }
 0x138   : > { %2150 = vmatpush1.bf16.msra.mxu0 %v5315_v33  ;;  %2232 = vmatpush1.bf16.msra.mxu1 %v5317_v34  ;;  %v749_v33 = vld [vmem:[%s7004_s15 + $0x680] sm:$0xff] }
 0x139   : > { %2151 = vmatprep.subr.bf16.mxu0 %v5324_v35  ;;  %2233 = vmatprep.subr.bf16.mxu1 %v5326_v36  ;;  %v753_v34 = vld [vmem:[%s7004_s15 + $0x6a0] sm:$0xff]  ;;  %v750_v35 = vld [vmem:[%s7004_s15 + $0x688] sm:$0xff] }
 0x13a   : > { %v754_v36 = vld [vmem:[%s7004_s15 + $0x6a8] sm:$0xff]  ;;  %v5388_v39 = vcombine.high %v749_v33, %v753_v34  ;;  %v5387_v45 = vcombine.low %v749_v33, %v753_v34  ;;  %v556_v33 = vld [vmem:[%s7004_s15 + $0x78] sm:$0xff] }
 0x13b   : > { %v5390_v40 = vcombine.high %v750_v35, %v754_v36  ;;  %v5389_v46 = vcombine.low %v750_v35, %v754_v36 }
 0x13c   : > { %2152 = vmatpush1.bf16.msra.mxu0 %v5323_v41  ;;  %2234 = vmatpush1.bf16.msra.mxu1 %v5325_v42  ;;  %v757_v41 = vld [vmem:[%s7004_s15 + $0x6c0] sm:$0xff] }
 0x13d   : > { %2153 = vmatprep.subr.bf16.mxu0 %v5332_v43  ;;  %2235 = vmatprep.subr.bf16.mxu1 %v5334_v44  ;;  %v761_v42 = vld [vmem:[%s7004_s15 + $0x6e0] sm:$0xff]  ;;  %v758_v43 = vld [vmem:[%s7004_s15 + $0x6c8] sm:$0xff] }
 0x13e   : > { %v762_v44 = vld [vmem:[%s7004_s15 + $0x6e8] sm:$0xff]  ;;  %v5396_v47 = vcombine.high %v757_v41, %v761_v42  ;;  %v5395_v54 = vcombine.low %v757_v41, %v761_v42  ;;  %v564_v41 = vld [vmem:[%s7004_s15 + $0xb8] sm:$0xff] }
 0x13f   : > { %v5398_v48 = vcombine.high %v758_v43, %v762_v44  ;;  %v5397_v55 = vcombine.low %v758_v43, %v762_v44 }
 0x140   : > { %2154 = vmatpush1.bf16.msra.mxu0 %v5331_v50  ;;  %2236 = vmatpush1.bf16.msra.mxu1 %v5333_v51  ;;  %v765_v50 = vld [vmem:[%s7004_s15 + $0x700] sm:$0xff] }
 0x141   : > { %2155 = vmatprep.subr.bf16.mxu0 %v5340_v52  ;;  %2237 = vmatprep.subr.bf16.mxu1 %v5342_v53  ;;  %v769_v51 = vld [vmem:[%s7004_s15 + $0x720] sm:$0xff]  ;;  %v766_v52 = vld [vmem:[%s7004_s15 + $0x708] sm:$0xff] }
 0x142   : > { %v770_v53 = vld [vmem:[%s7004_s15 + $0x728] sm:$0xff]  ;;  %v5404_v56 = vcombine.high %v765_v50, %v769_v51  ;;  %v5403_v0 = vcombine.low %v765_v50, %v769_v51  ;;  %v572_v50 = vld [vmem:[%s7004_s15 + $0xf8] sm:$0xff] }
 0x143   : > { %v5406_v57 = vcombine.high %v766_v52, %v770_v53  ;;  %v5405_v1 = vcombine.low %v766_v52, %v770_v53 }
 0x144   : > { %2156 = vmatpush1.bf16.msra.mxu0 %v5339_v59  ;;  %2238 = vmatpush1.bf16.msra.mxu1 %v5341_v60  ;;  %v773_v59 = vld [vmem:[%s7004_s15 + $0x740] sm:$0xff] }
 0x145   : > { %2157 = vmatprep.subr.bf16.mxu0 %v5348_v62  ;;  %2239 = vmatprep.subr.bf16.mxu1 %v5350_v63  ;;  %v777_v60 = vld [vmem:[%s7004_s15 + $0x760] sm:$0xff]  ;;  %v774_v62 = vld [vmem:[%s7004_s15 + $0x748] sm:$0xff] }
 0x146   : > { %v778_v63 = vld [vmem:[%s7004_s15 + $0x768] sm:$0xff]  ;;  %v5412_v2 = vcombine.high %v773_v59, %v777_v60  ;;  %v5411_v9 = vcombine.low %v773_v59, %v777_v60  ;;  %v580_v59 = vld [vmem:[%s7004_s15 + $0x138] sm:$0xff] }
 0x147   : > { %v5414_v3 = vcombine.high %v774_v62, %v778_v63  ;;  %v5413_v10 = vcombine.low %v774_v62, %v778_v63 }
 0x148   : > { %2158 = vmatpush1.bf16.msra.mxu0 %v5347_v4  ;;  %2240 = vmatpush1.bf16.msra.mxu1 %v5349_v6  ;;  %v781_v4 = vld [vmem:[%s7004_s15 + $0x780] sm:$0xff] }
 0x149   : > { %2159 = vmatprep.subr.bf16.mxu0 %v5356_v7  ;;  %2241 = vmatprep.subr.bf16.mxu1 %v5358_v8  ;;  %v785_v6 = vld [vmem:[%s7004_s15 + $0x7a0] sm:$0xff]  ;;  %v782_v7 = vld [vmem:[%s7004_s15 + $0x788] sm:$0xff] }
 0x14a   : > { %v786_v8 = vld [vmem:[%s7004_s15 + $0x7a8] sm:$0xff]  ;;  %v5420_v11 = vcombine.high %v781_v4, %v785_v6  ;;  %v5419_v17 = vcombine.low %v781_v4, %v785_v6 }
 0x14b   : > { %v5422_v12 = vcombine.high %v782_v7, %v786_v8  ;;  %v5421_v18 = vcombine.low %v782_v7, %v786_v8 }
 0x14c   : > { %2160 = vmatpush1.bf16.msra.mxu0 %v5355_v13  ;;  %2242 = vmatpush1.bf16.msra.mxu1 %v5357_v14  ;;  %v789_v13 = vld [vmem:[%s7004_s15 + $0x7c0] sm:$0xff] }
 0x14d   : > { %2161 = vmatprep.subr.bf16.mxu0 %v5364_v15  ;;  %2243 = vmatprep.subr.bf16.mxu1 %v5366_v16  ;;  %v793_v14 = vld [vmem:[%s7004_s15 + $0x7e0] sm:$0xff]  ;;  %v790_v15 = vld [vmem:[%s7004_s15 + $0x7c8] sm:$0xff] }
 0x14e   : > { %v794_v16 = vld [vmem:[%s7004_s15 + $0x7e8] sm:$0xff]  ;;  %v5428_v19 = vcombine.high %v789_v13, %v793_v14  ;;  %v5427_v26 = vcombine.low %v789_v13, %v793_v14 }
 0x14f   : > { %v5430_v20 = vcombine.high %v790_v15, %v794_v16  ;;  %v5429_v27 = vcombine.low %v790_v15, %v794_v16 }
 0x150   : > { %2162 = vmatpush1.bf16.msra.mxu0 %v5363_v21  ;;  %2244 = vmatpush1.bf16.msra.mxu1 %v5365_v22  ;;  %v543_v21 = vld [vmem:[%s7004_s15 + $0x10] sm:$0xff] }
 0x151   : > { %2163 = vmatprep.subr.bf16.mxu0 %v5372_v24  ;;  %2245 = vmatprep.subr.bf16.mxu1 %v5374_v25  ;;  %v547_v22 = vld [vmem:[%s7004_s15 + $0x30] sm:$0xff]  ;;  %v544_v24 = vld [vmem:[%s7004_s15 + $0x18] sm:$0xff] }
 0x152   : > { %v548_v25 = vld [vmem:[%s7004_s15 + $0x38] sm:$0xff]  ;;  %v5184_v28 = vcombine.high %v543_v21, %v547_v22  ;;  %v5183_v34 = vcombine.low %v543_v21, %v547_v22 }
 0x153   : > { %v5186_v29 = vcombine.high %v544_v24, %v548_v25  ;;  %v5185_v35 = vcombine.low %v544_v24, %v548_v25 }
 0x154   : > { %2164 = vmatpush1.bf16.msra.mxu0 %v5371_v30  ;;  %2246 = vmatpush1.bf16.msra.mxu1 %v5373_v31  ;;  %v551_v30 = vld [vmem:[%s7004_s15 + $0x50] sm:$0xff] }
 0x155   : > { %2165 = vmatprep.subr.bf16.mxu0 %v5380_v58  ;;  %2247 = vmatprep.subr.bf16.mxu1 %v5382_v61  ;;  %v555_v31 = vld [vmem:[%s7004_s15 + $0x70] sm:$0xff]  ;;  %v7202_v58 = vcombine.high %v7126_v23, %v7126_v23  ;;  %v552_v61 = vld [vmem:[%s7004_s15 + $0x58] sm:$0xff] }
 0x156   : > { %v5192_v36 = vcombine.high %v551_v30, %v555_v31  ;;  %v5191_v42 = vcombine.low %v551_v30, %v555_v31  ;;  %v5193_v43 = vcombine.low %v552_v61, %v556_v33 }
 0x158   : > { %2166 = vmatpush1.bf16.msra.mxu0 %v5379_v37  ;;  %2248 = vmatpush1.bf16.msra.mxu1 %v5381_v38  ;;  %v5194_v37 = vcombine.high %v552_v61, %v556_v33  ;;  %v559_v38 = vld [vmem:[%s7004_s15 + $0x90] sm:$0xff] }
 0x159   : > { %2167 = vmatprep.subr.bf16.mxu0 %v5388_v39  ;;  %2249 = vmatprep.subr.bf16.mxu1 %v5390_v40  ;;  %v563_v39 = vld [vmem:[%s7004_s15 + $0xb0] sm:$0xff]  ;;  %v560_v40 = vld [vmem:[%s7004_s15 + $0x98] sm:$0xff] }
 0x15a   : > { %v5200_v44 = vcombine.high %v559_v38, %v563_v39  ;;  %v5199_v51 = vcombine.low %v559_v38, %v563_v39  ;;  %v5201_v52 = vcombine.low %v560_v40, %v564_v41 }
 0x15c   : > { %2168 = vmatpush1.bf16.msra.mxu0 %v5387_v45  ;;  %2250 = vmatpush1.bf16.msra.mxu1 %v5389_v46  ;;  %v5202_v45 = vcombine.high %v560_v40, %v564_v41  ;;  %v567_v46 = vld [vmem:[%s7004_s15 + $0xd0] sm:$0xff] }
 0x15d   : > { %2169 = vmatprep.subr.bf16.mxu0 %v5396_v47  ;;  %2251 = vmatprep.subr.bf16.mxu1 %v5398_v48  ;;  %v571_v47 = vld [vmem:[%s7004_s15 + $0xf0] sm:$0xff]  ;;  %v568_v48 = vld [vmem:[%s7004_s15 + $0xd8] sm:$0xff] }
 0x15e   : > { %v5208_v53 = vcombine.high %v567_v46, %v571_v47  ;;  %v5207_v60 = vcombine.low %v567_v46, %v571_v47 }
 0x160   : > { %2170 = vmatpush1.bf16.msra.mxu0 %v5395_v54  ;;  %2252 = vmatpush1.bf16.msra.mxu1 %v5397_v55  ;;  %v5210_v54 = vcombine.high %v568_v48, %v572_v50  ;;  %v575_v55 = vld [vmem:[%s7004_s15 + $0x110] sm:$0xff] }
 0x161   : > { %2171 = vmatprep.subr.bf16.mxu0 %v5404_v56  ;;  %2253 = vmatprep.subr.bf16.mxu1 %v5406_v57  ;;  %v579_v56 = vld [vmem:[%s7004_s15 + $0x130] sm:$0xff]  ;;  %v576_v57 = vld [vmem:[%s7004_s15 + $0x118] sm:$0xff] }
 0x162   : > { %v5216_v62 = vcombine.high %v575_v55, %v579_v56  ;;  %v5218_v63 = vcombine.high %v576_v57, %v580_v59  ;;  %v5215_v4 = vcombine.low %v575_v55, %v579_v56  ;;  %v5217_v6 = vcombine.low %v576_v57, %v580_v59 }
 0x164   : > { %2172 = vmatpush1.bf16.msra.mxu0 %v5403_v0  ;;  %2254 = vmatpush1.bf16.msra.mxu1 %v5405_v1  ;;  %v583_v0 = vld [vmem:[%s7004_s15 + $0x150] sm:$0xff] }
 0x165   : > { %2173 = vmatprep.subr.bf16.mxu0 %v5412_v2  ;;  %2255 = vmatprep.subr.bf16.mxu1 %v5414_v3  ;;  %v587_v1 = vld [vmem:[%s7004_s15 + $0x170] sm:$0xff]  ;;  %v584_v2 = vld [vmem:[%s7004_s15 + $0x158] sm:$0xff] }
 0x166   : > { %v588_v3 = vld [vmem:[%s7004_s15 + $0x178] sm:$0xff]  ;;  %v5224_v7 = vcombine.high %v583_v0, %v587_v1  ;;  %v5223_v13 = vcombine.low %v583_v0, %v587_v1 }
 0x167   : > { %v5226_v8 = vcombine.high %v584_v2, %v588_v3  ;;  %v5225_v14 = vcombine.low %v584_v2, %v588_v3 }
 0x168   : > { %2174 = vmatpush1.bf16.msra.mxu0 %v5411_v9  ;;  %2256 = vmatpush1.bf16.msra.mxu1 %v5413_v10  ;;  %v591_v9 = vld [vmem:[%s7004_s15 + $0x190] sm:$0xff] }
 0x169   : > { %2175 = vmatprep.subr.bf16.mxu0 %v5420_v11  ;;  %2257 = vmatprep.subr.bf16.mxu1 %v5422_v12  ;;  %v595_v10 = vld [vmem:[%s7004_s15 + $0x1b0] sm:$0xff]  ;;  %v592_v11 = vld [vmem:[%s7004_s15 + $0x198] sm:$0xff] }
 0x16a   : > { %v596_v12 = vld [vmem:[%s7004_s15 + $0x1b8] sm:$0xff]  ;;  %v5232_v15 = vcombine.high %v591_v9, %v595_v10  ;;  %v5231_v21 = vcombine.low %v591_v9, %v595_v10 }
 0x16b   : > { %v5234_v16 = vcombine.high %v592_v11, %v596_v12  ;;  %v5233_v22 = vcombine.low %v592_v11, %v596_v12 }
 0x16c   : > { %2176 = vmatpush1.bf16.msra.mxu0 %v5419_v17  ;;  %2258 = vmatpush1.bf16.msra.mxu1 %v5421_v18  ;;  %v599_v17 = vld [vmem:[%s7004_s15 + $0x1d0] sm:$0xff] }
 0x16d   : > { %2177 = vmatprep.subr.bf16.mxu0 %v5428_v19  ;;  %2259 = vmatprep.subr.bf16.mxu1 %v5430_v20  ;;  %v603_v18 = vld [vmem:[%s7004_s15 + $0x1f0] sm:$0xff]  ;;  %v600_v19 = vld [vmem:[%s7004_s15 + $0x1d8] sm:$0xff] }
 0x16e   : > { %v604_v20 = vld [vmem:[%s7004_s15 + $0x1f8] sm:$0xff]  ;;  %v5240_v24 = vcombine.high %v599_v17, %v603_v18  ;;  %v5239_v30 = vcombine.low %v599_v17, %v603_v18 }
 0x16f   : > { %v5242_v25 = vcombine.high %v600_v19, %v604_v20  ;;  %v5241_v31 = vcombine.low %v600_v19, %v604_v20 }
 0x170   : > { %2178 = vmatpush1.bf16.msra.mxu0 %v5427_v26  ;;  %2260 = vmatpush1.bf16.msra.mxu1 %v5429_v27  ;;  %v607_v26 = vld [vmem:[%s7004_s15 + $0x210] sm:$0xff] }
 0x171   : > { %2270 = vmatprep.subr.bf16.mxu0 %v5184_v28  ;;  %2352 = vmatprep.subr.bf16.mxu1 %v5186_v29  ;;  %v611_v27 = vld [vmem:[%s7004_s15 + $0x230] sm:$0xff]  ;;  %v608_v28 = vld [vmem:[%s7004_s15 + $0x218] sm:$0xff] }
 0x172   : > { %v612_v29 = vld [vmem:[%s7004_s15 + $0x238] sm:$0xff]  ;;  %v5248_v61 = vcombine.high %v607_v26, %v611_v27  ;;  %v5247_v38 = vcombine.low %v607_v26, %v611_v27 }
 0x173   : > { %2180 = vmatmul.mubr.bf16.vlgmr.msra.gmra.mrb[0].mxu0 %v7202_v58  ;;  %2262 = vmatmul.mubr.bf16.vlgmr.msra.gmra.mrb[0].mxu1 %v7202_v58  ;;  %v5250_v33 = vcombine.high %v608_v28, %v612_v29  ;;  %v5249_v39 = vcombine.low %v608_v28, %v612_v29 }
 0x174   : > { %2271 = vmatpush1.bf16.msra.mxu0 %v5183_v34  ;;  %2353 = vmatpush1.bf16.msra.mxu1 %v5185_v35  ;;  %v615_v34 = vld [vmem:[%s7004_s15 + $0x250] sm:$0xff] }
 0x175   : > { %2272 = vmatprep.subr.bf16.mxu0 %v5192_v36  ;;  %2354 = vmatprep.subr.bf16.mxu1 %v5194_v37  ;;  %v619_v35 = vld [vmem:[%s7004_s15 + $0x270] sm:$0xff]  ;;  %v616_v36 = vld [vmem:[%s7004_s15 + $0x258] sm:$0xff] }
 0x176   : > { %2302 = vmatprep.mubr.bf16.mxu0 %v7082_v5  ;;  %2384 = vmatprep.mubr.bf16.mxu1 %v7082_v5  ;;  %v5209_v5 = vcombine.low %v568_v48, %v572_v50  ;;  %v620_v37 = vld [vmem:[%s7004_s15 + $0x278] sm:$0xff]  ;;  %v5256_v40 = vcombine.high %v615_v34, %v619_v35  ;;  %v5255_v46 = vcombine.low %v615_v34, %v619_v35 }
 0x177   : > { %v5258_v41 = vcombine.high %v616_v36, %v620_v37  ;;  %v5257_v47 = vcombine.low %v616_v36, %v620_v37 }
 0x178   : > { %2273 = vmatpush1.bf16.msra.mxu0 %v5191_v42  ;;  %2355 = vmatpush1.bf16.msra.mxu1 %v5193_v43  ;;  %v623_v42 = vld [vmem:[%s7004_s15 + $0x290] sm:$0xff] }
 0x179   : > { %2274 = vmatprep.subr.bf16.mxu0 %v5200_v44  ;;  %2356 = vmatprep.subr.bf16.mxu1 %v5202_v45  ;;  %v627_v43 = vld [vmem:[%s7004_s15 + $0x2b0] sm:$0xff]  ;;  %v624_v44 = vld [vmem:[%s7004_s15 + $0x298] sm:$0xff] }
 0x17a   : > { %v628_v45 = vld [vmem:[%s7004_s15 + $0x2b8] sm:$0xff]  ;;  %v5264_v48 = vcombine.high %v623_v42, %v627_v43  ;;  %v5263_v55 = vcombine.low %v623_v42, %v627_v43 }
 0x17b   : > { %v5266_v50 = vcombine.high %v624_v44, %v628_v45  ;;  %v5265_v56 = vcombine.low %v624_v44, %v628_v45 }
 0x17c   : > { %2275 = vmatpush1.bf16.msra.mxu0 %v5199_v51  ;;  %2357 = vmatpush1.bf16.msra.mxu1 %v5201_v52  ;;  %v631_v51 = vld [vmem:[%s7004_s15 + $0x2d0] sm:$0xff] }
 0x17d   : > { %2276 = vmatprep.subr.bf16.mxu0 %v5208_v53  ;;  %2358 = vmatprep.subr.bf16.mxu1 %v5210_v54  ;;  %v635_v52 = vld [vmem:[%s7004_s15 + $0x2f0] sm:$0xff]  ;;  %v632_v53 = vld [vmem:[%s7004_s15 + $0x2d8] sm:$0xff] }
 0x17e   : > { %v636_v54 = vld [vmem:[%s7004_s15 + $0x2f8] sm:$0xff]  ;;  %v5272_v57 = vcombine.high %v631_v51, %v635_v52  ;;  %v5271_v0 = vcombine.low %v631_v51, %v635_v52 }
 0x17f   : > { %v5274_v59 = vcombine.high %v632_v53, %v636_v54  ;;  %v5273_v1 = vcombine.low %v632_v53, %v636_v54 }
 0x180   : > { %2277 = vmatpush1.bf16.msra.mxu0 %v5207_v60  ;;  %2359 = vmatpush1.bf16.msra.mxu1 %v5209_v5  ;;  %v639_v60 = vld [vmem:[%s7004_s15 + $0x310] sm:$0xff] }
 0x181   : > { %2278 = vmatprep.subr.bf16.mxu0 %v5216_v62  ;;  %2360 = vmatprep.subr.bf16.mxu1 %v5218_v63  ;;  %v643_v5 = vld [vmem:[%s7004_s15 + $0x330] sm:$0xff]  ;;  %v640_v62 = vld [vmem:[%s7004_s15 + $0x318] sm:$0xff] }
 0x182   : > { %v644_v63 = vld [vmem:[%s7004_s15 + $0x338] sm:$0xff]  ;;  %v5280_v2 = vcombine.high %v639_v60, %v643_v5  ;;  %v5279_v9 = vcombine.low %v639_v60, %v643_v5 }
 0x183   : > { %v5282_v3 = vcombine.high %v640_v62, %v644_v63  ;;  %v5281_v10 = vcombine.low %v640_v62, %v644_v63  ;;  %v703_v63 = vld [vmem:[%s7004_s15 + $0x510] sm:$0xff] }
 0x184   : > { %2279 = vmatpush1.bf16.msra.mxu0 %v5215_v4  ;;  %2361 = vmatpush1.bf16.msra.mxu1 %v5217_v6  ;;  %v647_v4 = vld [vmem:[%s7004_s15 + $0x350] sm:$0xff] }
 0x185   : > { %2280 = vmatprep.subr.bf16.mxu0 %v5224_v7  ;;  %2362 = vmatprep.subr.bf16.mxu1 %v5226_v8  ;;  %v651_v6 = vld [vmem:[%s7004_s15 + $0x370] sm:$0xff]  ;;  %v648_v7 = vld [vmem:[%s7004_s15 + $0x358] sm:$0xff] }
 0x186   : > { %v652_v8 = vld [vmem:[%s7004_s15 + $0x378] sm:$0xff]  ;;  %v5288_v11 = vcombine.high %v647_v4, %v651_v6  ;;  %v5287_v17 = vcombine.low %v647_v4, %v651_v6 }
 0x187   : > { %v5290_v12 = vcombine.high %v648_v7, %v652_v8  ;;  %v5289_v18 = vcombine.low %v648_v7, %v652_v8  ;;  %v711_v7 = vld [vmem:[%s7004_s15 + $0x550] sm:$0xff] }
 0x188   : > { %2281 = vmatpush1.bf16.msra.mxu0 %v5223_v13  ;;  %2363 = vmatpush1.bf16.msra.mxu1 %v5225_v14  ;;  %v655_v13 = vld [vmem:[%s7004_s15 + $0x390] sm:$0xff] }
 0x189   : > { %2282 = vmatprep.subr.bf16.mxu0 %v5232_v15  ;;  %2364 = vmatprep.subr.bf16.mxu1 %v5234_v16  ;;  %v659_v14 = vld [vmem:[%s7004_s15 + $0x3b0] sm:$0xff]  ;;  %v656_v15 = vld [vmem:[%s7004_s15 + $0x398] sm:$0xff] }
 0x18a   : > { %v660_v16 = vld [vmem:[%s7004_s15 + $0x3b8] sm:$0xff]  ;;  %v5296_v19 = vcombine.high %v655_v13, %v659_v14  ;;  %v5295_v26 = vcombine.low %v655_v13, %v659_v14  ;;  %v715_v8 = vld [vmem:[%s7004_s15 + $0x570] sm:$0xff] }
 0x18b   : > { %v5298_v20 = vcombine.high %v656_v15, %v660_v16  ;;  %v5297_v27 = vcombine.low %v656_v15, %v660_v16  ;;  %v5352_v13 = vcombine.high %v711_v7, %v715_v8  ;;  %v719_v15 = vld [vmem:[%s7004_s15 + $0x590] sm:$0xff] }
 0x18c   : > { %2283 = vmatpush1.bf16.msra.mxu0 %v5231_v21  ;;  %2365 = vmatpush1.bf16.msra.mxu1 %v5233_v22  ;;  %v663_v21 = vld [vmem:[%s7004_s15 + $0x3d0] sm:$0xff] }
 0x18d   : > { %2284 = vmatprep.subr.bf16.mxu0 %v5240_v24  ;;  %2366 = vmatprep.subr.bf16.mxu1 %v5242_v25  ;;  %v667_v22 = vld [vmem:[%s7004_s15 + $0x3f0] sm:$0xff]  ;;  %v664_v24 = vld [vmem:[%s7004_s15 + $0x3d8] sm:$0xff] }
 0x18e   : > { %v668_v25 = vld [vmem:[%s7004_s15 + $0x3f8] sm:$0xff]  ;;  %v5304_v28 = vcombine.high %v663_v21, %v667_v22  ;;  %v5303_v34 = vcombine.low %v663_v21, %v667_v22  ;;  %v723_v16 = vld [vmem:[%s7004_s15 + $0x5b0] sm:$0xff] }
 0x18f   : > { %v5306_v29 = vcombine.high %v664_v24, %v668_v25  ;;  %v5305_v35 = vcombine.low %v664_v24, %v668_v25  ;;  %v5360_v21 = vcombine.high %v719_v15, %v723_v16  ;;  %v727_v24 = vld [vmem:[%s7004_s15 + $0x5d0] sm:$0xff] }
 0x190   : > { %2285 = vmatpush1.bf16.msra.mxu0 %v5239_v30  ;;  %2367 = vmatpush1.bf16.msra.mxu1 %v5241_v31  ;;  %v671_v30 = vld [vmem:[%s7004_s15 + $0x410] sm:$0xff] }
 0x191   : > { %2286 = vmatprep.subr.bf16.mxu0 %v5248_v61  ;;  %2368 = vmatprep.subr.bf16.mxu1 %v5250_v33  ;;  %v675_v31 = vld [vmem:[%s7004_s15 + $0x430] sm:$0xff]  ;;  %v672_v61 = vld [vmem:[%s7004_s15 + $0x418] sm:$0xff] }
 0x192   : > { %v676_v33 = vld [vmem:[%s7004_s15 + $0x438] sm:$0xff]  ;;  %v5312_v36 = vcombine.high %v671_v30, %v675_v31  ;;  %v5311_v42 = vcombine.low %v671_v30, %v675_v31  ;;  %v731_v25 = vld [vmem:[%s7004_s15 + $0x5f0] sm:$0xff] }
 0x193   : > { %v5314_v37 = vcombine.high %v672_v61, %v676_v33  ;;  %v5313_v43 = vcombine.low %v672_v61, %v676_v33  ;;  %v5368_v30 = vcombine.high %v727_v24, %v731_v25  ;;  %v735_v61 = vld [vmem:[%s7004_s15 + $0x610] sm:$0xff] }
 0x194   : > { %2287 = vmatpush1.bf16.msra.mxu0 %v5247_v38  ;;  %2369 = vmatpush1.bf16.msra.mxu1 %v5249_v39  ;;  %v679_v38 = vld [vmem:[%s7004_s15 + $0x450] sm:$0xff] }
 0x195   : > { %2288 = vmatprep.subr.bf16.mxu0 %v5256_v40  ;;  %2370 = vmatprep.subr.bf16.mxu1 %v5258_v41  ;;  %v683_v39 = vld [vmem:[%s7004_s15 + $0x470] sm:$0xff]  ;;  %v680_v40 = vld [vmem:[%s7004_s15 + $0x458] sm:$0xff] }
 0x196   : > { %v684_v41 = vld [vmem:[%s7004_s15 + $0x478] sm:$0xff]  ;;  %v5320_v44 = vcombine.high %v679_v38, %v683_v39  ;;  %v5319_v51 = vcombine.low %v679_v38, %v683_v39  ;;  %v739_v33 = vld [vmem:[%s7004_s15 + $0x630] sm:$0xff] }
 0x197   : > { %v5322_v45 = vcombine.high %v680_v40, %v684_v41  ;;  %v5321_v52 = vcombine.low %v680_v40, %v684_v41  ;;  %v5376_v38 = vcombine.high %v735_v61, %v739_v33  ;;  %v743_v40 = vld [vmem:[%s7004_s15 + $0x650] sm:$0xff] }
 0x198   : > { %2289 = vmatpush1.bf16.msra.mxu0 %v5255_v46  ;;  %2371 = vmatpush1.bf16.msra.mxu1 %v5257_v47  ;;  %v687_v46 = vld [vmem:[%s7004_s15 + $0x490] sm:$0xff] }
 0x199   : > { %2290 = vmatprep.subr.bf16.mxu0 %v5264_v48  ;;  %2372 = vmatprep.subr.bf16.mxu1 %v5266_v50  ;;  %v691_v47 = vld [vmem:[%s7004_s15 + $0x4b0] sm:$0xff]  ;;  %v688_v48 = vld [vmem:[%s7004_s15 + $0x498] sm:$0xff] }
 0x19a   : > { %v692_v50 = vld [vmem:[%s7004_s15 + $0x4b8] sm:$0xff]  ;;  %v5328_v53 = vcombine.high %v687_v46, %v691_v47  ;;  %v747_v41 = vld [vmem:[%s7004_s15 + $0x670] sm:$0xff] }
 0x19b   : > { %v5330_v54 = vcombine.high %v688_v48, %v692_v50  ;;  %v5329_v60 = vcombine.low %v688_v48, %v692_v50  ;;  %v751_v48 = vld [vmem:[%s7004_s15 + $0x690] sm:$0xff] }
 0x19c   : > { %2291 = vmatpush1.bf16.msra.mxu0 %v5263_v55  ;;  %2373 = vmatpush1.bf16.msra.mxu1 %v5265_v56  ;;  %v695_v55 = vld [vmem:[%s7004_s15 + $0x4d0] sm:$0xff] }
 0x19d   : > { %2292 = vmatprep.subr.bf16.mxu0 %v5272_v57  ;;  %2374 = vmatprep.subr.bf16.mxu1 %v5274_v59  ;;  %v699_v56 = vld [vmem:[%s7004_s15 + $0x4f0] sm:$0xff]  ;;  %v696_v57 = vld [vmem:[%s7004_s15 + $0x4d8] sm:$0xff] }
 0x19e   : > { %v700_v59 = vld [vmem:[%s7004_s15 + $0x4f8] sm:$0xff]  ;;  %v5336_v5 = vcombine.high %v695_v55, %v699_v56  ;;  %v755_v50 = vld [vmem:[%s7004_s15 + $0x6b0] sm:$0xff] }
 0x19f   : > { %v5338_v62 = vcombine.high %v696_v57, %v700_v59 }
 0x1a0   : > { %2293 = vmatpush1.bf16.msra.mxu0 %v5271_v0  ;;  %2375 = vmatpush1.bf16.msra.mxu1 %v5273_v1  ;;  %v707_v0 = vld [vmem:[%s7004_s15 + $0x530] sm:$0xff]  ;;  %v704_v1 = vld [vmem:[%s7004_s15 + $0x518] sm:$0xff] }
 0x1a1   : > { %2294 = vmatprep.subr.bf16.mxu0 %v5280_v2  ;;  %2376 = vmatprep.subr.bf16.mxu1 %v5282_v3  ;;  %v708_v2 = vld [vmem:[%s7004_s15 + $0x538] sm:$0xff]  ;;  %v5335_v3 = vcombine.low %v695_v55, %v699_v56  ;;  %v5344_v4 = vcombine.high %v703_v63, %v707_v0  ;;  %v5392_v55 = vcombine.high %v751_v48, %v755_v50 }
 0x1a2   : > { %v5346_v6 = vcombine.high %v704_v1, %v708_v2 }
 0x1a4   : > { %2295 = vmatpush1.bf16.msra.mxu0 %v5279_v9  ;;  %2377 = vmatpush1.bf16.msra.mxu1 %v5281_v10  ;;  %v712_v9 = vld [vmem:[%s7004_s15 + $0x558] sm:$0xff] }
 0x1a5   : > { %2296 = vmatprep.subr.bf16.mxu0 %v5288_v11  ;;  %2378 = vmatprep.subr.bf16.mxu1 %v5290_v12  ;;  %v716_v10 = vld [vmem:[%s7004_s15 + $0x578] sm:$0xff]  ;;  %v5343_v11 = vcombine.low %v703_v63, %v707_v0  ;;  %v5345_v12 = vcombine.low %v704_v1, %v708_v2  ;;  %v767_v1 = vld [vmem:[%s7004_s15 + $0x710] sm:$0xff] }
 0x1a6   : > { %v5354_v14 = vcombine.high %v712_v9, %v716_v10  ;;  %v771_v2 = vld [vmem:[%s7004_s15 + $0x730] sm:$0xff] }
 0x1a8   : > { %2297 = vmatpush1.bf16.msra.mxu0 %v5287_v17  ;;  %2379 = vmatpush1.bf16.msra.mxu1 %v5289_v18  ;;  %v720_v17 = vld [vmem:[%s7004_s15 + $0x598] sm:$0xff] }
 0x1a9   : > { %2298 = vmatprep.subr.bf16.mxu0 %v5296_v19  ;;  %2380 = vmatprep.subr.bf16.mxu1 %v5298_v20  ;;  %v724_v18 = vld [vmem:[%s7004_s15 + $0x5b8] sm:$0xff]  ;;  %v5351_v19 = vcombine.low %v711_v7, %v715_v8  ;;  %v5353_v20 = vcombine.low %v712_v9, %v716_v10  ;;  %v5408_v7 = vcombine.high %v767_v1, %v771_v2  ;;  %v775_v9 = vld [vmem:[%s7004_s15 + $0x750] sm:$0xff] }
 0x1aa   : > { %v5362_v22 = vcombine.high %v720_v17, %v724_v18  ;;  %v779_v10 = vld [vmem:[%s7004_s15 + $0x770] sm:$0xff] }
 0x1ac   : > { %2299 = vmatpush1.bf16.msra.mxu0 %v5295_v26  ;;  %2381 = vmatpush1.bf16.msra.mxu1 %v5297_v27  ;;  %v728_v26 = vld [vmem:[%s7004_s15 + $0x5d8] sm:$0xff] }
 0x1ad   : > { %2300 = vmatprep.subr.bf16.mxu0 %v5304_v28  ;;  %2382 = vmatprep.subr.bf16.mxu1 %v5306_v29  ;;  %v732_v27 = vld [vmem:[%s7004_s15 + $0x5f8] sm:$0xff]  ;;  %v5359_v28 = vcombine.low %v719_v15, %v723_v16  ;;  %v5361_v29 = vcombine.low %v720_v17, %v724_v18  ;;  %v5416_v15 = vcombine.high %v775_v9, %v779_v10  ;;  %v783_v17 = vld [vmem:[%s7004_s15 + $0x790] sm:$0xff] }
 0x1ae   : > { %v5370_v31 = vcombine.high %v728_v26, %v732_v27  ;;  %v787_v18 = vld [vmem:[%s7004_s15 + $0x7b0] sm:$0xff] }
 0x1b0   : > { %2301 = vmatpush1.bf16.msra.mxu0 %v5303_v34  ;;  %2383 = vmatpush1.bf16.msra.mxu1 %v5305_v35  ;;  %v736_v34 = vld [vmem:[%s7004_s15 + $0x618] sm:$0xff] }
 0x1b1   : > { %2311 = vmatprep.subr.bf16.mxu0 %v5312_v36  ;;  %2393 = vmatprep.subr.bf16.mxu1 %v5314_v37  ;;  %v740_v35 = vld [vmem:[%s7004_s15 + $0x638] sm:$0xff]  ;;  %v5367_v36 = vcombine.low %v727_v24, %v731_v25  ;;  %v5369_v37 = vcombine.low %v728_v26, %v732_v27  ;;  %v5424_v24 = vcombine.high %v783_v17, %v787_v18  ;;  %v791_v26 = vld [vmem:[%s7004_s15 + $0x7d0] sm:$0xff] }
 0x1b2   : > { %v5378_v39 = vcombine.high %v736_v34, %v740_v35  ;;  %v795_v27 = vld [vmem:[%s7004_s15 + $0x7f0] sm:$0xff] }
 0x1b3   : > { %2303 = vmatmul.mubr.bf16.vlgmr.msra.gmra.mrb[4].mxu0 %v7126_v23  ;;  %2385 = vmatmul.mubr.bf16.vlgmr.msra.gmra.mrb[4].mxu1 %v7126_v23  ;;  %v5327_v23 = vcombine.low %v687_v46, %v691_v47  ;;  %v5384_v46 = vcombine.high %v743_v40, %v747_v41 }
 0x1b4   : > { %2312 = vmatpush1.bf16.msra.mxu0 %v5311_v42  ;;  %2394 = vmatpush1.bf16.msra.mxu1 %v5313_v43  ;;  %v744_v42 = vld [vmem:[%s7004_s15 + $0x658] sm:$0xff] }
 0x1b5   : > { %2313 = vmatprep.subr.bf16.mxu0 %v5320_v44  ;;  %2395 = vmatprep.subr.bf16.mxu1 %v5322_v45  ;;  %v748_v43 = vld [vmem:[%s7004_s15 + $0x678] sm:$0xff]  ;;  %v5375_v44 = vcombine.low %v735_v61, %v739_v33  ;;  %v5377_v45 = vcombine.low %v736_v34, %v740_v35  ;;  %v5432_v61 = vcombine.high %v791_v26, %v795_v27 }
 0x1b6   : > { %2343 = vmatprep.mubr.bf16.mxu0 %v7134_v32  ;;  %2425 = vmatprep.mubr.bf16.mxu1 %v7134_v32  ;;  %v5337_v32 = vcombine.low %v696_v57, %v700_v59  ;;  %v5386_v47 = vcombine.high %v744_v42, %v748_v43  ;;  %v759_v57 = vld [vmem:[%s7004_s15 + $0x6d0] sm:$0xff]  ;;  %v5431_v34 = vcombine.low %v791_v26, %v795_v27  ;;  %v5969_v26 = vld [vmem:[#allocation10 + $0x88] ss:$16 sps:$4 sm:$0xff] (!%p5435_p5)  }
 0x1b7   : > { %v763_v59 = vld [vmem:[%s7004_s15 + $0x6f0] sm:$0xff] }
 0x1b8   : > { %2314 = vmatpush1.bf16.msra.mxu0 %v5319_v51  ;;  %2396 = vmatpush1.bf16.msra.mxu1 %v5321_v52  ;;  %v752_v51 = vld [vmem:[%s7004_s15 + $0x698] sm:$0xff]  ;;  %v5400_v63 = vcombine.high %v759_v57, %v763_v59  ;;  %v5970_v27 = vld [vmem:[#allocation10 + $0xa4] ss:$16 sps:$4 sm:$0xff] (!%p5435_p5)  }
 0x1b9   : > { %2315 = vmatprep.subr.bf16.mxu0 %v5328_v53  ;;  %2397 = vmatprep.subr.bf16.mxu1 %v5330_v54  ;;  %v756_v52 = vld [vmem:[%s7004_s15 + $0x6b8] sm:$0xff]  ;;  %v5383_v53 = vcombine.low %v743_v40, %v747_v41  ;;  %v5385_v54 = vcombine.low %v744_v42, %v748_v43 }
 0x1ba   : > { %v5394_v56 = vcombine.high %v752_v51, %v756_v52 }
 0x1bc   : > { %2316 = vmatpush1.bf16.msra.mxu0 %v5327_v23  ;;  %2398 = vmatpush1.bf16.msra.mxu1 %v5329_v60  ;;  %v760_v23 = vld [vmem:[%s7004_s15 + $0x6d8] sm:$0xff] }
 0x1bd   : > { %2317 = vmatprep.subr.bf16.mxu0 %v5336_v5  ;;  %2399 = vmatprep.subr.bf16.mxu1 %v5338_v62  ;;  %v764_v60 = vld [vmem:[%s7004_s15 + $0x6f8] sm:$0xff]  ;;  %v5391_v5 = vcombine.low %v751_v48, %v755_v50  ;;  %v5393_v62 = vcombine.low %v752_v51, %v756_v52  ;;  %v538_v52 = vld [vmem:[#allocation2] sm:$0xff] }
 0x1be   : > { %v5402_v0 = vcombine.high %v760_v23, %v764_v60 }
 0x1c0   : > { %2318 = vmatpush1.bf16.msra.mxu0 %v5335_v3  ;;  %2400 = vmatpush1.bf16.msra.mxu1 %v5337_v32  ;;  %v768_v3 = vld [vmem:[%s7004_s15 + $0x718] sm:$0xff] }
 0x1c1   : > { %2319 = vmatprep.subr.bf16.mxu0 %v5344_v4  ;;  %2401 = vmatprep.subr.bf16.mxu1 %v5346_v6  ;;  %v772_v32 = vld [vmem:[%s7004_s15 + $0x738] sm:$0xff]  ;;  %v5399_v4 = vcombine.low %v759_v57, %v763_v59  ;;  %v5401_v6 = vcombine.low %v760_v23, %v764_v60 }
 0x1c2   : > { %v5410_v8 = vcombine.high %v768_v3, %v772_v32 }
 0x1c4   : > { %2320 = vmatpush1.bf16.msra.mxu0 %v5343_v11  ;;  %2402 = vmatpush1.bf16.msra.mxu1 %v5345_v12  ;;  %v776_v11 = vld [vmem:[%s7004_s15 + $0x758] sm:$0xff] }
 0x1c5   : > { %2321 = vmatprep.subr.bf16.mxu0 %v5352_v13  ;;  %2403 = vmatprep.subr.bf16.mxu1 %v5354_v14  ;;  %v780_v12 = vld [vmem:[%s7004_s15 + $0x778] sm:$0xff]  ;;  %v5407_v13 = vcombine.low %v767_v1, %v771_v2  ;;  %v5409_v14 = vcombine.low %v768_v3, %v772_v32 }
 0x1c6   : > { %v5418_v16 = vcombine.high %v776_v11, %v780_v12  ;;  %v539_v3 = vld [vmem:[#allocation2 + $0x8] sm:$0xff] }
 0x1c8   : > { %2322 = vmatpush1.bf16.msra.mxu0 %v5351_v19  ;;  %2404 = vmatpush1.bf16.msra.mxu1 %v5353_v20  ;;  %v784_v19 = vld [vmem:[%s7004_s15 + $0x798] sm:$0xff] }
 0x1c9   : > { %2323 = vmatprep.subr.bf16.mxu0 %v5360_v21  ;;  %2405 = vmatprep.subr.bf16.mxu1 %v5362_v22  ;;  %v788_v20 = vld [vmem:[%s7004_s15 + $0x7b8] sm:$0xff]  ;;  %v5415_v21 = vcombine.low %v775_v9, %v779_v10  ;;  %v5417_v22 = vcombine.low %v776_v11, %v780_v12  ;;  %v5946_v10 = vld [vmem:[#allocation10 + $0x24] ss:$16 sps:$4 sm:$0xff] (!%p5435_p5)   ;;  %v5950_v12 = vld [vmem:[#allocation10 + $0x20] ss:$16 sps:$4 sm:$0xff] (!%p5435_p5)  }
 0x1ca   : > { %v5426_v25 = vcombine.high %v784_v19, %v788_v20  ;;  %v5945_v9 = vld [vmem:[#allocation10 + $0x8] ss:$16 sps:$4 sm:$0xff] (!%p5435_p5)   ;;  %v5948_v11 = vld [vmem:[#allocation10 + $0x2c] ss:$16 sps:$4 sm:$0xff] (!%p5435_p5)  }
 0x1cc   : > { %2324 = vmatpush1.bf16.msra.mxu0 %v5359_v28  ;;  %2406 = vmatpush1.bf16.msra.mxu1 %v5361_v29  ;;  %v792_v28 = vld [vmem:[%s7004_s15 + $0x7d8] sm:$0xff] }
 0x1cd   : > { %2325 = vmatprep.subr.bf16.mxu0 %v5368_v30  ;;  %2407 = vmatprep.subr.bf16.mxu1 %v5370_v31  ;;  %v796_v29 = vld [vmem:[%s7004_s15 + $0x7f8] sm:$0xff]  ;;  %v5423_v30 = vcombine.low %v783_v17, %v787_v18  ;;  %v5425_v31 = vcombine.low %v784_v19, %v788_v20  ;;  %v5958_v18 = vld [vmem:[#allocation10 + $0x64] ss:$16 sps:$4 sm:$0xff] (!%p5435_p5)   ;;  %v5962_v20 = vld [vmem:[#allocation10 + $0x60] ss:$16 sps:$4 sm:$0xff] (!%p5435_p5)  }
 0x1ce   : > { %v5434_v33 = vcombine.high %v792_v28, %v796_v29  ;;  %v5433_v35 = vcombine.low %v792_v28, %v796_v29  ;;  %v5957_v17 = vld [vmem:[#allocation10 + $0x48] ss:$16 sps:$4 sm:$0xff] (!%p5435_p5)   ;;  %v5960_v19 = vld [vmem:[#allocation10 + $0x6c] ss:$16 sps:$4 sm:$0xff] (!%p5435_p5)   ;;  %v5974_v29 = vld [vmem:[#allocation10 + $0xa0] ss:$16 sps:$4 sm:$0xff] (!%p5435_p5)  }
 0x1cf   : > { %v5972_v28 = vld [vmem:[#allocation10 + $0xac] ss:$16 sps:$4 sm:$0xff] (!%p5435_p5)  }
 0x1d0   : > { %2326 = vmatpush1.bf16.msra.mxu0 %v5367_v36  ;;  %2408 = vmatpush1.bf16.msra.mxu1 %v5369_v37  ;;  %v6684_v36 = vmov 1983009808  }
 0x1d1   : > { %2327 = vmatprep.subr.bf16.mxu0 %v5376_v38  ;;  %2409 = vmatprep.subr.bf16.mxu1 %v5378_v39  ;;  %v2445_v37 = vunpack.c.l.s4 %v6684_v36  ;;  %v5984_v36 = vld [vmem:[#allocation10 + $0xec] ss:$16 sps:$4 sm:$0xff] (!%p5435_p5)  }
 0x1d3   : > { %v2446_v38 = vunpack.c.0.s8 %v2445_v37  ;;  %v5986_v37 = vld [vmem:[#allocation10 + $0xe0] ss:$16 sps:$4 sm:$0xff] (!%p5435_p5)  }
 0x1d4   : > { %2328 = vmatpush1.bf16.msra.mxu0 %v5375_v44  ;;  %2410 = vmatpush1.bf16.msra.mxu1 %v5377_v45 }
 0x1d5   : > { %2329 = vmatprep.subr.bf16.mxu0 %v5384_v46  ;;  %2411 = vmatprep.subr.bf16.mxu1 %v5386_v47  ;;  %v7337_v40 = vsub.s32 %v2446_v38, %v7059_v49  ;;  %v5987_v38 = vld [vmem:[#allocation10 + $0xe8] ss:$16 sps:$4 sm:$0xff] (!%p5435_p5)  }
 0x1d8   : > { %2330 = vmatpush1.bf16.msra.mxu0 %v5383_v53  ;;  %2412 = vmatpush1.bf16.msra.mxu1 %v5385_v54 }
 0x1d9   : > { %2331 = vmatprep.subr.bf16.mxu0 %v5392_v55  ;;  %2413 = vmatprep.subr.bf16.mxu1 %v5394_v56 }
 0x1dc   : > { %2332 = vmatpush1.bf16.msra.mxu0 %v5391_v5  ;;  %2414 = vmatpush1.bf16.msra.mxu1 %v5393_v62 }
 0x1dd   : > { %2333 = vmatprep.subr.bf16.mxu0 %v5400_v63  ;;  %2415 = vmatprep.subr.bf16.mxu1 %v5402_v0 }
 0x1e0   : > { %2334 = vmatpush1.bf16.msra.mxu0 %v5399_v4  ;;  %2416 = vmatpush1.bf16.msra.mxu1 %v5401_v6  ;;  %v5940_v6 = vld [vmem:[#allocation10 + $0x4] ss:$16 sps:$4 sm:$0xff] (!%p5435_p5)  }
 0x1e1   : > { %2335 = vmatprep.subr.bf16.mxu0 %v5408_v7  ;;  %2417 = vmatprep.subr.bf16.mxu1 %v5410_v8  ;;  %v5942_v7 = vld [vmem:[#allocation10 + $0xc] ss:$16 sps:$4 sm:$0xff] (!%p5435_p5)   ;;  %v5944_v8 = vld [vmem:[#allocation10] ss:$16 sps:$4 sm:$0xff] (!%p5435_p5)  }
 0x1e4   : > { %2336 = vmatpush1.bf16.msra.mxu0 %v5407_v13  ;;  %2418 = vmatpush1.bf16.msra.mxu1 %v5409_v14  ;;  %v5951_v13 = vld [vmem:[#allocation10 + $0x28] ss:$16 sps:$4 sm:$0xff] (!%p5435_p5)   ;;  %v5952_v14 = vld [vmem:[#allocation10 + $0x44] ss:$16 sps:$4 sm:$0xff] (!%p5435_p5)  }
 0x1e5   : > { %2337 = vmatprep.subr.bf16.mxu0 %v5416_v15  ;;  %2419 = vmatprep.subr.bf16.mxu1 %v5418_v16  ;;  %v5954_v15 = vld [vmem:[#allocation10 + $0x4c] ss:$16 sps:$4 sm:$0xff] (!%p5435_p5)   ;;  %v5956_v16 = vld [vmem:[#allocation10 + $0x40] ss:$16 sps:$4 sm:$0xff] (!%p5435_p5)  }
 0x1e8   : > { %2338 = vmatpush1.bf16.msra.mxu0 %v5415_v21  ;;  %2420 = vmatpush1.bf16.msra.mxu1 %v5417_v22  ;;  %v5963_v21 = vld [vmem:[#allocation10 + $0x68] ss:$16 sps:$4 sm:$0xff] (!%p5435_p5)   ;;  %v5964_v22 = vld [vmem:[#allocation10 + $0x84] ss:$16 sps:$4 sm:$0xff] (!%p5435_p5)  }
 0x1e9   : > { %2339 = vmatprep.subr.bf16.mxu0 %v5424_v24  ;;  %2421 = vmatprep.subr.bf16.mxu1 %v5426_v25  ;;  %v5966_v24 = vld [vmem:[#allocation10 + $0x8c] ss:$16 sps:$4 sm:$0xff] (!%p5435_p5)   ;;  %v5968_v25 = vld [vmem:[#allocation10 + $0x80] ss:$16 sps:$4 sm:$0xff] (!%p5435_p5)  }
 0x1ec   : > { %2340 = vmatpush1.bf16.msra.mxu0 %v5423_v30  ;;  %2422 = vmatpush1.bf16.msra.mxu1 %v5425_v31  ;;  %v5975_v30 = vld [vmem:[#allocation10 + $0xa8] ss:$16 sps:$4 sm:$0xff] (!%p5435_p5)   ;;  %v5976_v31 = vld [vmem:[#allocation10 + $0xc4] ss:$16 sps:$4 sm:$0xff] (!%p5435_p5)  }
 0x1ed   : > { %2341 = vmatprep.subr.bf16.mxu0 %v5432_v61  ;;  %2423 = vmatprep.subr.bf16.mxu1 %v5434_v33  ;;  %v5978_v61 = vld [vmem:[#allocation10 + $0xcc] ss:$16 sps:$4 sm:$0xff] (!%p5435_p5)   ;;  %v5980_v33 = vld [vmem:[#allocation10 + $0xc0] ss:$16 sps:$4 sm:$0xff] (!%p5435_p5)  }
 0x1f0   : > { %2342 = vmatpush1.bf16.msra.mxu0 %v5431_v34  ;;  %2424 = vmatpush1.bf16.msra.mxu1 %v5433_v35  ;;  %v5981_v34 = vld [vmem:[#allocation10 + $0xc8] ss:$16 sps:$4 sm:$0xff] (!%p5435_p5)   ;;  %v5982_v35 = vld [vmem:[#allocation10 + $0xe4] ss:$16 sps:$4 sm:$0xff] (!%p5435_p5)  }
 0x1f1   : > { %4222 = vmatprep.subr.bf16.mxu0 (!%p5435_p5), %v5940_v6  ;;  %4386 = vmatprep.subr.bf16.mxu1 (!%p5435_p5), %v5942_v7 }
 0x1f3   : > { %2344 = vmatmul.mubr.bf16.vlgmr.msra.gmra.mrb[4].mxu0 %v7202_v58  ;;  %2426 = vmatmul.mubr.bf16.vlgmr.msra.gmra.mrb[4].mxu1 %v7202_v58 }
 0x1f4   : > { %4223 = vmatpush1.bf16.msra.mxu0 (!%p5435_p5), %v5944_v8  ;;  %4387 = vmatpush1.bf16.msra.mxu1 (!%p5435_p5), %v5945_v9  ;;  %v6016_v9 = vld [vmem:[#allocation10 + $0x180] ss:$16 sps:$4 sm:$0xff] (!%p5435_p5)  }
 0x1f5   : > { %4224 = vmatprep.subr.bf16.mxu0 (!%p5435_p5), %v5946_v10  ;;  %4388 = vmatprep.subr.bf16.mxu1 (!%p5435_p5), %v5948_v11 }
 0x1f8   : > { %4225 = vmatpush1.bf16.msra.mxu0 (!%p5435_p5), %v5950_v12  ;;  %4389 = vmatpush1.bf16.msra.mxu1 (!%p5435_p5), %v5951_v13  ;;  %v6017_v12 = vld [vmem:[#allocation10 + $0x188] ss:$16 sps:$4 sm:$0xff] (!%p5435_p5)   ;;  %v6018_v13 = vld [vmem:[#allocation10 + $0x1a4] ss:$16 sps:$4 sm:$0xff] (!%p5435_p5)  }
 0x1f9   : > { %4226 = vmatprep.subr.bf16.mxu0 (!%p5435_p5), %v5952_v14  ;;  %4390 = vmatprep.subr.bf16.mxu1 (!%p5435_p5), %v5954_v15 }
 0x1fc   : > { %4227 = vmatpush1.bf16.msra.mxu0 (!%p5435_p5), %v5956_v16  ;;  %4391 = vmatpush1.bf16.msra.mxu1 (!%p5435_p5), %v5957_v17  ;;  %v6020_v16 = vld [vmem:[#allocation10 + $0x1ac] ss:$16 sps:$4 sm:$0xff] (!%p5435_p5)  }
 0x1fd   : > { %4228 = vmatprep.subr.bf16.mxu0 (!%p5435_p5), %v5958_v18  ;;  %4392 = vmatprep.subr.bf16.mxu1 (!%p5435_p5), %v5960_v19 }
 0x200   : > { %4229 = vmatpush1.bf16.msra.mxu0 (!%p5435_p5), %v5962_v20  ;;  %4393 = vmatpush1.bf16.msra.mxu1 (!%p5435_p5), %v5963_v21  ;;  %v6022_v21 = vld [vmem:[#allocation10 + $0x1a0] ss:$16 sps:$4 sm:$0xff] (!%p5435_p5)  }
 0x201   : > { %4230 = vmatprep.subr.bf16.mxu0 (!%p5435_p5), %v5964_v22  ;;  %4394 = vmatprep.subr.bf16.mxu1 (!%p5435_p5), %v5966_v24  ;;  %v6023_v24 = vld [vmem:[#allocation10 + $0x1a8] ss:$16 sps:$4 sm:$0xff] (!%p5435_p5)  }
 0x204   : > { %4231 = vmatpush1.bf16.msra.mxu0 (!%p5435_p5), %v5968_v25  ;;  %4395 = vmatpush1.bf16.msra.mxu1 (!%p5435_p5), %v5969_v26  ;;  %v6024_v25 = vld [vmem:[#allocation10 + $0x1c4] ss:$16 sps:$4 sm:$0xff] (!%p5435_p5)  }
 0x205   : > { %4232 = vmatprep.subr.bf16.mxu0 (!%p5435_p5), %v5970_v27  ;;  %4396 = vmatprep.subr.bf16.mxu1 (!%p5435_p5), %v5972_v28  ;;  %v6026_v27 = vld [vmem:[#allocation10 + $0x1cc] ss:$16 sps:$4 sm:$0xff] (!%p5435_p5)  }
 0x208   : > { %4233 = vmatpush1.bf16.msra.mxu0 (!%p5435_p5), %v5974_v29  ;;  %4397 = vmatpush1.bf16.msra.mxu1 (!%p5435_p5), %v5975_v30  ;;  %v6028_v29 = vld [vmem:[#allocation10 + $0x1c0] ss:$16 sps:$4 sm:$0xff] (!%p5435_p5)  }
 0x209   : > { %4234 = vmatprep.subr.bf16.mxu0 (!%p5435_p5), %v5976_v31  ;;  %4398 = vmatprep.subr.bf16.mxu1 (!%p5435_p5), %v5978_v61  ;;  %v6029_v31 = vld [vmem:[#allocation10 + $0x1c8] ss:$16 sps:$4 sm:$0xff] (!%p5435_p5)   ;;  %v6030_v61 = vld [vmem:[#allocation10 + $0x1e4] ss:$16 sps:$4 sm:$0xff] (!%p5435_p5)  }
 0x20c   : > { %4235 = vmatpush1.bf16.msra.mxu0 (!%p5435_p5), %v5980_v33  ;;  %4399 = vmatpush1.bf16.msra.mxu1 (!%p5435_p5), %v5981_v34  ;;  %v6032_v33 = vld [vmem:[#allocation10 + $0x1ec] ss:$16 sps:$4 sm:$0xff] (!%p5435_p5)  }
 0x20d   : > { %4236 = vmatprep.subr.bf16.mxu0 (!%p5435_p5), %v5982_v35  ;;  %4400 = vmatprep.subr.bf16.mxu1 (!%p5435_p5), %v5984_v36 }
 0x210   : > { %4237 = vmatpush1.bf16.msra.mxu0 (!%p5435_p5), %v5986_v37  ;;  %4401 = vmatpush1.bf16.msra.mxu1 (!%p5435_p5), %v5987_v38  ;;  %v6034_v37 = vld [vmem:[#allocation10 + $0x1e0] ss:$16 sps:$4 sm:$0xff] (!%p5435_p5)   ;;  %v6035_v38 = vld [vmem:[#allocation10 + $0x1e8] ss:$16 sps:$4 sm:$0xff] (!%p5435_p5)  }
 0x246   : > { %v2181_v39 = vpop.f32.mrb[0].mxu0  ;;  %v2263_v41 = vpop.f32.mrb[0].mxu1 }
 0x247   : > { %v2183_v42 = vpop.f32.mrb[1].mxu0  ;;  %v2265_v44 = vpop.f32.mrb[1].mxu1 }
 0x248   : > { %v2442_v43 = vcombine.low %v2181_v39, %v2183_v42  ;;  %v2185_v45 = vpop.f32.mrb[2].mxu0  ;;  %v2443_v46 = vcombine.low %v2263_v41, %v2265_v44  ;;  %v2267_v47 = vpop.f32.mrb[2].mxu1  ;;  %v5988_v39 = vld [vmem:[#allocation10 + $0x104] ss:$16 sps:$4 sm:$0xff] (!%p5435_p5)   ;;  %v5990_v41 = vld [vmem:[#allocation10 + $0x10c] ss:$16 sps:$4 sm:$0xff] (!%p5435_p5)  }
 0x249   : > { %v2186_v48 = vpop.f32.mrb[3].mxu0  ;;  %v2268_v51 = vpop.f32.mrb[3].mxu1  ;;  %v5992_v42 = vld [vmem:[#allocation10 + $0x100] ss:$16 sps:$4 sm:$0xff] (!%p5435_p5)   ;;  %v5994_v44 = vld [vmem:[#allocation10 + $0x124] ss:$16 sps:$4 sm:$0xff] (!%p5435_p5)   ;;  %4238 = vmatprep.subr.bf16.mxu0 (!%p5435_p5), %v5988_v39  ;;  %4402 = vmatprep.subr.bf16.mxu1 (!%p5435_p5), %v5990_v41 }
 0x24a   : > { %v2450_v50 = vrot.slane %v2442_v43, %v7337_v40  ;;  %v2457_v58 = vrot.slane %v2443_v46, %v7337_v40  ;;  %v5993_v43 = vld [vmem:[#allocation10 + $0x108] ss:$16 sps:$4 sm:$0xff] (!%p5435_p5)   ;;  %v5996_v45 = vld [vmem:[#allocation10 + $0x12c] ss:$16 sps:$4 sm:$0xff] (!%p5435_p5)   ;;  %v5998_v46 = vld [vmem:[#allocation10 + $0x120] ss:$16 sps:$4 sm:$0xff] (!%p5435_p5)   ;;  %4239 = vmatpush1.bf16.msra.mxu0 (!%p5435_p5), %v5992_v42 }
 0x24b   : > { %4403 = vmatpush1.bf16.msra.mxu1 (!%p5435_p5), %v5993_v43  ;;  %v5999_v47 = vld [vmem:[#allocation10 + $0x128] ss:$16 sps:$4 sm:$0xff] (!%p5435_p5)   ;;  %v6000_v48 = vld [vmem:[#allocation10 + $0x144] ss:$16 sps:$4 sm:$0xff] (!%p5435_p5)   ;;  %4240 = vmatprep.subr.bf16.mxu0 (!%p5435_p5), %v5994_v44  ;;  %v6004_v51 = vld [vmem:[#allocation10 + $0x140] ss:$16 sps:$4 sm:$0xff] (!%p5435_p5)  }
 0x24c   : > { %v2458_v53 = vcombine.low %v2450_v50, %v2457_v58  ;;  %4404 = vmatprep.subr.bf16.mxu1 (!%p5435_p5), %v5996_v45  ;;  %v6002_v50 = vld [vmem:[#allocation10 + $0x14c] ss:$16 sps:$4 sm:$0xff] (!%p5435_p5)   ;;  %v6005_v58 = vld [vmem:[#allocation10 + $0x148] ss:$16 sps:$4 sm:$0xff] (!%p5435_p5)   ;;  %v6038_v41 = vld [vmem:[#allocation10 + $0x204] ss:$16 sps:$4 sm:$0xff] (!%p5435_p5)  }
 0x24d   : > { %v6041_v43 = vld [vmem:[#allocation10 + $0x20c] ss:$16 sps:$4 sm:$0xff] (!%p5435_p5)   ;;  %v6036_v45 = vld [vmem:[#allocation10 + $0x200] ss:$16 sps:$4 sm:$0xff] (!%p5435_p5)  }
 0x24e   : > { %v2478_v54 = vadd.f32 %v2458_v53, %v538_v52  ;;  %v7345_v52 = vsub.s32 (!%p5435_p5), 0, %v7059_v49  ;;  %4241 = vmatpush1.bf16.msra.mxu0 (!%p5435_p5), %v5998_v46  ;;  %v6006_v53 = vld [vmem:[#allocation10 + $0x164] ss:$16 sps:$4 sm:$0xff] (!%p5435_p5)  }
 0x24f   : > { %4405 = vmatpush1.bf16.msra.mxu1 (!%p5435_p5), %v5999_v47  ;;  %4242 = vmatprep.subr.bf16.mxu0 (!%p5435_p5), %v6000_v48  ;;  %v6039_v48 = vld [vmem:[#allocation10 + $0x208] ss:$16 sps:$4 sm:$0xff] (!%p5435_p5)  }
 0x250   : > { %2480 = vst [vmem:[#allocation2] sm:$0xff] %v2478_v54  ;;  %v7348_v54 = vsub.s32 (!%p5435_p5), 1, %v7059_v49  ;;  %4406 = vmatprep.subr.bf16.mxu1 (!%p5435_p5), %v6002_v50  ;;  %v6044_v50 = vld [vmem:[#allocation10 + $0x224] ss:$16 sps:$4 sm:$0xff] (!%p5435_p5)  }
 0x252   : > { %4243 = vmatpush1.bf16.msra.mxu0 (!%p5435_p5), %v6004_v51  ;;  %v6047_v51 = vld [vmem:[#allocation10 + $0x22c] ss:$16 sps:$4 sm:$0xff] (!%p5435_p5)  }
 0x253   : > { %4407 = vmatpush1.bf16.msra.mxu1 (!%p5435_p5), %v6005_v58  ;;  %4244 = vmatprep.subr.bf16.mxu0 (!%p5435_p5), %v6006_v53  ;;  %v6042_v53 = vld [vmem:[#allocation10 + $0x220] ss:$16 sps:$4 sm:$0xff] (!%p5435_p5)  }
 0x257   : > { %v2486_v19 = vld [vmem:[#allocation2] sm:$0xff] (!%p5435_p5) }
 0x2c6   : > { %v2345_v55 = vpop.f32.mrb[4].mxu0  ;;  %v2427_v56 = vpop.f32.mrb[4].mxu1 }
 0x2c7   : > { %v2347_v57 = vpop.f32.mrb[5].mxu0  ;;  %v2429_v23 = vpop.f32.mrb[5].mxu1 }
 0x2c8   : > { %v2459_v59 = vcombine.low %v2345_v55, %v2347_v57  ;;  %v2349_v60 = vpop.f32.mrb[6].mxu0  ;;  %v2460_v5 = vcombine.low %v2427_v56, %v2429_v23  ;;  %v2431_v62 = vpop.f32.mrb[6].mxu1  ;;  %v7351_v55 = vsub.s32 (!%p5435_p5), 2, %v7059_v49  ;;  %v6008_v56 = vld [vmem:[#allocation10 + $0x16c] ss:$16 sps:$4 sm:$0xff] (!%p5435_p5)   ;;  %v7354_v57 = vsub.s32 (!%p5435_p5), 3, %v7059_v49 }
 0x2c9   : > { %v2350_v63 = vpop.f32.mrb[7].mxu0  ;;  %v2432_v1 = vpop.f32.mrb[7].mxu1  ;;  %v7356_v23 = vld [vmem:[#allocation7] sm:$0xff] (!%p5435_p5)  ;;  %v7358_v60 = vld [vmem:[#allocation9] sm:$0xff] (!%p5435_p5)  ;;  %4408 = vmatprep.subr.bf16.mxu1 (!%p5435_p5), %v6008_v56 }
 0x2ca   : > { %v2467_v0 = vrot.slane %v2459_v59, %v7337_v40  ;;  %v2474_v2 = vrot.slane %v2460_v5, %v7337_v40  ;;  %2485 = sbr.rel (%p5435_p5) target bundleno = 1689 (0x699), region = 104  ;;  %v6010_v59 = vld [vmem:[#allocation10 + $0x160] ss:$16 sps:$4 sm:$0xff] (!%p5435_p5)   ;;  %v6011_v5 = vld [vmem:[#allocation10 + $0x168] ss:$16 sps:$4 sm:$0xff] (!%p5435_p5)   ;;  %v2493_v63 = vrot.slane (!%p5435_p5), %v7356_v23, %v7345_v52  ;;  %v2501_v1 = vrot.slane (!%p5435_p5), %v7356_v23, %v7351_v55 }
 0x2cb   : > { %v6012_v62 = vld [vmem:[#allocation10 + $0x184] ss:$16 sps:$4 sm:$0xff] (!%p5435_p5)   ;;  %v2573_v7 = vrot.slane (!%p5435_p5), %v7358_v60, %v7351_v55  ;;  %v2577_v8 = vrot.slane (!%p5435_p5), %v7358_v60, %v7354_v57  ;;  %4245 = vmatpush1.bf16.msra.mxu0 (!%p5435_p5), %v6010_v59  ;;  %4409 = vmatpush1.bf16.msra.mxu1 (!%p5435_p5), %v6011_v5  ;;  %v6045_v56 = vld [vmem:[#allocation10 + $0x228] ss:$16 sps:$4 sm:$0xff] (!%p5435_p5)   ;;  %v6053_v5 = vld [vmem:[#allocation10 + $0x24c] ss:$16 sps:$4 sm:$0xff] (!%p5435_p5)  }
 0x2cc   : > { %v2475_v32 = vcombine.low %v2467_v0, %v2474_v2  ;;  %v2497_v0 = vrot.slane (!%p5435_p5), %v7356_v23, %v7348_v54  ;;  %v6014_v2 = vld [vmem:[#allocation10 + $0x18c] ss:$16 sps:$4 sm:$0xff] (!%p5435_p5)   ;;  %4246 = vmatprep.subr.bf16.mxu0 (!%p5435_p5), %v6012_v62  ;;  %v6050_v59 = vld [vmem:[#allocation10 + $0x244] ss:$16 sps:$4 sm:$0xff] (!%p5435_p5)   ;;  %v6048_v62 = vld [vmem:[#allocation10 + $0x240] ss:$16 sps:$4 sm:$0xff] (!%p5435_p5)  }
 0x2cd   : > { %v2595_v15 = vcombine.low (!%p5435_p5), %v2573_v7, %v2577_v8  ;;  %4410 = vmatprep.subr.bf16.mxu1 (!%p5435_p5), %v6014_v2  ;;  %v6054_v2 = vld [vmem:[#allocation10 + $0x260] ss:$16 sps:$4 sm:$0xff] (!%p5435_p5)   ;;  %v6063_v7 = vld [vmem:[#allocation10 + $0x288] ss:$16 sps:$4 sm:$0xff] (!%p5435_p5)   ;;  %v6068_v8 = vld [vmem:[#allocation10 + $0x2a4] ss:$16 sps:$4 sm:$0xff] (!%p5435_p5)  }
 0x2ce   : > { %v2479_v4 = vadd.f32 %v2475_v32, %v539_v3  ;;  %v2505_v3 = vrot.slane (!%p5435_p5), %v7356_v23, %v7354_v57  ;;  %v2565_v32 = vrot.slane (!%p5435_p5), %v7358_v60, %v7345_v52  ;;  %v2522_v6 = vcombine.low (!%p5435_p5), %v2493_v63, %v2497_v0  ;;  %v6051_v63 = vld [vmem:[#allocation10 + $0x248] ss:$16 sps:$4 sm:$0xff] (!%p5435_p5)   ;;  %v6056_v0 = vld [vmem:[#allocation10 + $0x264] ss:$16 sps:$4 sm:$0xff] (!%p5435_p5)  }
 0x2cf   : > { %v2609_v20 = vrot.slane (!%p5435_p5), %v2595_v15, %v7337_v40  ;;  %4247 = vmatpush1.bf16.msra.mxu0 (!%p5435_p5), %v6016_v9  ;;  %4411 = vmatpush1.bf16.msra.mxu1 (!%p5435_p5), %v6017_v12  ;;  %v6071_v9 = vld [vmem:[#allocation10 + $0x2ac] ss:$16 sps:$4 sm:$0xff] (!%p5435_p5)   ;;  %v6074_v12 = vld [vmem:[#allocation10 + $0x2c4] ss:$16 sps:$4 sm:$0xff] (!%p5435_p5)   ;;  %v6075_v15 = vld [vmem:[#allocation10 + $0x2c8] ss:$16 sps:$4 sm:$0xff] (!%p5435_p5)  }
 0x2d0   : > { %2481 = vst [vmem:[#allocation2 + $0x8] sm:$0xff] %v2479_v4  ;;  %v2569_v4 = vrot.slane (!%p5435_p5), %v7358_v60, %v7348_v54  ;;  %v2523_v10 = vcombine.low (!%p5435_p5), %v2501_v1, %v2505_v3  ;;  %v2530_v14 = vrot.slane (!%p5435_p5), %v2522_v6, %v7337_v40  ;;  %4248 = vmatprep.subr.bf16.mxu0 (!%p5435_p5), %v6018_v13  ;;  %v6059_v1 = vld [vmem:[#allocation10 + $0x26c] ss:$16 sps:$4 sm:$0xff] (!%p5435_p5)   ;;  %v6057_v3 = vld [vmem:[#allocation10 + $0x268] ss:$16 sps:$4 sm:$0xff] (!%p5435_p5)  }
 0x2d1   : > { %4412 = vmatprep.subr.bf16.mxu1 %v6020_v16  ;;  %v6060_v6 = vld [vmem:[#allocation10 + $0x280] ss:$16 sps:$4 sm:$0xff]   ;;  %v6077_v13 = vld [vmem:[#allocation10 + $0x2cc] ss:$16 sps:$4 sm:$0xff]   ;;  %v6080_v16 = vld [vmem:[#allocation10 + $0x2e4] ss:$16 sps:$4 sm:$0xff]  }
 0x2d2   : > { %v2594_v11 = vcombine.low %v2565_v32, %v2569_v4  ;;  %v2537_v17 = vrot.slane %v2523_v10, %v7337_v40  ;;  %v6062_v32 = vld [vmem:[#allocation10 + $0x284] ss:$16 sps:$4 sm:$0xff]   ;;  %v6065_v4 = vld [vmem:[#allocation10 + $0x28c] ss:$16 sps:$4 sm:$0xff]   ;;  %v6066_v10 = vld [vmem:[#allocation10 + $0x2a0] ss:$16 sps:$4 sm:$0xff]  }
 0x2d3   : > { %4249 = vmatpush1.bf16.msra.mxu0 %v6022_v21  ;;  %4413 = vmatpush1.bf16.msra.mxu1 %v6023_v24  ;;  %v6089_v21 = vld [vmem:[#allocation10 + $0x30c] ss:$16 sps:$4 sm:$0xff]   ;;  %v6087_v24 = vld [vmem:[#allocation10 + $0x308] ss:$16 sps:$4 sm:$0xff]  }
 0x2d4   : > { %v2602_v18 = vrot.slane %v2594_v11, %v7337_v40  ;;  %v2538_v22 = vcombine.low %v2530_v14, %v2537_v17  ;;  %4250 = vmatprep.subr.bf16.mxu0 %v6024_v25  ;;  %4414 = vmatprep.subr.bf16.mxu1 %v6026_v27  ;;  %v6069_v11 = vld [vmem:[#allocation10 + $0x2a8] ss:$16 sps:$4 sm:$0xff]   ;;  %v6072_v14 = vld [vmem:[#allocation10 + $0x2c0] ss:$16 sps:$4 sm:$0xff]   ;;  %v6083_v17 = vld [vmem:[#allocation10 + $0x2ec] ss:$16 sps:$4 sm:$0xff]  }
 0x2d5   : > { %v6092_v25 = vld [vmem:[#allocation10 + $0x324] ss:$16 sps:$4 sm:$0xff]   ;;  %v6090_v27 = vld [vmem:[#allocation10 + $0x320] ss:$16 sps:$4 sm:$0xff]  }
 0x2d6   : > { %v2610_v26 = vcombine.low %v2602_v18, %v2609_v20  ;;  %v2558_v28 = vmul.f32 %v2538_v22, %v2486_v19  ;;  %v6078_v18 = vld [vmem:[#allocation10 + $0x2e0] ss:$16 sps:$4 sm:$0xff]   ;;  %v6081_v19 = vld [vmem:[#allocation10 + $0x2e8] ss:$16 sps:$4 sm:$0xff]   ;;  %v6086_v20 = vld [vmem:[#allocation10 + $0x304] ss:$16 sps:$4 sm:$0xff]  }
 0x2d7   : > { %4251 = vmatpush1.bf16.msra.mxu0 %v6028_v29  ;;  %4415 = vmatpush1.bf16.msra.mxu1 %v6029_v31  ;;  %v6084_v22 = vld [vmem:[#allocation10 + $0x300] ss:$16 sps:$4 sm:$0xff]   ;;  %v6098_v29 = vld [vmem:[#allocation10 + $0x344] ss:$16 sps:$4 sm:$0xff]  }
 0x2d8   : > { %v2630_v30 = vadd.f32 %v2610_v26, %v2558_v28  ;;  %4252 = vmatprep.subr.bf16.mxu0 %v6030_v61  ;;  %4416 = vmatprep.subr.bf16.mxu1 %v6032_v33  ;;  %v6095_v26 = vld [vmem:[#allocation10 + $0x32c] ss:$16 sps:$4 sm:$0xff]   ;;  %v6093_v28 = vld [vmem:[#allocation10 + $0x328] ss:$16 sps:$4 sm:$0xff]   ;;  %v6096_v31 = vld [vmem:[#allocation10 + $0x340] ss:$16 sps:$4 sm:$0xff]  }
 0x2d9   : > { %v6099_v61 = vld [vmem:[#allocation10 + $0x348] ss:$16 sps:$4 sm:$0xff]   ;;  %v6104_v33 = vld [vmem:[#allocation10 + $0x364] ss:$16 sps:$4 sm:$0xff]  }
 0x2da   : > { %v2632_v34 = vmax.f32 %v2630_v30, 0.0  ;;  %v6101_v30 = vld [vmem:[#allocation10 + $0x34c] ss:$16 sps:$4 sm:$0xff]  }
 0x2db   : > { %4253 = vmatpush1.bf16.msra.mxu0 %v6034_v37  ;;  %4417 = vmatpush1.bf16.msra.mxu1 %v6035_v38  ;;  %v6110_v37 = vld [vmem:[#allocation10 + $0x384] ss:$16 sps:$4 sm:$0xff]   ;;  %v6113_v38 = vld [vmem:[#allocation10 + $0x38c] ss:$16 sps:$4 sm:$0xff]  }
 0x2dc   : > { %v2643_v35 = vrot.slane %v2632_v34, %v7337_v40  ;;  %v2636_v36 = vcombine.high %v2632_v34, %v2632_v34  ;;  %4263 = vmatprep.subr.bf16.mxu0 %v6038_v41  ;;  %4427 = vmatprep.subr.bf16.mxu1 %v6041_v43  ;;  %v6107_v34 = vld [vmem:[#allocation10 + $0x36c] ss:$16 sps:$4 sm:$0xff]   ;;  %v2512_v41 = vsub.s32 5, %v7059_v49  ;;  %v2516_v43 = vsub.s32 6, %v7059_v49 }
 0x2de   : > { %v2651_v39 = vcombine.high %v2643_v35, %v2643_v35  ;;  %v7382_v42 = vrot.slane %v2636_v36, %v7337_v40  ;;  %v2678_v46 = vpack.c.bf16 %v2643_v35, %v2643_v35  ;;  %v6102_v35 = vld [vmem:[#allocation10 + $0x360] ss:$16 sps:$4 sm:$0xff]   ;;  %v6105_v36 = vld [vmem:[#allocation10 + $0x368] ss:$16 sps:$4 sm:$0xff]  }
 0x2e0   : > { %v2679_v44 = vpack.c.bf16 %v2651_v39, %v2651_v39  ;;  %v2652_v47 = vcombine.high %v7382_v42, %v7382_v42  ;;  %v2508_v39 = vsub.s32 4, %v7059_v49 }
 0x2e2   : > { %4254 = vmatprep.mubr.bf16.mxu0 %v2679_v44  ;;  %4418 = vmatprep.mubr.bf16.mxu1 %v2679_v44  ;;  %v2681_v58 = vpack.c.bf16 %v2652_v47, %v2652_v47  ;;  %v2520_v44 = vsub.s32 7, %v7059_v49  ;;  %v6116_v47 = vld [vmem:[#allocation10 + $0x3a4] ss:$16 sps:$4 sm:$0xff]   ;;  %v6117_v49 = vld [vmem:[#allocation10 + $0x3a8] ss:$16 sps:$4 sm:$0xff]  }
 0x2e3   : > { %4255 = vmatmul.mubr.bf16.vlgmr.msra.gmra.mrb[0].mxu0 %v2678_v46  ;;  %4419 = vmatmul.mubr.bf16.vlgmr.msra.gmra.mrb[0].mxu1 %v2678_v46  ;;  %v6111_v46 = vld [vmem:[#allocation10 + $0x388] ss:$16 sps:$4 sm:$0xff]  }
 0x2e4   : > { %4264 = vmatpush1.bf16.msra.mxu0 %v6036_v45  ;;  %4428 = vmatpush1.bf16.msra.mxu1 %v6039_v48  ;;  %v6108_v45 = vld [vmem:[#allocation10 + $0x380] ss:$16 sps:$4 sm:$0xff]   ;;  %v6119_v48 = vld [vmem:[#allocation10 + $0x3ac] ss:$16 sps:$4 sm:$0xff]  }
 0x2e5   : > { %4265 = vmatprep.subr.bf16.mxu0 %v6044_v50  ;;  %4429 = vmatprep.subr.bf16.mxu1 %v6047_v51  ;;  %v2509_v50 = vrot.slane %v7356_v23, %v2508_v39  ;;  %v2513_v51 = vrot.slane %v7356_v23, %v2512_v41 }
 0x2e6   : > { %4295 = vmatprep.mubr.bf16.mxu0 %v2681_v58  ;;  %4459 = vmatprep.mubr.bf16.mxu1 %v2681_v58  ;;  %v2517_v58 = vrot.slane %v7356_v23, %v2516_v43 }
 0x2e8   : > { %4266 = vmatpush1.bf16.msra.mxu0 %v6042_v53  ;;  %4430 = vmatpush1.bf16.msra.mxu1 %v6045_v56  ;;  %v2521_v53 = vrot.slane %v7356_v23, %v2520_v44  ;;  %v6114_v56 = vld [vmem:[#allocation10 + $0x3a0] ss:$16 sps:$4 sm:$0xff]   ;;  %v6123_v23 = vld [vmem:[#allocation10 + $0x3c8] ss:$16 sps:$4 sm:$0xff]  }
 0x2e9   : > { %4267 = vmatprep.subr.bf16.mxu0 %v6050_v59  ;;  %4431 = vmatprep.subr.bf16.mxu1 %v6053_v5  ;;  %v2581_v59 = vrot.slane %v7358_v60, %v2508_v39  ;;  %v6122_v5 = vld [vmem:[#allocation10 + $0x3c4] ss:$16 sps:$4 sm:$0xff]  }
 0x2ea   : > { %v6158_v39 = vld [vmem:[#allocation10 + $0x484] ss:$16 sps:$4 sm:$0xff]  }
 0x2ec   : > { %4268 = vmatpush1.bf16.msra.mxu0 %v6048_v62  ;;  %4432 = vmatpush1.bf16.msra.mxu1 %v6051_v63  ;;  %v2585_v62 = vrot.slane %v7358_v60, %v2512_v41  ;;  %v2589_v63 = vrot.slane %v7358_v60, %v2516_v43  ;;  %v6161_v43 = vld [vmem:[#allocation10 + $0x48c] ss:$16 sps:$4 sm:$0xff]  }
 0x2ed   : > { %4269 = vmatprep.subr.bf16.mxu0 %v6056_v0  ;;  %4433 = vmatprep.subr.bf16.mxu1 %v6059_v1  ;;  %v2593_v0 = vrot.slane %v7358_v60, %v2520_v44  ;;  %v6125_v1 = vld [vmem:[#allocation10 + $0x3cc] ss:$16 sps:$4 sm:$0xff]   ;;  %v6126_v60 = vld [vmem:[#allocation10 + $0x3e0] ss:$16 sps:$4 sm:$0xff]  }
 0x2ee   : > { %v6156_v44 = vld [vmem:[#allocation10 + $0x480] ss:$16 sps:$4 sm:$0xff]  }
 0x2f0   : > { %4270 = vmatpush1.bf16.msra.mxu0 %v6054_v2  ;;  %4434 = vmatpush1.bf16.msra.mxu1 %v6057_v3  ;;  %v2539_v2 = vcombine.low %v2509_v50, %v2513_v51  ;;  %v2540_v3 = vcombine.low %v2517_v58, %v2521_v53  ;;  %v6165_v50 = vld [vmem:[#allocation10 + $0x4a8] ss:$16 sps:$4 sm:$0xff]   ;;  %v6170_v51 = vld [vmem:[#allocation10 + $0x4c4] ss:$16 sps:$4 sm:$0xff]   ;;  %v6173_v58 = vld [vmem:[#allocation10 + $0x4cc] ss:$16 sps:$4 sm:$0xff]  }
 0x2f1   : > { %4271 = vmatprep.subr.bf16.mxu0 %v6062_v32  ;;  %4435 = vmatprep.subr.bf16.mxu1 %v6065_v4  ;;  %v6120_v32 = vld [vmem:[#allocation10 + $0x3c0] ss:$16 sps:$4 sm:$0xff]   ;;  %v6128_v4 = vld [vmem:[#allocation10 + $0x3e4] ss:$16 sps:$4 sm:$0xff]  }
 0x2f2   : > { %v6168_v53 = vld [vmem:[#allocation10 + $0x4c0] ss:$16 sps:$4 sm:$0xff]  }
 0x2f4   : > { %4272 = vmatpush1.bf16.msra.mxu0 %v6060_v6  ;;  %4436 = vmatpush1.bf16.msra.mxu1 %v6063_v7  ;;  %v2611_v6 = vcombine.low %v2581_v59, %v2585_v62  ;;  %v2612_v7 = vcombine.low %v2589_v63, %v2593_v0  ;;  %v6176_v59 = vld [vmem:[#allocation10 + $0x4e4] ss:$16 sps:$4 sm:$0xff]   ;;  %v6177_v62 = vld [vmem:[#allocation10 + $0x4e8] ss:$16 sps:$4 sm:$0xff]   ;;  %v6185_v0 = vld [vmem:[#allocation10 + $0x50c] ss:$16 sps:$4 sm:$0xff]  }
 0x2f5   : > { %4273 = vmatprep.subr.bf16.mxu0 %v6068_v8  ;;  %4437 = vmatprep.subr.bf16.mxu1 %v6071_v9  ;;  %v6131_v8 = vld [vmem:[#allocation10 + $0x3ec] ss:$16 sps:$4 sm:$0xff]   ;;  %v2547_v9 = vrot.slane %v2539_v2, %v7337_v40  ;;  %v6182_v63 = vld [vmem:[#allocation10 + $0x504] ss:$16 sps:$4 sm:$0xff]   ;;  %v6183_v2 = vld [vmem:[#allocation10 + $0x508] ss:$16 sps:$4 sm:$0xff]  }
 0x2f8   : > { %4274 = vmatpush1.bf16.msra.mxu0 %v6066_v10  ;;  %4438 = vmatpush1.bf16.msra.mxu1 %v6069_v11  ;;  %v2554_v10 = vrot.slane %v2540_v3, %v7337_v40  ;;  %v6129_v11 = vld [vmem:[#allocation10 + $0x3e8] ss:$16 sps:$4 sm:$0xff]   ;;  %v6188_v3 = vld [vmem:[#allocation10 + $0x524] ss:$16 sps:$4 sm:$0xff]  }
 0x2f9   : > { %4275 = vmatprep.subr.bf16.mxu0 %v6074_v12  ;;  %4439 = vmatprep.subr.bf16.mxu1 %v6077_v13  ;;  %v6134_v12 = vld [vmem:[#allocation10 + $0x404] ss:$16 sps:$4 sm:$0xff]   ;;  %v2619_v13 = vrot.slane %v2611_v6, %v7337_v40 }
 0x2fa   : > { %v6194_v6 = vld [vmem:[#allocation10 + $0x544] ss:$16 sps:$4 sm:$0xff]  }
 0x2fc   : > { %4276 = vmatpush1.bf16.msra.mxu0 %v6072_v14  ;;  %4440 = vmatpush1.bf16.msra.mxu1 %v6075_v15  ;;  %v2626_v14 = vrot.slane %v2612_v7, %v7337_v40  ;;  %v6137_v15 = vld [vmem:[#allocation10 + $0x40c] ss:$16 sps:$4 sm:$0xff]  }
 0x2fd   : > { %4277 = vmatprep.subr.bf16.mxu0 %v6080_v16  ;;  %4441 = vmatprep.subr.bf16.mxu1 %v6083_v17  ;;  %v2555_v16 = vcombine.low %v2547_v9, %v2554_v10  ;;  %v6132_v17 = vld [vmem:[#allocation10 + $0x400] ss:$16 sps:$4 sm:$0xff]   ;;  %v6197_v7 = vld [vmem:[#allocation10 + $0x54c] ss:$16 sps:$4 sm:$0xff]   ;;  %v6195_v9 = vld [vmem:[#allocation10 + $0x548] ss:$16 sps:$4 sm:$0xff]  }
 0x2fe   : > { %v6200_v10 = vld [vmem:[#allocation10 + $0x564] ss:$16 sps:$4 sm:$0xff]  }
 0x300   : > { %4278 = vmatpush1.bf16.msra.mxu0 %v6078_v18  ;;  %4442 = vmatpush1.bf16.msra.mxu1 %v6081_v19  ;;  %v6135_v18 = vld [vmem:[#allocation10 + $0x408] ss:$16 sps:$4 sm:$0xff]   ;;  %v2680_v19 = vpack.c.bf16 %v7382_v42, %v7382_v42  ;;  %v6149_v42 = vld [vmem:[#allocation10 + $0x44c] ss:$16 sps:$4 sm:$0xff]  }
 0x301   : > { %4279 = vmatprep.subr.bf16.mxu0 %v6086_v20  ;;  %4443 = vmatprep.subr.bf16.mxu1 %v6089_v21  ;;  %v6140_v20 = vld [vmem:[#allocation10 + $0x424] ss:$16 sps:$4 sm:$0xff]   ;;  %v6143_v21 = vld [vmem:[#allocation10 + $0x42c] ss:$16 sps:$4 sm:$0xff]  }
 0x304   : > { %4280 = vmatpush1.bf16.msra.mxu0 %v6084_v22  ;;  %4444 = vmatpush1.bf16.msra.mxu1 %v6087_v24  ;;  %v2627_v22 = vcombine.low %v2619_v13, %v2626_v14  ;;  %v2487_v24 = vld [vmem:[#allocation2 + $0x8] sm:$0xff] }
 0x305   : > { %4281 = vmatprep.subr.bf16.mxu0 %v6092_v25  ;;  %4445 = vmatprep.subr.bf16.mxu1 %v6095_v26  ;;  %v2559_v25 = vmul.f32 %v2555_v16, %v2487_v24  ;;  %v6138_v26 = vld [vmem:[#allocation10 + $0x420] ss:$16 sps:$4 sm:$0xff]   ;;  %v6206_v13 = vld [vmem:[#allocation10 + $0x584] ss:$16 sps:$4 sm:$0xff]   ;;  %v6209_v14 = vld [vmem:[#allocation10 + $0x58c] ss:$16 sps:$4 sm:$0xff]  }
 0x306   : > { %v6207_v16 = vld [vmem:[#allocation10 + $0x588] ss:$16 sps:$4 sm:$0xff]   ;;  %v6216_v24 = vld [vmem:[#allocation10 + $0x5c0] ss:$16 sps:$4 sm:$0xff]  }
 0x308   : > { %4282 = vmatpush1.bf16.msra.mxu0 %v6090_v27  ;;  %4446 = vmatpush1.bf16.msra.mxu1 %v6093_v28  ;;  %v6141_v27 = vld [vmem:[#allocation10 + $0x428] ss:$16 sps:$4 sm:$0xff]   ;;  %v6146_v28 = vld [vmem:[#allocation10 + $0x444] ss:$16 sps:$4 sm:$0xff]  }
 0x309   : > { %4283 = vmatprep.subr.bf16.mxu0 %v6098_v29  ;;  %4447 = vmatprep.subr.bf16.mxu1 %v6101_v30  ;;  %v2631_v29 = vadd.f32 %v2627_v22, %v2559_v25  ;;  %v6221_v22 = vld [vmem:[#allocation10 + $0x5cc] ss:$16 sps:$4 sm:$0xff]  }
 0x30b   : > { %v7404_v30 = vmax.f32 %v2631_v29, 0.0  ;;  %v6222_v29 = vld [vmem:[#allocation10 + $0x5e0] ss:$16 sps:$4 sm:$0xff]  }
 0x30c   : > { %4284 = vmatpush1.bf16.msra.mxu0 %v6096_v31  ;;  %4448 = vmatpush1.bf16.msra.mxu1 %v6099_v61  ;;  %v6144_v31 = vld [vmem:[#allocation10 + $0x440] ss:$16 sps:$4 sm:$0xff]   ;;  %v6147_v61 = vld [vmem:[#allocation10 + $0x448] ss:$16 sps:$4 sm:$0xff]  }
 0x30d   : > { %4285 = vmatprep.subr.bf16.mxu0 %v6104_v33  ;;  %4449 = vmatprep.subr.bf16.mxu1 %v6107_v34  ;;  %v6152_v33 = vld [vmem:[#allocation10 + $0x464] ss:$16 sps:$4 sm:$0xff]   ;;  %v7408_v34 = vrot.slane %v7404_v30, %v7337_v40  ;;  %v2653_v25 = vcombine.high %v7404_v30, %v7404_v30 }
 0x310   : > { %4286 = vmatpush1.bf16.msra.mxu0 %v6102_v35  ;;  %4450 = vmatpush1.bf16.msra.mxu1 %v6105_v36  ;;  %v6155_v35 = vld [vmem:[#allocation10 + $0x46c] ss:$16 sps:$4 sm:$0xff]   ;;  %v2668_v36 = vcombine.high %v7408_v34, %v7408_v34 }
 0x311   : > { %4287 = vmatprep.subr.bf16.mxu0 %v6110_v37  ;;  %4451 = vmatprep.subr.bf16.mxu1 %v6113_v38  ;;  %v6150_v37 = vld [vmem:[#allocation10 + $0x460] ss:$16 sps:$4 sm:$0xff]   ;;  %v6153_v38 = vld [vmem:[#allocation10 + $0x468] ss:$16 sps:$4 sm:$0xff]  }
 0x312   : > { %v2683_v41 = vpack.c.bf16 %v2668_v36, %v2668_v36  ;;  %v6231_v36 = vld [vmem:[#allocation10 + $0x608] ss:$16 sps:$4 sm:$0xff]  }
 0x314   : > { %4288 = vmatpush1.bf16.msra.mxu0 %v6108_v45  ;;  %4452 = vmatpush1.bf16.msra.mxu1 %v6111_v46  ;;  %v6159_v45 = vld [vmem:[#allocation10 + $0x488] ss:$16 sps:$4 sm:$0xff]   ;;  %v6164_v46 = vld [vmem:[#allocation10 + $0x4a4] ss:$16 sps:$4 sm:$0xff]  }
 0x315   : > { %4289 = vmatprep.subr.bf16.mxu0 %v6116_v47  ;;  %4453 = vmatprep.subr.bf16.mxu1 %v6119_v48  ;;  %v6167_v47 = vld [vmem:[#allocation10 + $0x4ac] ss:$16 sps:$4 sm:$0xff]   ;;  %v6162_v48 = vld [vmem:[#allocation10 + $0x4a0] ss:$16 sps:$4 sm:$0xff]  }
 0x318   : > { %4290 = vmatpush1.bf16.msra.mxu0 %v6114_v56  ;;  %4454 = vmatpush1.bf16.msra.mxu1 %v6117_v49  ;;  %v6171_v56 = vld [vmem:[#allocation10 + $0x4c8] ss:$16 sps:$4 sm:$0xff]   ;;  %v6179_v49 = vld [vmem:[#allocation10 + $0x4ec] ss:$16 sps:$4 sm:$0xff]  }
 0x319   : > { %4291 = vmatprep.subr.bf16.mxu0 %v6122_v5  ;;  %4455 = vmatprep.subr.bf16.mxu1 %v6125_v1  ;;  %v6174_v5 = vld [vmem:[#allocation10 + $0x4e0] ss:$16 sps:$4 sm:$0xff]  }
 0x31a   : > { %v6180_v1 = vld [vmem:[#allocation10 + $0x500] ss:$16 sps:$4 sm:$0xff]  }
 0x31c   : > { %4292 = vmatpush1.bf16.msra.mxu0 %v6120_v32  ;;  %4456 = vmatpush1.bf16.msra.mxu1 %v6123_v23  ;;  %v6191_v32 = vld [vmem:[#allocation10 + $0x52c] ss:$16 sps:$4 sm:$0xff]   ;;  %v6186_v23 = vld [vmem:[#allocation10 + $0x520] ss:$16 sps:$4 sm:$0xff]  }
 0x31d   : > { %4293 = vmatprep.subr.bf16.mxu0 %v6128_v4  ;;  %4457 = vmatprep.subr.bf16.mxu1 %v6131_v8  ;;  %v6189_v4 = vld [vmem:[#allocation10 + $0x528] ss:$16 sps:$4 sm:$0xff]   ;;  %v6192_v8 = vld [vmem:[#allocation10 + $0x540] ss:$16 sps:$4 sm:$0xff]  }
 0x320   : > { %4294 = vmatpush1.bf16.msra.mxu0 %v6126_v60  ;;  %4458 = vmatpush1.bf16.msra.mxu1 %v6129_v11  ;;  %v6203_v60 = vld [vmem:[#allocation10 + $0x56c] ss:$16 sps:$4 sm:$0xff]   ;;  %v6198_v11 = vld [vmem:[#allocation10 + $0x560] ss:$16 sps:$4 sm:$0xff]  }
 0x321   : > { %4304 = vmatprep.subr.bf16.mxu0 %v6134_v12  ;;  %4468 = vmatprep.subr.bf16.mxu1 %v6137_v15  ;;  %v6201_v12 = vld [vmem:[#allocation10 + $0x568] ss:$16 sps:$4 sm:$0xff]   ;;  %v6204_v15 = vld [vmem:[#allocation10 + $0x580] ss:$16 sps:$4 sm:$0xff]  }
 0x323   : > { %4296 = vmatmul.mubr.bf16.vlgmr.msra.gmra.mrb[0].mxu0 %v2680_v19  ;;  %4460 = vmatmul.mubr.bf16.vlgmr.msra.gmra.mrb[0].mxu1 %v2680_v19  ;;  %v6210_v19 = vld [vmem:[#allocation10 + $0x5a0] ss:$16 sps:$4 sm:$0xff]  }
 0x324   : > { %4305 = vmatpush1.bf16.msra.mxu0 %v6132_v17  ;;  %4469 = vmatpush1.bf16.msra.mxu1 %v6135_v18  ;;  %v6212_v17 = vld [vmem:[#allocation10 + $0x5a4] ss:$16 sps:$4 sm:$0xff]   ;;  %v6215_v18 = vld [vmem:[#allocation10 + $0x5ac] ss:$16 sps:$4 sm:$0xff]  }
 0x325   : > { %4306 = vmatprep.subr.bf16.mxu0 %v6140_v20  ;;  %4470 = vmatprep.subr.bf16.mxu1 %v6143_v21  ;;  %v6213_v20 = vld [vmem:[#allocation10 + $0x5a8] ss:$16 sps:$4 sm:$0xff]   ;;  %v6218_v21 = vld [vmem:[#allocation10 + $0x5c4] ss:$16 sps:$4 sm:$0xff]  }
 0x326   : > { %4336 = vmatprep.mubr.bf16.mxu0 %v2683_v41  ;;  %4500 = vmatprep.mubr.bf16.mxu1 %v2683_v41  ;;  %v6237_v41 = vld [vmem:[#allocation10 + $0x628] ss:$16 sps:$4 sm:$0xff]  }
 0x328   : > { %4307 = vmatpush1.bf16.msra.mxu0 %v6138_v26  ;;  %4471 = vmatpush1.bf16.msra.mxu1 %v6141_v27  ;;  %v6219_v26 = vld [vmem:[#allocation10 + $0x5c8] ss:$16 sps:$4 sm:$0xff]   ;;  %v6224_v27 = vld [vmem:[#allocation10 + $0x5e4] ss:$16 sps:$4 sm:$0xff]  }
 0x329   : > { %4308 = vmatprep.subr.bf16.mxu0 %v6146_v28  ;;  %4472 = vmatprep.subr.bf16.mxu1 %v6149_v42  ;;  %v6227_v28 = vld [vmem:[#allocation10 + $0x5ec] ss:$16 sps:$4 sm:$0xff]   ;;  %v7415_v42 = vrot.slane %v2653_v25, %v7337_v40  ;;  %v6300_v25 = vld [vmem:[#allocation10 + $0x780] ss:$16 sps:$4 sm:$0xff]  }
 0x32a   : > { %v6239_v40 = vld [vmem:[#allocation10 + $0x62c] ss:$16 sps:$4 sm:$0xff]  }
 0x32b   : > { %v2669_v30 = vcombine.high %v7415_v42, %v7415_v42 }
 0x32c   : > { %4309 = vmatpush1.bf16.msra.mxu0 %v6144_v31  ;;  %4473 = vmatpush1.bf16.msra.mxu1 %v6147_v61  ;;  %v6225_v31 = vld [vmem:[#allocation10 + $0x5e8] ss:$16 sps:$4 sm:$0xff]   ;;  %v6230_v61 = vld [vmem:[#allocation10 + $0x604] ss:$16 sps:$4 sm:$0xff]  }
 0x32d   : > { %4310 = vmatprep.subr.bf16.mxu0 %v6152_v33  ;;  %4474 = vmatprep.subr.bf16.mxu1 %v6155_v35  ;;  %v6233_v33 = vld [vmem:[#allocation10 + $0x60c] ss:$16 sps:$4 sm:$0xff]   ;;  %v6228_v35 = vld [vmem:[#allocation10 + $0x600] ss:$16 sps:$4 sm:$0xff]  }
 0x330   : > { %4311 = vmatpush1.bf16.msra.mxu0 %v6150_v37  ;;  %4475 = vmatpush1.bf16.msra.mxu1 %v6153_v38  ;;  %v2682_v37 = vpack.c.bf16 %v7408_v34, %v7408_v34  ;;  %v6236_v38 = vld [vmem:[#allocation10 + $0x624] ss:$16 sps:$4 sm:$0xff]   ;;  %v6243_v34 = vld [vmem:[#allocation10 + $0x648] ss:$16 sps:$4 sm:$0xff]  }
 0x331   : > { %4312 = vmatprep.subr.bf16.mxu0 %v6158_v39  ;;  %4476 = vmatprep.subr.bf16.mxu1 %v6161_v43  ;;  %v6234_v39 = vld [vmem:[#allocation10 + $0x620] ss:$16 sps:$4 sm:$0xff]   ;;  %v2685_v43 = vpack.c.bf16 %v2669_v30, %v2669_v30  ;;  %v6315_v30 = vld [vmem:[#allocation10 + $0x7c8] ss:$16 sps:$4 sm:$0xff]  }
 0x334   : > { %4313 = vmatpush1.bf16.msra.mxu0 %v6156_v44  ;;  %4477 = vmatpush1.bf16.msra.mxu1 %v6159_v45  ;;  %v6242_v44 = vld [vmem:[#allocation10 + $0x644] ss:$16 sps:$4 sm:$0xff]   ;;  %v6245_v45 = vld [vmem:[#allocation10 + $0x64c] ss:$16 sps:$4 sm:$0xff]  }
 0x335   : > { %4314 = vmatprep.subr.bf16.mxu0 %v6164_v46  ;;  %4478 = vmatprep.subr.bf16.mxu1 %v6167_v47  ;;  %v6240_v46 = vld [vmem:[#allocation10 + $0x640] ss:$16 sps:$4 sm:$0xff]   ;;  %v6248_v47 = vld [vmem:[#allocation10 + $0x664] ss:$16 sps:$4 sm:$0xff]  }
 0x338   : > { %4315 = vmatpush1.bf16.msra.mxu0 %v6162_v48  ;;  %4479 = vmatpush1.bf16.msra.mxu1 %v6165_v50  ;;  %v6251_v48 = vld [vmem:[#allocation10 + $0x66c] ss:$16 sps:$4 sm:$0xff]   ;;  %v6246_v50 = vld [vmem:[#allocation10 + $0x660] ss:$16 sps:$4 sm:$0xff]  }
 0x339   : > { %4316 = vmatprep.subr.bf16.mxu0 %v6170_v51  ;;  %4480 = vmatprep.subr.bf16.mxu1 %v6173_v58  ;;  %v6249_v51 = vld [vmem:[#allocation10 + $0x668] ss:$16 sps:$4 sm:$0xff]   ;;  %v6254_v58 = vld [vmem:[#allocation10 + $0x684] ss:$16 sps:$4 sm:$0xff]  }
 0x33c   : > { %4317 = vmatpush1.bf16.msra.mxu0 %v6168_v53  ;;  %4481 = vmatpush1.bf16.msra.mxu1 %v6171_v56  ;;  %v6257_v53 = vld [vmem:[#allocation10 + $0x68c] ss:$16 sps:$4 sm:$0xff]   ;;  %v6252_v56 = vld [vmem:[#allocation10 + $0x680] ss:$16 sps:$4 sm:$0xff]  }
 0x33d   : > { %4318 = vmatprep.subr.bf16.mxu0 %v6176_v59  ;;  %4482 = vmatprep.subr.bf16.mxu1 %v6179_v49  ;;  %v6255_v59 = vld [vmem:[#allocation10 + $0x688] ss:$16 sps:$4 sm:$0xff]   ;;  %v6260_v49 = vld [vmem:[#allocation10 + $0x6a4] ss:$16 sps:$4 sm:$0xff]  }
 0x340   : > { %4319 = vmatpush1.bf16.msra.mxu0 %v6174_v5  ;;  %4483 = vmatpush1.bf16.msra.mxu1 %v6177_v62  ;;  %v6263_v5 = vld [vmem:[#allocation10 + $0x6ac] ss:$16 sps:$4 sm:$0xff]   ;;  %v6258_v62 = vld [vmem:[#allocation10 + $0x6a0] ss:$16 sps:$4 sm:$0xff]  }
 0x341   : > { %4320 = vmatprep.subr.bf16.mxu0 %v6182_v63  ;;  %4484 = vmatprep.subr.bf16.mxu1 %v6185_v0  ;;  %v6261_v63 = vld [vmem:[#allocation10 + $0x6a8] ss:$16 sps:$4 sm:$0xff]   ;;  %v6266_v0 = vld [vmem:[#allocation10 + $0x6c4] ss:$16 sps:$4 sm:$0xff]  }
 0x344   : > { %4321 = vmatpush1.bf16.msra.mxu0 %v6180_v1  ;;  %4485 = vmatpush1.bf16.msra.mxu1 %v6183_v2  ;;  %v6269_v1 = vld [vmem:[#allocation10 + $0x6cc] ss:$16 sps:$4 sm:$0xff]   ;;  %v6264_v2 = vld [vmem:[#allocation10 + $0x6c0] ss:$16 sps:$4 sm:$0xff]  }
 0x345   : > { %4322 = vmatprep.subr.bf16.mxu0 %v6188_v3  ;;  %4486 = vmatprep.subr.bf16.mxu1 %v6191_v32  ;;  %v6267_v3 = vld [vmem:[#allocation10 + $0x6c8] ss:$16 sps:$4 sm:$0xff]   ;;  %v6272_v32 = vld [vmem:[#allocation10 + $0x6e4] ss:$16 sps:$4 sm:$0xff]  }
 0x348   : > { %4323 = vmatpush1.bf16.msra.mxu0 %v6186_v23  ;;  %4487 = vmatpush1.bf16.msra.mxu1 %v6189_v4  ;;  %v6275_v23 = vld [vmem:[#allocation10 + $0x6ec] ss:$16 sps:$4 sm:$0xff]   ;;  %v6270_v4 = vld [vmem:[#allocation10 + $0x6e0] ss:$16 sps:$4 sm:$0xff]  }
 0x349   : > { %4324 = vmatprep.subr.bf16.mxu0 %v6194_v6  ;;  %4488 = vmatprep.subr.bf16.mxu1 %v6197_v7  ;;  %v6273_v6 = vld [vmem:[#allocation10 + $0x6e8] ss:$16 sps:$4 sm:$0xff]   ;;  %v6278_v7 = vld [vmem:[#allocation10 + $0x704] ss:$16 sps:$4 sm:$0xff]  }
 0x34c   : > { %4325 = vmatpush1.bf16.msra.mxu0 %v6192_v8  ;;  %4489 = vmatpush1.bf16.msra.mxu1 %v6195_v9  ;;  %v6281_v8 = vld [vmem:[#allocation10 + $0x70c] ss:$16 sps:$4 sm:$0xff]   ;;  %v6276_v9 = vld [vmem:[#allocation10 + $0x700] ss:$16 sps:$4 sm:$0xff]  }
 0x34d   : > { %4326 = vmatprep.subr.bf16.mxu0 %v6200_v10  ;;  %4490 = vmatprep.subr.bf16.mxu1 %v6203_v60  ;;  %v6279_v10 = vld [vmem:[#allocation10 + $0x708] ss:$16 sps:$4 sm:$0xff]   ;;  %v6284_v60 = vld [vmem:[#allocation10 + $0x724] ss:$16 sps:$4 sm:$0xff]  }
 0x350   : > { %4327 = vmatpush1.bf16.msra.mxu0 %v6198_v11  ;;  %4491 = vmatpush1.bf16.msra.mxu1 %v6201_v12  ;;  %v6287_v11 = vld [vmem:[#allocation10 + $0x72c] ss:$16 sps:$4 sm:$0xff]   ;;  %v6282_v12 = vld [vmem:[#allocation10 + $0x720] ss:$16 sps:$4 sm:$0xff]  }
 0x351   : > { %4328 = vmatprep.subr.bf16.mxu0 %v6206_v13  ;;  %4492 = vmatprep.subr.bf16.mxu1 %v6209_v14  ;;  %v6285_v13 = vld [vmem:[#allocation10 + $0x728] ss:$16 sps:$4 sm:$0xff]   ;;  %v6290_v14 = vld [vmem:[#allocation10 + $0x744] ss:$16 sps:$4 sm:$0xff]  }
 0x354   : > { %4329 = vmatpush1.bf16.msra.mxu0 %v6204_v15  ;;  %4493 = vmatpush1.bf16.msra.mxu1 %v6207_v16  ;;  %v6293_v15 = vld [vmem:[#allocation10 + $0x74c] ss:$16 sps:$4 sm:$0xff]   ;;  %v6288_v16 = vld [vmem:[#allocation10 + $0x740] ss:$16 sps:$4 sm:$0xff]  }
 0x355   : > { %4330 = vmatprep.subr.bf16.mxu0 %v6212_v17  ;;  %4494 = vmatprep.subr.bf16.mxu1 %v6215_v18  ;;  %v6291_v17 = vld [vmem:[#allocation10 + $0x748] ss:$16 sps:$4 sm:$0xff]   ;;  %v6296_v18 = vld [vmem:[#allocation10 + $0x764] ss:$16 sps:$4 sm:$0xff]  }
 0x358   : > { %4331 = vmatpush1.bf16.msra.mxu0 %v6210_v19  ;;  %4495 = vmatpush1.bf16.msra.mxu1 %v6213_v20  ;;  %v6299_v19 = vld [vmem:[#allocation10 + $0x76c] ss:$16 sps:$4 sm:$0xff]   ;;  %v6294_v20 = vld [vmem:[#allocation10 + $0x760] ss:$16 sps:$4 sm:$0xff]  }
 0x359   : > { %4332 = vmatprep.subr.bf16.mxu0 %v6218_v21  ;;  %4496 = vmatprep.subr.bf16.mxu1 %v6221_v22  ;;  %v6297_v21 = vld [vmem:[#allocation10 + $0x768] ss:$16 sps:$4 sm:$0xff]   ;;  %v6302_v22 = vld [vmem:[#allocation10 + $0x784] ss:$16 sps:$4 sm:$0xff]  }
 0x35c   : > { %4333 = vmatpush1.bf16.msra.mxu0 %v6216_v24  ;;  %4497 = vmatpush1.bf16.msra.mxu1 %v6219_v26  ;;  %v6305_v24 = vld [vmem:[#allocation10 + $0x78c] ss:$16 sps:$4 sm:$0xff]   ;;  %v6303_v26 = vld [vmem:[#allocation10 + $0x788] ss:$16 sps:$4 sm:$0xff]  }
 0x35d   : > { %4334 = vmatprep.subr.bf16.mxu0 %v6224_v27  ;;  %4498 = vmatprep.subr.bf16.mxu1 %v6227_v28  ;;  %v6308_v27 = vld [vmem:[#allocation10 + $0x7a4] ss:$16 sps:$4 sm:$0xff]   ;;  %v6311_v28 = vld [vmem:[#allocation10 + $0x7ac] ss:$16 sps:$4 sm:$0xff]  }
 0x360   : > { %4335 = vmatpush1.bf16.msra.mxu0 %v6222_v29  ;;  %4499 = vmatpush1.bf16.msra.mxu1 %v6225_v31  ;;  %v6306_v29 = vld [vmem:[#allocation10 + $0x7a0] ss:$16 sps:$4 sm:$0xff]   ;;  %v6309_v31 = vld [vmem:[#allocation10 + $0x7a8] ss:$16 sps:$4 sm:$0xff]  }
 0x361   : > { %4345 = vmatprep.subr.bf16.mxu0 %v6230_v61  ;;  %4509 = vmatprep.subr.bf16.mxu1 %v6233_v33  ;;  %v6314_v61 = vld [vmem:[#allocation10 + $0x7c4] ss:$16 sps:$4 sm:$0xff]   ;;  %v6317_v33 = vld [vmem:[#allocation10 + $0x7cc] ss:$16 sps:$4 sm:$0xff]  }
 0x363   : > { %4337 = vmatmul.mubr.bf16.vlgmr.msra.gmra.mrb[0].mxu0 %v2682_v37  ;;  %4501 = vmatmul.mubr.bf16.vlgmr.msra.gmra.mrb[0].mxu1 %v2682_v37  ;;  %v6323_v37 = vld [vmem:[#allocation10 + $0x7ec] ss:$16 sps:$4 sm:$0xff]  }
 0x364   : > { %4346 = vmatpush1.bf16.msra.mxu0 %v6228_v35  ;;  %4510 = vmatpush1.bf16.msra.mxu1 %v6231_v36  ;;  %v6312_v35 = vld [vmem:[#allocation10 + $0x7c0] ss:$16 sps:$4 sm:$0xff]   ;;  %v6320_v36 = vld [vmem:[#allocation10 + $0x7e4] ss:$16 sps:$4 sm:$0xff]  }
 0x365   : > { %4347 = vmatprep.subr.bf16.mxu0 %v6236_v38  ;;  %4511 = vmatprep.subr.bf16.mxu1 %v6239_v40  ;;  %v6318_v38 = vld [vmem:[#allocation10 + $0x7e0] ss:$16 sps:$4 sm:$0xff]   ;;  %v6321_v40 = vld [vmem:[#allocation10 + $0x7e8] ss:$16 sps:$4 sm:$0xff]  }
 0x366   : > { %4377 = vmatprep.mubr.bf16.mxu0 %v2685_v43  ;;  %4541 = vmatprep.mubr.bf16.mxu1 %v2685_v43  ;;  %v2684_v43 = vpack.c.bf16 %v7415_v42, %v7415_v42  ;;  %v6329_v42 = vld [vmem:[%s7584_s7 + $0xc8] sm:$0xff]  }
 0x368   : > { %4348 = vmatpush1.bf16.msra.mxu0 %v6234_v39  ;;  %4512 = vmatpush1.bf16.msra.mxu1 %v6237_v41  ;;  %v6324_v39 = vld [vmem:[%s7584_s7 + $0x40] sm:$0xff]  }
 0x369   : > { %4349 = vmatprep.subr.bf16.mxu0 %v6242_v44  ;;  %4513 = vmatprep.subr.bf16.mxu1 %v6245_v45  ;;  %v6325_v41 = vld [vmem:[%s7584_s7 + $0xc0] sm:$0xff]  }
 0x36a   : > { %v6326_v44 = vld [vmem:[%s7584_s7] sm:$0xff]  }
 0x36b   : > { %v6327_v45 = vld [vmem:[%s7584_s7 + $0x80] sm:$0xff]  }
 0x36c   : > { %4350 = vmatpush1.bf16.msra.mxu0 %v6240_v46  ;;  %4514 = vmatpush1.bf16.msra.mxu1 %v6243_v34  ;;  %v6328_v46 = vld [vmem:[%s7584_s7 + $0x48] sm:$0xff]  }
 0x36d   : > { %4351 = vmatprep.subr.bf16.mxu0 %v6248_v47  ;;  %4515 = vmatprep.subr.bf16.mxu1 %v6251_v48  ;;  %v6330_v34 = vld [vmem:[%s7584_s7 + $0x8] sm:$0xff]   ;;  %v6332_v48 = vld [vmem:[%s7584_s7 + $0x50] sm:$0xff]  }
 0x36e   : > { %v6331_v47 = vld [vmem:[%s7584_s7 + $0x88] sm:$0xff]  }
 0x370   : > { %4352 = vmatpush1.bf16.msra.mxu0 %v6246_v50  ;;  %4516 = vmatpush1.bf16.msra.mxu1 %v6249_v51  ;;  %v6333_v50 = vld [vmem:[%s7584_s7 + $0xd0] sm:$0xff]  }
 0x371   : > { %4353 = vmatprep.subr.bf16.mxu0 %v6254_v58  ;;  %4517 = vmatprep.subr.bf16.mxu1 %v6257_v53  ;;  %v6334_v51 = vld [vmem:[%s7584_s7 + $0x10] sm:$0xff]   ;;  %v6336_v53 = vld [vmem:[%s7584_s7 + $0x58] sm:$0xff]  }
 0x372   : > { %v6335_v58 = vld [vmem:[%s7584_s7 + $0x90] sm:$0xff]  }
 0x374   : > { %4354 = vmatpush1.bf16.msra.mxu0 %v6252_v56  ;;  %4518 = vmatpush1.bf16.msra.mxu1 %v6255_v59  ;;  %v6337_v56 = vld [vmem:[%s7584_s7 + $0xd8] sm:$0xff]  }
 0x375   : > { %4355 = vmatprep.subr.bf16.mxu0 %v6260_v49  ;;  %4519 = vmatprep.subr.bf16.mxu1 %v6263_v5  ;;  %v6338_v59 = vld [vmem:[%s7584_s7 + $0x18] sm:$0xff]   ;;  %v6340_v5 = vld [vmem:[%s7584_s7 + $0x60] sm:$0xff]  }
 0x376   : > { %v6339_v49 = vld [vmem:[%s7584_s7 + $0x98] sm:$0xff]  }
 0x378   : > { %4356 = vmatpush1.bf16.msra.mxu0 %v6258_v62  ;;  %4520 = vmatpush1.bf16.msra.mxu1 %v6261_v63  ;;  %v6341_v62 = vld [vmem:[%s7584_s7 + $0xe0] sm:$0xff]  }
 0x379   : > { %4357 = vmatprep.subr.bf16.mxu0 %v6266_v0  ;;  %4521 = vmatprep.subr.bf16.mxu1 %v6269_v1  ;;  %v6342_v63 = vld [vmem:[%s7584_s7 + $0x20] sm:$0xff]   ;;  %v6344_v1 = vld [vmem:[%s7584_s7 + $0x68] sm:$0xff]  }
 0x37a   : > { %v6343_v0 = vld [vmem:[%s7584_s7 + $0xa0] sm:$0xff]  }
 0x37c   : > { %4358 = vmatpush1.bf16.msra.mxu0 %v6264_v2  ;;  %4522 = vmatpush1.bf16.msra.mxu1 %v6267_v3  ;;  %v6345_v2 = vld [vmem:[%s7584_s7 + $0xe8] sm:$0xff]  }
 0x37d   : > { %4359 = vmatprep.subr.bf16.mxu0 %v6272_v32  ;;  %4523 = vmatprep.subr.bf16.mxu1 %v6275_v23  ;;  %v6346_v3 = vld [vmem:[%s7584_s7 + $0x28] sm:$0xff]   ;;  %v6348_v23 = vld [vmem:[%s7584_s7 + $0x70] sm:$0xff]  }
 0x37e   : > { %v6347_v32 = vld [vmem:[%s7584_s7 + $0xa8] sm:$0xff]  }
 0x380   : > { %4360 = vmatpush1.bf16.msra.mxu0 %v6270_v4  ;;  %4524 = vmatpush1.bf16.msra.mxu1 %v6273_v6  ;;  %v6349_v4 = vld [vmem:[%s7584_s7 + $0xf0] sm:$0xff]  }
 0x381   : > { %4361 = vmatprep.subr.bf16.mxu0 %v6278_v7  ;;  %4525 = vmatprep.subr.bf16.mxu1 %v6281_v8  ;;  %v6350_v6 = vld [vmem:[%s7584_s7 + $0x30] sm:$0xff]   ;;  %v6352_v8 = vld [vmem:[%s7584_s7 + $0x78] sm:$0xff]  }
 0x382   : > { %v6351_v7 = vld [vmem:[%s7584_s7 + $0xb0] sm:$0xff]  }
 0x384   : > { %4362 = vmatpush1.bf16.msra.mxu0 %v6276_v9  ;;  %4526 = vmatpush1.bf16.msra.mxu1 %v6279_v10  ;;  %v6353_v9 = vld [vmem:[%s7584_s7 + $0xf8] sm:$0xff]  }
 0x385   : > { %4363 = vmatprep.subr.bf16.mxu0 %v6284_v60  ;;  %4527 = vmatprep.subr.bf16.mxu1 %v6287_v11  ;;  %v6354_v10 = vld [vmem:[%s7584_s7 + $0x38] sm:$0xff]   ;;  %v4550_v11 = vld [vmem:[#allocation12] sm:$0xf] }
 0x386   : > { %v6355_v60 = vld [vmem:[%s7584_s7 + $0xb8] sm:$0xff]  }
 0x388   : > { %4364 = vmatpush1.bf16.msra.mxu0 %v6282_v12  ;;  %4528 = vmatpush1.bf16.msra.mxu1 %v6285_v13  ;;  %v4576_v12 = vld [vmem:[#allocation13] sm:$0xf]  ;;  %v4555_v13 = vrot.slane %v4550_v11, %v7345_v52 }
 0x389   : > { %4365 = vmatprep.subr.bf16.mxu0 %v6290_v14  ;;  %4529 = vmatprep.subr.bf16.mxu1 %v6293_v15  ;;  %v4563_v14 = vrot.slane %v4550_v11, %v7351_v55  ;;  %v4559_v15 = vrot.slane %v4550_v11, %v7348_v54 }
 0x38c   : > { %4366 = vmatpush1.bf16.msra.mxu0 %v6288_v16  ;;  %4530 = vmatpush1.bf16.msra.mxu1 %v6291_v17  ;;  %v4567_v16 = vrot.slane %v4550_v11, %v7354_v57  ;;  %v4581_v17 = vrot.slane %v4576_v12, %v7345_v52 }
 0x38d   : > { %4367 = vmatprep.subr.bf16.mxu0 %v6296_v18  ;;  %4531 = vmatprep.subr.bf16.mxu1 %v6299_v19  ;;  %v4589_v18 = vrot.slane %v4576_v12, %v7351_v55 }
 0x390   : > { %4368 = vmatpush1.bf16.msra.mxu0 %v6294_v20  ;;  %4532 = vmatpush1.bf16.msra.mxu1 %v6297_v21  ;;  %v4967_v20 = vld [vmem:[#allocation16] sm:$0xf] }
 0x391   : > { %4369 = vmatprep.subr.bf16.mxu0 %v6302_v22  ;;  %4533 = vmatprep.subr.bf16.mxu1 %v6305_v24  ;;  %v4585_v22 = vrot.slane %v4576_v12, %v7348_v54  ;;  %v4593_v24 = vrot.slane %v4576_v12, %v7354_v57 }
 0x394   : > { %4370 = vmatpush1.bf16.msra.mxu0 %v6300_v25  ;;  %4534 = vmatpush1.bf16.msra.mxu1 %v6303_v26 }
 0x395   : > { %4371 = vmatprep.subr.bf16.mxu0 %v6308_v27  ;;  %4535 = vmatprep.subr.bf16.mxu1 %v6311_v28 }
 0x398   : > { %4372 = vmatpush1.bf16.msra.mxu0 %v6306_v29  ;;  %4536 = vmatpush1.bf16.msra.mxu1 %v6309_v31 }
 0x399   : > { %4373 = vmatprep.subr.bf16.mxu0 %v6314_v61  ;;  %4537 = vmatprep.subr.bf16.mxu1 %v6317_v33 }
 0x39c   : > { %4374 = vmatpush1.bf16.msra.mxu0 %v6312_v35  ;;  %4538 = vmatpush1.bf16.msra.mxu1 %v6315_v30  ;;  %v4972_v30 = vrot.slane %v4967_v20, %v7345_v52 }
 0x39d   : > { %4375 = vmatprep.subr.bf16.mxu0 %v6320_v36  ;;  %4539 = vmatprep.subr.bf16.mxu1 %v6323_v37 }
 0x3a0   : > { %4376 = vmatpush1.bf16.msra.mxu0 %v6318_v38  ;;  %4540 = vmatpush1.bf16.msra.mxu1 %v6321_v40 }
 0x3a1   : > { %5732 = vmatprep.subr.bf16.mxu0 %v6324_v39  ;;  %5754 = vmatprep.subr.bf16.mxu1 %v6325_v41  ;;  %v4976_v39 = vrot.slane %v4967_v20, %v7348_v54 }
 0x3a3   : > { %4378 = vmatmul.mubr.bf16.vlgmr.msra.gmra.mrb[0].mxu0 %v2684_v43  ;;  %4542 = vmatmul.mubr.bf16.vlgmr.msra.gmra.mrb[0].mxu1 %v2684_v43  ;;  %v4980_v43 = vrot.slane %v4967_v20, %v7351_v55 }
 0x3a4   : > { %5733 = vmatpush3.bf16.msra.mxu0 %v6326_v44  ;;  %5755 = vmatpush3.bf16.msra.mxu1 %v6327_v45 }
 0x3a5   : > { %5734 = vmatprep.subr.bf16.mxu0 %v6328_v46  ;;  %5756 = vmatprep.subr.bf16.mxu1 %v6329_v42 }
 0x3a8   : > { %5735 = vmatpush3.bf16.msra.mxu0 %v6330_v34  ;;  %5757 = vmatpush3.bf16.msra.mxu1 %v6331_v47  ;;  %v4984_v34 = vrot.slane %v4967_v20, %v7354_v57 }
 0x3a9   : > { %5736 = vmatprep.subr.bf16.mxu0 %v6332_v48  ;;  %5758 = vmatprep.subr.bf16.mxu1 %v6333_v50 }
 0x3ac   : > { %5737 = vmatpush3.bf16.msra.mxu0 %v6334_v51  ;;  %5759 = vmatpush3.bf16.msra.mxu1 %v6335_v58 }
 0x3ad   : > { %5738 = vmatprep.subr.bf16.mxu0 %v6336_v53  ;;  %5760 = vmatprep.subr.bf16.mxu1 %v6337_v56 }
 0x3b0   : > { %5739 = vmatpush3.bf16.msra.mxu0 %v6338_v59  ;;  %5761 = vmatpush3.bf16.msra.mxu1 %v6339_v49 }
 0x3b1   : > { %5740 = vmatprep.subr.bf16.mxu0 %v6340_v5  ;;  %5762 = vmatprep.subr.bf16.mxu1 %v6341_v62 }
 0x3b4   : > { %5741 = vmatpush3.bf16.msra.mxu0 %v6342_v63  ;;  %5763 = vmatpush3.bf16.msra.mxu1 %v6343_v0  ;;  %v5725_v63 = vld [vmem:[#allocation3] ss:$0 sm:$0xff] }
 0x3b5   : > { %5742 = vmatprep.subr.bf16.mxu0 %v6344_v1  ;;  %5764 = vmatprep.subr.bf16.mxu1 %v6345_v2 }
 0x3b8   : > { %5743 = vmatpush3.bf16.msra.mxu0 %v6346_v3  ;;  %5765 = vmatpush3.bf16.msra.mxu1 %v6347_v32 }
 0x3b9   : > { %5744 = vmatprep.subr.bf16.mxu0 %v6348_v23  ;;  %5766 = vmatprep.subr.bf16.mxu1 %v6349_v4  ;;  %v5692_v23 = vld [vmem:[#allocation15] ss:$0 sm:$0xff] }
 0x3bc   : > { %5745 = vmatpush3.bf16.msra.mxu0 %v6350_v6  ;;  %5767 = vmatpush3.bf16.msra.mxu1 %v6351_v7 }
 0x3bd   : > { %5746 = vmatprep.subr.bf16.mxu0 %v6352_v8  ;;  %5768 = vmatprep.subr.bf16.mxu1 %v6353_v9 }
 0x3c0   : > { %5747 = vmatpush3.bf16.msra.mxu0 %v6354_v10  ;;  %5769 = vmatpush3.bf16.msra.mxu1 %v6355_v60 }
 0x476   : > { %v4379_v19 = vpop.f32.mrb[0].mxu0  ;;  %v4543_v21 = vpop.f32.mrb[0].mxu1 }
 0x477   : > { %v4572_v25 = vmul.f32 %v4555_v13, %v4379_v19  ;;  %v4574_v26 = vmul.f32 %v4563_v14, %v4543_v21  ;;  %v4381_v27 = vpop.f32.mrb[1].mxu0  ;;  %v4545_v28 = vpop.f32.mrb[1].mxu1 }
 0x478   : > { %v4573_v29 = vmul.f32 %v4559_v15, %v4381_v27  ;;  %v4575_v31 = vmul.f32 %v4567_v16, %v4545_v28  ;;  %v4383_v61 = vpop.f32.mrb[2].mxu0  ;;  %v4547_v33 = vpop.f32.mrb[2].mxu1 }
 0x479   : > { %v4598_v35 = vadd.f32 %v4581_v17, %v4572_v25  ;;  %v4600_v36 = vadd.f32 %v4589_v18, %v4574_v26  ;;  %v4384_v37 = vpop.f32.mrb[3].mxu0  ;;  %v4548_v38 = vpop.f32.mrb[3].mxu1 }
 0x47a   : > { %v4599_v40 = vadd.f32 %v4585_v22, %v4573_v29  ;;  %v4601_v41 = vadd.f32 %v4593_v24, %v4575_v31 }
 0x47b   : > { %v4602_v44 = vmax.f32 %v4598_v35, 0.0  ;;  %v4604_v45 = vmax.f32 %v4600_v36, 0.0 }
 0x47c   : > { %v4603_v46 = vmax.f32 %v4599_v40, 0.0  ;;  %v4605_v42 = vmax.f32 %v4601_v41, 0.0 }
 0x47d   : > { %v4989_v47 = vmul.f32 %v4972_v30, %v4602_v44  ;;  %v4991_v51 = vmul.f32 %v4980_v43, %v4604_v45  ;;  %v4606_v58 = vpack.c.bf16 %v4602_v44, %v4602_v44  ;;  %v4608_v53 = vpack.c.bf16 %v4604_v45, %v4604_v45 }
 0x47e   : > { %v4990_v48 = vmul.f32 %v4976_v39, %v4603_v46  ;;  %v4607_v50 = vpack.c.bf16 %v4603_v46, %v4603_v46  ;;  %v4609_v52 = vpack.c.bf16 %v4605_v42, %v4605_v42  ;;  %v4992_v54 = vmul.f32 %v4984_v34, %v4605_v42 }
 0x47f   : > { %v4994_v56 = vsel %vm4993_vm0, %v4989_v47, 0.0  ;;  %v4997_v57 = vsel %vm4993_vm0, %v4991_v51, 0.0 }
 0x480   : > { %4905 = vmatprep.mubr.bf16.mxu0 %v4607_v50  ;;  %4945 = vmatprep.mubr.bf16.mxu1 %v4609_v52  ;;  %v4995_v55 = vsel %vm4993_vm0, %v4990_v48, 0.0  ;;  %v4999_v5 = vsel %vm4993_vm0, %v4992_v54, 0.0 }
 0x481   : > { %4906 = vmatmul.mubr.bf16.vlgmr.msra.gmra.mrb[4].mxu0 %v4606_v58  ;;  %4946 = vmatmul.mubr.bf16.vlgmr.msra.gmra.mrb[4].mxu1 %v4608_v53  ;;  %v4996_v59 = vadd.f32 %v4995_v55, %v4994_v56 }
 0x483   : > { %v4998_v49 = vadd.f32 %v4997_v57, %v4996_v59 }
 0x485   : > { %v5000_v62 = vadd.f32 %v4999_v5, %v4998_v49 }
 0x487   : > { %5001 = vadd.xlane.f32.xlu1 %v5000_v62 }
 0x514   : > { %v5002_v0 = vpop.xlane.xlu1 %5001 }
 0x515   : > { %v5010_v1 = vadd.f32 %v5725_v63, %v5002_v0 }
 0x517   : > { %6356 = vtanh.f32 %v5010_v1 }
 0x521   : > { %v6357_v2 = vpop.eup %6356 }
 0x522   : > { %5013 = vst.msk [vmem:[%s7589_s12] sm:$0x3] %vm5012_vm1, %v6357_v2 }
 0x554   : > { %v5748_v3 = vpop.f32.mrb[4].mxu0  ;;  %v5770_v32 = vpop.f32.mrb[4].mxu1 }
 0x555   : > { %v5749_v4 = vpop.f32.mrb[5].mxu0  ;;  %v5771_v6 = vpop.f32.mrb[5].mxu1 }
 0x556   : > { %v5750_v7 = vadd.f32 %v5749_v4, %v5748_v3  ;;  %v5772_v8 = vadd.f32 %v5771_v6, %v5770_v32  ;;  %v5751_v9 = vpop.f32.mrb[6].mxu0  ;;  %v5773_v10 = vpop.f32.mrb[6].mxu1 }
 0x557   : > { %v5752_v60 = vpop.f32.mrb[7].mxu0  ;;  %v5774_v11 = vpop.f32.mrb[7].mxu1 }
 0x558   : > { %v4908_v12 = vadd.f32 %v5750_v7, %v5692_v23 }
 0x55a   : > { %v4948_v13 = vadd.f32 %v5772_v8, %v4908_v12 }
 0x55c   : > { %v4954_v14 = vsel %vm4953_vm2, %v4948_v13, -inf }
 0x55d   : > { %4955 = vmax.xlane.f32.xlu0 %v4954_v14 }
 0x5ea   : > { %v4956_v15 = vpop.xlane.xlu0 %4955 }
 0x5eb   : > { %v4957_v16 = vsub.f32 %v4948_v13, %v4956_v15 }
 0x5ed   : > { %v4958_v17 = vmul.f32 1.442695, %v4957_v16 }
 0x5ef   : > { %6358 = vpow2.f32 %v4958_v17 }
 0x5f9   : > { %v6359_v18 = vpop.eup %6358 }
 0x5fa   : > { %v4960_v19 = vsel %vm4953_vm2, %v6359_v18, 0.0 }
 0x5fb   : > { %4961 = vadd.xlane.f32.xlu0 %v4960_v19 }
 0x688   : > { %v4962_v20 = vpop.xlane.xlu0 %4961 }
 0x689   : > { %6360 = vlog2.f32 %v4962_v20 }
 0x693   : > { %v6361_v21 = vpop.eup %6360 }
 0x694   : > { %v4964_v22 = vmul.f32 0.6931472, %v6361_v21 }
 0x696   : > { %v4965_v24 = vsub.f32 %v4957_v16, %v4964_v22 }
 0x698   : > { %4966 = vst.msk [vmem:[#allocation18] sm:$0x3] %vm4953_vm2, %v4965_v24 }
 0x699 PF: > { %p5891_p8 = scmp.eq.s32.totalorder %s6775_s28, 3  ;;  %s6685_s13 = smov [#allocation18]  }
 0x69a   : > { %s5021_s23 = sshll.u32 %s6685_s13, 4  ;;  %s5022_s23 = int_to_ptr.vmem [resolvable:$true] %s5021_s23 }
 0x69b   : > { %s6588_s11 = scalar_lea.vmem %s5022_s23, 32  ;;  %p6595_p6 = scmp.lt.s32.totalorder %s5022_s23, %s5022_s23 }
 0x69c   : > { %p6589_p7 = scmp.ne.s32.totalorder %s5022_s23, %s6588_s11  ;;  %p6596_p9 = scmp.lt.s32.totalorder %s6588_s11, %s6588_s11 }
 0x69e   : > { %p6590_p13 = pnand %p6589_p7, %p5891_p8  ;;  %p6597_p3 = por %p6596_p9, %p6595_p6 }
 0x6a0   : > { %p6591_p2 = pneg %p6590_p13 }
 0x6a2   : > { %p6598_p1 = pnand %p6597_p3, %p6591_p2 }
 0x6a4   : > { %6601 = shalt.err (!%p6598_p1)
}
 0x6a5   : > { %s7612_s17 = sld [smem:[#allocation26_spill]] }
 0x6ab   : > { %s6602_s21 = scalar_lea.hbm %s7612_s17, 32 }
 0x6ac   : > { %p6603_p4 = scmp.ne.s32.totalorder %s7612_s17, %s6602_s21  ;;  %p6608_p12 = scmp.lt.u32.totalorder %s6602_s21, %s7612_s17 }
 0x6ae   : > { %p6604_p10 = pnand %p6603_p4, %p5891_p8 }
 0x6b0   : > { %p6605_p11 = pneg %p6604_p10 }
 0x6b2   : > { %p6610_p0 = pnand %p6608_p12, %p6605_p11 }
 0x6b4   : > { %6613 = shalt.err (!%p6610_p0)
}
 0x6b5   : > { %5847 = dma.vmem_to_hbm [thread:$0]  (%p5891_p8), %s5022_s23, 32, %s7612_s17, [#allocation6]  }
 0x6b6   : > { %6651 = dma.done.wait (%p5891_p8), [#allocation6], 32  }
 0x6b7   : > { %6653 = vsyncadd (%p5891_p8), [#allocation6], 4294967264 }
 0x6b8 PF: > { %p30_p5 = scmp.ge.s32.totalorder %s6940_s22, 6   ;;  %s7613_s23 = smov %s6660_s24 }
 0x6b9   : > { %s7614_s24 = smov %s6664_s25  ;;  %s7615_s25 = smov %s6951_s19 }
 0x6ba   : > { %s7616_s26 = smov %s6940_s22  ;;  %32 = sbr.rel (!%p30_p5) target bundleno = 11 (0xb), region = 148 }
 0x6c1   :  { %5040 = vsyncpa [#allocation5], 1 }
 0x6c2   :  { %5042 = vsyncpa [#allocation5 + $0x1], 1 }
 0x6c3   :  { %5043 = vsyncpa [#allocation8], 1 }
 0x6c4   :  { %5044 = vsyncpa [#allocation11], 1 }
 0x6c5   :  { %5045 = vsyncpa [#allocation14], 1 }
 0x6c6   :  { %5046 = vsyncpa [#allocation17], 1 }
 0x6c7   :  { %5047 = vsyncpa [#allocation6], 1 }
 0x6c8   :  { %5049 = vsyncpa [#allocation6 + $0x1], 1 }

// kernel: _lambda_.2
= control target key start
LH: loop header
LB: loop body
LE: loop exit
PB: predicated region body
PF: predicated region fallthrough
CT: control target
= control target key end

     0   :  { %18 = vsyncpa [#allocation5], 0  ;;  %s6989_s0 = inlined_call_operand.vmem [shape: bf16[128,9], index: 0, kind: input, shape index: {}]   ;;  %s6990_s1 = inlined_call_operand.hbm [shape: bf16[9,128], index: 1, kind: input, shape index: {}]   ;;  %s6991_s2 = inlined_call_operand.hbm [shape: f32[1,128], index: 2, kind: input, shape index: {}]   ;;  %s6992_s3 = inlined_call_operand.hbm [shape: f32[1,128], index: 3, kind: input, shape index: {}]   ;;  %s6993_s4 = inlined_call_operand.hbm [shape: bf16[1152,128], index: 4, kind: input, shape index: {}]   ;;  %s6994_s5 = inlined_call_operand.hbm [shape: f32[1,128], index: 5, kind: input, shape index: {}]   ;;  %s6995_s6 = inlined_call_operand.hbm [shape: f32[1,128], index: 6, kind: input, shape index: {}]   ;;  %s6996_s7 = inlined_call_operand.hbm [shape: bf16[1152,128], index: 7, kind: input, shape index: {}]   ;;  %s6997_s8 = inlined_call_operand.hbm [shape: f32[1,128], index: 8, kind: input, shape index: {}]   ;;  %s6998_s9 = inlined_call_operand.hbm [shape: f32[1,128], index: 9, kind: input, shape index: {}]   ;;  %s6999_s10 = inlined_call_operand.hbm [shape: bf16[1152,128], index: 10, kind: input, shape index: {}]   ;;  %s7000_s11 = inlined_call_operand.hbm [shape: f32[1,128], index: 11, kind: input, shape index: {}]   ;;  %s7001_s12 = inlined_call_operand.hbm [shape: f32[1,128], index: 12, kind: input, shape index: {}]   ;;  %s7002_s13 = inlined_call_operand.vmem [shape: bf16[32,128], index: 13, kind: output, shape index: {}]  }
   0x1   :  { %19 = vsyncpa [#allocation7], 0 }
   0x2   :  { %20 = vsyncpa [#allocation10], 0 }
   0x3   :  { %21 = vsyncpa [#allocation13], 0 }
   0x4   :  { %22 = vsyncpa [#allocation16], 0 }
   0x5   :  { %23 = vsyncpa [#allocation19], 0 }
   0x6   :  { %24 = vsyncpa [#allocation22], 0  ;;  %s5943_s25 = smov [#allocation6]   ;;  %s5665_s29 = scalar_lea.hbm %s6991_s2, 16 }
   0x7   :  { %s45_s26 = sshll.u32 %s5943_s25, 4  ;;  %p5666_p0 = scmp.ne.s32.totalorder %s6991_s2, %s5665_s29  ;;  %s46_s26 = int_to_ptr.vmem [resolvable:$true] %s45_s26 }
   0x8   :  { %p5669_p1 = scmp.lt.u32.totalorder %s5665_s29, %s6991_s2 }
   0xa   :  { %p5671_p2 = pnand %p5669_p1, %p5666_p0 }
   0xc   :  { %5674 = shalt.err (!%p5671_p2)
}
   0xd   :  { %s5675_s17 = scalar_lea.vmem %s46_s26, 16  ;;  %s5679_s18 = scalar_lea.vmem %s46_s26, 32 }
   0xe   :  { %p5676_p3 = scmp.ne.s32.totalorder %s46_s26, %s5675_s17  ;;  %p5680_p4 = scmp.lt.s32.totalorder %s46_s26, %s46_s26 }
   0xf   :  { %p5681_p5 = scmp.lt.s32.totalorder %s5679_s18, %s5675_s17 }
  0x11   :  { %p5682_p6 = por %p5681_p5, %p5680_p4 }
  0x13   :  { %p5683_p7 = pnand %p5682_p6, %p5676_p3 }
  0x15   :  { %5686 = shalt.err (!%p5683_p7)
}
  0x16   :  { %48 = dma.hbm_to_vmem [thread:$0]  %s6991_s2, 16, %s46_s26, [#allocation7]  }
  0x17   :  { %s5944_s21 = smov [#allocation9]   ;;  %s5945_s23 = smov [#allocation12]  }
  0x18   :  { %s64_s22 = sshll.u32 %s5944_s21, 4  ;;  %s87_s24 = sshll.u32 %s5945_s23, 4  ;;  %s65_s22 = int_to_ptr.vmem [resolvable:$true] %s64_s22  ;;  %s88_s24 = int_to_ptr.vmem [resolvable:$true] %s87_s24 }
  0x19   :  { %s5687_s28 = scalar_lea.hbm %s6993_s4, 9216 }
  0x1a   :  { %p5688_p8 = scmp.ne.s32.totalorder %s6993_s4, %s5687_s28  ;;  %p5691_p9 = scmp.lt.u32.totalorder %s5687_s28, %s6993_s4 }
  0x1c   :  { %p5693_p10 = pnand %p5691_p9, %p5688_p8 }
  0x1e   :  { %5696 = shalt.err (!%p5693_p10)
}
  0x1f   :  { %s5697_s2 = scalar_lea.vmem %s65_s22, 9216  ;;  %p5702_p12 = scmp.lt.s32.totalorder %s65_s22, %s65_s22 }
  0x20   :  { %p5698_p11 = scmp.ne.s32.totalorder %s65_s22, %s5697_s2  ;;  %p5703_p13 = scmp.lt.s32.totalorder %s5697_s2, %s5697_s2 }
  0x22   :  { %p5704_p0 = por %p5703_p13, %p5702_p12 }
  0x24   :  { %p5705_p1 = pnand %p5704_p0, %p5698_p11 }
  0x26   :  { %5708 = shalt.err (!%p5705_p1)
}
  0x27   :  { %s5946_s26 = smov 64   ;;  %s5947_s16 = smov 4  }
  0x28   :  { %70 = dma.hbm_to_vmem [thread:$0]  %s6993_s4, 9216, %s65_s22, [#allocation10], %s5946_s26, %s5946_s26, %s5947_s16  }
  0x29   :  { %s5709_s21 = scalar_lea.hbm %s6995_s6, 16 }
  0x2a   :  { %p5710_p2 = scmp.ne.s32.totalorder %s6995_s6, %s5709_s21  ;;  %p5713_p3 = scmp.lt.u32.totalorder %s5709_s21, %s6995_s6 }
  0x2c   :  { %p5715_p4 = pnand %p5713_p3, %p5710_p2 }
  0x2e   :  { %5718 = shalt.err (!%p5715_p4)
}
  0x2f   :  { %s5719_s29 = scalar_lea.vmem %s88_s24, 16  ;;  %s5723_s30 = scalar_lea.vmem %s88_s24, 32 }
  0x30   :  { %p5720_p5 = scmp.ne.s32.totalorder %s88_s24, %s5719_s29  ;;  %p5724_p6 = scmp.lt.s32.totalorder %s88_s24, %s88_s24 }
  0x31   :  { %p5725_p7 = scmp.lt.s32.totalorder %s5723_s30, %s5719_s29 }
  0x33   :  { %p5726_p8 = por %p5725_p7, %p5724_p6 }
  0x35   :  { %p5727_p9 = pnand %p5726_p8, %p5720_p5 }
  0x37   :  { %5730 = shalt.err (!%p5727_p9)
}
  0x38   :  { %90 = dma.hbm_to_vmem [thread:$0]  %s6995_s6, 16, %s88_s24, [#allocation13]  }
  0x39   :  { %s5948_s14 = smov [#allocation15]   ;;  %s5949_s2 = smov [#allocation18]  }
  0x3a   :  { %s109_s15 = sshll.u32 %s5948_s14, 4  ;;  %s128_s17 = sshll.u32 %s5949_s2, 4  ;;  %s110_s15 = int_to_ptr.vmem [resolvable:$true] %s109_s15  ;;  %s129_s17 = int_to_ptr.vmem [resolvable:$true] %s128_s17 }
  0x3b   :  { %s5731_s20 = scalar_lea.hbm %s6997_s8, 16 }
  0x3c   :  { %p5732_p10 = scmp.ne.s32.totalorder %s6997_s8, %s5731_s20  ;;  %p5735_p11 = scmp.lt.u32.totalorder %s5731_s20, %s6997_s8 }
  0x3e   :  { %p5737_p12 = pnand %p5735_p11, %p5732_p10 }
  0x40   :  { %5740 = shalt.err (!%p5737_p12)
}
  0x41   :  { %s5741_s6 = scalar_lea.vmem %s110_s15, 16  ;;  %s5745_s24 = scalar_lea.vmem %s110_s15, 32 }
  0x42   :  { %p5742_p13 = scmp.ne.s32.totalorder %s110_s15, %s5741_s6  ;;  %p5746_p0 = scmp.lt.s32.totalorder %s110_s15, %s110_s15 }
  0x43   :  { %p5747_p1 = scmp.lt.s32.totalorder %s5745_s24, %s5741_s6 }
  0x45   :  { %p5748_p2 = por %p5747_p1, %p5746_p0 }
  0x47   :  { %p5749_p3 = pnand %p5748_p2, %p5742_p13 }
  0x49   :  { %5752 = shalt.err (!%p5749_p3)
}
  0x4a   :  { %112 = dma.hbm_to_vmem [thread:$0]  %s6997_s8, 16, %s110_s15, [#allocation16]  }
  0x4b   :  { %s5753_s22 = scalar_lea.hbm %s6999_s10, 9216 }
  0x4c   :  { %p5754_p4 = scmp.ne.s32.totalorder %s6999_s10, %s5753_s22  ;;  %p5757_p5 = scmp.lt.u32.totalorder %s5753_s22, %s6999_s10 }
  0x4e   :  { %p5759_p6 = pnand %p5757_p5, %p5754_p4 }
  0x50   :  { %5762 = shalt.err (!%p5759_p6)
}
  0x51   :  { %s5763_s20 = scalar_lea.vmem %s129_s17, 9216  ;;  %p5768_p8 = scmp.lt.s32.totalorder %s129_s17, %s129_s17 }
  0x52   :  { %p5764_p7 = scmp.ne.s32.totalorder %s129_s17, %s5763_s20  ;;  %p5769_p9 = scmp.lt.s32.totalorder %s5763_s20, %s5763_s20 }
  0x54   :  { %p5770_p10 = por %p5769_p9, %p5768_p8 }
  0x56   :  { %p5771_p11 = pnand %p5770_p10, %p5764_p7 }
  0x58   :  { %5774 = shalt.err (!%p5771_p11)
}
  0x59   :  { %134 = dma.hbm_to_vmem [thread:$0]  %s6999_s10, 9216, %s129_s17, [#allocation19], %s5946_s26, %s5946_s26, %s5947_s16  }
  0x5a   :  { %s5950_s21 = smov [#allocation4]   ;;  %s5951_s25 = smov [#allocation8]  }
  0x5b   :  { %s32_s23 = sshll.u32 %s5950_s21, 4  ;;  %s55_s27 = sshll.u32 %s5951_s25, 4  ;;  %s33_s23 = int_to_ptr.vmem [resolvable:$true] %s32_s23  ;;  %s56_s27 = int_to_ptr.vmem [resolvable:$true] %s55_s27 }
  0x5c   :  { %s5775_s28 = scalar_lea.hbm %s6990_s1, 128 }
  0x5d   :  { %p5776_p12 = scmp.ne.s32.totalorder %s6990_s1, %s5775_s28  ;;  %p5779_p13 = scmp.lt.u32.totalorder %s5775_s28, %s6990_s1 }
  0x5f   :  { %p5781_p0 = pnand %p5779_p13, %p5776_p12 }
  0x61   :  { %5784 = shalt.err (!%p5781_p0)
}
  0x62   :  { %s5785_s10 = scalar_lea.vmem %s33_s23, 128  ;;  %p5790_p2 = scmp.lt.s32.totalorder %s33_s23, %s33_s23 }
  0x63   :  { %p5786_p1 = scmp.ne.s32.totalorder %s33_s23, %s5785_s10  ;;  %p5791_p3 = scmp.lt.s32.totalorder %s5785_s10, %s5785_s10 }
  0x65   :  { %p5792_p4 = por %p5791_p3, %p5790_p2 }
  0x67   :  { %p5793_p5 = pnand %p5792_p4, %p5786_p1 }
  0x69   :  { %5796 = shalt.err (!%p5793_p5)
}
  0x6a   :  { %38 = dma.hbm_to_vmem [thread:$0]  %s6990_s1, 128, %s33_s23, [#allocation5], %s5946_s26, %s5946_s26, %s5947_s16  }
  0x6b   :  { %s5797_s19 = scalar_lea.hbm %s6992_s3, 16 }
  0x6c   :  { %p5798_p6 = scmp.ne.s32.totalorder %s6992_s3, %s5797_s19  ;;  %p5801_p7 = scmp.lt.u32.totalorder %s5797_s19, %s6992_s3 }
  0x6e   :  { %p5803_p8 = pnand %p5801_p7, %p5798_p6 }
  0x70   :  { %5806 = shalt.err (!%p5803_p8)
}
  0x71   :  { %s5807_s25 = scalar_lea.vmem %s56_s27, 16  ;;  %s5811_s6 = scalar_lea.vmem %s56_s27, 32 }
  0x72   :  { %p5808_p9 = scmp.ne.s32.totalorder %s56_s27, %s5807_s25  ;;  %p5812_p10 = scmp.lt.s32.totalorder %s56_s27, %s56_s27 }
  0x73   :  { %p5813_p11 = scmp.lt.s32.totalorder %s5811_s6, %s5807_s25 }
  0x75   :  { %p5814_p12 = por %p5813_p11, %p5812_p10 }
  0x77   :  { %p5815_p13 = pnand %p5814_p12, %p5808_p9 }
  0x79   :  { %5818 = shalt.err (!%p5815_p13)
}
  0x7a   :  { %58 = dma.hbm_to_vmem [thread:$0]  %s6992_s3, 16, %s56_s27, [#allocation7]  }
  0x7b   :  { %s5952_s24 = smov [#allocation11]   ;;  %s5953_s29 = smov [#allocation14]  }
  0x7c   :  { %s77_s28 = sshll.u32 %s5952_s24, 4  ;;  %s96_s30 = sshll.u32 %s5953_s29, 4  ;;  %s78_s28 = int_to_ptr.vmem [resolvable:$true] %s77_s28  ;;  %s97_s30 = int_to_ptr.vmem [resolvable:$true] %s96_s30 }
  0x7d   :  { %s5819_s10 = scalar_lea.hbm %s6994_s5, 16 }
  0x7e   :  { %p5820_p0 = scmp.ne.s32.totalorder %s6994_s5, %s5819_s10  ;;  %p5823_p1 = scmp.lt.u32.totalorder %s5819_s10, %s6994_s5 }
  0x80   :  { %p5825_p2 = pnand %p5823_p1, %p5820_p0 }
  0x82   :  { %5828 = shalt.err (!%p5825_p2)
}
  0x83   :  { %s5829_s3 = scalar_lea.vmem %s78_s28, 16  ;;  %s5833_s27 = scalar_lea.vmem %s78_s28, 32 }
  0x84   :  { %p5830_p3 = scmp.ne.s32.totalorder %s78_s28, %s5829_s3  ;;  %p5834_p4 = scmp.lt.s32.totalorder %s78_s28, %s78_s28 }
  0x85   :  { %p5835_p5 = scmp.lt.s32.totalorder %s5833_s27, %s5829_s3 }
  0x87   :  { %p5836_p6 = por %p5835_p5, %p5834_p4 }
  0x89   :  { %p5837_p7 = pnand %p5836_p6, %p5830_p3 }
  0x8b   :  { %5840 = shalt.err (!%p5837_p7)
}
  0x8c   :  { %80 = dma.hbm_to_vmem [thread:$0]  %s6994_s5, 16, %s78_s28, [#allocation10]  }
  0x8d   :  { %s5841_s21 = scalar_lea.hbm %s6996_s7, 9216 }
  0x8e   :  { %p5842_p8 = scmp.ne.s32.totalorder %s6996_s7, %s5841_s21  ;;  %p5845_p9 = scmp.lt.u32.totalorder %s5841_s21, %s6996_s7 }
  0x90   :  { %p5847_p10 = pnand %p5845_p9, %p5842_p8 }
  0x92   :  { %5850 = shalt.err (!%p5847_p10)
}
  0x93   :  { %s5851_s24 = scalar_lea.vmem %s97_s30, 9216  ;;  %p5856_p12 = scmp.lt.s32.totalorder %s97_s30, %s97_s30 }
  0x94   :  { %p5852_p11 = scmp.ne.s32.totalorder %s97_s30, %s5851_s24  ;;  %p5857_p13 = scmp.lt.s32.totalorder %s5851_s24, %s5851_s24 }
  0x96   :  { %p5858_p0 = por %p5857_p13, %p5856_p12 }
  0x98   :  { %p5859_p1 = pnand %p5858_p0, %p5852_p11 }
  0x9a   :  { %5862 = shalt.err (!%p5859_p1)
}
  0x9b   :  { %102 = dma.hbm_to_vmem [thread:$0]  %s6996_s7, 9216, %s97_s30, [#allocation13], %s5946_s26, %s5946_s26, %s5947_s16  }
  0x9c   :  { %s5954_s29 = smov [#allocation17]   ;;  %s5955_s22 = smov [#allocation20]  }
  0x9d   :  { %s119_s4 = sshll.u32 %s5954_s29, 4  ;;  %s141_s10 = sshll.u32 %s5955_s22, 4  ;;  %s120_s4 = int_to_ptr.vmem [resolvable:$true] %s119_s4  ;;  %s142_s10 = int_to_ptr.vmem [resolvable:$true] %s141_s10 }
  0x9e   :  { %s5863_s2 = scalar_lea.hbm %s6998_s9, 16 }
  0x9f   :  { %p5864_p2 = scmp.ne.s32.totalorder %s6998_s9, %s5863_s2  ;;  %p5867_p3 = scmp.lt.u32.totalorder %s5863_s2, %s6998_s9 }
  0xa1   :  { %p5869_p4 = pnand %p5867_p3, %p5864_p2 }
  0xa3   :  { %5872 = shalt.err (!%p5869_p4)
}
  0xa4   :  { %s5873_s7 = scalar_lea.vmem %s120_s4, 16  ;;  %s5877_s26 = scalar_lea.vmem %s120_s4, 32 }
  0xa5   :  { %p5874_p5 = scmp.ne.s32.totalorder %s120_s4, %s5873_s7  ;;  %p5878_p6 = scmp.lt.s32.totalorder %s120_s4, %s120_s4 }
  0xa6   :  { %p5879_p7 = scmp.lt.s32.totalorder %s5877_s26, %s5873_s7 }
  0xa8   :  { %p5880_p8 = por %p5879_p7, %p5878_p6 }
  0xaa   :  { %p5881_p9 = pnand %p5880_p8, %p5874_p5 }
  0xac   :  { %5884 = shalt.err (!%p5881_p9)
}
  0xad   :  { %122 = dma.hbm_to_vmem [thread:$0]  %s6998_s9, 16, %s120_s4, [#allocation16]  }
  0xae   :  { %s5885_s15 = scalar_lea.hbm %s7000_s11, 16 }
  0xaf   :  { %p5886_p10 = scmp.ne.s32.totalorder %s7000_s11, %s5885_s15  ;;  %p5889_p11 = scmp.lt.u32.totalorder %s5885_s15, %s7000_s11 }
  0xb1   :  { %p5891_p12 = pnand %p5889_p11, %p5886_p10 }
  0xb3   :  { %5894 = shalt.err (!%p5891_p12)
}
  0xb4   :  { %s5895_s23 = scalar_lea.vmem %s142_s10, 16  ;;  %s5899_s24 = scalar_lea.vmem %s142_s10, 32 }
  0xb5   :  { %p5896_p13 = scmp.ne.s32.totalorder %s142_s10, %s5895_s23  ;;  %p5900_p0 = scmp.lt.s32.totalorder %s142_s10, %s142_s10 }
  0xb6   :  { %p5901_p1 = scmp.lt.s32.totalorder %s5899_s24, %s5895_s23 }
  0xb8   :  { %p5902_p2 = por %p5901_p1, %p5900_p0 }
  0xba   :  { %p5903_p3 = pnand %p5902_p2, %p5896_p13 }
  0xbc   :  { %5906 = shalt.err (!%p5903_p3)
}
  0xbd   :  { %144 = dma.hbm_to_vmem [thread:$0]  %s7000_s11, 16, %s142_s10, [#allocation19]  }
  0xbe   :  { %s5956_s28 = smov [#allocation21]   ;;  %s5907_s17 = scalar_lea.hbm %s7001_s12, 16 }
  0xbf   :  { %s151_s29 = sshll.u32 %s5956_s28, 4  ;;  %p5908_p4 = scmp.ne.s32.totalorder %s7001_s12, %s5907_s17  ;;  %s152_s29 = int_to_ptr.vmem [resolvable:$true] %s151_s29 }
  0xc0   :  { %p5911_p5 = scmp.lt.u32.totalorder %s5907_s17, %s7001_s12 }
  0xc2   :  { %p5913_p6 = pnand %p5911_p5, %p5908_p4 }
  0xc4   :  { %5916 = shalt.err (!%p5913_p6)
}
  0xc5   :  { %s5917_s27 = scalar_lea.vmem %s152_s29, 16  ;;  %s5921_s11 = scalar_lea.vmem %s152_s29, 32 }
  0xc6   :  { %p5918_p7 = scmp.ne.s32.totalorder %s152_s29, %s5917_s27  ;;  %p5922_p8 = scmp.lt.s32.totalorder %s152_s29, %s152_s29 }
  0xc7   :  { %p5923_p9 = scmp.lt.s32.totalorder %s5921_s11, %s5917_s27 }
  0xc9   :  { %p5924_p10 = por %p5923_p9, %p5922_p8 }
  0xcb   :  { %p5925_p11 = pnand %p5924_p10, %p5918_p7 }
  0xcd   :  { %5928 = shalt.err (!%p5925_p11)
}
  0xce   :  { %154 = dma.hbm_to_vmem [thread:$0]  %s7001_s12, 16, %s152_s29, [#allocation22]  }
  0xcf   :  { %5929 = dma.done.wait [#allocation5], 128  }
  0xd0   :  { %5930 = vsyncadd [#allocation5], 4294967168 }
  0xd1   :  { %5931 = dma.done.wait [#allocation7], 32  }
  0xd2   :  { %5932 = vsyncadd [#allocation7], 4294967264 }
  0xd3   :  { %5933 = dma.done.wait [#allocation10], 9232  }
  0xd4   :  { %5934 = vsyncadd [#allocation10], 4294958064 }
  0xd5   :  { %5935 = dma.done.wait [#allocation13], 9232  }
  0xd6   :  { %5936 = vsyncadd [#allocation13], 4294958064 }
  0xd7   :  { %5937 = dma.done.wait [#allocation16], 32  }
  0xd8   :  { %5938 = vsyncadd [#allocation16], 4294967264 }
  0xd9   :  { %5939 = dma.done.wait [#allocation19], 9232  }
  0xda   :  { %5940 = vsyncadd [#allocation19], 4294958064 }
  0xdb   :  { %5941 = dma.done.wait [#allocation22], 16  }
  0xdc   :  { %5942 = vsyncadd [#allocation22], 4294967280  ;;  %vm340_vm0 = vcmask 1043456   ;;  %v5957_v0 = vmov 0.0   ;;  %vm341_vm1 = vcmask 1044480   ;;  %v5958_v1 = vmov 65535  }
  0xdd   :  { %192 = vst [vmem:[#allocation2] sm:$0xff] %v5957_v0  ;;  %193 = vst [vmem:[#allocation2 + $0x8] sm:$0xff] %v5957_v0  ;;  %v342_v2 = vsel %vm340_vm0, 4294967295, %v5958_v1  ;;  %vm315_vm2 = vcmask 72704   ;;  %v5402_v4 = vld [vmem:[#allocation4] sm:$0x1f]  }
  0xde   :  { %194 = vst [vmem:[#allocation2 + $0x10] sm:$0xff] %v5957_v0  ;;  %195 = vst [vmem:[#allocation2 + $0x18] sm:$0xff] %v5957_v0  ;;  %v343_v3 = vsel %vm341_vm1, %v342_v2, 0  ;;  %v5403_v5 = vld [vmem:[%s6989_s0] sm:$0xff]   ;;  %v5404_v7 = vld [vmem:[%s6989_s0 + $0x8] sm:$0xff]  }
  0xdf   :  { %197 = vst [vmem:[#allocation2 + $0x28] sm:$0xff] %v5957_v0  ;;  %198 = vst [vmem:[#allocation2 + $0x30] sm:$0xff] %v5957_v0  ;;  %v345_v6 = vand.u32 %v5402_v4, %v343_v3  ;;  %5286 = vmatprep.mubr.msk.bf16.mxu0 %vm315_vm2, %v5403_v5  ;;  %v5405_v8 = vld [vmem:[%s6989_s0 + $0x10] sm:$0xff]   ;;  %v5406_v10 = vld [vmem:[%s6989_s0 + $0x18] sm:$0xff]  }
  0xe0   :  { %200 = vst [vmem:[#allocation2 + $0x40] sm:$0xff] %v5957_v0  ;;  %201 = vst [vmem:[#allocation2 + $0x48] sm:$0xff] %v5957_v0  ;;  %v5411_v9 = vld [vmem:[#allocation9 + $0x40] sm:$0xff]   ;;  %v5407_v12 = vld [vmem:[%s6989_s0 + $0x20] sm:$0xff]  }
  0xe1   :  { %203 = vst [vmem:[#allocation2 + $0x58] sm:$0xff] %v5957_v0  ;;  %204 = vst [vmem:[#allocation2 + $0x60] sm:$0xff] %v5957_v0  ;;  %5284 = vmatprep.subr.bf16.mxu0 %v345_v6  ;;  %v5412_v11 = vld [vmem:[#allocation9] sm:$0xff]   ;;  %4618 = vmatprep.subr.bf16.mxu1 %v5411_v9  ;;  %v5414_v14 = vld [vmem:[#allocation9 + $0x48] sm:$0xff]  }
  0xe2   :  { %206 = vst [vmem:[#allocation2 + $0x70] sm:$0xff] %v5957_v0  ;;  %207 = vst [vmem:[#allocation2 + $0x78] sm:$0xff] %v5957_v0  ;;  %5285 = vmatpush3.bf16.msra.mxu0 %v345_v6  ;;  %v5413_v13 = vld [vmem:[#allocation9 + $0xc0] sm:$0xff]   ;;  %4619 = vmatpush3.bf16.msra.mxu1 %v5412_v11  ;;  %v5416_v16 = vld [vmem:[#allocation9 + $0x8] sm:$0xff]  }
  0xe3   :  { %209 = vst [vmem:[#allocation2 + $0x88] sm:$0xff] %v5957_v0  ;;  %210 = vst [vmem:[#allocation2 + $0x90] sm:$0xff] %v5957_v0  ;;  %4682 = vmatprep.subr.bf16.mxu0 %v5413_v13  ;;  %v5415_v15 = vld [vmem:[#allocation9 + $0x80] sm:$0xff]   ;;  %4620 = vmatprep.subr.bf16.mxu1 %v5414_v14  ;;  %v5417_v17 = vld [vmem:[#allocation9 + $0xc8] sm:$0xff]  }
  0xe4   :  { %212 = vst [vmem:[#allocation2 + $0xa0] sm:$0xff] %v5957_v0  ;;  %213 = vst [vmem:[#allocation2 + $0xa8] sm:$0xff] %v5957_v0  ;;  %v5418_v18 = vld [vmem:[#allocation9 + $0x50] sm:$0xff]   ;;  %v5419_v19 = vld [vmem:[#allocation9 + $0x88] sm:$0xff]  }
  0xe5   :  { %215 = vst [vmem:[#allocation2 + $0xb8] sm:$0xff] %v5957_v0  ;;  %216 = vst [vmem:[#allocation2 + $0xc0] sm:$0xff] %v5957_v0  ;;  %5287 = vmatmul.mubr.msk.bf16.vlgmr.msra.gmra.mrb[0].mxu0 %vm315_vm2, %v5404_v7  ;;  %v5408_v20 = vld [vmem:[%s6989_s0 + $0x28] sm:$0xff]   ;;  %v5420_v21 = vld [vmem:[#allocation9 + $0x10] sm:$0xff]  }
  0xe6   :  { %218 = vst [vmem:[#allocation2 + $0xd0] sm:$0xff] %v5957_v0  ;;  %219 = vst [vmem:[#allocation2 + $0xd8] sm:$0xff] %v5957_v0  ;;  %5290 = vmatprep.mubr.msk.bf16.mxu0 %vm315_vm2, %v5405_v8  ;;  %4683 = vmatpush3.bf16.msra.mxu0 %v5415_v15  ;;  %v5409_v22 = vld [vmem:[%s6989_s0 + $0x30] sm:$0xff]   ;;  %v5421_v23 = vld [vmem:[#allocation9 + $0xd0] sm:$0xff]  }
  0xe7   :  { %220 = vst [vmem:[#allocation2 + $0xe0] sm:$0xff] %v5957_v0  ;;  %221 = vst [vmem:[#allocation2 + $0xe8] sm:$0xff] %v5957_v0  ;;  %4621 = vmatpush3.bf16.msra.mxu1 %v5416_v16  ;;  %4684 = vmatprep.subr.bf16.mxu0 %v5417_v17  ;;  %v5422_v24 = vld [vmem:[#allocation9 + $0x58] sm:$0xff]   ;;  %v5423_v25 = vld [vmem:[#allocation9 + $0x90] sm:$0xff]  }
  0xe8   :  { %222 = vst [vmem:[#allocation2 + $0xf0] sm:$0xff] %v5957_v0  ;;  %223 = vst [vmem:[#allocation2 + $0xf8] sm:$0xff] %v5957_v0  ;;  %4622 = vmatprep.subr.bf16.mxu1 %v5418_v18  ;;  %v5424_v26 = vld [vmem:[#allocation9 + $0x18] sm:$0xff]   ;;  %v5410_v27 = vld [vmem:[%s6989_s0 + $0x38] sm:$0xff]  }
  0xe9   :  { %224 = vst [vmem:[#allocation2 + $0x100] sm:$0xff] %v5957_v0  ;;  %225 = vst [vmem:[#allocation2 + $0x108] sm:$0xff] %v5957_v0  ;;  %v5425_v28 = vld [vmem:[#allocation9 + $0xd8] sm:$0xff]   ;;  %v5426_v29 = vld [vmem:[#allocation9 + $0x60] sm:$0xff]  }
  0xea   :  { %227 = vst [vmem:[#allocation2 + $0x118] sm:$0xff] %v5957_v0  ;;  %228 = vst [vmem:[#allocation2 + $0x120] sm:$0xff] %v5957_v0  ;;  %4685 = vmatpush3.bf16.msra.mxu0 %v5419_v19  ;;  %v5427_v30 = vld [vmem:[#allocation9 + $0x98] sm:$0xff]   ;;  %v5428_v31 = vld [vmem:[#allocation9 + $0x20] sm:$0xff]  }
  0xeb   :  { %230 = vst [vmem:[#allocation2 + $0x130] sm:$0xff] %v5957_v0  ;;  %231 = vst [vmem:[#allocation2 + $0x138] sm:$0xff] %v5957_v0  ;;  %4623 = vmatpush3.bf16.msra.mxu1 %v5420_v21  ;;  %4686 = vmatprep.subr.bf16.mxu0 %v5421_v23  ;;  %v5429_v32 = vld [vmem:[#allocation9 + $0xe0] sm:$0xff]   ;;  %v5430_v33 = vld [vmem:[#allocation9 + $0x68] sm:$0xff]  }
  0xec   :  { %233 = vst [vmem:[#allocation2 + $0x148] sm:$0xff] %v5957_v0  ;;  %234 = vst [vmem:[#allocation2 + $0x150] sm:$0xff] %v5957_v0  ;;  %4624 = vmatprep.subr.bf16.mxu1 %v5422_v24  ;;  %v5431_v34 = vld [vmem:[#allocation9 + $0xa0] sm:$0xff]   ;;  %v5432_v35 = vld [vmem:[#allocation9 + $0x28] sm:$0xff]  }
  0xed   :  { %236 = vst [vmem:[#allocation2 + $0x160] sm:$0xff] %v5957_v0  ;;  %237 = vst [vmem:[#allocation2 + $0x168] sm:$0xff] %v5957_v0  ;;  %5291 = vmatmul.mubr.msk.bf16.gmra.mrb[4].mxu0 %vm315_vm2, %v5406_v10  ;;  %v5433_v36 = vld [vmem:[#allocation9 + $0xe8] sm:$0xff]   ;;  %v5434_v37 = vld [vmem:[#allocation9 + $0x70] sm:$0xff]  }
  0xee   :  { %239 = vst [vmem:[#allocation2 + $0x178] sm:$0xff] %v5957_v0  ;;  %240 = vst [vmem:[#allocation2 + $0x180] sm:$0xff] %v5957_v0  ;;  %5294 = vmatprep.mubr.msk.bf16.mxu0 %vm315_vm2, %v5407_v12  ;;  %4687 = vmatpush3.bf16.msra.mxu0 %v5423_v25  ;;  %v5435_v38 = vld [vmem:[#allocation9 + $0xa8] sm:$0xff]   ;;  %v5436_v39 = vld [vmem:[#allocation9 + $0x30] sm:$0xff]  }
  0xef   :  { %242 = vst [vmem:[#allocation2 + $0x190] sm:$0xff] %v5957_v0  ;;  %243 = vst [vmem:[#allocation2 + $0x198] sm:$0xff] %v5957_v0  ;;  %4625 = vmatpush3.bf16.msra.mxu1 %v5424_v26  ;;  %4688 = vmatprep.subr.bf16.mxu0 %v5425_v28  ;;  %v5437_v40 = vld [vmem:[#allocation9 + $0xf0] sm:$0xff]   ;;  %v5438_v41 = vld [vmem:[#allocation9 + $0x78] sm:$0xff]  }
  0xf0   :  { %245 = vst [vmem:[#allocation2 + $0x1a8] sm:$0xff] %v5957_v0  ;;  %246 = vst [vmem:[#allocation2 + $0x1b0] sm:$0xff] %v5957_v0  ;;  %4626 = vmatprep.subr.bf16.mxu1 %v5426_v29  ;;  %v5439_v42 = vld [vmem:[#allocation9 + $0xb0] sm:$0xff]   ;;  %v5440_v43 = vld [vmem:[#allocation9 + $0x38] sm:$0xff]  }
  0xf1   :  { %248 = vst [vmem:[#allocation2 + $0x1c0] sm:$0xff] %v5957_v0  ;;  %249 = vst [vmem:[#allocation2 + $0x1c8] sm:$0xff] %v5957_v0  ;;  %v5441_v44 = vld [vmem:[#allocation9 + $0xf8] sm:$0xff]   ;;  %v5443_v46 = vld [vmem:[#allocation9 + $0x140] sm:$0xff]  }
  0xf2   :  { %250 = vst [vmem:[#allocation2 + $0x1d0] sm:$0xff] %v5957_v0  ;;  %251 = vst [vmem:[#allocation2 + $0x1d8] sm:$0xff] %v5957_v0  ;;  %4689 = vmatpush3.bf16.msra.mxu0 %v5427_v30  ;;  %v5442_v45 = vld [vmem:[#allocation9 + $0xb8] sm:$0xff]   ;;  %v5453_v47 = vld [vmem:[#allocation9 + $0x1c0] sm:$0xff]  }
  0xf3   :  { %4627 = vmatpush3.bf16.msra.mxu1 %v5428_v31  ;;  %4690 = vmatprep.subr.bf16.mxu0 %v5429_v32  ;;  %v6218_v48 = vld [vmem:[#allocation6] ss:$0 sm:$0xff]  ;;  %v6220_v50 = vld [vmem:[#allocation8] ss:$0 sm:$0xff]  ;;  %v6240_v3 = vld [vmem:[#allocation2] sm:$0xff] }
  0xf4   :  { %4628 = vmatprep.subr.bf16.mxu1 %v5430_v33  ;;  %v523_v19 = vld [vmem:[#allocation2 + $0x7] sm:$0xff]  ;;  %v5445_v29 = vld [vmem:[#allocation9 + $0x148] sm:$0xff]  }
  0xf5   :  { %5295 = vmatmul.mubr.msk.bf16.gmra.mrb[8].mxu0 %vm315_vm2, %v5408_v20  ;;  %v5444_v25 = vld [vmem:[#allocation9 + $0x100] sm:$0xff]  }
  0xf6   :  { %5298 = vmatprep.mubr.msk.bf16.mxu0 %vm315_vm2, %v5409_v22  ;;  %4691 = vmatpush3.bf16.msra.mxu0 %v5431_v34  ;;  %v555_v22 = vld [vmem:[#allocation2 + $0x9] sm:$0xff] }
  0xf7   :  { %4629 = vmatpush3.bf16.msra.mxu1 %v5432_v35  ;;  %4692 = vmatprep.subr.bf16.mxu0 %v5433_v36 }
  0xf8   :  { %4630 = vmatprep.subr.bf16.mxu1 %v5434_v37 }
  0xfa   :  { %4693 = vmatpush3.bf16.msra.mxu0 %v5435_v38 }
  0xfb   :  { %4631 = vmatpush3.bf16.msra.mxu1 %v5436_v39  ;;  %4694 = vmatprep.subr.bf16.mxu0 %v5437_v40  ;;  %v5454_v40 = vld [vmem:[#allocation9 + $0x180] sm:$0xff]  }
  0xfc   :  { %4632 = vmatprep.subr.bf16.mxu1 %v5438_v41 }
  0xfd   :  { %5299 = vmatmul.mubr.msk.bf16.gmra.mrb[12].mxu0 %vm315_vm2, %v5410_v27 }
  0xfe   :  { %4695 = vmatpush3.bf16.msra.mxu0 %v5439_v42 }
  0xff   :  { %4633 = vmatpush3.bf16.msra.mxu1 %v5440_v43  ;;  %4696 = vmatprep.subr.bf16.mxu0 %v5441_v44  ;;  %v5446_v43 = vld [vmem:[#allocation9 + $0x108] sm:$0xff]  }
 0x100   :  { %4746 = vmatprep.subr.bf16.mxu1 %v5443_v46 }
 0x102   :  { %4697 = vmatpush3.bf16.msra.mxu0 %v5442_v45 }
 0x103   :  { %4810 = vmatprep.subr.bf16.mxu0 %v5453_v47  ;;  %v5455_v47 = vld [vmem:[#allocation9 + $0x1c8] sm:$0xff]  }
 0x1b8   :  { %v5288_v49 = vpop.f32.mrb[0].mxu0 }
 0x1b9   :  { %v453_v51 = vmul.f32 %v5288_v49, %v6218_v48  ;;  %v381_v52 = vpop.f32.mrb[1].mxu0 }
 0x1ba   :  { %v451_v53 = vmul.f32 %v6218_v48, %v381_v52  ;;  %v5289_v54 = vpop.f32.mrb[2].mxu0 }
 0x1bb   :  { %v476_v55 = vadd.f32 %v6220_v50, %v453_v51  ;;  %v454_v56 = vmul.f32 %v5289_v54, %v6218_v48  ;;  %v384_v57 = vpop.f32.mrb[3].mxu0 }
 0x1bc   :  { %v474_v58 = vadd.f32 %v6220_v50, %v451_v53  ;;  %v452_v59 = vmul.f32 %v6218_v48, %v384_v57  ;;  %v5447_v53 = vld [vmem:[#allocation9 + $0x150] sm:$0xff]  }
 0x1bd   :  { %v6228_v60 = vmax.f32 %v476_v55, 0.0  ;;  %v477_v61 = vadd.f32 %v6220_v50, %v454_v56 }
 0x1be   :  { %v6231_v62 = vmax.f32 %v474_v58, 0.0  ;;  %v475_v63 = vadd.f32 %v6220_v50, %v452_v59 }
 0x1bf   :  { %509 = vst [vmem:[#allocation2 + $0x50] sm:$0xff] %v6228_v60  ;;  %v6235_v0 = vmax.f32 %v477_v61, 0.0 }
 0x1c0   :  { %507 = vst [vmem:[#allocation2 + $0x20] sm:$0xff] %v6231_v62  ;;  %v6238_v1 = vmax.f32 %v475_v63, 0.0  ;;  %v5292_v2 = vpop.f32.mrb[4].mxu0  ;;  %v669_v4 = vpack.c.bf16 %v6231_v62, %v6240_v3 }
 0x1c1   :  { %510 = vst [vmem:[#allocation2 + $0x68] sm:$0xff] %v6235_v0  ;;  %v457_v5 = vmul.f32 %v5292_v2, %v6218_v48  ;;  %v397_v6 = vpop.f32.mrb[5].mxu0  ;;  %v681_v7 = vpack.c.bf16 %v6235_v0, %v6228_v60  ;;  %v5448_v2 = vld [vmem:[#allocation9 + $0x110] sm:$0xff]  }
 0x1c2   :  { %508 = vst [vmem:[#allocation2 + $0x38] sm:$0xff] %v6238_v1  ;;  %v455_v8 = vmul.f32 %v6218_v48, %v397_v6  ;;  %v5293_v9 = vpop.f32.mrb[6].mxu0  ;;  %1348 = vmatprep.mubr.bf16.mxu1 %v669_v4  ;;  %v6252_v10 = vpack.c.bf16 %v6228_v60, %v6238_v1  ;;  %v672_v11 = vpack.c.bf16 %v6238_v1, %v6231_v62  ;;  %v5479_v62 = vld [vmem:[#allocation9 + $0x220] sm:$0xff]  }
 0x1c3   :  { %v480_v12 = vadd.f32 %v6220_v50, %v457_v5  ;;  %v458_v13 = vmul.f32 %v5293_v9, %v6218_v48  ;;  %v400_v14 = vpop.f32.mrb[7].mxu0  ;;  %v5457_v9 = vld [vmem:[#allocation9 + $0x188] sm:$0xff]  }
 0x1c4   :  { %v478_v15 = vadd.f32 %v6220_v50, %v455_v8  ;;  %v456_v16 = vmul.f32 %v6218_v48, %v400_v14  ;;  %v5449_v8 = vld [vmem:[#allocation9 + $0x158] sm:$0xff]  }
 0x1c5   :  { %v6260_v17 = vmax.f32 %v480_v12, 0.0  ;;  %v481_v18 = vadd.f32 %v6220_v50, %v458_v13  ;;  %v5459_v12 = vld [vmem:[#allocation9 + $0x1d0] sm:$0xff]  }
 0x1c6   :  { %v6263_v20 = vmax.f32 %v478_v15, 0.0  ;;  %v479_v21 = vadd.f32 %v6220_v50, %v456_v16  ;;  %v573_v41 = vld [vmem:[#allocation2 + $0x4f] sm:$0xff] }
 0x1c7   :  { %513 = vst [vmem:[#allocation2 + $0xb0] sm:$0xff] %v6260_v17  ;;  %v6267_v23 = vmax.f32 %v481_v18, 0.0  ;;  %v524_v24 = vld [vmem:[#allocation2 + $0x1f] sm:$0xff]  ;;  %v6316_v13 = vld [vmem:[#allocation2 + $0x51] sm:$0xff] }
 0x1c8   :  { %v6269_v26 = vld [vmem:[#allocation2 + $0x21] sm:$0xff]  ;;  %511 = vst [vmem:[#allocation2 + $0x80] sm:$0xff] %v6263_v20  ;;  %v6272_v27 = vmax.f32 %v479_v21, 0.0  ;;  %v668_v28 = vpack.c.bf16 %v524_v24, %v523_v19  ;;  %v5296_v30 = vpop.f32.mrb[8].mxu0  ;;  %v6276_v31 = vpack.c.bf16 %v6263_v20, %v6235_v0 }
 0x1c9   :  { %514 = vst [vmem:[#allocation2 + $0xc8] sm:$0xff] %v6267_v23  ;;  %v572_v32 = vld [vmem:[#allocation2 + $0x37] sm:$0xff]  ;;  %v6279_v33 = vld [vmem:[#allocation2 + $0x67] sm:$0xff]  ;;  %v461_v34 = vmul.f32 %v5296_v30, %v6218_v48  ;;  %v413_v35 = vpop.f32.mrb[9].mxu0  ;;  %v670_v37 = vpack.c.bf16 %v6269_v26, %v555_v22  ;;  %v699_v57 = vpack.c.bf16 %v6267_v23, %v6260_v17  ;;  %v702_v60 = vpack.c.bf16 %v6240_v3, %v6267_v23 }
 0x1ca   :  { %512 = vst [vmem:[#allocation2 + $0x98] sm:$0xff] %v6272_v27  ;;  %1349 = vmatmul.mubr.bf16.vlgmr.msra.gmra.mrb[0].mxu1 %v668_v28  ;;  %v671_v36 = vpack.c.bf16 %v572_v32, %v524_v24  ;;  %v459_v38 = vmul.f32 %v6218_v48, %v413_v35  ;;  %v5297_v39 = vpop.f32.mrb[10].mxu0  ;;  %v6290_v46 = vpack.c.bf16 %v6260_v17, %v6272_v27  ;;  %v6308_v63 = vld [vmem:[#allocation2 + $0x39] sm:$0xff]  ;;  %v5450_v28 = vld [vmem:[#allocation9 + $0x118] sm:$0xff]  }
 0x1cb   :  { %4747 = vmatpush3.bf16.msra.mxu1 %v5444_v25  ;;  %1356 = vmatprep.mubr.bf16.mxu1 %v6252_v10  ;;  %v484_v42 = vadd.f32 %v6220_v50, %v461_v34  ;;  %v462_v44 = vmul.f32 %v5297_v39, %v6218_v48  ;;  %v416_v45 = vpop.f32.mrb[11].mxu0  ;;  %v680_v49 = vpack.c.bf16 %v6279_v33, %v573_v41  ;;  %v5481_v0 = vld [vmem:[#allocation9 + $0x230] sm:$0xff]  }
 0x1cc   :  { %1445 = vmatprep.mubr.bf16.mxu0 %v671_v36  ;;  %4748 = vmatprep.subr.bf16.mxu1 %v5445_v29  ;;  %v482_v51 = vadd.f32 %v6220_v50, %v459_v38  ;;  %v460_v52 = vmul.f32 %v6218_v48, %v416_v45  ;;  %v690_v56 = vpack.c.bf16 %v6272_v27, %v6263_v20  ;;  %v5451_v36 = vld [vmem:[#allocation9 + $0x160] sm:$0xff]  }
 0x1cd   :  { %1446 = vmatmul.mubr.bf16.vlgmr.msra.gmra.mrb[16].mxu0 %v670_v37  ;;  %v6295_v54 = vmax.f32 %v484_v42, 0.0  ;;  %v485_v55 = vadd.f32 %v6220_v50, %v462_v44  ;;  %v6310_v4 = vpack.c.bf16 %v573_v41, %v572_v32  ;;  %v6324_v19 = vpack.c.bf16 %v6316_v13, %v6308_v63  ;;  %v5460_v37 = vld [vmem:[#allocation9 + $0x190] sm:$0xff]   ;;  %v5452_v45 = vld [vmem:[#allocation9 + $0x120] sm:$0xff]  }
 0x1ce   :  { %1453 = vmatprep.mubr.bf16.mxu0 %v680_v49  ;;  %v6302_v58 = vmax.f32 %v482_v51, 0.0  ;;  %v483_v59 = vadd.f32 %v6220_v50, %v460_v52  ;;  %4811 = vmatpush3.bf16.msra.mxu0 %v5454_v40  ;;  %v5461_v40 = vld [vmem:[#allocation9 + $0x1d8] sm:$0xff]   ;;  %v5456_v52 = vld [vmem:[#allocation9 + $0x168] sm:$0xff]  }
 0x1cf   :  { %517 = vst [vmem:[#allocation2 + $0x140] sm:$0xff] %v6295_v54  ;;  %4749 = vmatpush3.bf16.msra.mxu1 %v5446_v43  ;;  %v6306_v61 = vmax.f32 %v485_v55, 0.0  ;;  %4812 = vmatprep.subr.bf16.mxu0 %v5455_v47  ;;  %v575_v16 = vld [vmem:[#allocation2 + $0x7f] sm:$0xff]  ;;  %v577_v55 = vld [vmem:[#allocation2 + $0xaf] sm:$0xff] }
 0x1d0   :  { %515 = vst [vmem:[#allocation2 + $0x110] sm:$0xff] %v6302_v58  ;;  %v6313_v5 = vmax.f32 %v483_v59, 0.0  ;;  %v5300_v6 = vpop.f32.mrb[12].mxu0  ;;  %4750 = vmatprep.subr.bf16.mxu1 %v5447_v53  ;;  %v6354_v47 = vpack.c.bf16 %v575_v16, %v6279_v33  ;;  %v6356_v49 = vld [vmem:[#allocation2 + $0x81] sm:$0xff]  ;;  %v5465_v33 = vld [vmem:[#allocation9 + $0x1e0] sm:$0xff]  }
 0x1d1   :  { %518 = vst [vmem:[#allocation2 + $0x158] sm:$0xff] %v6306_v61  ;;  %v465_v14 = vmul.f32 %v5300_v6, %v6218_v48  ;;  %v429_v15 = vpop.f32.mrb[13].mxu0  ;;  %v6319_v18 = vld [vmem:[#allocation2 + $0x97] sm:$0xff]  ;;  %v717_v42 = vpack.c.bf16 %v6306_v61, %v6295_v54  ;;  %v5463_v53 = vld [vmem:[#allocation9 + $0x198] sm:$0xff]  }
 0x1d2   :  { %1357 = vmatmul.mubr.bf16.gmra.mrb[4].mxu1 %v6310_v4  ;;  %516 = vst [vmem:[#allocation2 + $0x128] sm:$0xff] %v6313_v5  ;;  %v463_v21 = vmul.f32 %v6218_v48, %v429_v15  ;;  %v689_v22 = vpack.c.bf16 %v6319_v18, %v575_v16  ;;  %v5301_v24 = vpop.f32.mrb[14].mxu0  ;;  %v6334_v32 = vpack.c.bf16 %v6295_v54, %v6313_v5  ;;  %v6364_v59 = vld [vmem:[#allocation2 + $0xc7] sm:$0xff]  ;;  %v5462_v16 = vld [vmem:[#allocation9 + $0x170] sm:$0xff]   ;;  %v635_v54 = vld [vmem:[#allocation2 + $0x1cf] sm:$0xff] }
 0x1d3   :  { %1364 = vmatprep.mubr.bf16.mxu1 %v6276_v31  ;;  %v488_v25 = vadd.f32 %v6220_v50, %v465_v14  ;;  %4751 = vmatpush3.bf16.msra.mxu1 %v5448_v2  ;;  %v466_v29 = vmul.f32 %v5301_v24, %v6218_v48  ;;  %v432_v30 = vpop.f32.mrb[15].mxu0  ;;  %v708_v41 = vpack.c.bf16 %v6313_v5, %v6302_v58  ;;  %v6370_v6 = vld [vmem:[#allocation2 + $0x69] sm:$0xff]  ;;  %v5464_v24 = vld [vmem:[#allocation9 + $0x130] sm:$0xff]   ;;  %v5476_v2 = vld [vmem:[#allocation9 + $0x208] sm:$0xff]  }
 0x1d4   :  { %v486_v34 = vadd.f32 %v6220_v50, %v463_v21  ;;  %4752 = vmatprep.subr.bf16.mxu1 %v5449_v8  ;;  %v464_v35 = vmul.f32 %v6218_v48, %v432_v30  ;;  %4813 = vmatpush3.bf16.msra.mxu0 %v5457_v9  ;;  %v6380_v9 = vpack.c.bf16 %v6356_v49, %v6370_v6  ;;  %v5466_v21 = vld [vmem:[#allocation9 + $0x1a0] sm:$0xff]   ;;  %v659_v5 = vld [vmem:[#allocation2 + $0xe1] sm:$0xff] }
 0x1d5   :  { %1454 = vmatmul.mubr.bf16.gmra.mrb[20].mxu0 %v6324_v19  ;;  %v6339_v38 = vmax.f32 %v488_v25, 0.0  ;;  %v489_v39 = vadd.f32 %v6220_v50, %v466_v29  ;;  %4814 = vmatprep.subr.bf16.mxu0 %v5459_v12  ;;  %v5458_v12 = vld [vmem:[#allocation9 + $0x128] sm:$0xff]   ;;  %v698_v15 = vpack.c.bf16 %v6364_v59, %v577_v55  ;;  %v5468_v29 = vld [vmem:[#allocation9 + $0x178] sm:$0xff]   ;;  %v6387_v30 = vpack.c.bf16 %v577_v55, %v6319_v18 }
 0x1d6   :  { %v6346_v43 = vmax.f32 %v486_v34, 0.0  ;;  %1461 = vmatprep.mubr.bf16.mxu0 %v689_v22  ;;  %v487_v48 = vadd.f32 %v6220_v50, %v464_v35  ;;  %v5467_v22 = vld [vmem:[#allocation9 + $0x1e8] sm:$0xff]   ;;  %v5473_v55 = vld [vmem:[#allocation9 + $0x1f8] sm:$0xff]  }
 0x1d7   :  { %521 = vst [vmem:[#allocation2 + $0x1a0] sm:$0xff] %v6339_v38  ;;  %4753 = vmatpush3.bf16.msra.mxu1 %v5450_v28  ;;  %v6350_v44 = vmax.f32 %v489_v39, 0.0  ;;  %v579_v25 = vld [vmem:[#allocation2 + $0x10f] sm:$0xff]  ;;  %v6389_v34 = vld [vmem:[#allocation2 + $0x99] sm:$0xff] }
 0x1d8   :  { %519 = vst [vmem:[#allocation2 + $0x170] sm:$0xff] %v6346_v43  ;;  %v6358_v51 = vmax.f32 %v487_v48, 0.0  ;;  %4754 = vmatprep.subr.bf16.mxu1 %v5451_v36  ;;  %v6362_v50 = vpack.c.bf16 %v6346_v43, %v6306_v61  ;;  %4815 = vmatpush3.bf16.msra.mxu0 %v5460_v37  ;;  %v6391_v35 = vld [vmem:[#allocation2 + $0xb1] sm:$0xff]  ;;  %v705_v37 = vpack.c.bf16 %v6302_v58, %v6240_v3  ;;  %v5471_v39 = vld [vmem:[#allocation9 + $0x1f0] sm:$0xff]   ;;  %v610_v1 = vld [vmem:[#allocation2 + $0xc9] sm:$0xff] }
 0x1d9   :  { %522 = vst [vmem:[#allocation2 + $0x1b8] sm:$0xff] %v6350_v44  ;;  %4816 = vmatprep.subr.bf16.mxu0 %v5461_v40  ;;  %v580_v28 = vld [vmem:[#allocation2 + $0x127] sm:$0xff]  ;;  %v5469_v36 = vld [vmem:[#allocation9 + $0x1a8] sm:$0xff]   ;;  %v6398_v48 = vpack.c.bf16 %v6391_v35, %v6389_v34  ;;  %v7003_v58 = vpack.c.bf16 %v6350_v44, %v6339_v38 }
 0x1da   :  { %1365 = vmatmul.mubr.bf16.gmra.mrb[8].mxu1 %v6354_v47  ;;  %520 = vst [vmem:[#allocation2 + $0x188] sm:$0xff] %v6358_v51  ;;  %v6375_v8 = vpack.c.bf16 %v6339_v38, %v6358_v51  ;;  %v726_v14 = vpack.c.bf16 %v6358_v51, %v6346_v43  ;;  %v707_v40 = vpack.c.bf16 %v580_v28, %v579_v25  ;;  %v531_v18 = vld [vmem:[#allocation2 + $0xf7] sm:$0xff]  ;;  %v5487_v43 = vld [vmem:[#allocation14 + $0x50] sm:$0xff]  }
 0x1db   :  { %1372 = vmatprep.mubr.bf16.mxu1 %v6290_v46  ;;  %4755 = vmatpush3.bf16.msra.mxu1 %v5452_v45  ;;  %v5470_v45 = vld [vmem:[#allocation9 + $0x138] sm:$0xff]   ;;  %v5484_v38 = vld [vmem:[#allocation14] sm:$0xff]  }
 0x1dc   :  { %4756 = vmatprep.subr.bf16.mxu1 %v5456_v52  ;;  %4817 = vmatpush3.bf16.msra.mxu0 %v5463_v53  ;;  %v5472_v52 = vld [vmem:[#allocation9 + $0x1b0] sm:$0xff]   ;;  %v5475_v53 = vld [vmem:[#allocation9 + $0x200] sm:$0xff]  }
 0x1dd   :  { %1462 = vmatmul.mubr.bf16.gmra.mrb[24].mxu0 %v6380_v9  ;;  %4818 = vmatprep.subr.bf16.mxu0 %v5465_v33  ;;  %v704_v33 = vpack.c.bf16 %v579_v25, %v531_v18  ;;  %v5491_v51 = vld [vmem:[#allocation14 + $0x60] sm:$0xff]  }
 0x1de   :  { %1469 = vmatprep.mubr.bf16.mxu0 %v698_v15  ;;  %v6401_v15 = vld [vmem:[#allocation2 + $0x111] sm:$0xff] }
 0x1df   :  { %4757 = vmatpush3.bf16.msra.mxu1 %v5458_v12  ;;  %v563_v12 = vld [vmem:[#allocation2 + $0xf9] sm:$0xff] }
 0x1e0   :  { %4758 = vmatprep.subr.bf16.mxu1 %v5462_v16  ;;  %4819 = vmatpush3.bf16.msra.mxu0 %v5466_v21  ;;  %v5474_v16 = vld [vmem:[#allocation9 + $0x1b8] sm:$0xff]   ;;  %v618_v23 = vld [vmem:[#allocation2 + $0x1b9] sm:$0xff] }
 0x1e1   :  { %4820 = vmatprep.subr.bf16.mxu0 %v5467_v22  ;;  %v581_v21 = vld [vmem:[#allocation2 + $0x13f] sm:$0xff]  ;;  %v582_v22 = vld [vmem:[#allocation2 + $0x157] sm:$0xff]  ;;  %v584_v25 = vld [vmem:[#allocation2 + $0x187] sm:$0xff] }
 0x1e2   :  { %1373 = vmatmul.mubr.bf16.gmra.mrb[12].mxu1 %v6387_v30 }
 0x1e3   :  { %1380 = vmatprep.mubr.bf16.mxu1 %v705_v37  ;;  %4759 = vmatpush3.bf16.msra.mxu1 %v5464_v24  ;;  %v706_v24 = vpack.c.bf16 %v6401_v15, %v563_v12  ;;  %v6407_v37 = vld [vmem:[#allocation2 + $0x129] sm:$0xff]  ;;  %v6424_v12 = vld [vmem:[#allocation2 + $0x1b7] sm:$0xff] }
 0x1e4   :  { %4760 = vmatprep.subr.bf16.mxu1 %v5468_v29  ;;  %4821 = vmatpush3.bf16.msra.mxu0 %v5469_v36  ;;  %v716_v29 = vpack.c.bf16 %v582_v22, %v581_v21  ;;  %v6405_v36 = vpack.c.bf16 %v581_v21, %v580_v28  ;;  %v6420_v28 = vld [vmem:[#allocation2 + $0x159] sm:$0xff]  ;;  %v737_v61 = vpack.c.bf16 %v635_v54, %v6424_v12 }
 0x1e5   :  { %1470 = vmatmul.mubr.bf16.gmra.mrb[28].mxu0 %v6398_v48  ;;  %4822 = vmatprep.subr.bf16.mxu0 %v5471_v39  ;;  %v6409_v39 = vld [vmem:[#allocation2 + $0x141] sm:$0xff] }
 0x1e6   :  { %1477 = vmatprep.mubr.bf16.mxu0 %v707_v40  ;;  %v583_v40 = vld [vmem:[#allocation2 + $0x16f] sm:$0xff]  ;;  %v718_v27 = vpack.c.bf16 %v6420_v28, %v6409_v39 }
 0x1e7   :  { %4761 = vmatpush3.bf16.msra.mxu1 %v5470_v45  ;;  %v725_v18 = vpack.c.bf16 %v584_v25, %v583_v40  ;;  %v6415_v45 = vpack.c.bf16 %v6409_v39, %v6407_v37  ;;  %v5501_v39 = vld [vmem:[#allocation14 + $0xd8] sm:$0xff]  }
 0x1e8   :  { %4823 = vmatpush3.bf16.msra.mxu0 %v5472_v52  ;;  %5302 = vmatprep.subr.bf16.mxu1 %v5475_v53  ;;  %v6418_v52 = vpack.c.bf16 %v583_v40, %v582_v22  ;;  %v673_v40 = vpack.c.bf16 %v6308_v63, %v6269_v26  ;;  %v5477_v26 = vld [vmem:[#allocation9 + $0x210] sm:$0xff]   ;;  %v5478_v63 = vld [vmem:[#allocation9 + $0x218] sm:$0xff]  }
 0x1e9   :  { %4824 = vmatprep.subr.bf16.mxu0 %v5473_v55  ;;  %v6422_v55 = vld [vmem:[#allocation2 + $0x171] sm:$0xff] }
 0x1ea   :  { %1381 = vmatmul.mubr.bf16.gmra.mrb[16].mxu1 %v704_v33  ;;  %v585_v33 = vld [vmem:[#allocation2 + $0x19f] sm:$0xff] }
 0x1eb   :  { %1388 = vmatprep.mubr.bf16.mxu1 %v6334_v32  ;;  %v734_v21 = vpack.c.bf16 %v6424_v12, %v585_v33  ;;  %v6434_v22 = vpack.c.bf16 %v585_v33, %v584_v25  ;;  %v682_v25 = vpack.c.bf16 %v6370_v6, %v6316_v13  ;;  %v703_v13 = vpack.c.bf16 %v659_v5, %v610_v1  ;;  %v5495_v6 = vld [vmem:[#allocation14 + $0xc8] sm:$0xff]  }
 0x1ec   :  { %4825 = vmatpush3.bf16.msra.mxu0 %v5474_v16  ;;  %v6430_v16 = vpack.c.bf16 %v6422_v55, %v6420_v28  ;;  %v5503_v28 = vld [vmem:[#allocation14 + $0x98] sm:$0xff]  }
 0x1ed   :  { %1478 = vmatmul.mubr.bf16.gmra.mrb[32].mxu0 %v706_v24  ;;  %v569_v24 = vld [vmem:[#allocation2 + $0x189] sm:$0xff] }
 0x1ee   :  { %1485 = vmatprep.mubr.bf16.mxu0 %v716_v29  ;;  %v6436_v29 = vld [vmem:[#allocation2 + $0x1a1] sm:$0xff]  ;;  %v727_v17 = vpack.c.bf16 %v569_v24, %v6422_v55 }
 0x1f2   :  { %1389 = vmatmul.mubr.bf16.gmra.mrb[20].mxu1 %v6405_v36 }
 0x1f3   :  { %1396 = vmatprep.mubr.bf16.mxu1 %v6362_v50 }
 0x1f5   :  { %1486 = vmatmul.mubr.bf16.gmra.mrb[36].mxu0 %v6415_v45 }
 0x1f6   :  { %1493 = vmatprep.mubr.bf16.mxu0 %v725_v18  ;;  %v6442_v18 = vpack.c.bf16 %v6436_v29, %v569_v24 }
 0x1fa   :  { %1397 = vmatmul.mubr.bf16.gmra.mrb[24].mxu1 %v6418_v52 }
 0x1fb   :  { %1404 = vmatprep.mubr.bf16.mxu1 %v6375_v8 }
 0x1fd   :  { %1494 = vmatmul.mubr.bf16.gmra.mrb[40].mxu0 %v6430_v16 }
 0x1fe   :  { %1501 = vmatprep.mubr.bf16.mxu0 %v734_v21 }
 0x202   :  { %1405 = vmatmul.mubr.bf16.gmra.mrb[28].mxu1 %v6434_v22 }
 0x203   :  { %1542 = vmatprep.mubr.bf16.mxu1 %v673_v40 }
 0x205   :  { %1502 = vmatmul.mubr.bf16.gmra.mrb[44].mxu0 %v6442_v18 }
 0x206   :  { %1639 = vmatprep.mubr.bf16.mxu0 %v6252_v10  ;;  %v691_v10 = vpack.c.bf16 %v6389_v34, %v6356_v49  ;;  %v5490_v49 = vld [vmem:[#allocation14 + $0x18] sm:$0xff]  }
 0x20a   :  { %1543 = vmatmul.mubr.bf16.vlgmr.msra.gmra.mrb[32].mxu1 %v672_v11  ;;  %v5480_v11 = vld [vmem:[#allocation9 + $0x228] sm:$0xff]  }
 0x20b   :  { %5303 = vmatpush3.bf16.msra.mxu1 %v5475_v53  ;;  %1550 = vmatprep.mubr.bf16.mxu1 %v682_v25 }
 0x20c   :  { %5304 = vmatprep.subr.bf16.mxu1 %v5476_v2 }
 0x20d   :  { %1640 = vmatmul.mubr.bf16.vlgmr.msra.gmra.mrb[48].mxu0 %v6310_v4  ;;  %v709_v4 = vpack.c.bf16 %v6407_v37, %v6401_v15 }
 0x20e   :  { %1647 = vmatprep.mubr.bf16.mxu0 %v6276_v31  ;;  %v700_v31 = vpack.c.bf16 %v610_v1, %v6391_v35  ;;  %v5500_v35 = vld [vmem:[#allocation14 + $0x90] sm:$0xff]  }
 0x20f   :  { %5305 = vmatpush3.bf16.msra.mxu1 %v5476_v2  ;;  %v5494_v2 = vld [vmem:[#allocation14 + $0x80] sm:$0xff]  }
 0x210   :  { %5306 = vmatprep.subr.bf16.mxu1 %v5477_v26 }
 0x212   :  { %1551 = vmatmul.mubr.bf16.gmra.mrb[36].mxu1 %v681_v7  ;;  %v627_v7 = vld [vmem:[#allocation2 + $0xdf] sm:$0xff] }
 0x213   :  { %1558 = vmatprep.mubr.bf16.mxu1 %v691_v10  ;;  %5307 = vmatpush3.bf16.msra.mxu1 %v5477_v26  ;;  %v701_v20 = vpack.c.bf16 %v627_v7, %v6364_v59  ;;  %v5493_v59 = vld [vmem:[#allocation14 + $0xc0] sm:$0xff]  }
 0x214   :  { %5308 = vmatprep.subr.bf16.mxu1 %v5478_v63 }
 0x215   :  { %1648 = vmatmul.mubr.bf16.gmra.mrb[52].mxu0 %v6354_v47  ;;  %v5489_v47 = vld [vmem:[#allocation14 + $0x58] sm:$0xff]  }
 0x216   :  { %1655 = vmatprep.mubr.bf16.mxu0 %v6290_v46  ;;  %v5482_v46 = vld [vmem:[#allocation9 + $0x238] sm:$0xff]  }
 0x217   :  { %5309 = vmatpush3.bf16.msra.mxu1 %v5478_v63 }
 0x218   :  { %5310 = vmatprep.subr.bf16.mxu1 %v5479_v62 }
 0x21a   :  { %1559 = vmatmul.mubr.bf16.gmra.mrb[40].mxu1 %v690_v56  ;;  %v736_v56 = vpack.c.bf16 %v618_v23, %v6436_v29  ;;  %v5506_v29 = vld [vmem:[#allocation14 + $0xa0] sm:$0xff]  }
 0x21b   :  { %1566 = vmatprep.mubr.bf16.mxu1 %v700_v31  ;;  %5311 = vmatpush3.bf16.msra.mxu1 %v5479_v62  ;;  %v5507_v62 = vld [vmem:[#allocation14 + $0xe8] sm:$0xff]   ;;  %v5502_v31 = vld [vmem:[#allocation14 + $0x70] sm:$0xff]  }
 0x21c   :  { %5312 = vmatprep.subr.bf16.mxu1 %v5480_v11 }
 0x21d   :  { %1656 = vmatmul.mubr.bf16.gmra.mrb[56].mxu0 %v6387_v30  ;;  %v5499_v30 = vld [vmem:[#allocation14 + $0xd0] sm:$0xff]  }
 0x21e   :  { %1663 = vmatprep.mubr.bf16.mxu0 %v702_v60  ;;  %v5504_v60 = vld [vmem:[#allocation14 + $0x30] sm:$0xff]  }
 0x21f   :  { %5313 = vmatpush3.bf16.msra.mxu1 %v5480_v11 }
 0x220   :  { %5314 = vmatprep.subr.bf16.mxu1 %v5481_v0 }
 0x222   :  { %1567 = vmatmul.mubr.bf16.gmra.mrb[44].mxu1 %v699_v57  ;;  %v738_v57 = vpack.c.bf16 %v6240_v3, %v6350_v44  ;;  %v667_v3 = vld [vmem:[#allocation2 + $0x1d1] sm:$0xff]  ;;  %v5488_v44 = vld [vmem:[#allocation14 + $0x10] sm:$0xff]  }
 0x223   :  { %1574 = vmatprep.mubr.bf16.mxu1 %v709_v4  ;;  %5315 = vmatpush3.bf16.msra.mxu1 %v5481_v0  ;;  %v5509_v0 = vld [vmem:[#allocation14 + $0xa8] sm:$0xff]  }
 0x224   :  { %5316 = vmatprep.subr.bf16.mxu1 %v5482_v46 }
 0x225   :  { %1664 = vmatmul.mubr.bf16.gmra.mrb[60].mxu0 %v701_v20 }
 0x226   :  { %1671 = vmatprep.mubr.bf16.mxu0 %v6334_v32  ;;  %v739_v32 = vpack.c.bf16 %v667_v3, %v618_v23 }
 0x227   :  { %5317 = vmatpush3.bf16.msra.mxu1 %v5482_v46 }
 0x228   :  { %4954 = vmatprep.subr.bf16.mxu1 %v5493_v59 }
 0x22a   :  { %1575 = vmatmul.mubr.bf16.gmra.mrb[48].mxu1 %v708_v41  ;;  %v5485_v41 = vld [vmem:[#allocation14 + $0x48] sm:$0xff]  }
 0x22b   :  { %1582 = vmatprep.mubr.bf16.mxu1 %v718_v27 }
 0x22d   :  { %1672 = vmatmul.mubr.bf16.gmra.mrb[64].mxu0 %v6405_v36 }
 0x22e   :  { %1679 = vmatprep.mubr.bf16.mxu0 %v6362_v50  ;;  %v5492_v50 = vld [vmem:[#allocation14 + $0x20] sm:$0xff]  }
 0x232   :  { %1583 = vmatmul.mubr.bf16.gmra.mrb[52].mxu1 %v717_v42  ;;  %v5486_v42 = vld [vmem:[#allocation14 + $0x8] sm:$0xff]  }
 0x233   :  { %1590 = vmatprep.mubr.bf16.mxu1 %v727_v17  ;;  %v5511_v17 = vld [vmem:[#allocation14 + $0xf0] sm:$0xff]  }
 0x235   :  { %1680 = vmatmul.mubr.bf16.gmra.mrb[68].mxu0 %v6418_v52 }
 0x236   :  { %1687 = vmatprep.mubr.bf16.mxu0 %v6375_v8  ;;  %v5497_v8 = vld [vmem:[#allocation14 + $0x88] sm:$0xff]  }
 0x23a   :  { %1591 = vmatmul.mubr.bf16.gmra.mrb[56].mxu1 %v726_v14  ;;  %v5498_v14 = vld [vmem:[#allocation14 + $0x28] sm:$0xff]  }
 0x23b   :  { %1598 = vmatprep.mubr.bf16.mxu1 %v736_v56  ;;  %v5508_v56 = vld [vmem:[#allocation14 + $0x78] sm:$0xff]  }
 0x23d   :  { %1688 = vmatmul.mubr.bf16.gmra.mrb[72].mxu0 %v6434_v22  ;;  %v5505_v22 = vld [vmem:[#allocation14 + $0xe0] sm:$0xff]  }
 0x23e   :  { %1695 = vmatprep.mubr.bf16.mxu0 %v738_v57  ;;  %v5512_v57 = vld [vmem:[#allocation14 + $0xb0] sm:$0xff]  }
 0x242   :  { %1599 = vmatmul.mubr.bf16.gmra.mrb[60].mxu1 %v7003_v58 }
 0x243   :  { %5318 = vmatprep.mubr.bf16.mxu1 %v6324_v19  ;;  %v5483_v19 = vld [vmem:[#allocation14 + $0x40] sm:$0xff]  }
 0x244   :  { %4890 = vmatprep.subr.bf16.mxu0 %v5483_v19  ;;  %v5513_v19 = vld [vmem:[#allocation14 + $0xf8] sm:$0xff]  }
 0x245   :  { %1696 = vmatmul.mubr.bf16.gmra.mrb[76].mxu0 %v737_v61  ;;  %v5510_v61 = vld [vmem:[#allocation14 + $0x38] sm:$0xff]  }
 0x246   :  { %4891 = vmatpush3.bf16.msra.mxu0 %v5484_v38 }
 0x247   :  { %4892 = vmatprep.subr.bf16.mxu0 %v5485_v41 }
 0x24a   :  { %5319 = vmatmul.mubr.bf16.vlgmr.msra.gmra.mrb[64].mxu1 %v6380_v9  ;;  %4893 = vmatpush3.bf16.msra.mxu0 %v5486_v42  ;;  %v5496_v9 = vld [vmem:[#allocation14 + $0x68] sm:$0xff]   ;;  %v5514_v42 = vld [vmem:[#allocation14 + $0xb8] sm:$0xff]  }
 0x24b   :  { %5322 = vmatprep.mubr.bf16.mxu1 %v6398_v48  ;;  %4894 = vmatprep.subr.bf16.mxu0 %v5487_v43 }
 0x24c   :  { %4955 = vmatpush3.bf16.msra.mxu1 %v5494_v2 }
 0x24d   :  { %4956 = vmatprep.subr.bf16.mxu1 %v5495_v6 }
 0x24e   :  { %4895 = vmatpush3.bf16.msra.mxu0 %v5488_v44 }
 0x24f   :  { %4896 = vmatprep.subr.bf16.mxu0 %v5489_v47 }
 0x250   :  { %4957 = vmatpush3.bf16.msra.mxu1 %v5497_v8 }
 0x251   :  { %4958 = vmatprep.subr.bf16.mxu1 %v5499_v30 }
 0x252   :  { %5323 = vmatmul.mubr.bf16.gmra.mrb[68].mxu1 %v703_v13  ;;  %4897 = vmatpush3.bf16.msra.mxu0 %v5490_v49 }
 0x253   :  { %5326 = vmatprep.mubr.bf16.mxu1 %v6415_v45  ;;  %4898 = vmatprep.subr.bf16.mxu0 %v5491_v51 }
 0x254   :  { %4959 = vmatpush3.bf16.msra.mxu1 %v5500_v35  ;;  %v5515_v35 = vld [vmem:[#allocation14 + $0x140] sm:$0xff]  }
 0x255   :  { %4960 = vmatprep.subr.bf16.mxu1 %v5501_v39 }
 0x256   :  { %4899 = vmatpush3.bf16.msra.mxu0 %v5492_v50 }
 0x257   :  { %4900 = vmatprep.subr.bf16.mxu0 %v5496_v9 }
 0x258   :  { %4961 = vmatpush3.bf16.msra.mxu1 %v5503_v28 }
 0x259   :  { %4962 = vmatprep.subr.bf16.mxu1 %v5505_v22 }
 0x25a   :  { %5327 = vmatmul.mubr.bf16.gmra.mrb[72].mxu1 %v6430_v16  ;;  %4901 = vmatpush3.bf16.msra.mxu0 %v5498_v14 }
 0x25b   :  { %5330 = vmatprep.mubr.bf16.mxu1 %v6442_v18  ;;  %4902 = vmatprep.subr.bf16.mxu0 %v5502_v31 }
 0x25c   :  { %4963 = vmatpush3.bf16.msra.mxu1 %v5506_v29 }
 0x25d   :  { %4964 = vmatprep.subr.bf16.mxu1 %v5507_v62 }
 0x25e   :  { %4903 = vmatpush3.bf16.msra.mxu0 %v5504_v60 }
 0x25f   :  { %4904 = vmatprep.subr.bf16.mxu0 %v5508_v56 }
 0x260   :  { %4965 = vmatpush3.bf16.msra.mxu1 %v5509_v0 }
 0x261   :  { %4966 = vmatprep.subr.bf16.mxu1 %v5511_v17 }
 0x262   :  { %5331 = vmatmul.mubr.bf16.gmra.mrb[76].mxu1 %v739_v32  ;;  %4905 = vmatpush3.bf16.msra.mxu0 %v5510_v61 }
 0x263   :  { %5018 = vmatprep.subr.bf16.mxu0 %v5515_v35 }
 0x264   :  { %4967 = vmatpush3.bf16.msra.mxu1 %v5512_v57 }
 0x265   :  { %4968 = vmatprep.subr.bf16.mxu1 %v5513_v19 }
 0x268   :  { %4969 = vmatpush3.bf16.msra.mxu1 %v5514_v42 }
 0x29d   :  { %v4634_v34 = vpop.f32.mrb[0].mxu1 }
 0x29e   :  { %v4635_v48 = vpop.f32.mrb[1].mxu1 }
 0x29f   :  { %v4636_v53 = vadd.f32 %v4635_v48, %v4634_v34  ;;  %v4637_v15 = vpop.f32.mrb[2].mxu1 }
 0x2a0   :  { %v4698_v36 = vpop.f32.mrb[16].mxu0  ;;  %v4638_v37 = vpop.f32.mrb[3].mxu1 }
 0x2a1   :  { %v4639_v45 = vadd.f32 %v4638_v37, %v4637_v15  ;;  %v4699_v52 = vpop.f32.mrb[17].mxu0 }
 0x2a2   :  { %v4700_v55 = vadd.f32 %v4699_v52, %v4698_v36  ;;  %v4701_v33 = vpop.f32.mrb[18].mxu0 }
 0x2a3   :  { %v4702_v12 = vpop.f32.mrb[19].mxu0 }
 0x2a4   :  { %v6504_v16 = vadd.f32 %v4700_v55, %v4636_v53  ;;  %v4703_v21 = vadd.f32 %v4702_v12, %v4701_v33 }
 0x2a5   :  { %v4640_v24 = vpop.f32.mrb[4].mxu1 }
 0x2a6   :  { %v6506_v40 = vadd.f32 %v4703_v21, %v4639_v45  ;;  %v4641_v18 = vpop.f32.mrb[5].mxu1 }
 0x2a7   :  { %v4642_v25 = vadd.f32 %v4641_v18, %v4640_v24  ;;  %v4643_v26 = vpop.f32.mrb[6].mxu1 }
 0x2a8   :  { %v4704_v63 = vpop.f32.mrb[20].mxu0  ;;  %v4644_v10 = vpop.f32.mrb[7].mxu1 }
 0x2a9   :  { %v4645_v1 = vadd.f32 %v4644_v10, %v4643_v26  ;;  %v4705_v11 = vpop.f32.mrb[21].mxu0 }
 0x2aa   :  { %v4706_v7 = vadd.f32 %v4705_v11, %v4704_v63  ;;  %v4707_v46 = vpop.f32.mrb[22].mxu0 }
 0x2ab   :  { %v4708_v4 = vpop.f32.mrb[23].mxu0 }
 0x2ac   :  { %v6508_v20 = vadd.f32 %v4706_v7, %v4642_v25  ;;  %v4709_v27 = vadd.f32 %v4708_v4, %v4707_v46 }
 0x2ad   :  { %v4646_v23 = vpop.f32.mrb[8].mxu1 }
 0x2ae   :  { %v6510_v54 = vadd.f32 %v4709_v27, %v4645_v1  ;;  %v4647_v58 = vpop.f32.mrb[9].mxu1 }
 0x2af   :  { %v4648_v5 = vadd.f32 %v4647_v58, %v4646_v23  ;;  %v4649_v13 = vpop.f32.mrb[10].mxu1 }
 0x2b0   :  { %v4710_v3 = vpop.f32.mrb[24].mxu0  ;;  %v4650_v32 = vpop.f32.mrb[11].mxu1 }
 0x2b1   :  { %v4651_v38 = vadd.f32 %v4650_v32, %v4649_v13  ;;  %v4711_v41 = vpop.f32.mrb[25].mxu0 }
 0x2b2   :  { %v4712_v43 = vadd.f32 %v4711_v41, %v4710_v3  ;;  %v4713_v44 = vpop.f32.mrb[26].mxu0 }
 0x2b3   :  { %v4714_v47 = vpop.f32.mrb[27].mxu0 }
 0x2b4   :  { %v6512_v49 = vadd.f32 %v4712_v43, %v4648_v5  ;;  %v4715_v51 = vadd.f32 %v4714_v47, %v4713_v44  ;;  %v5525_v47 = vld [vmem:[#allocation14 + $0x1c0] sm:$0xff]  }
 0x2b5   :  { %v4652_v50 = vpop.f32.mrb[12].mxu1  ;;  %5082 = vmatprep.subr.bf16.mxu1 %v5525_v47 }
 0x2b6   :  { %v6514_v59 = vadd.f32 %v4715_v51, %v4651_v38  ;;  %v4653_v2 = vpop.f32.mrb[13].mxu1 }
 0x2b7   :  { %v4654_v6 = vadd.f32 %v4653_v2, %v4652_v50  ;;  %v4655_v8 = vpop.f32.mrb[14].mxu1 }
 0x2b8   :  { %v4716_v9 = vpop.f32.mrb[28].mxu0  ;;  %v4656_v14 = vpop.f32.mrb[15].mxu1 }
 0x2b9   :  { %v4657_v30 = vadd.f32 %v4656_v14, %v4655_v8  ;;  %v4717_v34 = vpop.f32.mrb[29].mxu0 }
 0x2ba   :  { %v4718_v48 = vadd.f32 %v4717_v34, %v4716_v9  ;;  %v4719_v53 = vpop.f32.mrb[30].mxu0 }
 0x2bb   :  { %v4720_v15 = vpop.f32.mrb[31].mxu0 }
 0x2bc   :  { %v6516_v36 = vadd.f32 %v4718_v48, %v4654_v6  ;;  %v4721_v37 = vadd.f32 %v4720_v15, %v4719_v53 }
 0x2bd   :  { %v4658_v39 = vpop.f32.mrb[16].mxu1 }
 0x2be   :  { %v6518_v45 = vadd.f32 %v4721_v37, %v4657_v30  ;;  %v4659_v52 = vpop.f32.mrb[17].mxu1 }
 0x2bf   :  { %v4660_v28 = vadd.f32 %v4659_v52, %v4658_v39  ;;  %v4661_v55 = vpop.f32.mrb[18].mxu1 }
 0x2c0   :  { %v4722_v33 = vpop.f32.mrb[32].mxu0  ;;  %v4662_v12 = vpop.f32.mrb[19].mxu1 }
 0x2c1   :  { %v4663_v21 = vadd.f32 %v4662_v12, %v4661_v55  ;;  %v4723_v22 = vpop.f32.mrb[33].mxu0 }
 0x2c2   :  { %v4724_v24 = vadd.f32 %v4723_v22, %v4722_v33  ;;  %v4725_v29 = vpop.f32.mrb[34].mxu0 }
 0x2c3   :  { %v4726_v18 = vpop.f32.mrb[35].mxu0 }
 0x2c4   :  { %v6520_v25 = vadd.f32 %v4724_v24, %v4660_v28  ;;  %v4727_v26 = vadd.f32 %v4726_v18, %v4725_v29 }
 0x2c5   :  { %v4664_v63 = vpop.f32.mrb[20].mxu1 }
 0x2c6   :  { %v6522_v10 = vadd.f32 %v4727_v26, %v4663_v21  ;;  %v4665_v62 = vpop.f32.mrb[21].mxu1 }
 0x2c7   :  { %v4666_v1 = vadd.f32 %v4665_v62, %v4664_v63  ;;  %v4667_v11 = vpop.f32.mrb[22].mxu1 }
 0x2c8   :  { %v4728_v31 = vpop.f32.mrb[36].mxu0  ;;  %v4668_v60 = vpop.f32.mrb[23].mxu1 }
 0x2c9   :  { %v4669_v0 = vadd.f32 %v4668_v60, %v4667_v11  ;;  %v4729_v7 = vpop.f32.mrb[37].mxu0 }
 0x2ca   :  { %v4730_v46 = vadd.f32 %v4729_v7, %v4728_v31  ;;  %v4731_v4 = vpop.f32.mrb[38].mxu0 }
 0x2cb   :  { %v4732_v27 = vpop.f32.mrb[39].mxu0 }
 0x2cc   :  { %v6524_v17 = vadd.f32 %v4730_v46, %v4666_v1  ;;  %v4733_v23 = vadd.f32 %v4732_v27, %v4731_v4 }
 0x2cd   :  { %v4670_v56 = vpop.f32.mrb[24].mxu1 }
 0x2ce   :  { %v6526_v57 = vadd.f32 %v4733_v23, %v4669_v0  ;;  %v4671_v58 = vpop.f32.mrb[25].mxu1 }
 0x2cf   :  { %v4672_v61 = vadd.f32 %v4671_v58, %v4670_v56  ;;  %v4673_v5 = vpop.f32.mrb[26].mxu1 }
 0x2d0   :  { %v4734_v13 = vpop.f32.mrb[40].mxu0  ;;  %v4674_v3 = vpop.f32.mrb[27].mxu1 }
 0x2d1   :  { %v4675_v32 = vadd.f32 %v4674_v3, %v4673_v5  ;;  %v4735_v19 = vpop.f32.mrb[41].mxu0 }
 0x2d2   :  { %v4736_v38 = vadd.f32 %v4735_v19, %v4734_v13  ;;  %v4737_v41 = vpop.f32.mrb[42].mxu0 }
 0x2d3   :  { %v4738_v42 = vpop.f32.mrb[43].mxu0 }
 0x2d4   :  { %v6528_v43 = vadd.f32 %v4736_v38, %v4672_v61  ;;  %v4739_v44 = vadd.f32 %v4738_v42, %v4737_v41 }
 0x2d5   :  { %v4676_v51 = vpop.f32.mrb[28].mxu1 }
 0x2d6   :  { %v6530_v50 = vadd.f32 %v4739_v44, %v4675_v32  ;;  %v4677_v2 = vpop.f32.mrb[29].mxu1 }
 0x2d7   :  { %v4678_v6 = vadd.f32 %v4677_v2, %v4676_v51  ;;  %v4679_v8 = vpop.f32.mrb[30].mxu1 }
 0x2d8   :  { %v4740_v9 = vpop.f32.mrb[44].mxu0  ;;  %v4680_v14 = vpop.f32.mrb[31].mxu1 }
 0x2d9   :  { %v4681_v30 = vadd.f32 %v4680_v14, %v4679_v8  ;;  %v4741_v34 = vpop.f32.mrb[45].mxu0 }
 0x2da   :  { %v4742_v35 = vadd.f32 %v4741_v34, %v4740_v9  ;;  %v4743_v48 = vpop.f32.mrb[46].mxu0 }
 0x2db   :  { %v4744_v53 = vpop.f32.mrb[47].mxu0 }
 0x2dc   :  { %v6532_v15 = vadd.f32 %v4742_v35, %v4678_v6  ;;  %v4745_v37 = vadd.f32 %v4744_v53, %v4743_v48 }
 0x2dd   :  { %v4762_v39 = vpop.f32.mrb[32].mxu1 }
 0x2de   :  { %v6534_v52 = vadd.f32 %v4745_v37, %v4681_v30  ;;  %v4763_v28 = vpop.f32.mrb[33].mxu1 }
 0x2df   :  { %v4764_v55 = vadd.f32 %v4763_v28, %v4762_v39  ;;  %v4765_v33 = vpop.f32.mrb[34].mxu1 }
 0x2e0   :  { %v4826_v12 = vpop.f32.mrb[48].mxu0  ;;  %v4766_v21 = vpop.f32.mrb[35].mxu1 }
 0x2e1   :  { %v1545_v22 = vadd.f32 %v4764_v55, %v6504_v16  ;;  %v4767_v24 = vadd.f32 %v4766_v21, %v4765_v33  ;;  %v4827_v29 = vpop.f32.mrb[49].mxu0 }
 0x2e2   :  { %v4828_v18 = vadd.f32 %v4827_v29, %v4826_v12  ;;  %v4829_v26 = vpop.f32.mrb[50].mxu0 }
 0x2e3   :  { %v1548_v63 = vadd.f32 %v4767_v24, %v6506_v40  ;;  %v4830_v62 = vpop.f32.mrb[51].mxu0 }
 0x2e4   :  { %v4831_v1 = vadd.f32 %v4830_v62, %v4829_v26  ;;  %v6538_v11 = vadd.f32 %v4828_v18, %v1545_v22 }
 0x2e5   :  { %v4768_v31 = vpop.f32.mrb[36].mxu1 }
 0x2e6   :  { %v4769_v60 = vpop.f32.mrb[37].mxu1  ;;  %v6540_v0 = vadd.f32 %v4831_v1, %v1548_v63 }
 0x2e7   :  { %v4770_v7 = vadd.f32 %v4769_v60, %v4768_v31  ;;  %v4771_v46 = vpop.f32.mrb[38].mxu1 }
 0x2e8   :  { %v4832_v4 = vpop.f32.mrb[52].mxu0  ;;  %v4772_v27 = vpop.f32.mrb[39].mxu1 }
 0x2e9   :  { %v1553_v16 = vadd.f32 %v4770_v7, %v6508_v20  ;;  %v4773_v23 = vadd.f32 %v4772_v27, %v4771_v46  ;;  %v4833_v56 = vpop.f32.mrb[53].mxu0 }
 0x2ea   :  { %v4834_v58 = vadd.f32 %v4833_v56, %v4832_v4  ;;  %v4835_v61 = vpop.f32.mrb[54].mxu0 }
 0x2eb   :  { %v1556_v40 = vadd.f32 %v4773_v23, %v6510_v54  ;;  %v4836_v5 = vpop.f32.mrb[55].mxu0 }
 0x2ec   :  { %v4837_v13 = vadd.f32 %v4836_v5, %v4835_v61  ;;  %v6544_v3 = vadd.f32 %v4834_v58, %v1553_v16 }
 0x2ed   :  { %v4774_v32 = vpop.f32.mrb[40].mxu1 }
 0x2ee   :  { %v4775_v19 = vpop.f32.mrb[41].mxu1  ;;  %v6546_v38 = vadd.f32 %v4837_v13, %v1556_v40 }
 0x2ef   :  { %v4776_v41 = vadd.f32 %v4775_v19, %v4774_v32  ;;  %v4777_v42 = vpop.f32.mrb[42].mxu1 }
 0x2f0   :  { %v4838_v44 = vpop.f32.mrb[56].mxu0  ;;  %v4778_v47 = vpop.f32.mrb[43].mxu1 }
 0x2f1   :  { %v1561_v20 = vadd.f32 %v4776_v41, %v6512_v49  ;;  %v4779_v51 = vadd.f32 %v4778_v47, %v4777_v42  ;;  %v4839_v2 = vpop.f32.mrb[57].mxu0 }
 0x2f2   :  { %v4840_v6 = vadd.f32 %v4839_v2, %v4838_v44  ;;  %v4841_v8 = vpop.f32.mrb[58].mxu0 }
 0x2f3   :  { %v1564_v54 = vadd.f32 %v4779_v51, %v6514_v59  ;;  %v4842_v9 = vpop.f32.mrb[59].mxu0 }
 0x2f4   :  { %v4843_v14 = vadd.f32 %v4842_v9, %v4841_v8  ;;  %v6550_v30 = vadd.f32 %v4840_v6, %v1561_v20 }
 0x2f5   :  { %v4780_v34 = vpop.f32.mrb[44].mxu1 }
 0x2f6   :  { %v4781_v35 = vpop.f32.mrb[45].mxu1  ;;  %v6552_v48 = vadd.f32 %v4843_v14, %v1564_v54 }
 0x2f7   :  { %v4782_v53 = vadd.f32 %v4781_v35, %v4780_v34  ;;  %v4783_v37 = vpop.f32.mrb[46].mxu1 }
 0x2f8   :  { %v4844_v39 = vpop.f32.mrb[60].mxu0  ;;  %v4784_v28 = vpop.f32.mrb[47].mxu1 }
 0x2f9   :  { %v1569_v49 = vadd.f32 %v4782_v53, %v6516_v36  ;;  %v4785_v55 = vadd.f32 %v4784_v28, %v4783_v37  ;;  %v4845_v33 = vpop.f32.mrb[61].mxu0 }
 0x2fa   :  { %v4846_v12 = vadd.f32 %v4845_v33, %v4844_v39  ;;  %v4847_v21 = vpop.f32.mrb[62].mxu0 }
 0x2fb   :  { %v1572_v59 = vadd.f32 %v4785_v55, %v6518_v45  ;;  %v4848_v22 = vpop.f32.mrb[63].mxu0 }
 0x2fc   :  { %v4849_v24 = vadd.f32 %v4848_v22, %v4847_v21  ;;  %v6556_v29 = vadd.f32 %v4846_v12, %v1569_v49 }
 0x2fd   :  { %v4786_v18 = vpop.f32.mrb[48].mxu1 }
 0x2fe   :  { %v4787_v26 = vpop.f32.mrb[49].mxu1  ;;  %v6558_v63 = vadd.f32 %v4849_v24, %v1572_v59 }
 0x2ff   :  { %v4788_v62 = vadd.f32 %v4787_v26, %v4786_v18  ;;  %v4789_v1 = vpop.f32.mrb[50].mxu1 }
 0x300   :  { %v4850_v31 = vpop.f32.mrb[64].mxu0  ;;  %v4790_v60 = vpop.f32.mrb[51].mxu1 }
 0x301   :  { %v1577_v36 = vadd.f32 %v4788_v62, %v6520_v25  ;;  %v4791_v7 = vadd.f32 %v4790_v60, %v4789_v1  ;;  %v4851_v46 = vpop.f32.mrb[65].mxu0 }
 0x302   :  { %v4852_v4 = vadd.f32 %v4851_v46, %v4850_v31  ;;  %v4853_v27 = vpop.f32.mrb[66].mxu0 }
 0x303   :  { %v1580_v45 = vadd.f32 %v4791_v7, %v6522_v10  ;;  %v4854_v16 = vpop.f32.mrb[67].mxu0 }
 0x304   :  { %v4855_v23 = vadd.f32 %v4854_v16, %v4853_v27  ;;  %v6562_v56 = vadd.f32 %v4852_v4, %v1577_v36  ;;  %v6582_v27 = vld [vmem:[#allocation11] ss:$0 sm:$0xff] }
 0x305   :  { %v4792_v58 = vpop.f32.mrb[52].mxu1 }
 0x306   :  { %v4793_v61 = vpop.f32.mrb[53].mxu1  ;;  %v6564_v40 = vadd.f32 %v4855_v23, %v1580_v45 }
 0x307   :  { %v4794_v5 = vadd.f32 %v4793_v61, %v4792_v58  ;;  %v4795_v13 = vpop.f32.mrb[54].mxu1  ;;  %v6587_v58 = vld [vmem:[#allocation12] ss:$0 sm:$0xff] }
 0x308   :  { %v4856_v32 = vpop.f32.mrb[68].mxu0  ;;  %v4796_v19 = vpop.f32.mrb[55].mxu1 }
 0x309   :  { %v1585_v25 = vadd.f32 %v4794_v5, %v6524_v17  ;;  %v4797_v41 = vadd.f32 %v4796_v19, %v4795_v13  ;;  %v4857_v42 = vpop.f32.mrb[69].mxu0 }
 0x30a   :  { %v4858_v44 = vadd.f32 %v4857_v42, %v4856_v32  ;;  %v4859_v47 = vpop.f32.mrb[70].mxu0 }
 0x30b   :  { %v1588_v10 = vadd.f32 %v4797_v41, %v6526_v57  ;;  %v4860_v20 = vpop.f32.mrb[71].mxu0 }
 0x30c   :  { %v4861_v51 = vadd.f32 %v4860_v20, %v4859_v47  ;;  %v6568_v2 = vadd.f32 %v4858_v44, %v1585_v25 }
 0x30d   :  { %v4798_v6 = vpop.f32.mrb[56].mxu1 }
 0x30e   :  { %v4799_v8 = vpop.f32.mrb[57].mxu1  ;;  %v6570_v54 = vadd.f32 %v4861_v51, %v1588_v10 }
 0x30f   :  { %v4800_v9 = vadd.f32 %v4799_v8, %v4798_v6  ;;  %v4801_v14 = vpop.f32.mrb[58].mxu1 }
 0x310   :  { %v4862_v34 = vpop.f32.mrb[72].mxu0  ;;  %v4802_v35 = vpop.f32.mrb[59].mxu1 }
 0x311   :  { %v1593_v17 = vadd.f32 %v4800_v9, %v6528_v43  ;;  %v4803_v53 = vadd.f32 %v4802_v35, %v4801_v14  ;;  %v4863_v37 = vpop.f32.mrb[73].mxu0  ;;  %v6612_v14 = vld [vmem:[#allocation2] sm:$0xff] }
 0x312   :  { %v4864_v39 = vadd.f32 %v4863_v37, %v4862_v34  ;;  %v4865_v28 = vpop.f32.mrb[74].mxu0 }
 0x313   :  { %v1596_v57 = vadd.f32 %v4803_v53, %v6530_v50  ;;  %v4866_v49 = vpop.f32.mrb[75].mxu0 }
 0x314   :  { %v4867_v55 = vadd.f32 %v4866_v49, %v4865_v28  ;;  %v6574_v33 = vadd.f32 %v4864_v39, %v1593_v17 }
 0x315   :  { %v4804_v12 = vpop.f32.mrb[60].mxu1 }
 0x316   :  { %v4805_v21 = vpop.f32.mrb[61].mxu1  ;;  %v6576_v59 = vadd.f32 %v4867_v55, %v1596_v57 }
 0x317   :  { %v4806_v22 = vadd.f32 %v4805_v21, %v4804_v12  ;;  %v4807_v24 = vpop.f32.mrb[62].mxu1  ;;  %v1879_v21 = vld [vmem:[#allocation2 + $0x7] sm:$0xff] }
 0x318   :  { %v4868_v18 = vpop.f32.mrb[76].mxu0  ;;  %v4808_v26 = vpop.f32.mrb[63].mxu1 }
 0x319   :  { %v1601_v43 = vadd.f32 %v4806_v22, %v6532_v15  ;;  %v4809_v62 = vadd.f32 %v4808_v26, %v4807_v24  ;;  %v4869_v1 = vpop.f32.mrb[77].mxu0  ;;  %v1911_v26 = vld [vmem:[#allocation2 + $0x9] sm:$0xff] }
 0x31a   :  { %v4870_v31 = vadd.f32 %v4869_v1, %v4868_v18  ;;  %v4871_v60 = vpop.f32.mrb[78].mxu0 }
 0x31b   :  { %v1604_v50 = vadd.f32 %v4809_v62, %v6534_v52  ;;  %v4872_v36 = vpop.f32.mrb[79].mxu0 }
 0x31c   :  { %v4873_v7 = vadd.f32 %v4872_v36, %v4871_v60  ;;  %v6580_v46 = vadd.f32 %v4870_v31, %v1601_v43  ;;  %v5516_v60 = vld [vmem:[#allocation14 + $0x100] sm:$0xff]  }
 0x31d   :  { %v5320_v4 = vpop.f32.mrb[64].mxu1 }
 0x31e   :  { %v1747_v45 = vadd.f32 %v5320_v4, %v6544_v3  ;;  %v1738_v16 = vpop.f32.mrb[65].mxu1  ;;  %v6585_v23 = vadd.f32 %v4873_v7, %v1604_v50 }
 0x31f   :  { %v1739_v15 = vadd.f32 %v1738_v16, %v6538_v11  ;;  %v5321_v61 = vpop.f32.mrb[66].mxu1 }
 0x320   :  { %v1810_v5 = vmul.f32 %v6582_v27, %v1747_v45  ;;  %v1750_v52 = vadd.f32 %v5321_v61, %v6546_v38  ;;  %v1741_v13 = vpop.f32.mrb[67].mxu1 }
 0x321   :  { %v1808_v32 = vmul.f32 %v6582_v27, %v1739_v15  ;;  %v1742_v19 = vadd.f32 %v1741_v13, %v6540_v0  ;;  %v5517_v15 = vld [vmem:[#allocation14 + $0x148] sm:$0xff]  }
 0x322   :  { %v1833_v25 = vadd.f32 %v6587_v58, %v1810_v5  ;;  %v1811_v3 = vmul.f32 %v6582_v27, %v1750_v52 }
 0x323   :  { %v1831_v41 = vadd.f32 %v6587_v58, %v1808_v32  ;;  %v1809_v42 = vmul.f32 %v6582_v27, %v1742_v19 }
 0x324   :  { %v6598_v44 = vmax.f32 %v1833_v25, 0.0  ;;  %v1834_v11 = vadd.f32 %v6587_v58, %v1811_v3 }
 0x325   :  { %v6601_v47 = vmax.f32 %v1831_v41, 0.0  ;;  %v1832_v38 = vadd.f32 %v6587_v58, %v1809_v42  ;;  %v5324_v10 = vpop.f32.mrb[68].mxu1  ;;  %v5526_v41 = vld [vmem:[#allocation14 + $0x180] sm:$0xff]  }
 0x326   :  { %1865 = vst [vmem:[#allocation2 + $0x50] sm:$0xff] %v6598_v44  ;;  %v6605_v0 = vmax.f32 %v1834_v11, 0.0  ;;  %v1763_v20 = vadd.f32 %v5324_v10, %v6556_v29  ;;  %v1754_v51 = vpop.f32.mrb[69].mxu1  ;;  %v5527_v10 = vld [vmem:[#allocation14 + $0x1c8] sm:$0xff]  }
 0x327   :  { %1863 = vst [vmem:[#allocation2 + $0x20] sm:$0xff] %v6601_v47  ;;  %v6609_v6 = vmax.f32 %v1832_v38, 0.0  ;;  %v1755_v8 = vadd.f32 %v1754_v51, %v6550_v30  ;;  %v5325_v9 = vpop.f32.mrb[70].mxu1  ;;  %v2024_v34 = vpack.c.bf16 %v6601_v47, %v6612_v14  ;;  %v5518_v38 = vld [vmem:[#allocation14 + $0x108] sm:$0xff]   ;;  %v5519_v51 = vld [vmem:[#allocation14 + $0x150] sm:$0xff]  }
 0x328   :  { %1866 = vst [vmem:[#allocation2 + $0x68] sm:$0xff] %v6605_v0  ;;  %v1814_v35 = vmul.f32 %v6582_v27, %v1763_v20  ;;  %v1766_v17 = vadd.f32 %v5325_v9, %v6558_v63  ;;  %v1757_v29 = vpop.f32.mrb[71].mxu1  ;;  %v2036_v53 = vpack.c.bf16 %v6605_v0, %v6598_v44 }
 0x329   :  { %1864 = vst [vmem:[#allocation2 + $0x38] sm:$0xff] %v6609_v6  ;;  %v1812_v30 = vmul.f32 %v6582_v27, %v1755_v8  ;;  %v1758_v37 = vadd.f32 %v1757_v29, %v6552_v48  ;;  %2703 = vmatprep.mubr.bf16.mxu0 %v2024_v34  ;;  %v6626_v39 = vpack.c.bf16 %v6598_v44, %v6609_v6 }
 0x32a   :  { %v2027_v28 = vpack.c.bf16 %v6609_v6, %v6601_v47  ;;  %v1837_v63 = vadd.f32 %v6587_v58, %v1814_v35  ;;  %v1815_v57 = vmul.f32 %v6582_v27, %v1766_v17  ;;  %v5551_v47 = vld [vmem:[#allocation14 + $0x220] sm:$0xff]  }
 0x32b   :  { %v1835_v49 = vadd.f32 %v6587_v58, %v1812_v30  ;;  %v1813_v55 = vmul.f32 %v6582_v27, %v1758_v37 }
 0x32c   :  { %v6634_v12 = vmax.f32 %v1837_v63, 0.0  ;;  %v1838_v48 = vadd.f32 %v6587_v58, %v1815_v57 }
 0x32d   :  { %v6637_v22 = vmax.f32 %v1835_v49, 0.0  ;;  %v1836_v24 = vadd.f32 %v6587_v58, %v1813_v55  ;;  %v5328_v18 = vpop.f32.mrb[72].mxu1  ;;  %v1929_v3 = vld [vmem:[#allocation2 + $0x4f] sm:$0xff]  ;;  %v5520_v55 = vld [vmem:[#allocation14 + $0x110] sm:$0xff]  }
 0x32e   :  { %1869 = vst [vmem:[#allocation2 + $0xb0] sm:$0xff] %v6634_v12  ;;  %v6641_v43 = vmax.f32 %v1838_v48, 0.0  ;;  %v1779_v62 = vadd.f32 %v5328_v18, %v6568_v2  ;;  %v1770_v1 = vpop.f32.mrb[73].mxu1  ;;  %v1880_v31 = vld [vmem:[#allocation2 + $0x1f] sm:$0xff] }
 0x32f   :  { %v6644_v50 = vld [vmem:[#allocation2 + $0x21] sm:$0xff]  ;;  %1867 = vst [vmem:[#allocation2 + $0x80] sm:$0xff] %v6637_v22  ;;  %v6647_v36 = vmax.f32 %v1836_v24, 0.0  ;;  %v1771_v7 = vadd.f32 %v1770_v1, %v6562_v56  ;;  %v5329_v4 = vpop.f32.mrb[74].mxu1  ;;  %v2023_v45 = vpack.c.bf16 %v1880_v31, %v1879_v21  ;;  %v6657_v13 = vpack.c.bf16 %v6637_v22, %v6605_v0 }
 0x330   :  { %v6650_v16 = vld [vmem:[#allocation2 + $0x67] sm:$0xff]  ;;  %1870 = vst [vmem:[#allocation2 + $0xc8] sm:$0xff] %v6641_v43  ;;  %v1818_v2 = vmul.f32 %v6582_v27, %v1779_v62  ;;  %v1782_v61 = vadd.f32 %v5329_v4, %v6570_v54  ;;  %v1773_v5 = vpop.f32.mrb[75].mxu1  ;;  %v1928_v52 = vld [vmem:[#allocation2 + $0x37] sm:$0xff]  ;;  %v2025_v25 = vpack.c.bf16 %v6644_v50, %v1911_v26  ;;  %v2054_v48 = vpack.c.bf16 %v6641_v43, %v6634_v12 }
 0x331   :  { %1868 = vst [vmem:[#allocation2 + $0x98] sm:$0xff] %v6647_v36  ;;  %v1816_v56 = vmul.f32 %v6582_v27, %v1771_v7  ;;  %v1774_v32 = vadd.f32 %v1773_v5, %v6564_v40  ;;  %2704 = vmatmul.mubr.bf16.vlgmr.msra.gmra.mrb[80].mxu0 %v2023_v45  ;;  %v2026_v19 = vpack.c.bf16 %v1928_v52, %v1880_v31  ;;  %v6685_v49 = vld [vmem:[#allocation2 + $0x39] sm:$0xff]  ;;  %v6698_v7 = vld [vmem:[#allocation2 + $0x51] sm:$0xff] }
 0x332   :  { %v1841_v54 = vadd.f32 %v6587_v58, %v1818_v2  ;;  %v1819_v42 = vmul.f32 %v6582_v27, %v1782_v61  ;;  %5019 = vmatpush3.bf16.msra.mxu0 %v5516_v60  ;;  %2711 = vmatprep.mubr.bf16.mxu0 %v6626_v39  ;;  %v2035_v11 = vpack.c.bf16 %v6650_v16, %v1929_v3  ;;  %v5529_v62 = vld [vmem:[#allocation14 + $0x188] sm:$0xff]   ;;  %v5531_v45 = vld [vmem:[#allocation14 + $0x1d0] sm:$0xff]  }
 0x333   :  { %v1839_v20 = vadd.f32 %v6587_v58, %v1816_v56  ;;  %v1817_v40 = vmul.f32 %v6582_v27, %v1774_v32  ;;  %2800 = vmatprep.mubr.bf16.mxu1 %v2026_v19  ;;  %5020 = vmatprep.subr.bf16.mxu0 %v5517_v15  ;;  %v6671_v8 = vpack.c.bf16 %v6634_v12, %v6647_v36  ;;  %v5522_v56 = vld [vmem:[#allocation14 + $0x118] sm:$0xff]   ;;  %v5523_v19 = vld [vmem:[#allocation14 + $0x160] sm:$0xff]   ;;  %v5553_v0 = vld [vmem:[#allocation14 + $0x230] sm:$0xff]  }
 0x334   :  { %v6673_v9 = vmax.f32 %v1841_v54, 0.0  ;;  %v1842_v34 = vadd.f32 %v6587_v58, %v1819_v42  ;;  %2801 = vmatmul.mubr.bf16.vlgmr.msra.gmra.mrb[80].mxu1 %v2025_v25  ;;  %v2045_v30 = vpack.c.bf16 %v6647_v36, %v6637_v22  ;;  %v6693_v26 = vpack.c.bf16 %v1929_v3, %v1928_v52  ;;  %v5532_v3 = vld [vmem:[#allocation14 + $0x190] sm:$0xff]   ;;  %v5533_v42 = vld [vmem:[#allocation14 + $0x1d8] sm:$0xff]  }
 0x335   :  { %v6676_v35 = vmax.f32 %v1839_v20, 0.0  ;;  %v1840_v17 = vadd.f32 %v6587_v58, %v1817_v40  ;;  %v5332_v29 = vpop.f32.mrb[76].mxu1  ;;  %2808 = vmatprep.mubr.bf16.mxu1 %v2035_v11  ;;  %5083 = vmatpush3.bf16.msra.mxu1 %v5526_v41  ;;  %v6708_v2 = vpack.c.bf16 %v6698_v7, %v6685_v49  ;;  %v5524_v20 = vld [vmem:[#allocation14 + $0x120] sm:$0xff]   ;;  %v2057_v44 = vpack.c.bf16 %v6612_v14, %v6641_v43 }
 0x336   :  { %1873 = vst [vmem:[#allocation2 + $0x140] sm:$0xff] %v6673_v9  ;;  %v6682_v37 = vmax.f32 %v1842_v34, 0.0  ;;  %v1795_v63 = vadd.f32 %v5332_v29, %v6580_v46  ;;  %v1786_v57 = vpop.f32.mrb[77].mxu1  ;;  %5021 = vmatpush3.bf16.msra.mxu0 %v5518_v38  ;;  %5084 = vmatprep.subr.bf16.mxu1 %v5527_v10  ;;  %v5521_v46 = vld [vmem:[#allocation14 + $0x158] sm:$0xff]   ;;  %v1931_v61 = vld [vmem:[#allocation2 + $0x7f] sm:$0xff] }
 0x337   :  { %1871 = vst [vmem:[#allocation2 + $0x110] sm:$0xff] %v6676_v35  ;;  %v6690_v21 = vmax.f32 %v1840_v17, 0.0  ;;  %v1787_v24 = vadd.f32 %v1786_v57, %v6574_v33  ;;  %v5333_v18 = vpop.f32.mrb[78].mxu1  ;;  %5022 = vmatprep.subr.bf16.mxu0 %v5519_v51  ;;  %v6738_v34 = vpack.c.bf16 %v1931_v61, %v6650_v16  ;;  %v5528_v17 = vld [vmem:[#allocation14 + $0x168] sm:$0xff]   ;;  %v6747_v57 = vld [vmem:[#allocation2 + $0xc7] sm:$0xff] }
 0x338   :  { %1874 = vst [vmem:[#allocation2 + $0x158] sm:$0xff] %v6682_v37  ;;  %v1822_v1 = vmul.f32 %v6582_v27, %v1795_v63  ;;  %v1798_v31 = vadd.f32 %v5333_v18, %v6585_v23  ;;  %v1789_v60 = vpop.f32.mrb[79].mxu1  ;;  %v6700_v4 = vld [vmem:[#allocation2 + $0x97] sm:$0xff]  ;;  %v2072_v40 = vpack.c.bf16 %v6682_v37, %v6673_v9  ;;  %v5535_v63 = vld [vmem:[#allocation14 + $0x198] sm:$0xff]  }
 0x339   :  { %1872 = vst [vmem:[#allocation2 + $0x128] sm:$0xff] %v6690_v21  ;;  %v1820_v33 = vmul.f32 %v6582_v27, %v1787_v24  ;;  %v1790_v15 = vadd.f32 %v1789_v60, %v6576_v59  ;;  %2712 = vmatmul.mubr.bf16.gmra.mrb[84].mxu0 %v6693_v26  ;;  %v2044_v52 = vpack.c.bf16 %v6700_v4, %v1931_v61  ;;  %v6753_v24 = vld [vmem:[#allocation2 + $0x69] sm:$0xff]  ;;  %v5536_v61 = vld [vmem:[#allocation14 + $0x130] sm:$0xff]   ;;  %v5548_v16 = vld [vmem:[#allocation14 + $0x208] sm:$0xff]  }
 0x33a   :  { %v1845_v23 = vadd.f32 %v6587_v58, %v1822_v1  ;;  %v1823_v5 = vmul.f32 %v6582_v27, %v1798_v31  ;;  %2719 = vmatprep.mubr.bf16.mxu0 %v6657_v13  ;;  %5023 = vmatpush3.bf16.msra.mxu0 %v5520_v55  ;;  %v6718_v25 = vpack.c.bf16 %v6673_v9, %v6690_v21  ;;  %v5537_v55 = vld [vmem:[#allocation14 + $0x1e0] sm:$0xff]   ;;  %v5530_v1 = vld [vmem:[#allocation14 + $0x128] sm:$0xff]  }
 0x33b   :  { %v1843_v32 = vadd.f32 %v6587_v58, %v1820_v33  ;;  %v1821_v59 = vmul.f32 %v6582_v27, %v1790_v15  ;;  %5024 = vmatprep.subr.bf16.mxu0 %v5521_v46  ;;  %5085 = vmatpush3.bf16.msra.mxu1 %v5529_v62  ;;  %v2063_v38 = vpack.c.bf16 %v6690_v21, %v6676_v35  ;;  %v1933_v62 = vld [vmem:[#allocation2 + $0xaf] sm:$0xff]  ;;  %v5539_v15 = vld [vmem:[#allocation14 + $0x1e8] sm:$0xff]   ;;  %v2014_v21 = vld [vmem:[#allocation2 + $0xe1] sm:$0xff] }
 0x33c   :  { %v6720_v41 = vmax.f32 %v1845_v23, 0.0  ;;  %v1846_v54 = vadd.f32 %v6587_v58, %v1823_v5  ;;  %2809 = vmatmul.mubr.bf16.gmra.mrb[84].mxu1 %v6708_v2  ;;  %5086 = vmatprep.subr.bf16.mxu1 %v5531_v45  ;;  %v2053_v60 = vpack.c.bf16 %v6747_v57, %v1933_v62  ;;  %v5534_v45 = vld [vmem:[#allocation14 + $0x170] sm:$0xff]   ;;  %v5538_v33 = vld [vmem:[#allocation14 + $0x1a0] sm:$0xff]   ;;  %v6769_v23 = vpack.c.bf16 %v1933_v62, %v6700_v4 }
 0x33d   :  { %v6724_v11 = vmax.f32 %v1843_v32, 0.0  ;;  %v1844_v27 = vadd.f32 %v6587_v58, %v1821_v59  ;;  %2816 = vmatprep.mubr.bf16.mxu1 %v2044_v52  ;;  %v6740_v58 = vld [vmem:[#allocation2 + $0x81] sm:$0xff]  ;;  %v6771_v5 = vld [vmem:[#allocation2 + $0x99] sm:$0xff]  ;;  %v2060_v32 = vpack.c.bf16 %v6676_v35, %v6612_v14  ;;  %v1966_v6 = vld [vmem:[#allocation2 + $0xc9] sm:$0xff] }
 0x33e   :  { %1877 = vst [vmem:[#allocation2 + $0x1a0] sm:$0xff] %v6720_v41  ;;  %v6730_v10 = vmax.f32 %v1846_v54, 0.0  ;;  %5025 = vmatpush3.bf16.msra.mxu0 %v5522_v56  ;;  %v6762_v46 = vpack.c.bf16 %v6740_v58, %v6753_v24  ;;  %v5540_v52 = vld [vmem:[#allocation14 + $0x178] sm:$0xff]   ;;  %v5541_v56 = vld [vmem:[#allocation14 + $0x1a8] sm:$0xff]  }
 0x33f   :  { %1875 = vst [vmem:[#allocation2 + $0x170] sm:$0xff] %v6724_v11  ;;  %v6735_v51 = vmax.f32 %v1844_v27, 0.0  ;;  %5026 = vmatprep.subr.bf16.mxu0 %v5523_v19  ;;  %v6744_v29 = vpack.c.bf16 %v6724_v11, %v6682_v37  ;;  %5087 = vmatpush3.bf16.msra.mxu1 %v5532_v3  ;;  %v5543_v19 = vld [vmem:[#allocation14 + $0x1f0] sm:$0xff]   ;;  %v6776_v3 = vld [vmem:[#allocation2 + $0xb1] sm:$0xff] }
 0x340   :  { %1878 = vst [vmem:[#allocation2 + $0x1b8] sm:$0xff] %v6730_v10  ;;  %5088 = vmatprep.subr.bf16.mxu1 %v5533_v42  ;;  %v1936_v59 = vld [vmem:[#allocation2 + $0x127] sm:$0xff]  ;;  %v6780_v4 = vpack.c.bf16 %v6776_v3, %v6771_v5  ;;  %v1935_v54 = vld [vmem:[#allocation2 + $0x10f] sm:$0xff]  ;;  %v7004_v37 = vpack.c.bf16 %v6730_v10, %v6720_v41 }
 0x341   :  { %1876 = vst [vmem:[#allocation2 + $0x188] sm:$0xff] %v6735_v51  ;;  %2720 = vmatmul.mubr.bf16.gmra.mrb[88].mxu0 %v6738_v34  ;;  %v6757_v18 = vpack.c.bf16 %v6720_v41, %v6735_v51  ;;  %v2081_v31 = vpack.c.bf16 %v6735_v51, %v6724_v11  ;;  %v5542_v42 = vld [vmem:[#allocation14 + $0x138] sm:$0xff]   ;;  %v2062_v27 = vpack.c.bf16 %v1936_v59, %v1935_v54  ;;  %v5556_v41 = vld [vmem:[#allocation18] sm:$0xff]   ;;  %v5557_v11 = vld [vmem:[#allocation18 + $0x48] sm:$0xff]  }
 0x342   :  { %2727 = vmatprep.mubr.bf16.mxu0 %v6671_v8  ;;  %5027 = vmatpush3.bf16.msra.mxu0 %v5524_v20  ;;  %v5544_v20 = vld [vmem:[#allocation14 + $0x1b0] sm:$0xff]   ;;  %v1990_v9 = vld [vmem:[#allocation2 + $0x1cf] sm:$0xff] }
 0x343   :  { %5028 = vmatprep.subr.bf16.mxu0 %v5528_v17  ;;  %5089 = vmatpush3.bf16.msra.mxu1 %v5535_v63  ;;  %v5547_v17 = vld [vmem:[#allocation14 + $0x200] sm:$0xff]  }
 0x344   :  { %2817 = vmatmul.mubr.bf16.gmra.mrb[88].mxu1 %v6762_v46  ;;  %5090 = vmatprep.subr.bf16.mxu1 %v5537_v55  ;;  %v1887_v63 = vld [vmem:[#allocation2 + $0xf7] sm:$0xff]  ;;  %v5545_v55 = vld [vmem:[#allocation14 + $0x1f8] sm:$0xff]  }
 0x345   :  { %2824 = vmatprep.mubr.bf16.mxu1 %v2053_v60  ;;  %v2059_v62 = vpack.c.bf16 %v1935_v54, %v1887_v63  ;;  %v6783_v60 = vld [vmem:[#allocation2 + $0x111] sm:$0xff]  ;;  %v6792_v54 = vld [vmem:[#allocation2 + $0x141] sm:$0xff] }
 0x346   :  { %5029 = vmatpush3.bf16.msra.mxu0 %v5530_v1  ;;  %v1919_v1 = vld [vmem:[#allocation2 + $0xf9] sm:$0xff]  ;;  %v6802_v63 = vld [vmem:[#allocation2 + $0x171] sm:$0xff] }
 0x347   :  { %5030 = vmatprep.subr.bf16.mxu0 %v5534_v45  ;;  %5091 = vmatpush3.bf16.msra.mxu1 %v5538_v33  ;;  %v5546_v45 = vld [vmem:[#allocation14 + $0x1b8] sm:$0xff]   ;;  %v1938_v33 = vld [vmem:[#allocation2 + $0x157] sm:$0xff] }
 0x348   :  { %5092 = vmatprep.subr.bf16.mxu1 %v5539_v15  ;;  %v2061_v15 = vpack.c.bf16 %v6783_v60, %v1919_v1  ;;  %v1974_v43 = vld [vmem:[#allocation2 + $0x1b9] sm:$0xff]  ;;  %v5561_v51 = vld [vmem:[#allocation18 + $0x58] sm:$0xff]  }
 0x349   :  { %2728 = vmatmul.mubr.bf16.gmra.mrb[92].mxu0 %v6769_v23 }
 0x34a   :  { %2735 = vmatprep.mubr.bf16.mxu0 %v2060_v32  ;;  %5031 = vmatpush3.bf16.msra.mxu0 %v5536_v61  ;;  %v1937_v61 = vld [vmem:[#allocation2 + $0x13f] sm:$0xff]  ;;  %v6789_v32 = vld [vmem:[#allocation2 + $0x129] sm:$0xff] }
 0x34b   :  { %5032 = vmatprep.subr.bf16.mxu0 %v5540_v52  ;;  %5093 = vmatpush3.bf16.msra.mxu1 %v5541_v56  ;;  %v2071_v52 = vpack.c.bf16 %v1938_v33, %v1937_v61  ;;  %v6787_v56 = vpack.c.bf16 %v1937_v61, %v1936_v59  ;;  %v1925_v61 = vld [vmem:[#allocation2 + $0x189] sm:$0xff] }
 0x34c   :  { %2825 = vmatmul.mubr.bf16.gmra.mrb[92].mxu1 %v6780_v4  ;;  %5094 = vmatprep.subr.bf16.mxu1 %v5543_v19  ;;  %v1940_v19 = vld [vmem:[#allocation2 + $0x187] sm:$0xff]  ;;  %v2082_v12 = vpack.c.bf16 %v1925_v61, %v6802_v63 }
 0x34d   :  { %2832 = vmatprep.mubr.bf16.mxu1 %v2062_v27  ;;  %v1939_v27 = vld [vmem:[#allocation2 + $0x16f] sm:$0xff] }
 0x34e   :  { %5033 = vmatpush3.bf16.msra.mxu0 %v5542_v42  ;;  %v6797_v42 = vpack.c.bf16 %v6792_v54, %v6789_v32  ;;  %v6800_v59 = vpack.c.bf16 %v1939_v27, %v1938_v33 }
 0x34f   :  { %5095 = vmatpush3.bf16.msra.mxu1 %v5544_v20  ;;  %5334 = vmatprep.subr.bf16.mxu0 %v5547_v17  ;;  %v2080_v20 = vpack.c.bf16 %v1940_v19, %v1939_v27  ;;  %v6821_v27 = vld [vmem:[#allocation2 + $0x1a1] sm:$0xff] }
 0x350   :  { %5096 = vmatprep.subr.bf16.mxu1 %v5545_v55  ;;  %v6804_v55 = vld [vmem:[#allocation2 + $0x1b7] sm:$0xff]  ;;  %v2091_v35 = vpack.c.bf16 %v1974_v43, %v6821_v27 }
 0x351   :  { %2736 = vmatmul.mubr.bf16.gmra.mrb[96].mxu0 %v2059_v62  ;;  %v6807_v62 = vld [vmem:[#allocation2 + $0x159] sm:$0xff] }
 0x352   :  { %2743 = vmatprep.mubr.bf16.mxu0 %v6718_v25  ;;  %v6812_v1 = vpack.c.bf16 %v6802_v63, %v6807_v62  ;;  %v2073_v36 = vpack.c.bf16 %v6807_v62, %v6792_v54  ;;  %v5568_v54 = vld [vmem:[#allocation18 + $0x88] sm:$0xff]  }
 0x353   :  { %5097 = vmatpush3.bf16.msra.mxu1 %v5546_v45  ;;  %v1941_v45 = vld [vmem:[#allocation2 + $0x19f] sm:$0xff] }
 0x354   :  { %2833 = vmatmul.mubr.bf16.gmra.mrb[96].mxu1 %v2061_v15  ;;  %v2089_v15 = vpack.c.bf16 %v6804_v55, %v1941_v45  ;;  %v6816_v33 = vpack.c.bf16 %v1941_v45, %v1940_v19  ;;  %v2037_v19 = vpack.c.bf16 %v6753_v24, %v6698_v7  ;;  %v2058_v7 = vpack.c.bf16 %v2014_v21, %v1966_v6  ;;  %v5571_v45 = vld [vmem:[#allocation18 + $0xd0] sm:$0xff]  }
 0x355   :  { %2840 = vmatprep.mubr.bf16.mxu1 %v2071_v52  ;;  %v2028_v52 = vpack.c.bf16 %v6685_v49, %v6644_v50  ;;  %v5549_v50 = vld [vmem:[#allocation14 + $0x210] sm:$0xff]   ;;  %v5550_v49 = vld [vmem:[#allocation14 + $0x218] sm:$0xff]  }
 0x359   :  { %2744 = vmatmul.mubr.bf16.gmra.mrb[100].mxu0 %v6787_v56 }
 0x35a   :  { %2751 = vmatprep.mubr.bf16.mxu0 %v6744_v29 }
 0x35c   :  { %2841 = vmatmul.mubr.bf16.gmra.mrb[100].mxu1 %v6797_v42 }
 0x35d   :  { %2848 = vmatprep.mubr.bf16.mxu1 %v2080_v20  ;;  %v6824_v20 = vpack.c.bf16 %v6821_v27, %v1925_v61  ;;  %v5569_v61 = vld [vmem:[#allocation18 + $0x68] sm:$0xff]   ;;  %v5572_v27 = vld [vmem:[#allocation18 + $0x90] sm:$0xff]  }
 0x361   :  { %2752 = vmatmul.mubr.bf16.gmra.mrb[104].mxu0 %v6800_v59 }
 0x362   :  { %2759 = vmatprep.mubr.bf16.mxu0 %v6757_v18 }
 0x364   :  { %2849 = vmatmul.mubr.bf16.gmra.mrb[104].mxu1 %v6812_v1 }
 0x365   :  { %2856 = vmatprep.mubr.bf16.mxu1 %v2089_v15 }
 0x369   :  { %2760 = vmatmul.mubr.bf16.gmra.mrb[108].mxu0 %v6816_v33 }
 0x36a   :  { %2897 = vmatprep.mubr.bf16.mxu0 %v2028_v52  ;;  %v5570_v52 = vld [vmem:[#allocation18 + $0x28] sm:$0xff]  }
 0x36c   :  { %2857 = vmatmul.mubr.bf16.gmra.mrb[108].mxu1 %v6824_v20 }
 0x36d   :  { %2994 = vmatprep.mubr.bf16.mxu1 %v6626_v39  ;;  %v2046_v39 = vpack.c.bf16 %v6771_v5, %v6740_v58  ;;  %v5563_v58 = vld [vmem:[#allocation18 + $0x60] sm:$0xff]  }
 0x371   :  { %2898 = vmatmul.mubr.bf16.vlgmr.msra.gmra.mrb[112].mxu0 %v2027_v28  ;;  %v5552_v28 = vld [vmem:[#allocation14 + $0x228] sm:$0xff]  }
 0x372   :  { %5335 = vmatpush3.bf16.msra.mxu0 %v5547_v17  ;;  %2905 = vmatprep.mubr.bf16.mxu0 %v2037_v19 }
 0x373   :  { %5336 = vmatprep.subr.bf16.mxu0 %v5548_v16 }
 0x374   :  { %2995 = vmatmul.mubr.bf16.vlgmr.msra.gmra.mrb[112].mxu1 %v6693_v26  ;;  %v2064_v26 = vpack.c.bf16 %v6789_v32, %v6783_v60 }
 0x375   :  { %3002 = vmatprep.mubr.bf16.mxu1 %v6657_v13  ;;  %v2055_v13 = vpack.c.bf16 %v1966_v6, %v6776_v3  ;;  %v5566_v3 = vld [vmem:[#allocation18 + $0x80] sm:$0xff]  }
 0x376   :  { %5337 = vmatpush3.bf16.msra.mxu0 %v5548_v16 }
 0x377   :  { %5338 = vmatprep.subr.bf16.mxu0 %v5549_v50 }
 0x379   :  { %2906 = vmatmul.mubr.bf16.gmra.mrb[116].mxu0 %v2036_v53  ;;  %v1982_v53 = vld [vmem:[#allocation2 + $0xdf] sm:$0xff] }
 0x37a   :  { %2913 = vmatprep.mubr.bf16.mxu0 %v2046_v39  ;;  %5339 = vmatpush3.bf16.msra.mxu0 %v5549_v50  ;;  %v2056_v22 = vpack.c.bf16 %v1982_v53, %v6747_v57 }
 0x37b   :  { %5340 = vmatprep.subr.bf16.mxu0 %v5550_v49 }
 0x37c   :  { %3003 = vmatmul.mubr.bf16.gmra.mrb[116].mxu1 %v6738_v34  ;;  %v5562_v34 = vld [vmem:[#allocation18 + $0x18] sm:$0xff]  }
 0x37d   :  { %3010 = vmatprep.mubr.bf16.mxu1 %v6671_v8  ;;  %v5554_v8 = vld [vmem:[#allocation14 + $0x238] sm:$0xff]  }
 0x37e   :  { %5341 = vmatpush3.bf16.msra.mxu0 %v5550_v49 }
 0x37f   :  { %5342 = vmatprep.subr.bf16.mxu0 %v5551_v47 }
 0x381   :  { %2914 = vmatmul.mubr.bf16.gmra.mrb[120].mxu0 %v2045_v30  ;;  %v2093_v30 = vpack.c.bf16 %v6612_v14, %v6730_v10  ;;  %v2022_v14 = vld [vmem:[#allocation2 + $0x1d1] sm:$0xff]  ;;  %v5559_v10 = vld [vmem:[#allocation18 + $0x50] sm:$0xff]  }
 0x382   :  { %2921 = vmatprep.mubr.bf16.mxu0 %v2055_v13  ;;  %5343 = vmatpush3.bf16.msra.mxu0 %v5551_v47  ;;  %v5573_v47 = vld [vmem:[#allocation18 + $0xd8] sm:$0xff]  }
 0x383   :  { %5344 = vmatprep.subr.bf16.mxu0 %v5552_v28 }
 0x384   :  { %3011 = vmatmul.mubr.bf16.gmra.mrb[120].mxu1 %v6769_v23 }
 0x385   :  { %3018 = vmatprep.mubr.bf16.mxu1 %v2057_v44 }
 0x386   :  { %5345 = vmatpush3.bf16.msra.mxu0 %v5552_v28  ;;  %v5574_v28 = vld [vmem:[#allocation18 + $0x98] sm:$0xff]  }
 0x387   :  { %5346 = vmatprep.subr.bf16.mxu0 %v5553_v0 }
 0x389   :  { %2922 = vmatmul.mubr.bf16.gmra.mrb[124].mxu0 %v2054_v48  ;;  %v2092_v48 = vpack.c.bf16 %v1990_v9, %v6804_v55 }
 0x38a   :  { %2929 = vmatprep.mubr.bf16.mxu0 %v2064_v26  ;;  %5347 = vmatpush3.bf16.msra.mxu0 %v5553_v0 }
 0x38b   :  { %5348 = vmatprep.subr.bf16.mxu0 %v5554_v8 }
 0x38c   :  { %3019 = vmatmul.mubr.bf16.gmra.mrb[124].mxu1 %v2056_v22  ;;  %v5577_v22 = vld [vmem:[#allocation18 + $0xe0] sm:$0xff]  }
 0x38d   :  { %3026 = vmatprep.mubr.bf16.mxu1 %v6718_v25  ;;  %v2094_v25 = vpack.c.bf16 %v2022_v14, %v1974_v43  ;;  %v5575_v43 = vld [vmem:[#allocation18 + $0x70] sm:$0xff]   ;;  %v5579_v14 = vld [vmem:[#allocation18 + $0xe8] sm:$0xff]  }
 0x38e   :  { %5349 = vmatpush3.bf16.msra.mxu0 %v5554_v8 }
 0x391   :  { %2930 = vmatmul.mubr.bf16.gmra.mrb[128].mxu0 %v2063_v38  ;;  %v5558_v38 = vld [vmem:[#allocation18 + $0x8] sm:$0xff]  }
 0x392   :  { %2937 = vmatprep.mubr.bf16.mxu0 %v2073_v36 }
 0x394   :  { %3027 = vmatmul.mubr.bf16.gmra.mrb[128].mxu1 %v6787_v56  ;;  %v5567_v56 = vld [vmem:[#allocation18 + $0xc8] sm:$0xff]  }
 0x395   :  { %3034 = vmatprep.mubr.bf16.mxu1 %v6744_v29  ;;  %v5564_v29 = vld [vmem:[#allocation18 + $0x20] sm:$0xff]  }
 0x399   :  { %2938 = vmatmul.mubr.bf16.gmra.mrb[132].mxu0 %v2072_v40  ;;  %v5560_v40 = vld [vmem:[#allocation18 + $0x10] sm:$0xff]  }
 0x39a   :  { %2945 = vmatprep.mubr.bf16.mxu0 %v2082_v12 }
 0x39c   :  { %3035 = vmatmul.mubr.bf16.gmra.mrb[132].mxu1 %v6800_v59 }
 0x39d   :  { %3042 = vmatprep.mubr.bf16.mxu1 %v6757_v18 }
 0x3a1   :  { %2946 = vmatmul.mubr.bf16.gmra.mrb[136].mxu0 %v2081_v31  ;;  %v5565_v31 = vld [vmem:[#allocation18 + $0xc0] sm:$0xff]  }
 0x3a2   :  { %2953 = vmatprep.mubr.bf16.mxu0 %v2091_v35  ;;  %5190 = vmatprep.subr.bf16.mxu0 %v5565_v31  ;;  %v5576_v35 = vld [vmem:[#allocation18 + $0x30] sm:$0xff]  }
 0x3a4   :  { %3043 = vmatmul.mubr.bf16.gmra.mrb[136].mxu1 %v6816_v33 }
 0x3a5   :  { %3050 = vmatprep.mubr.bf16.mxu1 %v2093_v30  ;;  %v5578_v30 = vld [vmem:[#allocation18 + $0xa0] sm:$0xff]  }
 0x3a9   :  { %2954 = vmatmul.mubr.bf16.gmra.mrb[140].mxu0 %v7004_v37 }
 0x3aa   :  { %5350 = vmatprep.mubr.bf16.mxu0 %v6708_v2  ;;  %v5555_v2 = vld [vmem:[#allocation18 + $0x40] sm:$0xff]  }
 0x3ab   :  { %5162 = vmatprep.subr.bf16.mxu1 %v5555_v2  ;;  %v5580_v2 = vld [vmem:[#allocation18 + $0xa8] sm:$0xff]  }
 0x3ac   :  { %3051 = vmatmul.mubr.bf16.gmra.mrb[140].mxu1 %v2092_v48 }
 0x3ad   :  { %5163 = vmatpush3.bf16.msra.mxu1 %v5556_v41 }
 0x3ae   :  { %5164 = vmatprep.subr.bf16.mxu1 %v5557_v11 }
 0x3b1   :  { %5351 = vmatmul.mubr.bf16.vlgmr.msra.gmra.mrb[144].mxu0 %v6762_v46  ;;  %5165 = vmatpush3.bf16.msra.mxu1 %v5558_v38 }
 0x3b2   :  { %5354 = vmatprep.mubr.bf16.mxu0 %v6780_v4  ;;  %5166 = vmatprep.subr.bf16.mxu1 %v5559_v10 }
 0x3b3   :  { %5191 = vmatpush3.bf16.msra.mxu0 %v5566_v3  ;;  %v5586_v3 = vld [vmem:[#allocation18 + $0xb8] sm:$0xff]  }
 0x3b4   :  { %5192 = vmatprep.subr.bf16.mxu0 %v5567_v56 }
 0x3b5   :  { %5167 = vmatpush3.bf16.msra.mxu1 %v5560_v40 }
 0x3b6   :  { %5168 = vmatprep.subr.bf16.mxu1 %v5561_v51 }
 0x3b7   :  { %5193 = vmatpush3.bf16.msra.mxu0 %v5568_v54  ;;  %v5595_v54 = vld [vmem:[#allocation18 + $0x1c0] sm:$0xff]  }
 0x3b8   :  { %5194 = vmatprep.subr.bf16.mxu0 %v5571_v45 }
 0x3b9   :  { %5355 = vmatmul.mubr.bf16.gmra.mrb[148].mxu0 %v2058_v7  ;;  %5169 = vmatpush3.bf16.msra.mxu1 %v5562_v34  ;;  %v5583_v34 = vld [vmem:[#allocation18 + $0xf0] sm:$0xff]  }
 0x3ba   :  { %5358 = vmatprep.mubr.bf16.mxu0 %v6797_v42  ;;  %5170 = vmatprep.subr.bf16.mxu1 %v5563_v58 }
 0x3bb   :  { %5195 = vmatpush3.bf16.msra.mxu0 %v5572_v27 }
 0x3bc   :  { %5196 = vmatprep.subr.bf16.mxu0 %v5573_v47 }
 0x3bd   :  { %5171 = vmatpush3.bf16.msra.mxu1 %v5564_v29  ;;  %v5581_v29 = vld [vmem:[#allocation18 + $0x78] sm:$0xff]  }
 0x3be   :  { %5172 = vmatprep.subr.bf16.mxu1 %v5569_v61 }
 0x3bf   :  { %5197 = vmatpush3.bf16.msra.mxu0 %v5574_v28 }
 0x3c0   :  { %5198 = vmatprep.subr.bf16.mxu0 %v5577_v22 }
 0x3c1   :  { %5359 = vmatmul.mubr.bf16.gmra.mrb[152].mxu0 %v6812_v1  ;;  %5173 = vmatpush3.bf16.msra.mxu1 %v5570_v52 }
 0x3c2   :  { %5362 = vmatprep.mubr.bf16.mxu0 %v6824_v20  ;;  %5174 = vmatprep.subr.bf16.mxu1 %v5575_v43 }
 0x3c3   :  { %5199 = vmatpush3.bf16.msra.mxu0 %v5578_v30 }
 0x3c4   :  { %5200 = vmatprep.subr.bf16.mxu0 %v5579_v14 }
 0x3c5   :  { %5175 = vmatpush3.bf16.msra.mxu1 %v5576_v35 }
 0x3c6   :  { %5176 = vmatprep.subr.bf16.mxu1 %v5581_v29 }
 0x3c7   :  { %5201 = vmatpush3.bf16.msra.mxu0 %v5580_v2 }
 0x3c8   :  { %5202 = vmatprep.subr.bf16.mxu0 %v5583_v34 }
 0x3c9   :  { %5363 = vmatmul.mubr.bf16.gmra.mrb[156].mxu0 %v2094_v25 }
 0x404   :  { %v4906_v57 = vpop.f32.mrb[80].mxu0 }
 0x405   :  { %v4907_v16 = vpop.f32.mrb[81].mxu0  ;;  %v5582_v57 = vld [vmem:[#allocation18 + $0x38] sm:$0xff]  }
 0x406   :  { %v4909_v24 = vpop.f32.mrb[82].mxu0  ;;  %v5584_v16 = vld [vmem:[#allocation18 + $0xb0] sm:$0xff]   ;;  %5177 = vmatpush3.bf16.msra.mxu1 %v5582_v57 }
 0x407   :  { %v4970_v18 = vpop.f32.mrb[80].mxu1  ;;  %v4910_v46 = vpop.f32.mrb[83].mxu0  ;;  %5203 = vmatpush3.bf16.msra.mxu0 %v5584_v16 }
 0x408   :  { %v4911_v23 = vadd.f32 %v4910_v46, %v4909_v24  ;;  %v4971_v5 = vpop.f32.mrb[81].mxu1 }
 0x409   :  { %v4973_v4 = vpop.f32.mrb[82].mxu1 }
 0x40a   :  { %v4974_v17 = vpop.f32.mrb[83].mxu1 }
 0x40b   :  { %v4975_v60 = vadd.f32 %v4974_v17, %v4973_v4  ;;  %v5589_v17 = vld [vmem:[#allocation18 + $0x140] sm:$0xff]  }
 0x40c   :  { %v4912_v32 = vpop.f32.mrb[84].mxu0  ;;  %5218 = vmatprep.subr.bf16.mxu1 %v5589_v17 }
 0x40d   :  { %v6886_v42 = vadd.f32 %v4975_v60, %v4911_v23  ;;  %v4913_v59 = vpop.f32.mrb[85].mxu0  ;;  %v5585_v23 = vld [vmem:[#allocation18 + $0xf8] sm:$0xff]  }
 0x40e   :  { %v4914_v63 = vadd.f32 %v4913_v59, %v4912_v32  ;;  %v4915_v55 = vpop.f32.mrb[86].mxu0  ;;  %5204 = vmatprep.subr.bf16.mxu0 %v5585_v23 }
 0x40f   :  { %v4976_v62 = vpop.f32.mrb[84].mxu1  ;;  %v4916_v1 = vpop.f32.mrb[87].mxu0  ;;  %5205 = vmatpush3.bf16.msra.mxu0 %v5586_v3 }
 0x410   :  { %v4917_v15 = vadd.f32 %v4916_v1, %v4915_v55  ;;  %v4977_v33 = vpop.f32.mrb[85].mxu1  ;;  %5246 = vmatprep.subr.bf16.mxu0 %v5595_v54 }
 0x411   :  { %v4978_v20 = vadd.f32 %v4977_v33, %v4976_v62  ;;  %v4979_v19 = vpop.f32.mrb[86].mxu1 }
 0x412   :  { %v4980_v50 = vpop.f32.mrb[87].mxu1 }
 0x413   :  { %v6888_v49 = vadd.f32 %v4978_v20, %v4914_v63  ;;  %v4981_v39 = vadd.f32 %v4980_v50, %v4979_v19 }
 0x414   :  { %v4918_v6 = vpop.f32.mrb[88].mxu0 }
 0x415   :  { %v6890_v13 = vadd.f32 %v4981_v39, %v4917_v15  ;;  %v4919_v44 = vpop.f32.mrb[89].mxu0 }
 0x416   :  { %v4920_v0 = vadd.f32 %v4919_v44, %v4918_v6  ;;  %v4921_v53 = vpop.f32.mrb[90].mxu0 }
 0x417   :  { %v4982_v8 = vpop.f32.mrb[88].mxu1  ;;  %v4922_v26 = vpop.f32.mrb[91].mxu0 }
 0x418   :  { %v4923_v36 = vadd.f32 %v4922_v26, %v4921_v53  ;;  %v4983_v12 = vpop.f32.mrb[89].mxu1 }
 0x419   :  { %v4984_v9 = vadd.f32 %v4983_v12, %v4982_v8  ;;  %v4985_v37 = vpop.f32.mrb[90].mxu1 }
 0x41a   :  { %v4986_v48 = vpop.f32.mrb[91].mxu1 }
 0x41b   :  { %v6892_v21 = vadd.f32 %v4984_v9, %v4920_v0  ;;  %v4987_v7 = vadd.f32 %v4986_v48, %v4985_v37 }
 0x41c   :  { %v4924_v25 = vpop.f32.mrb[92].mxu0 }
 0x41d   :  { %v6894_v41 = vadd.f32 %v4987_v7, %v4923_v36  ;;  %v4925_v11 = vpop.f32.mrb[93].mxu0 }
 0x41e   :  { %v4926_v38 = vadd.f32 %v4925_v11, %v4924_v25  ;;  %v4927_v10 = vpop.f32.mrb[94].mxu0 }
 0x41f   :  { %v4988_v40 = vpop.f32.mrb[92].mxu1  ;;  %v4928_v51 = vpop.f32.mrb[95].mxu0 }
 0x420   :  { %v4989_v58 = vpop.f32.mrb[93].mxu1 }
 0x421   :  { %v4990_v24 = vadd.f32 %v4989_v58, %v4988_v40  ;;  %v4991_v18 = vpop.f32.mrb[94].mxu1 }
 0x422   :  { %v4992_v46 = vpop.f32.mrb[95].mxu1 }
 0x423   :  { %v6896_v31 = vadd.f32 %v4990_v24, %v4926_v38 }
 0x424   :  { %v4930_v5 = vpop.f32.mrb[96].mxu0 }
 0x425   :  { %v4931_v4 = vpop.f32.mrb[97].mxu0 }
 0x426   :  { %v4933_v60 = vpop.f32.mrb[98].mxu0 }
 0x427   :  { %v4994_v56 = vpop.f32.mrb[96].mxu1  ;;  %v4934_v32 = vpop.f32.mrb[99].mxu0 }
 0x428   :  { %v4935_v59 = vadd.f32 %v4934_v32, %v4933_v60  ;;  %v4995_v63 = vpop.f32.mrb[97].mxu1 }
 0x429   :  { %v4997_v55 = vpop.f32.mrb[98].mxu1 }
 0x42a   :  { %v4998_v62 = vpop.f32.mrb[99].mxu1 }
 0x42b   :  { %v4999_v1 = vadd.f32 %v4998_v62, %v4997_v55 }
 0x42c   :  { %v4936_v45 = vpop.f32.mrb[100].mxu0 }
 0x42d   :  { %v6898_v15 = vadd.f32 %v4999_v1, %v4935_v59  ;;  %v4937_v33 = vpop.f32.mrb[101].mxu0 }
 0x42e   :  { %v4938_v61 = vadd.f32 %v4937_v33, %v4936_v45  ;;  %v4939_v52 = vpop.f32.mrb[102].mxu0 }
 0x42f   :  { %v5000_v27 = vpop.f32.mrb[100].mxu1  ;;  %v4940_v20 = vpop.f32.mrb[103].mxu0 }
 0x430   :  { %v4941_v19 = vadd.f32 %v4940_v20, %v4939_v52  ;;  %v5001_v50 = vpop.f32.mrb[101].mxu1 }
 0x431   :  { %v5002_v39 = vadd.f32 %v5001_v50, %v5000_v27  ;;  %v5003_v47 = vpop.f32.mrb[102].mxu1 }
 0x432   :  { %v5004_v6 = vpop.f32.mrb[103].mxu1 }
 0x433   :  { %v6900_v28 = vadd.f32 %v5002_v39, %v4938_v61  ;;  %v5005_v44 = vadd.f32 %v5004_v6, %v5003_v47 }
 0x434   :  { %v4942_v0 = vpop.f32.mrb[104].mxu0 }
 0x435   :  { %v6902_v53 = vadd.f32 %v5005_v44, %v4941_v19  ;;  %v4943_v8 = vpop.f32.mrb[105].mxu0 }
 0x436   :  { %v4944_v26 = vadd.f32 %v4943_v8, %v4942_v0  ;;  %v4945_v22 = vpop.f32.mrb[106].mxu0 }
 0x437   :  { %v5006_v36 = vpop.f32.mrb[104].mxu1  ;;  %v4946_v12 = vpop.f32.mrb[107].mxu0 }
 0x438   :  { %v4947_v43 = vadd.f32 %v4946_v12, %v4945_v22  ;;  %v5007_v35 = vpop.f32.mrb[105].mxu1 }
 0x439   :  { %v5008_v30 = vadd.f32 %v5007_v35, %v5006_v36  ;;  %v5009_v9 = vpop.f32.mrb[106].mxu1 }
 0x43a   :  { %v5010_v37 = vpop.f32.mrb[107].mxu1 }
 0x43b   :  { %v6904_v48 = vadd.f32 %v5008_v30, %v4944_v26  ;;  %v5011_v7 = vadd.f32 %v5010_v37, %v5009_v9 }
 0x43c   :  { %v4948_v14 = vpop.f32.mrb[108].mxu0 }
 0x43d   :  { %v6906_v25 = vadd.f32 %v5011_v7, %v4947_v43  ;;  %v4949_v2 = vpop.f32.mrb[109].mxu0 }
 0x43e   :  { %v4950_v11 = vadd.f32 %v4949_v2, %v4948_v14  ;;  %v4951_v38 = vpop.f32.mrb[110].mxu0 }
 0x43f   :  { %v5012_v10 = vpop.f32.mrb[108].mxu1  ;;  %v4952_v40 = vpop.f32.mrb[111].mxu0 }
 0x440   :  { %v5013_v51 = vpop.f32.mrb[109].mxu1 }
 0x441   :  { %v5014_v34 = vadd.f32 %v5013_v51, %v5012_v10  ;;  %v5015_v58 = vpop.f32.mrb[110].mxu1 }
 0x442   :  { %v5016_v29 = vpop.f32.mrb[111].mxu1 }
 0x443   :  { %v6908_v57 = vadd.f32 %v5014_v34, %v4950_v11 }
 0x444   :  { %v5034_v16 = vpop.f32.mrb[112].mxu0 }
 0x445   :  { %v5035_v24 = vpop.f32.mrb[113].mxu0 }
 0x446   :  { %v5037_v18 = vpop.f32.mrb[114].mxu0 }
 0x447   :  { %v5098_v46 = vpop.f32.mrb[112].mxu1  ;;  %v5038_v23 = vpop.f32.mrb[115].mxu0 }
 0x448   :  { %v5039_v5 = vadd.f32 %v5038_v23, %v5037_v18  ;;  %v5099_v3 = vpop.f32.mrb[113].mxu1 }
 0x449   :  { %v5101_v4 = vpop.f32.mrb[114].mxu1 }
 0x44a   :  { %v2903_v17 = vadd.f32 %v5039_v5, %v6886_v42  ;;  %v5102_v60 = vpop.f32.mrb[115].mxu1 }
 0x44b   :  { %v5103_v56 = vadd.f32 %v5102_v60, %v5101_v4 }
 0x44c   :  { %v5040_v32 = vpop.f32.mrb[116].mxu0 }
 0x44d   :  { %v5041_v54 = vpop.f32.mrb[117].mxu0  ;;  %v6911_v59 = vadd.f32 %v5103_v56, %v2903_v17 }
 0x44e   :  { %v5042_v63 = vadd.f32 %v5041_v54, %v5040_v32  ;;  %v5043_v55 = vpop.f32.mrb[118].mxu0 }
 0x44f   :  { %v5104_v62 = vpop.f32.mrb[116].mxu1  ;;  %v5044_v1 = vpop.f32.mrb[119].mxu0 }
 0x450   :  { %v2908_v45 = vadd.f32 %v5042_v63, %v6888_v49  ;;  %v5045_v33 = vadd.f32 %v5044_v1, %v5043_v55  ;;  %v5105_v61 = vpop.f32.mrb[117].mxu1 }
 0x451   :  { %v5106_v52 = vadd.f32 %v5105_v61, %v5104_v62  ;;  %v5107_v27 = vpop.f32.mrb[118].mxu1 }
 0x452   :  { %v2911_v20 = vadd.f32 %v5045_v33, %v6890_v13  ;;  %v5108_v19 = vpop.f32.mrb[119].mxu1 }
 0x453   :  { %v5109_v42 = vadd.f32 %v5108_v19, %v5107_v27  ;;  %v6915_v50 = vadd.f32 %v5106_v52, %v2908_v45 }
 0x454   :  { %v5046_v39 = vpop.f32.mrb[120].mxu0 }
 0x455   :  { %v5047_v47 = vpop.f32.mrb[121].mxu0  ;;  %v6917_v6 = vadd.f32 %v5109_v42, %v2911_v20 }
 0x456   :  { %v5048_v44 = vadd.f32 %v5047_v47, %v5046_v39  ;;  %v5049_v0 = vpop.f32.mrb[122].mxu0 }
 0x457   :  { %v5110_v8 = vpop.f32.mrb[120].mxu1  ;;  %v5050_v26 = vpop.f32.mrb[123].mxu0 }
 0x458   :  { %v2916_v49 = vadd.f32 %v5048_v44, %v6892_v21  ;;  %v5051_v22 = vadd.f32 %v5050_v26, %v5049_v0  ;;  %v5111_v36 = vpop.f32.mrb[121].mxu1 }
 0x459   :  { %v5112_v12 = vadd.f32 %v5111_v36, %v5110_v8  ;;  %v5113_v43 = vpop.f32.mrb[122].mxu1 }
 0x45a   :  { %v2919_v13 = vadd.f32 %v5051_v22, %v6894_v41  ;;  %v5114_v35 = vpop.f32.mrb[123].mxu1 }
 0x45b   :  { %v5115_v30 = vadd.f32 %v5114_v35, %v5113_v43  ;;  %v6921_v9 = vadd.f32 %v5112_v12, %v2916_v49 }
 0x45c   :  { %v5052_v37 = vpop.f32.mrb[124].mxu0 }
 0x45d   :  { %v5053_v7 = vpop.f32.mrb[125].mxu0  ;;  %v6923_v14 = vadd.f32 %v5115_v30, %v2919_v13 }
 0x45e   :  { %v5054_v2 = vadd.f32 %v5053_v7, %v5052_v37  ;;  %v5055_v11 = vpop.f32.mrb[126].mxu0 }
 0x45f   :  { %v5116_v38 = vpop.f32.mrb[124].mxu1  ;;  %v5056_v10 = vpop.f32.mrb[127].mxu0 }
 0x460   :  { %v2924_v21 = vadd.f32 %v5054_v2, %v6896_v31  ;;  %v5117_v40 = vpop.f32.mrb[125].mxu1 }
 0x461   :  { %v5118_v51 = vadd.f32 %v5117_v40, %v5116_v38  ;;  %v5119_v34 = vpop.f32.mrb[126].mxu1 }
 0x462   :  { %v5120_v58 = vpop.f32.mrb[127].mxu1 }
 0x463   :  { %v6926_v29 = vadd.f32 %v5118_v51, %v2924_v21 }
 0x464   :  { %v5058_v41 = vpop.f32.mrb[128].mxu0 }
 0x465   :  { %v5059_v16 = vpop.f32.mrb[129].mxu0  ;;  %v6944_v41 = vld [vmem:[#allocation15] ss:$0 sm:$0xff] }
 0x466   :  { %v5061_v24 = vpop.f32.mrb[130].mxu0 }
 0x467   :  { %v5122_v18 = vpop.f32.mrb[128].mxu1  ;;  %v5062_v46 = vpop.f32.mrb[131].mxu0 }
 0x468   :  { %v5063_v23 = vadd.f32 %v5062_v46, %v5061_v24  ;;  %v5123_v5 = vpop.f32.mrb[129].mxu1  ;;  %v6947_v18 = vld [vmem:[#allocation17] ss:$0 sm:$0xff] }
 0x469   :  { %v5125_v3 = vpop.f32.mrb[130].mxu1 }
 0x46a   :  { %v2935_v4 = vadd.f32 %v5063_v23, %v6898_v15  ;;  %v5126_v17 = vpop.f32.mrb[131].mxu1 }
 0x46b   :  { %v5127_v60 = vadd.f32 %v5126_v17, %v5125_v3 }
 0x46c   :  { %v5064_v56 = vpop.f32.mrb[132].mxu0 }
 0x46d   :  { %v5065_v31 = vpop.f32.mrb[133].mxu0  ;;  %v6929_v32 = vadd.f32 %v5127_v60, %v2935_v4 }
 0x46e   :  { %v5066_v54 = vadd.f32 %v5065_v31, %v5064_v56  ;;  %v5067_v63 = vpop.f32.mrb[134].mxu0 }
 0x46f   :  { %v5128_v55 = vpop.f32.mrb[132].mxu1  ;;  %v5068_v62 = vpop.f32.mrb[135].mxu0 }
 0x470   :  { %v2940_v1 = vadd.f32 %v5066_v54, %v6900_v28  ;;  %v5069_v45 = vadd.f32 %v5068_v62, %v5067_v63  ;;  %v5129_v33 = vpop.f32.mrb[133].mxu1 }
 0x471   :  { %v5130_v61 = vadd.f32 %v5129_v33, %v5128_v55  ;;  %v5131_v52 = vpop.f32.mrb[134].mxu1 }
 0x472   :  { %v2943_v27 = vadd.f32 %v5069_v45, %v6902_v53  ;;  %v5132_v20 = vpop.f32.mrb[135].mxu1 }
 0x473   :  { %v5133_v15 = vadd.f32 %v5132_v20, %v5131_v52  ;;  %v6933_v19 = vadd.f32 %v5130_v61, %v2940_v1 }
 0x474   :  { %v5070_v42 = vpop.f32.mrb[136].mxu0 }
 0x475   :  { %v5071_v39 = vpop.f32.mrb[137].mxu0  ;;  %v6935_v47 = vadd.f32 %v5133_v15, %v2943_v27 }
 0x476   :  { %v5072_v44 = vadd.f32 %v5071_v39, %v5070_v42  ;;  %v5073_v0 = vpop.f32.mrb[138].mxu0 }
 0x477   :  { %v5134_v8 = vpop.f32.mrb[136].mxu1  ;;  %v5074_v26 = vpop.f32.mrb[139].mxu0 }
 0x478   :  { %v2948_v28 = vadd.f32 %v5072_v44, %v6904_v48  ;;  %v5075_v49 = vadd.f32 %v5074_v26, %v5073_v0  ;;  %v5135_v22 = vpop.f32.mrb[137].mxu1 }
 0x479   :  { %v5136_v36 = vadd.f32 %v5135_v22, %v5134_v8  ;;  %v5137_v12 = vpop.f32.mrb[138].mxu1 }
 0x47a   :  { %v2951_v53 = vadd.f32 %v5075_v49, %v6906_v25  ;;  %v5138_v43 = vpop.f32.mrb[139].mxu1 }
 0x47b   :  { %v5139_v13 = vadd.f32 %v5138_v43, %v5137_v12  ;;  %v6939_v35 = vadd.f32 %v5136_v36, %v2948_v28 }
 0x47c   :  { %v5076_v30 = vpop.f32.mrb[140].mxu0 }
 0x47d   :  { %v5077_v37 = vpop.f32.mrb[141].mxu0  ;;  %v6941_v7 = vadd.f32 %v5139_v13, %v2951_v53 }
 0x47e   :  { %v5078_v2 = vadd.f32 %v5077_v37, %v5076_v30  ;;  %v5079_v11 = vpop.f32.mrb[142].mxu0 }
 0x47f   :  { %v5140_v38 = vpop.f32.mrb[140].mxu1  ;;  %v5080_v10 = vpop.f32.mrb[143].mxu0 }
 0x480   :  { %v2956_v48 = vadd.f32 %v5078_v2, %v6908_v57  ;;  %v5141_v21 = vpop.f32.mrb[141].mxu1 }
 0x481   :  { %v5142_v40 = vadd.f32 %v5141_v21, %v5140_v38  ;;  %v5143_v51 = vpop.f32.mrb[142].mxu1 }
 0x482   :  { %v5144_v34 = vpop.f32.mrb[143].mxu1 }
 0x483   :  { %v3053_v58 = vadd.f32 %v5142_v40, %v2956_v48 }
 0x484   :  { %v5352_v25 = vpop.f32.mrb[144].mxu0 }
 0x485   :  { %v3102_v16 = vadd.f32 %v5352_v25, %v6915_v50  ;;  %v3093_v24 = vpop.f32.mrb[145].mxu0 }
 0x486   :  { %v5353_v46 = vpop.f32.mrb[146].mxu0 }
 0x487   :  { %v3165_v23 = vmul.f32 %v6944_v41, %v3102_v16  ;;  %v3105_v5 = vadd.f32 %v5353_v46, %v6917_v6  ;;  %v3096_v3 = vpop.f32.mrb[147].mxu0  ;;  %v5599_v46 = vld [vmem:[#allocation18 + $0x148] sm:$0xff]  }
 0x488   :  { %v3097_v57 = vadd.f32 %v3096_v3, %v6911_v59 }
 0x489   :  { %v3188_v4 = vadd.f32 %v6947_v18, %v3165_v23  ;;  %v3166_v17 = vmul.f32 %v6944_v41, %v3105_v5 }
 0x48a   :  { %v3164_v60 = vmul.f32 %v6944_v41, %v3097_v57 }
 0x48b   :  { %v3204_v56 = vmax.f32 %v3188_v4, 0.0  ;;  %v3189_v50 = vadd.f32 %v6947_v18, %v3166_v17 }
 0x48c   :  { %v3187_v31 = vadd.f32 %v6947_v18, %v3164_v60  ;;  %v5356_v54 = vpop.f32.mrb[148].mxu0 }
 0x48d   :  { %3220 = vst [vmem:[#allocation3 + $0x10] sm:$0xff] %v3204_v56  ;;  %v3205_v63 = vmax.f32 %v3189_v50, 0.0  ;;  %v3118_v55 = vadd.f32 %v5356_v54, %v6926_v29  ;;  %v3109_v6 = vpop.f32.mrb[149].mxu0  ;;  %v5598_v50 = vld [vmem:[#allocation18 + $0x180] sm:$0xff]  }
 0x48e   :  { %v3203_v62 = vmax.f32 %v3187_v31, 0.0  ;;  %v3110_v59 = vadd.f32 %v3109_v6, %v6921_v9  ;;  %v5357_v1 = vpop.f32.mrb[150].mxu0 }
 0x48f   :  { %3221 = vst [vmem:[#allocation3 + $0x18] sm:$0xff] %v3205_v63  ;;  %v3169_v45 = vmul.f32 %v6944_v41, %v3118_v55  ;;  %v3112_v33 = vpop.f32.mrb[151].mxu0  ;;  %v5600_v63 = vld [vmem:[#allocation18 + $0x108] sm:$0xff]  }
 0x490   :  { %3219 = vst [vmem:[#allocation3 + $0x8] sm:$0xff] %v3203_v62  ;;  %v3167_v61 = vmul.f32 %v6944_v41, %v3110_v59  ;;  %v3113_v52 = vadd.f32 %v3112_v33, %v6923_v14  ;;  %v5601_v55 = vld [vmem:[#allocation18 + $0x1c8] sm:$0xff]   ;;  %v5603_v62 = vld [vmem:[#allocation18 + $0x150] sm:$0xff]  }
 0x491   :  { %v3192_v27 = vadd.f32 %v6947_v18, %v3169_v45  ;;  %v5602_v59 = vld [vmem:[#allocation18 + $0x188] sm:$0xff]   ;;  %v5605_v45 = vld [vmem:[#allocation18 + $0x1d0] sm:$0xff]  }
 0x492   :  { %v3190_v20 = vadd.f32 %v6947_v18, %v3167_v61  ;;  %v3168_v29 = vmul.f32 %v6944_v41, %v3113_v52  ;;  %v5606_v33 = vld [vmem:[#allocation18 + $0x190] sm:$0xff]   ;;  %v5607_v61 = vld [vmem:[#allocation18 + $0x158] sm:$0xff]  }
 0x493   :  { %v3208_v15 = vmax.f32 %v3192_v27, 0.0  ;;  %v5608_v52 = vld [vmem:[#allocation18 + $0x118] sm:$0xff]  }
 0x494   :  { %v3206_v42 = vmax.f32 %v3190_v20, 0.0  ;;  %v3191_v9 = vadd.f32 %v6947_v18, %v3168_v29  ;;  %v5360_v39 = vpop.f32.mrb[152].mxu0  ;;  %v5609_v27 = vld [vmem:[#allocation18 + $0x1d8] sm:$0xff]  }
 0x495   :  { %3224 = vst [vmem:[#allocation3 + $0x30] sm:$0xff] %v3208_v15  ;;  %v3134_v44 = vadd.f32 %v5360_v39, %v6933_v19  ;;  %v3125_v0 = vpop.f32.mrb[153].mxu0  ;;  %v5610_v29 = vld [vmem:[#allocation18 + $0x198] sm:$0xff]   ;;  %v5616_v39 = vld [vmem:[#allocation18 + $0x120] sm:$0xff]  }
 0x496   :  { %3222 = vst [vmem:[#allocation3 + $0x20] sm:$0xff] %v3206_v42  ;;  %v3207_v8 = vmax.f32 %v3191_v9, 0.0  ;;  %v5361_v26 = vpop.f32.mrb[154].mxu0  ;;  %v5593_v34 = vld [vmem:[#allocation3 + $0x11] ss:$8 sps:$4 sm:$0xff]  }
 0x497   :  { %v3173_v14 = vmul.f32 %v6944_v41, %v3134_v44  ;;  %v3137_v28 = vadd.f32 %v5361_v26, %v6935_v47  ;;  %v3128_v49 = vpop.f32.mrb[155].mxu0  ;;  %v5587_v13 = vld [vmem:[#allocation3 + $0xa] ss:$8 sps:$4 sm:$0xff]  }
 0x498   :  { %3223 = vst [vmem:[#allocation3 + $0x28] sm:$0xff] %v3207_v8  ;;  %v3129_v22 = vadd.f32 %v3128_v49, %v6929_v32  ;;  %v5590_v2 = vld [vmem:[#allocation3 + $0x9] ss:$8 sps:$4 sm:$0xff]  }
 0x499   :  { %v3196_v36 = vadd.f32 %v6947_v18, %v3173_v14  ;;  %v3174_v12 = vmul.f32 %v6944_v41, %v3137_v28  ;;  %v5592_v32 = vld [vmem:[#allocation18 + $0x100] sm:$0xff]  }
 0x49a   :  { %v3172_v53 = vmul.f32 %v6944_v41, %v3129_v22  ;;  %v5619_v8 = vld [vmem:[#allocation3 + $0x13] ss:$8 sps:$4 sm:$0xff]  }
 0x49b   :  { %v3212_v43 = vmax.f32 %v3196_v36, 0.0  ;;  %v3197_v19 = vadd.f32 %v6947_v18, %v3174_v12  ;;  %v5621_v26 = vld [vmem:[#allocation18 + $0x1e0] sm:$0xff]   ;;  %v5625_v22 = vld [vmem:[#allocation18 + $0x168] sm:$0xff]  }
 0x49c   :  { %v3195_v30 = vadd.f32 %v6947_v18, %v3172_v53  ;;  %v5364_v37 = vpop.f32.mrb[156].mxu0  ;;  %v5624_v12 = vld [vmem:[#allocation18 + $0x1a0] sm:$0xff]  }
 0x49d   :  { %3228 = vst [vmem:[#allocation3 + $0x50] sm:$0xff] %v3212_v43  ;;  %v3213_v47 = vmax.f32 %v3197_v19, 0.0  ;;  %v3150_v11 = vadd.f32 %v5364_v37, %v3053_v58  ;;  %v3141_v38 = vpop.f32.mrb[157].mxu0  ;;  %v5588_v10 = vld [vmem:[#allocation3 + $0x1a] ss:$8 sps:$4 sm:$0xff]  }
 0x49e   :  { %v3211_v48 = vmax.f32 %v3195_v30, 0.0  ;;  %v3142_v21 = vadd.f32 %v3141_v38, %v6939_v35  ;;  %v5365_v40 = vpop.f32.mrb[158].mxu0  ;;  %v5591_v51 = vld [vmem:[#allocation3 + $0x19] ss:$8 sps:$4 sm:$0xff]   ;;  %v3454_v24 = vpack.c.bf16 %v5588_v10, %v5587_v13  ;;  %v5596_v35 = vld [vmem:[#allocation3 + $0xb] ss:$8 sps:$4 sm:$0xff]  }
 0x49f   :  { %3229 = vst [vmem:[#allocation3 + $0x58] sm:$0xff] %v3213_v47  ;;  %v3177_v25 = vmul.f32 %v6944_v41, %v3150_v11  ;;  %v3144_v16 = vpop.f32.mrb[159].mxu0  ;;  %v3453_v5 = vpack.c.bf16 %v5591_v51, %v5590_v2  ;;  %v5594_v3 = vld [vmem:[#allocation3 + $0x21] ss:$8 sps:$4 sm:$0xff]  }
 0x4a0   :  { %3227 = vst [vmem:[#allocation3 + $0x48] sm:$0xff] %v3211_v48  ;;  %v3175_v23 = vmul.f32 %v6944_v41, %v3142_v21  ;;  %v3145_v58 = vadd.f32 %v3144_v16, %v6941_v7  ;;  %v5597_v57 = vld [vmem:[#allocation3 + $0x1b] ss:$8 sps:$4 sm:$0xff]   ;;  %4079 = vmatprep.mubr.bf16.mxu1 %v3454_v24  ;;  %v3456_v56 = vpack.c.bf16 %v5594_v3, %v5593_v34  ;;  %v5627_v53 = vld [vmem:[#allocation3 + $0x2a] ss:$8 sps:$4 sm:$0xff]  }
 0x4a1   :  { %v3200_v4 = vadd.f32 %v6947_v18, %v3177_v25  ;;  %4080 = vmatmul.mubr.bf16.vlgmr.msra.gmra.mrb[144].mxu1 %v3453_v5  ;;  %v3455_v54 = vpack.c.bf16 %v5597_v57, %v5596_v35  ;;  %v5620_v42 = vld [vmem:[#allocation3 + $0x23] ss:$8 sps:$4 sm:$0xff]   ;;  %v5641_v16 = vld [vmem:[#allocation18 + $0x200] sm:$0xff]  }
 0x4a2   :  { %v3198_v17 = vadd.f32 %v6947_v18, %v3175_v23  ;;  %v3176_v60 = vmul.f32 %v6944_v41, %v3145_v58  ;;  %5219 = vmatpush3.bf16.msra.mxu1 %v5592_v32  ;;  %4128 = vmatprep.mubr.bf16.mxu0 %v3456_v56  ;;  %v5604_v41 = vld [vmem:[#allocation18 + $0x110] sm:$0xff]   ;;  %v5628_v13 = vld [vmem:[#allocation18 + $0x128] sm:$0xff]   ;;  %v3458_v30 = vpack.c.bf16 %v5620_v42, %v5619_v8  ;;  %v5635_v21 = vld [vmem:[#allocation18 + $0x178] sm:$0xff]  }
 0x4a3   :  { %v3216_v31 = vmax.f32 %v3200_v4, 0.0  ;;  %5220 = vmatprep.subr.bf16.mxu1 %v5599_v46  ;;  %4129 = vmatmul.mubr.bf16.vlgmr.msra.gmra.mrb[160].mxu0 %v3455_v54  ;;  %v5626_v37 = vld [vmem:[#allocation3 + $0x1a] ss:$8 sps:$4 sm:$0xff]   ;;  %v5636_v51 = vld [vmem:[#allocation18 + $0x138] sm:$0xff]  }
 0x4a4   :  { %v3214_v7 = vmax.f32 %v3198_v17, 0.0  ;;  %v3199_v6 = vadd.f32 %v6947_v18, %v3176_v60  ;;  %5247 = vmatpush3.bf16.msra.mxu0 %v5598_v50  ;;  %v5613_v18 = vld [vmem:[#allocation18 + $0x160] sm:$0xff]   ;;  %v5629_v47 = vld [vmem:[#allocation18 + $0x1e8] sm:$0xff]   ;;  %v3460_v11 = vpack.c.bf16 %v5627_v53, %v5626_v37  ;;  %v5631_v38 = vld [vmem:[#allocation18 + $0x170] sm:$0xff]  }
 0x4a5   :  { %3232 = vst [vmem:[#allocation3 + $0x70] sm:$0xff] %v3216_v31  ;;  %5248 = vmatprep.subr.bf16.mxu0 %v5601_v55  ;;  %v5630_v10 = vld [vmem:[#allocation18 + $0x1a8] sm:$0xff]   ;;  %v5632_v32 = vld [vmem:[#allocation18 + $0x130] sm:$0xff]   ;;  %v5637_v34 = vld [vmem:[#allocation18 + $0x1f8] sm:$0xff]  }
 0x4a6   :  { %3230 = vst [vmem:[#allocation3 + $0x60] sm:$0xff] %v3214_v7  ;;  %v3215_v1 = vmax.f32 %v3199_v6, 0.0  ;;  %5221 = vmatpush3.bf16.msra.mxu1 %v5600_v63  ;;  %v5617_v44 = vld [vmem:[#allocation3 + $0x51] ss:$8 sps:$4 sm:$0xff]   ;;  %v5633_v48 = vld [vmem:[#allocation18 + $0x1f0] sm:$0xff]  }
 0x4a7   :  { %5222 = vmatprep.subr.bf16.mxu1 %v5603_v62  ;;  %v5611_v20 = vld [vmem:[#allocation3 + $0x4a] ss:$8 sps:$4 sm:$0xff]   ;;  %v5648_v4 = vld [vmem:[#allocation18 + $0x208] sm:$0xff]  }
 0x4a8   :  { %3231 = vst [vmem:[#allocation3 + $0x68] sm:$0xff] %v3215_v1  ;;  %5249 = vmatpush3.bf16.msra.mxu0 %v5602_v59  ;;  %v5614_v15 = vld [vmem:[#allocation3 + $0x49] ss:$8 sps:$4 sm:$0xff]   ;;  %v5644_v17 = vld [vmem:[#allocation3 + $0x19] ss:$8 sps:$4 sm:$0xff]  }
 0x4a9   :  { %5250 = vmatprep.subr.bf16.mxu0 %v5605_v45  ;;  %v5622_v19 = vld [vmem:[#allocation3 + $0x4b] ss:$8 sps:$4 sm:$0xff]   ;;  %v5652_v7 = vld [vmem:[#allocation3 + $0x1b] ss:$8 sps:$4 sm:$0xff]  }
 0x4aa   :  { %5223 = vmatpush3.bf16.msra.mxu1 %v5604_v41  ;;  %v5634_v40 = vld [vmem:[#allocation18 + $0x1b0] sm:$0xff]   ;;  %v5638_v46 = vld [vmem:[#allocation18 + $0x1b8] sm:$0xff]  }
 0x4ab   :  { %5224 = vmatprep.subr.bf16.mxu1 %v5607_v61  ;;  %v5640_v25 = vld [vmem:[#allocation3 + $0x22] ss:$8 sps:$4 sm:$0xff]   ;;  %v5639_v23 = vld [vmem:[#allocation3 + $0x12] ss:$8 sps:$4 sm:$0xff]  }
 0x4ac   :  { %5251 = vmatpush3.bf16.msra.mxu0 %v5606_v33  ;;  %v5642_v58 = vld [vmem:[#allocation3 + $0x53] ss:$8 sps:$4 sm:$0xff]   ;;  %v3457_v3 = vpack.c.bf16 %v5640_v25, %v5639_v23  ;;  %v5651_v54 = vld [vmem:[#allocation18 + $0x210] sm:$0xff]  }
 0x4ad   :  { %v5612_v9 = vld [vmem:[#allocation3 + $0x5a] ss:$8 sps:$4 sm:$0xff]   ;;  %5252 = vmatprep.subr.bf16.mxu0 %v5609_v27  ;;  %v5645_v5 = vld [vmem:[#allocation3 + $0x29] ss:$8 sps:$4 sm:$0xff]  }
 0x4ae   :  { %v5615_v0 = vld [vmem:[#allocation3 + $0x59] ss:$8 sps:$4 sm:$0xff]   ;;  %5225 = vmatpush3.bf16.msra.mxu1 %v5608_v52  ;;  %v3463_v14 = vpack.c.bf16 %v5612_v9, %v5611_v20  ;;  %v3459_v56 = vpack.c.bf16 %v5645_v5, %v5644_v17  ;;  %v5653_v63 = vld [vmem:[#allocation3 + $0x2b] ss:$8 sps:$4 sm:$0xff]  }
 0x4af   :  { %v5618_v28 = vld [vmem:[#allocation3 + $0x61] ss:$8 sps:$4 sm:$0xff]   ;;  %5226 = vmatprep.subr.bf16.mxu1 %v5613_v18  ;;  %v3462_v36 = vpack.c.bf16 %v5615_v0, %v5614_v15  ;;  %v5649_v55 = vld [vmem:[#allocation3 + $0x52] ss:$8 sps:$4 sm:$0xff]   ;;  %v3461_v1 = vpack.c.bf16 %v5653_v63, %v5652_v7 }
 0x4b0   :  { %v5623_v49 = vld [vmem:[#allocation3 + $0x5b] ss:$8 sps:$4 sm:$0xff]   ;;  %4087 = vmatprep.mubr.bf16.mxu1 %v3463_v14  ;;  %v3465_v43 = vpack.c.bf16 %v5618_v28, %v5617_v44  ;;  %5253 = vmatpush3.bf16.msra.mxu0 %v5610_v29  ;;  %v5647_v57 = vld [vmem:[#allocation3 + $0x6a] ss:$8 sps:$4 sm:$0xff]  }
 0x4b1   :  { %4088 = vmatmul.mubr.bf16.gmra.mrb[148].mxu1 %v3462_v36  ;;  %v3464_v2 = vpack.c.bf16 %v5623_v49, %v5622_v19  ;;  %5254 = vmatprep.subr.bf16.mxu0 %v5621_v26  ;;  %v5643_v24 = vld [vmem:[#allocation3 + $0x63] ss:$8 sps:$4 sm:$0xff]   ;;  %v5657_v33 = vld [vmem:[#allocation18 + $0x220] sm:$0xff]  }
 0x4b2   :  { %5227 = vmatpush3.bf16.msra.mxu1 %v5616_v39  ;;  %4136 = vmatprep.mubr.bf16.mxu0 %v3465_v43  ;;  %v3467_v35 = vpack.c.bf16 %v5643_v24, %v5642_v58  ;;  %v5646_v60 = vld [vmem:[#allocation3 + $0x5a] ss:$8 sps:$4 sm:$0xff]   ;;  %v5655_v6 = vld [vmem:[#allocation3 + $0x69] ss:$8 sps:$4 sm:$0xff]  }
 0x4b3   :  { %4177 = vmatprep.mubr.bf16.mxu1 %v3458_v30  ;;  %4137 = vmatmul.mubr.bf16.gmra.mrb[164].mxu0 %v3464_v2  ;;  %v3469_v50 = vpack.c.bf16 %v5647_v57, %v5646_v60  ;;  %v5650_v31 = vld [vmem:[#allocation3 + $0x62] ss:$8 sps:$4 sm:$0xff]  }
 0x4b4   :  { %5228 = vmatprep.subr.bf16.mxu1 %v5625_v22  ;;  %5255 = vmatpush3.bf16.msra.mxu0 %v5624_v12  ;;  %v3466_v62 = vpack.c.bf16 %v5650_v31, %v5649_v55  ;;  %v5656_v59 = vld [vmem:[#allocation18 + $0x218] sm:$0xff]   ;;  %v5654_v41 = vld [vmem:[#allocation3 + $0x59] ss:$8 sps:$4 sm:$0xff]  }
 0x4b5   :  { %4226 = vmatprep.mubr.bf16.mxu0 %v3460_v11  ;;  %5256 = vmatprep.subr.bf16.mxu0 %v5629_v47  ;;  %v3468_v45 = vpack.c.bf16 %v5655_v6, %v5654_v41  ;;  %v5658_v61 = vld [vmem:[#allocation18 + $0x228] sm:$0xff]   ;;  %v5659_v52 = vld [vmem:[#allocation18 + $0x230] sm:$0xff]   ;;  %v5660_v27 = vld [vmem:[#allocation18 + $0x238] sm:$0xff]  }
 0x4b6   :  { %5229 = vmatpush3.bf16.msra.mxu1 %v5628_v13  ;;  %v5662_v18 = vld [vmem:[#allocation3 + $0x6b] ss:$8 sps:$4 sm:$0xff]   ;;  %v5661_v20 = vld [vmem:[#allocation3 + $0x5b] ss:$8 sps:$4 sm:$0xff]  }
 0x4b7   :  { %5230 = vmatprep.subr.bf16.mxu1 %v5631_v38  ;;  %v3470_v29 = vpack.c.bf16 %v5662_v18, %v5661_v20  ;;  %v4588_v18 = vld [vmem:[#allocation20] ss:$0 sm:$0xff] }
 0x4b8   :  { %5257 = vmatpush3.bf16.msra.mxu0 %v5630_v10 }
 0x4b9   :  { %5258 = vmatprep.subr.bf16.mxu0 %v5633_v48 }
 0x4ba   :  { %5231 = vmatpush3.bf16.msra.mxu1 %v5632_v32 }
 0x4bb   :  { %5232 = vmatprep.subr.bf16.mxu1 %v5635_v21 }
 0x4bc   :  { %5259 = vmatpush3.bf16.msra.mxu0 %v5634_v40 }
 0x4bd   :  { %5260 = vmatprep.subr.bf16.mxu0 %v5637_v34 }
 0x4be   :  { %5233 = vmatpush3.bf16.msra.mxu1 %v5636_v51 }
 0x4bf   :  { %5366 = vmatprep.subr.bf16.mxu1 %v5641_v16 }
 0x4c0   :  { %5261 = vmatpush3.bf16.msra.mxu0 %v5638_v46 }
 0x4c1   :  { %4178 = vmatmul.mubr.bf16.vlgmr.msra.gmra.mrb[152].mxu1 %v3457_v3 }
 0x4c2   :  { %4185 = vmatprep.mubr.bf16.mxu1 %v3467_v35  ;;  %5367 = vmatpush3.bf16.msra.mxu1 %v5641_v16 }
 0x4c3   :  { %5368 = vmatprep.subr.bf16.mxu1 %v5648_v4  ;;  %4227 = vmatmul.mubr.bf16.vlgmr.msra.gmra.mrb[168].mxu0 %v3459_v56 }
 0x4c4   :  { %4234 = vmatprep.mubr.bf16.mxu0 %v3469_v50 }
 0x4c6   :  { %5369 = vmatpush3.bf16.msra.mxu1 %v5648_v4 }
 0x4c7   :  { %5370 = vmatprep.subr.bf16.mxu1 %v5651_v54 }
 0x4c9   :  { %4186 = vmatmul.mubr.bf16.gmra.mrb[156].mxu1 %v3466_v62 }
 0x4ca   :  { %5371 = vmatpush3.bf16.msra.mxu1 %v5651_v54  ;;  %5382 = vmatprep.mubr.bf16.mxu1 %v3461_v1 }
 0x4cb   :  { %5372 = vmatprep.subr.bf16.mxu1 %v5656_v59  ;;  %4235 = vmatmul.mubr.bf16.gmra.mrb[172].mxu0 %v3468_v45 }
 0x4ce   :  { %5373 = vmatpush3.bf16.msra.mxu1 %v5656_v59 }
 0x4cf   :  { %5374 = vmatprep.subr.bf16.mxu1 %v5657_v33 }
 0x4d2   :  { %5375 = vmatpush3.bf16.msra.mxu1 %v5657_v33 }
 0x4d3   :  { %5376 = vmatprep.subr.bf16.mxu1 %v5658_v61 }
 0x4d6   :  { %5377 = vmatpush3.bf16.msra.mxu1 %v5658_v61 }
 0x4d7   :  { %5378 = vmatprep.subr.bf16.mxu1 %v5659_v52 }
 0x4da   :  { %5379 = vmatpush3.bf16.msra.mxu1 %v5659_v52 }
 0x4db   :  { %5380 = vmatprep.subr.bf16.mxu1 %v5660_v27 }
 0x4de   :  { %5381 = vmatpush3.bf16.msra.mxu1 %v5660_v27 }
 0x4e1   :  { %5383 = vmatmul.mubr.bf16.vlgmr.msra.gmra.mrb[160].mxu1 %v3470_v29 }
 0x574   :  { %v5178_v15 = vpop.f32.mrb[144].mxu1 }
 0x575   :  { %v5179_v42 = vpop.f32.mrb[145].mxu1 }
 0x576   :  { %v5180_v9 = vadd.f32 %v5179_v42, %v5178_v15  ;;  %v5181_v39 = vpop.f32.mrb[146].mxu1  ;;  %v5206_v44 = vpop.f32.mrb[160].mxu0  ;;  %v4589_v15 = vld [vmem:[#allocation21] ss:$0 sm:$0xff] }
 0x577   :  { %v5182_v0 = vpop.f32.mrb[147].mxu1  ;;  %v5207_v26 = vpop.f32.mrb[161].mxu0 }
 0x578   :  { %v5183_v8 = vadd.f32 %v5182_v0, %v5181_v39  ;;  %v5208_v14 = vadd.f32 %v5207_v26, %v5206_v44  ;;  %v5209_v28 = vpop.f32.mrb[162].mxu0 }
 0x579   :  { %v5210_v49 = vpop.f32.mrb[163].mxu0 }
 0x57a   :  { %v4131_v22 = vadd.f32 %v5208_v14, %v5180_v9  ;;  %v5211_v36 = vadd.f32 %v5210_v49, %v5209_v28 }
 0x57c   :  { %v4134_v12 = vadd.f32 %v5211_v36, %v5183_v8 }
 0x584   :  { %v5184_v53 = vpop.f32.mrb[148].mxu1 }
 0x585   :  { %v5185_v43 = vpop.f32.mrb[149].mxu1 }
 0x586   :  { %v5186_v19 = vadd.f32 %v5185_v43, %v5184_v53  ;;  %v5187_v13 = vpop.f32.mrb[150].mxu1  ;;  %v5212_v30 = vpop.f32.mrb[164].mxu0 }
 0x587   :  { %v5188_v37 = vpop.f32.mrb[151].mxu1  ;;  %v5213_v47 = vpop.f32.mrb[165].mxu0 }
 0x588   :  { %v5189_v2 = vadd.f32 %v5188_v37, %v5187_v13  ;;  %v5214_v11 = vadd.f32 %v5213_v47, %v5212_v30  ;;  %v5215_v38 = vpop.f32.mrb[166].mxu0 }
 0x589   :  { %v5216_v10 = vpop.f32.mrb[167].mxu0 }
 0x58a   :  { %v4139_v32 = vadd.f32 %v5214_v11, %v5186_v19  ;;  %v5217_v48 = vadd.f32 %v5216_v10, %v5215_v38 }
 0x58c   :  { %v4142_v21 = vadd.f32 %v5217_v48, %v5189_v2 }
 0x594   :  { %v5234_v40 = vpop.f32.mrb[152].mxu1 }
 0x595   :  { %v5235_v51 = vpop.f32.mrb[153].mxu1 }
 0x596   :  { %v5236_v34 = vadd.f32 %v5235_v51, %v5234_v40  ;;  %v5237_v25 = vpop.f32.mrb[154].mxu1  ;;  %v5262_v16 = vpop.f32.mrb[168].mxu0 }
 0x597   :  { %v5238_v24 = vpop.f32.mrb[155].mxu1  ;;  %v5263_v58 = vpop.f32.mrb[169].mxu0 }
 0x598   :  { %v4180_v46 = vadd.f32 %v5236_v34, %v4131_v22  ;;  %v5239_v23 = vadd.f32 %v5238_v24, %v5237_v25  ;;  %v5264_v5 = vadd.f32 %v5263_v58, %v5262_v16  ;;  %v5265_v3 = vpop.f32.mrb[170].mxu0 }
 0x599   :  { %v5266_v4 = vpop.f32.mrb[171].mxu0 }
 0x59a   :  { %v4183_v57 = vadd.f32 %v5239_v23, %v4134_v12  ;;  %v5267_v35 = vadd.f32 %v5266_v4, %v5265_v3  ;;  %v4229_v17 = vadd.f32 %v5264_v5, %v4180_v46 }
 0x59c   :  { %v5240_v60 = vpop.f32.mrb[156].mxu1  ;;  %v4232_v50 = vadd.f32 %v5267_v35, %v4183_v57 }
 0x59d   :  { %v5241_v56 = vpop.f32.mrb[157].mxu1 }
 0x59e   :  { %v5242_v31 = vadd.f32 %v5241_v56, %v5240_v60  ;;  %v5243_v54 = vpop.f32.mrb[158].mxu1  ;;  %v5268_v63 = vpop.f32.mrb[172].mxu0 }
 0x59f   :  { %v5244_v55 = vpop.f32.mrb[159].mxu1  ;;  %v5269_v62 = vpop.f32.mrb[173].mxu0 }
 0x5a0   :  { %v4188_v7 = vadd.f32 %v5242_v31, %v4139_v32  ;;  %v5245_v6 = vadd.f32 %v5244_v55, %v5243_v54  ;;  %v5270_v59 = vadd.f32 %v5269_v62, %v5268_v63  ;;  %v5271_v1 = vpop.f32.mrb[174].mxu0 }
 0x5a1   :  { %v5272_v45 = vpop.f32.mrb[175].mxu0 }
 0x5a2   :  { %v4191_v41 = vadd.f32 %v5245_v6, %v4142_v21  ;;  %v5273_v33 = vadd.f32 %v5272_v45, %v5271_v1  ;;  %v4237_v61 = vadd.f32 %v5270_v59, %v4188_v7 }
 0x5a4   :  { %v4240_v52 = vadd.f32 %v5273_v33, %v4191_v41 }
 0x5b4   :  { %v5384_v27 = vpop.f32.mrb[160].mxu1 }
 0x5b5   :  { %v4286_v20 = vadd.f32 %v5384_v27, %v4237_v61  ;;  %v4277_v29 = vpop.f32.mrb[161].mxu1 }
 0x5b6   :  { %v4278_v42 = vadd.f32 %v4277_v29, %v4229_v17  ;;  %v5385_v9 = vpop.f32.mrb[162].mxu1 }
 0x5b7   :  { %v4301_v39 = vmul.f32 %v4588_v18, %v4286_v20  ;;  %v4289_v44 = vadd.f32 %v5385_v9, %v4240_v52  ;;  %v4280_v0 = vpop.f32.mrb[163].mxu1 }
 0x5b8   :  { %v4299_v8 = vmul.f32 %v4588_v18, %v4278_v42  ;;  %v4281_v26 = vadd.f32 %v4280_v0, %v4232_v50 }
 0x5b9   :  { %v4312_v14 = vadd.f32 %v4589_v15, %v4301_v39  ;;  %v4302_v28 = vmul.f32 %v4588_v18, %v4289_v44 }
 0x5ba   :  { %v4310_v49 = vadd.f32 %v4589_v15, %v4299_v8  ;;  %v4300_v22 = vmul.f32 %v4588_v18, %v4281_v26 }
 0x5bb   :  { %v4313_v36 = vadd.f32 %v4589_v15, %v4302_v28  ;;  %v4316_v53 = vmax.f32 %v4312_v14, 0.0 }
 0x5bc   :  { %v4311_v12 = vadd.f32 %v4589_v15, %v4300_v22  ;;  %v4314_v19 = vmax.f32 %v4310_v49, 0.0 }
 0x5bd   :  { %v4317_v43 = vmax.f32 %v4313_v36, 0.0 }
 0x5be   :  { %v4315_v13 = vmax.f32 %v4311_v12, 0.0 }
 0x5bf   :  { %v4606_v30 = vpack.c.bf16 %v4317_v43, %v4316_v53 }
 0x5c0   :  { %v4601_v37 = vpack.c.bf16 %v4315_v13, %v4314_v19 }
 0x5c1   :  { %4608 = vst [vmem:[%s7002_s13 + $0x8] sm:$0xff] %v4606_v30  }
 0x5c2   :  { %4602 = vst [vmem:[%s7002_s13] sm:$0xff] %v4601_v37  }
 0x5c3   :  { %4342 = vsyncpa [#allocation5], 1 }
 0x5c4   :  { %4343 = vsyncpa [#allocation7], 1 }
 0x5c5   :  { %4344 = vsyncpa [#allocation10], 1 }
 0x5c6   :  { %4345 = vsyncpa [#allocation13], 1 }
 0x5c7   :  { %4346 = vsyncpa [#allocation16], 1 }
 0x5c8   :  { %4347 = vsyncpa [#allocation19], 1 }
 0x5c9   :  { %4348 = vsyncpa [#allocation22], 1 }

</bundles_post_ra>
